<compile_context>
chip_gen: v5e
topology: v5e:2x2
jax: 0.10.0
libtpu: 0.0.40
codegen_flags: <defaults>
</compile_context>

<pallas_src>
import functools

import jax
import jax.numpy as jnp
from jax.experimental import pallas as pl
from jax.experimental.pallas import tpu as pltpu


# ----------------------------------------------------------------------------
# Fused residual-block kernel (one batch image per grid step)
# ----------------------------------------------------------------------------

def _resblock_kernel(xp_ref, w1_ref, b1_ref, w2_ref, b2_ref, mask_ref,
                     out2_ref, out1_ref, acc_ref, hpad_ref,
                     *, H, W, C, PE):
    """Fused ResidualBlockIncr forward for one image.

    xp_ref   : (1, PE, C)   bf16  zero-padded image, rows flattened over (H+2)*(W+2) (+slack)
    w1_ref   : (9, C, C)    bf16  conv1 taps, k = kh*3 + kw
    w2_ref   : (9, C, C)    bf16  conv2 taps
    b1_ref   : (1, C) f32         conv1 bias
    b2_ref   : (1, C) f32         conv2 bias
    mask_ref : (M, 1) f32         1.0 on real output columns (w < W), 0.0 on garbage cols
    out2_ref : (1, H, W, C) f32   relu(conv2(out1) + b2 + x)   (exact NHWC)
    out1_ref : (1, H, W, C) f32   relu(conv1(x) + b1)          (exact NHWC)
    acc_ref  : (M, C) f32   VMEM  conv accumulator
    hpad_ref : (PE, C) bf16 VMEM  zero-padded out1 (conv2 input)
    """
    Wp = W + 2
    M = H * Wp

    # ---------------- conv1: 9 shifted contiguous slices -> 9 bf16 MXU dots, f32 acc
    acc_ref[...] = jnp.dot(xp_ref[0, 0:M, :], w1_ref[0],
                           preferred_element_type=jnp.float32)
    for k in range(1, 9):
        kh, kw = divmod(k, 3)
        s = kh * Wp + kw                                   # static offset
        acc_ref[...] += jnp.dot(xp_ref[0, s:s + M, :], w1_ref[k],
                                preferred_element_type=jnp.float32)
    out1 = jnp.maximum(acc_ref[...] + b1_ref[...], 0.0)    # (M, C) f32, bias + ReLU

    # out1 -> HBM in exact NHWC (drop the 2 garbage columns per flattened row).
    for h in range(H):
        out1_ref[0, h] = out1[h * Wp:h * Wp + W, :]

    # ---------------- stage zero-padded out1 (bf16) in VMEM as conv2's input.
    # Only the small top/bottom borders need zeroing; done every step (megacore-safe).
    hpad_ref[0:Wp + 1, :] = jnp.zeros((Wp + 1, C), jnp.bfloat16)
    hpad_ref[Wp + 1 + M:PE, :] = jnp.zeros((PE - Wp - 1 - M, C), jnp.bfloat16)
    hpad_ref[Wp + 1:Wp + 1 + M, :] = (out1 * mask_ref[...]).astype(jnp.bfloat16)

    # ---------------- conv2 + bias + residual + ReLU
    acc_ref[...] = jnp.dot(hpad_ref[0:M, :], w2_ref[0],
                           preferred_element_type=jnp.float32)
    for k in range(1, 9):
        kh, kw = divmod(k, 3)
        s = kh * Wp + kw
        acc_ref[...] += jnp.dot(hpad_ref[s:s + M, :], w2_ref[k],
                                preferred_element_type=jnp.float32)
    residual = xp_ref[0, Wp + 1:Wp + 1 + M, :].astype(jnp.float32)  # x[h, w, :] flattened
    out2 = jnp.maximum(acc_ref[...] + b2_ref[...] + residual, 0.0)
    for h in range(H):
        out2_ref[0, h] = out2[h * Wp:h * Wp + W, :]


# ----------------------------------------------------------------------------
# Wrapper
# ----------------------------------------------------------------------------

@jax.jit
def residual_block_incr(x, w1, b1, w2, b2):
    """x: (B,H,W,Cin) f32 NHWC; w*: (3,3,C,C) HWIO; b*: (C,). Returns (out2, out1)."""
    B, H, W, Cin = x.shape
    Cout = w1.shape[-1]
    assert w1.shape == (3, 3, Cin, Cout) and w2.shape == (3, 3, Cout, Cout)
    assert Cin == Cout, "residual add without a downsample requires Cin == Cout"

    Wp = W + 2
    M = H * Wp                     # flattened conv rows (incl. 2 garbage cols / row)
    P = (H + 2) * Wp               # flattened zero-padded image rows
    PE = ((P + 8 + 7) // 8) * 8    # slack so shifted slices stay in-bounds, 8-aligned

    # Spatially zero-pad, cast the matmul operand to bf16, flatten the rows.
    xp = jnp.pad(x, ((0, 0), (1, 1), (1, 1), (0, 0))).astype(jnp.bfloat16)
    xp = xp.reshape(B, P, Cin)
    xp = jnp.pad(xp, ((0, 0), (0, PE - P), (0, 0)))

    w1f = w1.astype(jnp.bfloat16).reshape(9, Cin, Cout)
    w2f = w2.astype(jnp.bfloat16).reshape(9, Cout, Cout)
    b1r = b1.reshape(1, Cout).astype(jnp.float32)
    b2r = b2.reshape(1, Cout).astype(jnp.float32)

    # 1.0 where the flattened column is a real output column (w < W).
    mask = (jnp.arange(M, dtype=jnp.int32) % Wp < W).astype(jnp.float32).reshape(M, 1)

    kernel = functools.partial(_resblock_kernel, H=H, W=W, C=Cout, PE=PE)

    flops = 2 * B * M * 9 * (Cin * Cout + Cout * Cout)
    bytes_accessed = (B * PE * Cin * 2 + 9 * (Cin + Cout) * Cout * 2
                      + 2 * Cout * 4 + M * 4 + 2 * B * H * W * Cout * 4)

    out2, out1 = pl.pallas_call(
        kernel,
        out_shape=(jax.ShapeDtypeStruct((B, H, W, Cout), jnp.float32),
                   jax.ShapeDtypeStruct((B, H, W, Cout), jnp.float32)),
        grid_spec=pltpu.PrefetchScalarGridSpec(
            num_scalar_prefetch=0,
            grid=(B,),
            in_specs=[
                pl.BlockSpec((1, PE, Cin), lambda b: (b, 0, 0)),      # padded image
                pl.BlockSpec((9, Cin, Cout), lambda b: (0, 0, 0)),    # w1 (resident)
                pl.BlockSpec((1, Cout), lambda b: (0, 0)),            # b1
                pl.BlockSpec((9, Cout, Cout), lambda b: (0, 0, 0)),   # w2 (resident)
                pl.BlockSpec((1, Cout), lambda b: (0, 0)),            # b2
                pl.BlockSpec((M, 1), lambda b: (0, 0)),               # valid-column mask
            ],
            out_specs=[
                pl.BlockSpec((1, H, W, Cout), lambda b: (b, 0, 0, 0)),  # out2 (NHWC)
                pl.BlockSpec((1, H, W, Cout), lambda b: (b, 0, 0, 0)),  # out1 (NHWC)
            ],
            scratch_shapes=[
                pltpu.VMEM((M, Cout), jnp.float32),      # f32 conv accumulator
                pltpu.VMEM((PE, Cout), jnp.bfloat16),    # zero-padded out1 (conv2 input)
            ],
        ),
        compiler_params=pltpu.CompilerParams(
            dimension_semantics=("parallel",)),          # pipelined + megacore on v7x
        cost_estimate=pl.CostEstimate(flops=flops, transcendentals=0,
                                      bytes_accessed=bytes_accessed),
    )(xp, w1f, b1r, w2f, b2r, mask)

    return out2, out1


# ----------------------------------------------------------------------------
# Pure-JAX reference (same bf16 operands / f32 accumulation for a tight check)
# ----------------------------------------------------------------------------

def _conv3x3_ref(x_bf16, w_bf16, b_f32):
    y = jax.lax.conv_general_dilated(
        x_bf16, w_bf16, window_strides=(1, 1), padding="SAME",
        dimension_numbers=("NHWC", "HWIO", "NHWC"),
        preferred_element_type=jnp.float32)
    return y + b_f32.reshape(1, 1, 1, -1)


def _reference(x, w1, b1, w2, b2):
    xb = x.astype(jnp.bfloat16)
    out1 = jax.nn.relu(_conv3x3_ref(xb, w1.astype(jnp.bfloat16), b1))
    out2 = _conv3x3_ref(out1.astype(jnp.bfloat16), w2.astype(jnp.bfloat16), b2)
    out2 = jax.nn.relu(out2 + xb.astype(jnp.float32))
    return out2, out1


if __name__ == "__main__":
    B, H, W, C = 2, 16, 16, 32        # Cin == Cout required by the residual add
    key = jax.random.PRNGKey(0)
    kx, k1, k2, kb1, kb2 = jax.random.split(key, 5)
    x = jax.random.normal(kx, (B, H, W, C), jnp.float32)          # NHWC
    w1 = jax.random.normal(k1, (3, 3, C, C), jnp.float32) * 0.1
    w2 = jax.random.normal(k2, (3, 3, C, C), jnp.float32) * 0.1
    b1 = jax.random.normal(kb1, (C,), jnp.float32) * 0.1
    b2 = jax.random.normal(kb2, (C,), jnp.float32) * 0.1

    out2, out1 = residual_block_incr(x, w1, b1, w2, b2)
    out2, out1 = jax.block_until_ready((out2, out1))

    ref2, ref1 = _reference(x, w1, b1, w2, b2)
    assert out1.shape == (B, H, W, C) and out2.shape == (B, H, W, C)
    assert jnp.allclose(out1, ref1, atol=5e-3, rtol=5e-3), "out1 mismatch vs reference"
    assert jnp.allclose(out2, ref2, atol=5e-3, rtol=5e-3), "out2 mismatch vs reference"

    print("KERNEL_OK")
</pallas_src>

<mosaic_0001>
module attributes {stable_mosaic.version = 11 : i64} {
  func.func @_resblock_kernel(%arg0: i32, %arg1: memref<1x336x32xbf16, #tpu.memory_space<vmem>>, %arg2: memref<9x32x32xbf16, #tpu.memory_space<vmem>>, %arg3: memref<1x32xf32, #tpu.memory_space<vmem>>, %arg4: memref<9x32x32xbf16, #tpu.memory_space<vmem>>, %arg5: memref<1x32xf32, #tpu.memory_space<vmem>>, %arg6: memref<288x1xf32, #tpu.memory_space<vmem>>, %arg7: memref<1x16x16x32xf32, #tpu.memory_space<vmem>>, %arg8: memref<1x16x16x32xf32, #tpu.memory_space<vmem>>, %arg9: memref<288x32xf32, #tpu.memory_space<vmem>>, %arg10: memref<336x32xbf16, #tpu.memory_space<vmem>>) attributes {dimension_semantics = [#tpu.dimension_semantics<parallel>], iteration_bounds = array<i64: 2>, scalar_prefetch = 0 : i64, scratch_operands = 2 : i64, tpu.core_type = #tpu.core_type<tc>, window_params = [{transform_indices = @transform_0, window_bounds = array<i64: 1, 336, 32>}, {pipeline_mode = #tpu.pipeline_mode<synchronous>, transform_indices = @transform_1, window_bounds = array<i64: 9, 32, 32>}, {pipeline_mode = #tpu.pipeline_mode<synchronous>, transform_indices = @transform_2, window_bounds = array<i64: 1, 32>}, {pipeline_mode = #tpu.pipeline_mode<synchronous>, transform_indices = @transform_3, window_bounds = array<i64: 9, 32, 32>}, {pipeline_mode = #tpu.pipeline_mode<synchronous>, transform_indices = @transform_4, window_bounds = array<i64: 1, 32>}, {pipeline_mode = #tpu.pipeline_mode<synchronous>, transform_indices = @transform_5, window_bounds = array<i64: 288, 1>}, {transform_indices = @transform_6, window_bounds = array<i64: 1, 16, 16, 32>}, {transform_indices = @transform_7, window_bounds = array<i64: 1, 16, 16, 32>}]} {
    %c0 = arith.constant 0 : index
    %c0_0 = arith.constant 0 : index
    %c0_1 = arith.constant 0 : index
    %0 = vector.load %arg1[%c0, %c0_0, %c0_1] : memref<1x336x32xbf16, #tpu.memory_space<vmem>>, vector<1x288x32xbf16>
    %1 = vector.shape_cast %0 : vector<1x288x32xbf16> to vector<288x32xbf16>
    %c0_2 = arith.constant 0 : index
    %c0_3 = arith.constant 0 : index
    %c0_4 = arith.constant 0 : index
    %2 = vector.load %arg2[%c0_2, %c0_3, %c0_4] : memref<9x32x32xbf16, #tpu.memory_space<vmem>>, vector<1x32x32xbf16>
    %3 = vector.shape_cast %2 : vector<1x32x32xbf16> to vector<32x32xbf16>
    %cst = arith.constant dense<0.000000e+00> : vector<288x32xf32>
    %4 = tpu.matmul %1, %3, %cst {dimension_numbers = #tpu.dot_dimension_numbers<[1], [0], [0], [1], [0, 0, 1, 1], [], []>} : vector<288x32xbf16>, vector<32x32xbf16>, vector<288x32xf32> -> vector<288x32xf32>
    %c0_5 = arith.constant 0 : index
    %c0_6 = arith.constant 0 : index
    %5 = vector.load %arg9[%c0_5, %c0_6] : memref<288x32xf32, #tpu.memory_space<vmem>>, vector<288x32xf32>
    tpu.vector_store %arg9[%c0_5, %c0_6], %4 {strides = array<i32>} : memref<288x32xf32, #tpu.memory_space<vmem>>, vector<288x32xf32>,
    %c0_7 = arith.constant 0 : index
    %c0_8 = arith.constant 0 : index
    %6 = vector.load %arg9[%c0_7, %c0_8] : memref<288x32xf32, #tpu.memory_space<vmem>>, vector<288x32xf32>
    %c0_9 = arith.constant 0 : index
    %c1 = arith.constant 1 : index
    %c0_10 = arith.constant 0 : index
    %7 = vector.load %arg1[%c0_9, %c1, %c0_10] : memref<1x336x32xbf16, #tpu.memory_space<vmem>>, vector<1x288x32xbf16>
    %8 = vector.shape_cast %7 : vector<1x288x32xbf16> to vector<288x32xbf16>
    %c1_11 = arith.constant 1 : index
    %c0_12 = arith.constant 0 : index
    %c0_13 = arith.constant 0 : index
    %9 = vector.load %arg2[%c1_11, %c0_12, %c0_13] : memref<9x32x32xbf16, #tpu.memory_space<vmem>>, vector<1x32x32xbf16>
    %10 = vector.shape_cast %9 : vector<1x32x32xbf16> to vector<32x32xbf16>
    %cst_14 = arith.constant dense<0.000000e+00> : vector<288x32xf32>
    %11 = tpu.matmul %8, %10, %cst_14 {dimension_numbers = #tpu.dot_dimension_numbers<[1], [0], [0], [1], [0, 0, 1, 1], [], []>} : vector<288x32xbf16>, vector<32x32xbf16>, vector<288x32xf32> -> vector<288x32xf32>
    %12 = arith.addf %6, %11 : vector<288x32xf32>
    %c0_15 = arith.constant 0 : index
    %c0_16 = arith.constant 0 : index
    %13 = vector.load %arg9[%c0_15, %c0_16] : memref<288x32xf32, #tpu.memory_space<vmem>>, vector<288x32xf32>
    tpu.vector_store %arg9[%c0_15, %c0_16], %12 {strides = array<i32>} : memref<288x32xf32, #tpu.memory_space<vmem>>, vector<288x32xf32>,
    %c0_17 = arith.constant 0 : index
    %c0_18 = arith.constant 0 : index
    %14 = vector.load %arg9[%c0_17, %c0_18] : memref<288x32xf32, #tpu.memory_space<vmem>>, vector<288x32xf32>
    %c0_19 = arith.constant 0 : index
    %c2 = arith.constant 2 : index
    %c0_20 = arith.constant 0 : index
    %15 = vector.load %arg1[%c0_19, %c2, %c0_20] : memref<1x336x32xbf16, #tpu.memory_space<vmem>>, vector<1x288x32xbf16>
    %16 = vector.shape_cast %15 : vector<1x288x32xbf16> to vector<288x32xbf16>
    %c2_21 = arith.constant 2 : index
    %c0_22 = arith.constant 0 : index
    %c0_23 = arith.constant 0 : index
    %17 = vector.load %arg2[%c2_21, %c0_22, %c0_23] : memref<9x32x32xbf16, #tpu.memory_space<vmem>>, vector<1x32x32xbf16>
    %18 = vector.shape_cast %17 : vector<1x32x32xbf16> to vector<32x32xbf16>
    %cst_24 = arith.constant dense<0.000000e+00> : vector<288x32xf32>
    %19 = tpu.matmul %16, %18, %cst_24 {dimension_numbers = #tpu.dot_dimension_numbers<[1], [0], [0], [1], [0, 0, 1, 1], [], []>} : vector<288x32xbf16>, vector<32x32xbf16>, vector<288x32xf32> -> vector<288x32xf32>
    %20 = arith.addf %14, %19 : vector<288x32xf32>
    %c0_25 = arith.constant 0 : index
    %c0_26 = arith.constant 0 : index
    %21 = vector.load %arg9[%c0_25, %c0_26] : memref<288x32xf32, #tpu.memory_space<vmem>>, vector<288x32xf32>
    tpu.vector_store %arg9[%c0_25, %c0_26], %20 {strides = array<i32>} : memref<288x32xf32, #tpu.memory_space<vmem>>, vector<288x32xf32>,
    %c0_27 = arith.constant 0 : index
    %c0_28 = arith.constant 0 : index
    %22 = vector.load %arg9[%c0_27, %c0_28] : memref<288x32xf32, #tpu.memory_space<vmem>>, vector<288x32xf32>
    %c0_29 = arith.constant 0 : index
    %c18 = arith.constant 18 : index
    %c0_30 = arith.constant 0 : index
    %23 = vector.load %arg1[%c0_29, %c18, %c0_30] : memref<1x336x32xbf16, #tpu.memory_space<vmem>>, vector<1x288x32xbf16>
    %24 = vector.shape_cast %23 : vector<1x288x32xbf16> to vector<288x32xbf16>
    %c3 = arith.constant 3 : index
    %c0_31 = arith.constant 0 : index
    %c0_32 = arith.constant 0 : index
    %25 = vector.load %arg2[%c3, %c0_31, %c0_32] : memref<9x32x32xbf16, #tpu.memory_space<vmem>>, vector<1x32x32xbf16>
    %26 = vector.shape_cast %25 : vector<1x32x32xbf16> to vector<32x32xbf16>
    %cst_33 = arith.constant dense<0.000000e+00> : vector<288x32xf32>
    %27 = tpu.matmul %24, %26, %cst_33 {dimension_numbers = #tpu.dot_dimension_numbers<[1], [0], [0], [1], [0, 0, 1, 1], [], []>} : vector<288x32xbf16>, vector<32x32xbf16>, vector<288x32xf32> -> vector<288x32xf32>
    %28 = arith.addf %22, %27 : vector<288x32xf32>
    %c0_34 = arith.constant 0 : index
    %c0_35 = arith.constant 0 : index
    %29 = vector.load %arg9[%c0_34, %c0_35] : memref<288x32xf32, #tpu.memory_space<vmem>>, vector<288x32xf32>
    tpu.vector_store %arg9[%c0_34, %c0_35], %28 {strides = array<i32>} : memref<288x32xf32, #tpu.memory_space<vmem>>, vector<288x32xf32>,
    %c0_36 = arith.constant 0 : index
    %c0_37 = arith.constant 0 : index
    %30 = vector.load %arg9[%c0_36, %c0_37] : memref<288x32xf32, #tpu.memory_space<vmem>>, vector<288x32xf32>
    %c0_38 = arith.constant 0 : index
    %c19 = arith.constant 19 : index
    %c0_39 = arith.constant 0 : index
    %31 = vector.load %arg1[%c0_38, %c19, %c0_39] : memref<1x336x32xbf16, #tpu.memory_space<vmem>>, vector<1x288x32xbf16>
    %32 = vector.shape_cast %31 : vector<1x288x32xbf16> to vector<288x32xbf16>
    %c4 = arith.constant 4 : index
    %c0_40 = arith.constant 0 : index
    %c0_41 = arith.constant 0 : index
    %33 = vector.load %arg2[%c4, %c0_40, %c0_41] : memref<9x32x32xbf16, #tpu.memory_space<vmem>>, vector<1x32x32xbf16>
    %34 = vector.shape_cast %33 : vector<1x32x32xbf16> to vector<32x32xbf16>
    %cst_42 = arith.constant dense<0.000000e+00> : vector<288x32xf32>
    %35 = tpu.matmul %32, %34, %cst_42 {dimension_numbers = #tpu.dot_dimension_numbers<[1], [0], [0], [1], [0, 0, 1, 1], [], []>} : vector<288x32xbf16>, vector<32x32xbf16>, vector<288x32xf32> -> vector<288x32xf32>
    %36 = arith.addf %30, %35 : vector<288x32xf32>
    %c0_43 = arith.constant 0 : index
    %c0_44 = arith.constant 0 : index
    %37 = vector.load %arg9[%c0_43, %c0_44] : memref<288x32xf32, #tpu.memory_space<vmem>>, vector<288x32xf32>
    tpu.vector_store %arg9[%c0_43, %c0_44], %36 {strides = array<i32>} : memref<288x32xf32, #tpu.memory_space<vmem>>, vector<288x32xf32>,
    %c0_45 = arith.constant 0 : index
    %c0_46 = arith.constant 0 : index
    %38 = vector.load %arg9[%c0_45, %c0_46] : memref<288x32xf32, #tpu.memory_space<vmem>>, vector<288x32xf32>
    %c0_47 = arith.constant 0 : index
    %c20 = arith.constant 20 : index
    %c0_48 = arith.constant 0 : index
    %39 = vector.load %arg1[%c0_47, %c20, %c0_48] : memref<1x336x32xbf16, #tpu.memory_space<vmem>>, vector<1x288x32xbf16>
    %40 = vector.shape_cast %39 : vector<1x288x32xbf16> to vector<288x32xbf16>
    %c5 = arith.constant 5 : index
    %c0_49 = arith.constant 0 : index
    %c0_50 = arith.constant 0 : index
    %41 = vector.load %arg2[%c5, %c0_49, %c0_50] : memref<9x32x32xbf16, #tpu.memory_space<vmem>>, vector<1x32x32xbf16>
    %42 = vector.shape_cast %41 : vector<1x32x32xbf16> to vector<32x32xbf16>
    %cst_51 = arith.constant dense<0.000000e+00> : vector<288x32xf32>
    %43 = tpu.matmul %40, %42, %cst_51 {dimension_numbers = #tpu.dot_dimension_numbers<[1], [0], [0], [1], [0, 0, 1, 1], [], []>} : vector<288x32xbf16>, vector<32x32xbf16>, vector<288x32xf32> -> vector<288x32xf32>
    %44 = arith.addf %38, %43 : vector<288x32xf32>
    %c0_52 = arith.constant 0 : index
    %c0_53 = arith.constant 0 : index
    %45 = vector.load %arg9[%c0_52, %c0_53] : memref<288x32xf32, #tpu.memory_space<vmem>>, vector<288x32xf32>
    tpu.vector_store %arg9[%c0_52, %c0_53], %44 {strides = array<i32>} : memref<288x32xf32, #tpu.memory_space<vmem>>, vector<288x32xf32>,
    %c0_54 = arith.constant 0 : index
    %c0_55 = arith.constant 0 : index
    %46 = vector.load %arg9[%c0_54, %c0_55] : memref<288x32xf32, #tpu.memory_space<vmem>>, vector<288x32xf32>
    %c0_56 = arith.constant 0 : index
    %c36 = arith.constant 36 : index
    %c0_57 = arith.constant 0 : index
    %47 = vector.load %arg1[%c0_56, %c36, %c0_57] : memref<1x336x32xbf16, #tpu.memory_space<vmem>>, vector<1x288x32xbf16>
    %48 = vector.shape_cast %47 : vector<1x288x32xbf16> to vector<288x32xbf16>
    %c6 = arith.constant 6 : index
    %c0_58 = arith.constant 0 : index
    %c0_59 = arith.constant 0 : index
    %49 = vector.load %arg2[%c6, %c0_58, %c0_59] : memref<9x32x32xbf16, #tpu.memory_space<vmem>>, vector<1x32x32xbf16>
    %50 = vector.shape_cast %49 : vector<1x32x32xbf16> to vector<32x32xbf16>
    %cst_60 = arith.constant dense<0.000000e+00> : vector<288x32xf32>
    %51 = tpu.matmul %48, %50, %cst_60 {dimension_numbers = #tpu.dot_dimension_numbers<[1], [0], [0], [1], [0, 0, 1, 1], [], []>} : vector<288x32xbf16>, vector<32x32xbf16>, vector<288x32xf32> -> vector<288x32xf32>
    %52 = arith.addf %46, %51 : vector<288x32xf32>
    %c0_61 = arith.constant 0 : index
    %c0_62 = arith.constant 0 : index
    %53 = vector.load %arg9[%c0_61, %c0_62] : memref<288x32xf32, #tpu.memory_space<vmem>>, vector<288x32xf32>
    tpu.vector_store %arg9[%c0_61, %c0_62], %52 {strides = array<i32>} : memref<288x32xf32, #tpu.memory_space<vmem>>, vector<288x32xf32>,
    %c0_63 = arith.constant 0 : index
    %c0_64 = arith.constant 0 : index
    %54 = vector.load %arg9[%c0_63, %c0_64] : memref<288x32xf32, #tpu.memory_space<vmem>>, vector<288x32xf32>
    %c0_65 = arith.constant 0 : index
    %c37 = arith.constant 37 : index
    %c0_66 = arith.constant 0 : index
    %55 = vector.load %arg1[%c0_65, %c37, %c0_66] : memref<1x336x32xbf16, #tpu.memory_space<vmem>>, vector<1x288x32xbf16>
    %56 = vector.shape_cast %55 : vector<1x288x32xbf16> to vector<288x32xbf16>
    %c7 = arith.constant 7 : index
    %c0_67 = arith.constant 0 : index
    %c0_68 = arith.constant 0 : index
    %57 = vector.load %arg2[%c7, %c0_67, %c0_68] : memref<9x32x32xbf16, #tpu.memory_space<vmem>>, vector<1x32x32xbf16>
    %58 = vector.shape_cast %57 : vector<1x32x32xbf16> to vector<32x32xbf16>
    %cst_69 = arith.constant dense<0.000000e+00> : vector<288x32xf32>
    %59 = tpu.matmul %56, %58, %cst_69 {dimension_numbers = #tpu.dot_dimension_numbers<[1], [0], [0], [1], [0, 0, 1, 1], [], []>} : vector<288x32xbf16>, vector<32x32xbf16>, vector<288x32xf32> -> vector<288x32xf32>
    %60 = arith.addf %54, %59 : vector<288x32xf32>
    %c0_70 = arith.constant 0 : index
    %c0_71 = arith.constant 0 : index
    %61 = vector.load %arg9[%c0_70, %c0_71] : memref<288x32xf32, #tpu.memory_space<vmem>>, vector<288x32xf32>
    tpu.vector_store %arg9[%c0_70, %c0_71], %60 {strides = array<i32>} : memref<288x32xf32, #tpu.memory_space<vmem>>, vector<288x32xf32>,
    %c0_72 = arith.constant 0 : index
    %c0_73 = arith.constant 0 : index
    %62 = vector.load %arg9[%c0_72, %c0_73] : memref<288x32xf32, #tpu.memory_space<vmem>>, vector<288x32xf32>
    %c0_74 = arith.constant 0 : index
    %c38 = arith.constant 38 : index
    %c0_75 = arith.constant 0 : index
    %63 = vector.load %arg1[%c0_74, %c38, %c0_75] : memref<1x336x32xbf16, #tpu.memory_space<vmem>>, vector<1x288x32xbf16>
    %64 = vector.shape_cast %63 : vector<1x288x32xbf16> to vector<288x32xbf16>
    %c8 = arith.constant 8 : index
    %c0_76 = arith.constant 0 : index
    %c0_77 = arith.constant 0 : index
    %65 = vector.load %arg2[%c8, %c0_76, %c0_77] : memref<9x32x32xbf16, #tpu.memory_space<vmem>>, vector<1x32x32xbf16>
    %66 = vector.shape_cast %65 : vector<1x32x32xbf16> to vector<32x32xbf16>
    %cst_78 = arith.constant dense<0.000000e+00> : vector<288x32xf32>
    %67 = tpu.matmul %64, %66, %cst_78 {dimension_numbers = #tpu.dot_dimension_numbers<[1], [0], [0], [1], [0, 0, 1, 1], [], []>} : vector<288x32xbf16>, vector<32x32xbf16>, vector<288x32xf32> -> vector<288x32xf32>
    %68 = arith.addf %62, %67 : vector<288x32xf32>
    %c0_79 = arith.constant 0 : index
    %c0_80 = arith.constant 0 : index
    %69 = vector.load %arg9[%c0_79, %c0_80] : memref<288x32xf32, #tpu.memory_space<vmem>>, vector<288x32xf32>
    tpu.vector_store %arg9[%c0_79, %c0_80], %68 {strides = array<i32>} : memref<288x32xf32, #tpu.memory_space<vmem>>, vector<288x32xf32>,
    %c0_81 = arith.constant 0 : index
    %c0_82 = arith.constant 0 : index
    %70 = vector.load %arg9[%c0_81, %c0_82] : memref<288x32xf32, #tpu.memory_space<vmem>>, vector<288x32xf32>
    %c0_83 = arith.constant 0 : index
    %c0_84 = arith.constant 0 : index
    %71 = vector.load %arg3[%c0_83, %c0_84] : memref<1x32xf32, #tpu.memory_space<vmem>>, vector<1x32xf32>
    %72 = vector.broadcast %71 : vector<1x32xf32> to vector<288x32xf32>
    %73 = arith.addf %70, %72 : vector<288x32xf32>
    %cst_85 = arith.constant 0.000000e+00 : f32
    %74 = vector.broadcast %cst_85 : f32 to vector<288x32xf32>
    %75 = arith.maximumf %73, %74 : vector<288x32xf32>
    %76 = vector.extract_strided_slice %75 {offsets = [0, 0], sizes = [16, 32], strides = [1, 1]} : vector<288x32xf32> to vector<16x32xf32>
    %c0_86 = arith.constant 0 : index
    %c0_87 = arith.constant 0 : index
    %c0_88 = arith.constant 0 : index
    %c0_89 = arith.constant 0 : index
    %77 = vector.load %arg8[%c0_86, %c0_87, %c0_88, %c0_89] : memref<1x16x16x32xf32, #tpu.memory_space<vmem>>, vector<1x1x16x32xf32>
    %78 = vector.shape_cast %77 : vector<1x1x16x32xf32> to vector<16x32xf32>
    %79 = vector.shape_cast %76 : vector<16x32xf32> to vector<1x1x16x32xf32>
    tpu.vector_store %arg8[%c0_86, %c0_87, %c0_88, %c0_89], %79 {strides = array<i32>} : memref<1x16x16x32xf32, #tpu.memory_space<vmem>>, vector<1x1x16x32xf32>,
    %80 = vector.extract_strided_slice %75 {offsets = [18, 0], sizes = [16, 32], strides = [1, 1]} : vector<288x32xf32> to vector<16x32xf32>
    %c0_90 = arith.constant 0 : index
    %c1_91 = arith.constant 1 : index
    %c0_92 = arith.constant 0 : index
    %c0_93 = arith.constant 0 : index
    %81 = vector.load %arg8[%c0_90, %c1_91, %c0_92, %c0_93] : memref<1x16x16x32xf32, #tpu.memory_space<vmem>>, vector<1x1x16x32xf32>
    %82 = vector.shape_cast %81 : vector<1x1x16x32xf32> to vector<16x32xf32>
    %83 = vector.shape_cast %80 : vector<16x32xf32> to vector<1x1x16x32xf32>
    tpu.vector_store %arg8[%c0_90, %c1_91, %c0_92, %c0_93], %83 {strides = array<i32>} : memref<1x16x16x32xf32, #tpu.memory_space<vmem>>, vector<1x1x16x32xf32>,
    %84 = vector.extract_strided_slice %75 {offsets = [36, 0], sizes = [16, 32], strides = [1, 1]} : vector<288x32xf32> to vector<16x32xf32>
    %c0_94 = arith.constant 0 : index
    %c2_95 = arith.constant 2 : index
    %c0_96 = arith.constant 0 : index
    %c0_97 = arith.constant 0 : index
    %85 = vector.load %arg8[%c0_94, %c2_95, %c0_96, %c0_97] : memref<1x16x16x32xf32, #tpu.memory_space<vmem>>, vector<1x1x16x32xf32>
    %86 = vector.shape_cast %85 : vector<1x1x16x32xf32> to vector<16x32xf32>
    %87 = vector.shape_cast %84 : vector<16x32xf32> to vector<1x1x16x32xf32>
    tpu.vector_store %arg8[%c0_94, %c2_95, %c0_96, %c0_97], %87 {strides = array<i32>} : memref<1x16x16x32xf32, #tpu.memory_space<vmem>>, vector<1x1x16x32xf32>,
    %88 = vector.extract_strided_slice %75 {offsets = [54, 0], sizes = [16, 32], strides = [1, 1]} : vector<288x32xf32> to vector<16x32xf32>
    %c0_98 = arith.constant 0 : index
    %c3_99 = arith.constant 3 : index
    %c0_100 = arith.constant 0 : index
    %c0_101 = arith.constant 0 : index
    %89 = vector.load %arg8[%c0_98, %c3_99, %c0_100, %c0_101] : memref<1x16x16x32xf32, #tpu.memory_space<vmem>>, vector<1x1x16x32xf32>
    %90 = vector.shape_cast %89 : vector<1x1x16x32xf32> to vector<16x32xf32>
    %91 = vector.shape_cast %88 : vector<16x32xf32> to vector<1x1x16x32xf32>
    tpu.vector_store %arg8[%c0_98, %c3_99, %c0_100, %c0_101], %91 {strides = array<i32>} : memref<1x16x16x32xf32, #tpu.memory_space<vmem>>, vector<1x1x16x32xf32>,
    %92 = vector.extract_strided_slice %75 {offsets = [72, 0], sizes = [16, 32], strides = [1, 1]} : vector<288x32xf32> to vector<16x32xf32>
    %c0_102 = arith.constant 0 : index
    %c4_103 = arith.constant 4 : index
    %c0_104 = arith.constant 0 : index
    %c0_105 = arith.constant 0 : index
    %93 = vector.load %arg8[%c0_102, %c4_103, %c0_104, %c0_105] : memref<1x16x16x32xf32, #tpu.memory_space<vmem>>, vector<1x1x16x32xf32>
    %94 = vector.shape_cast %93 : vector<1x1x16x32xf32> to vector<16x32xf32>
    %95 = vector.shape_cast %92 : vector<16x32xf32> to vector<1x1x16x32xf32>
    tpu.vector_store %arg8[%c0_102, %c4_103, %c0_104, %c0_105], %95 {strides = array<i32>} : memref<1x16x16x32xf32, #tpu.memory_space<vmem>>, vector<1x1x16x32xf32>,
    %96 = vector.extract_strided_slice %75 {offsets = [90, 0], sizes = [16, 32], strides = [1, 1]} : vector<288x32xf32> to vector<16x32xf32>
    %c0_106 = arith.constant 0 : index
    %c5_107 = arith.constant 5 : index
    %c0_108 = arith.constant 0 : index
    %c0_109 = arith.constant 0 : index
    %97 = vector.load %arg8[%c0_106, %c5_107, %c0_108, %c0_109] : memref<1x16x16x32xf32, #tpu.memory_space<vmem>>, vector<1x1x16x32xf32>
    %98 = vector.shape_cast %97 : vector<1x1x16x32xf32> to vector<16x32xf32>
    %99 = vector.shape_cast %96 : vector<16x32xf32> to vector<1x1x16x32xf32>
    tpu.vector_store %arg8[%c0_106, %c5_107, %c0_108, %c0_109], %99 {strides = array<i32>} : memref<1x16x16x32xf32, #tpu.memory_space<vmem>>, vector<1x1x16x32xf32>,
    %100 = vector.extract_strided_slice %75 {offsets = [108, 0], sizes = [16, 32], strides = [1, 1]} : vector<288x32xf32> to vector<16x32xf32>
    %c0_110 = arith.constant 0 : index
    %c6_111 = arith.constant 6 : index
    %c0_112 = arith.constant 0 : index
    %c0_113 = arith.constant 0 : index
    %101 = vector.load %arg8[%c0_110, %c6_111, %c0_112, %c0_113] : memref<1x16x16x32xf32, #tpu.memory_space<vmem>>, vector<1x1x16x32xf32>
    %102 = vector.shape_cast %101 : vector<1x1x16x32xf32> to vector<16x32xf32>
    %103 = vector.shape_cast %100 : vector<16x32xf32> to vector<1x1x16x32xf32>
    tpu.vector_store %arg8[%c0_110, %c6_111, %c0_112, %c0_113], %103 {strides = array<i32>} : memref<1x16x16x32xf32, #tpu.memory_space<vmem>>, vector<1x1x16x32xf32>,
    %104 = vector.extract_strided_slice %75 {offsets = [126, 0], sizes = [16, 32], strides = [1, 1]} : vector<288x32xf32> to vector<16x32xf32>
    %c0_114 = arith.constant 0 : index
    %c7_115 = arith.constant 7 : index
    %c0_116 = arith.constant 0 : index
    %c0_117 = arith.constant 0 : index
    %105 = vector.load %arg8[%c0_114, %c7_115, %c0_116, %c0_117] : memref<1x16x16x32xf32, #tpu.memory_space<vmem>>, vector<1x1x16x32xf32>
    %106 = vector.shape_cast %105 : vector<1x1x16x32xf32> to vector<16x32xf32>
    %107 = vector.shape_cast %104 : vector<16x32xf32> to vector<1x1x16x32xf32>
    tpu.vector_store %arg8[%c0_114, %c7_115, %c0_116, %c0_117], %107 {strides = array<i32>} : memref<1x16x16x32xf32, #tpu.memory_space<vmem>>, vector<1x1x16x32xf32>,
    %108 = vector.extract_strided_slice %75 {offsets = [144, 0], sizes = [16, 32], strides = [1, 1]} : vector<288x32xf32> to vector<16x32xf32>
    %c0_118 = arith.constant 0 : index
    %c8_119 = arith.constant 8 : index
    %c0_120 = arith.constant 0 : index
    %c0_121 = arith.constant 0 : index
    %109 = vector.load %arg8[%c0_118, %c8_119, %c0_120, %c0_121] : memref<1x16x16x32xf32, #tpu.memory_space<vmem>>, vector<1x1x16x32xf32>
    %110 = vector.shape_cast %109 : vector<1x1x16x32xf32> to vector<16x32xf32>
    %111 = vector.shape_cast %108 : vector<16x32xf32> to vector<1x1x16x32xf32>
    tpu.vector_store %arg8[%c0_118, %c8_119, %c0_120, %c0_121], %111 {strides = array<i32>} : memref<1x16x16x32xf32, #tpu.memory_space<vmem>>, vector<1x1x16x32xf32>,
    %112 = vector.extract_strided_slice %75 {offsets = [162, 0], sizes = [16, 32], strides = [1, 1]} : vector<288x32xf32> to vector<16x32xf32>
    %c0_122 = arith.constant 0 : index
    %c9 = arith.constant 9 : index
    %c0_123 = arith.constant 0 : index
    %c0_124 = arith.constant 0 : index
    %113 = vector.load %arg8[%c0_122, %c9, %c0_123, %c0_124] : memref<1x16x16x32xf32, #tpu.memory_space<vmem>>, vector<1x1x16x32xf32>
    %114 = vector.shape_cast %113 : vector<1x1x16x32xf32> to vector<16x32xf32>
    %115 = vector.shape_cast %112 : vector<16x32xf32> to vector<1x1x16x32xf32>
    tpu.vector_store %arg8[%c0_122, %c9, %c0_123, %c0_124], %115 {strides = array<i32>} : memref<1x16x16x32xf32, #tpu.memory_space<vmem>>, vector<1x1x16x32xf32>,
    %116 = vector.extract_strided_slice %75 {offsets = [180, 0], sizes = [16, 32], strides = [1, 1]} : vector<288x32xf32> to vector<16x32xf32>
    %c0_125 = arith.constant 0 : index
    %c10 = arith.constant 10 : index
    %c0_126 = arith.constant 0 : index
    %c0_127 = arith.constant 0 : index
    %117 = vector.load %arg8[%c0_125, %c10, %c0_126, %c0_127] : memref<1x16x16x32xf32, #tpu.memory_space<vmem>>, vector<1x1x16x32xf32>
    %118 = vector.shape_cast %117 : vector<1x1x16x32xf32> to vector<16x32xf32>
    %119 = vector.shape_cast %116 : vector<16x32xf32> to vector<1x1x16x32xf32>
    tpu.vector_store %arg8[%c0_125, %c10, %c0_126, %c0_127], %119 {strides = array<i32>} : memref<1x16x16x32xf32, #tpu.memory_space<vmem>>, vector<1x1x16x32xf32>,
    %120 = vector.extract_strided_slice %75 {offsets = [198, 0], sizes = [16, 32], strides = [1, 1]} : vector<288x32xf32> to vector<16x32xf32>
    %c0_128 = arith.constant 0 : index
    %c11 = arith.constant 11 : index
    %c0_129 = arith.constant 0 : index
    %c0_130 = arith.constant 0 : index
    %121 = vector.load %arg8[%c0_128, %c11, %c0_129, %c0_130] : memref<1x16x16x32xf32, #tpu.memory_space<vmem>>, vector<1x1x16x32xf32>
    %122 = vector.shape_cast %121 : vector<1x1x16x32xf32> to vector<16x32xf32>
    %123 = vector.shape_cast %120 : vector<16x32xf32> to vector<1x1x16x32xf32>
    tpu.vector_store %arg8[%c0_128, %c11, %c0_129, %c0_130], %123 {strides = array<i32>} : memref<1x16x16x32xf32, #tpu.memory_space<vmem>>, vector<1x1x16x32xf32>,
    %124 = vector.extract_strided_slice %75 {offsets = [216, 0], sizes = [16, 32], strides = [1, 1]} : vector<288x32xf32> to vector<16x32xf32>
    %c0_131 = arith.constant 0 : index
    %c12 = arith.constant 12 : index
    %c0_132 = arith.constant 0 : index
    %c0_133 = arith.constant 0 : index
    %125 = vector.load %arg8[%c0_131, %c12, %c0_132, %c0_133] : memref<1x16x16x32xf32, #tpu.memory_space<vmem>>, vector<1x1x16x32xf32>
    %126 = vector.shape_cast %125 : vector<1x1x16x32xf32> to vector<16x32xf32>
    %127 = vector.shape_cast %124 : vector<16x32xf32> to vector<1x1x16x32xf32>
    tpu.vector_store %arg8[%c0_131, %c12, %c0_132, %c0_133], %127 {strides = array<i32>} : memref<1x16x16x32xf32, #tpu.memory_space<vmem>>, vector<1x1x16x32xf32>,
    %128 = vector.extract_strided_slice %75 {offsets = [234, 0], sizes = [16, 32], strides = [1, 1]} : vector<288x32xf32> to vector<16x32xf32>
    %c0_134 = arith.constant 0 : index
    %c13 = arith.constant 13 : index
    %c0_135 = arith.constant 0 : index
    %c0_136 = arith.constant 0 : index
    %129 = vector.load %arg8[%c0_134, %c13, %c0_135, %c0_136] : memref<1x16x16x32xf32, #tpu.memory_space<vmem>>, vector<1x1x16x32xf32>
    %130 = vector.shape_cast %129 : vector<1x1x16x32xf32> to vector<16x32xf32>
    %131 = vector.shape_cast %128 : vector<16x32xf32> to vector<1x1x16x32xf32>
    tpu.vector_store %arg8[%c0_134, %c13, %c0_135, %c0_136], %131 {strides = array<i32>} : memref<1x16x16x32xf32, #tpu.memory_space<vmem>>, vector<1x1x16x32xf32>,
    %132 = vector.extract_strided_slice %75 {offsets = [252, 0], sizes = [16, 32], strides = [1, 1]} : vector<288x32xf32> to vector<16x32xf32>
    %c0_137 = arith.constant 0 : index
    %c14 = arith.constant 14 : index
    %c0_138 = arith.constant 0 : index
    %c0_139 = arith.constant 0 : index
    %133 = vector.load %arg8[%c0_137, %c14, %c0_138, %c0_139] : memref<1x16x16x32xf32, #tpu.memory_space<vmem>>, vector<1x1x16x32xf32>
    %134 = vector.shape_cast %133 : vector<1x1x16x32xf32> to vector<16x32xf32>
    %135 = vector.shape_cast %132 : vector<16x32xf32> to vector<1x1x16x32xf32>
    tpu.vector_store %arg8[%c0_137, %c14, %c0_138, %c0_139], %135 {strides = array<i32>} : memref<1x16x16x32xf32, #tpu.memory_space<vmem>>, vector<1x1x16x32xf32>,
    %136 = vector.extract_strided_slice %75 {offsets = [270, 0], sizes = [16, 32], strides = [1, 1]} : vector<288x32xf32> to vector<16x32xf32>
    %c0_140 = arith.constant 0 : index
    %c15 = arith.constant 15 : index
    %c0_141 = arith.constant 0 : index
    %c0_142 = arith.constant 0 : index
    %137 = vector.load %arg8[%c0_140, %c15, %c0_141, %c0_142] : memref<1x16x16x32xf32, #tpu.memory_space<vmem>>, vector<1x1x16x32xf32>
    %138 = vector.shape_cast %137 : vector<1x1x16x32xf32> to vector<16x32xf32>
    %139 = vector.shape_cast %136 : vector<16x32xf32> to vector<1x1x16x32xf32>
    tpu.vector_store %arg8[%c0_140, %c15, %c0_141, %c0_142], %139 {strides = array<i32>} : memref<1x16x16x32xf32, #tpu.memory_space<vmem>>, vector<1x1x16x32xf32>,
    %cst_143 = arith.constant 0.000000e+00 : bf16
    %140 = vector.broadcast %cst_143 : bf16 to vector<19x32xbf16>
    %c0_144 = arith.constant 0 : index
    %c0_145 = arith.constant 0 : index
    %141 = vector.load %arg10[%c0_144, %c0_145] : memref<336x32xbf16, #tpu.memory_space<vmem>>, vector<19x32xbf16>
    tpu.vector_store %arg10[%c0_144, %c0_145], %140 {strides = array<i32>} : memref<336x32xbf16, #tpu.memory_space<vmem>>, vector<19x32xbf16>,
    %cst_146 = arith.constant 0.000000e+00 : bf16
    %142 = vector.broadcast %cst_146 : bf16 to vector<29x32xbf16>
    %c307 = arith.constant 307 : index
    %c0_147 = arith.constant 0 : index
    %143 = vector.load %arg10[%c307, %c0_147] : memref<336x32xbf16, #tpu.memory_space<vmem>>, vector<29x32xbf16>
    tpu.vector_store %arg10[%c307, %c0_147], %142 {strides = array<i32>} : memref<336x32xbf16, #tpu.memory_space<vmem>>, vector<29x32xbf16>,
    %c0_148 = arith.constant 0 : index
    %c0_149 = arith.constant 0 : index
    %144 = vector.load %arg6[%c0_148, %c0_149] : memref<288x1xf32, #tpu.memory_space<vmem>>, vector<288x1xf32>
    %145 = vector.broadcast %144 : vector<288x1xf32> to vector<288x32xf32>
    %146 = arith.mulf %75, %145 : vector<288x32xf32>
    %147 = arith.truncf %146 : vector<288x32xf32> to vector<288x32xbf16>
    %c19_150 = arith.constant 19 : index
    %c0_151 = arith.constant 0 : index
    %148 = vector.load %arg10[%c19_150, %c0_151] : memref<336x32xbf16, #tpu.memory_space<vmem>>, vector<288x32xbf16>
    tpu.vector_store %arg10[%c19_150, %c0_151], %147 {strides = array<i32>} : memref<336x32xbf16, #tpu.memory_space<vmem>>, vector<288x32xbf16>,
    %c0_152 = arith.constant 0 : index
    %c0_153 = arith.constant 0 : index
    %149 = vector.load %arg10[%c0_152, %c0_153] : memref<336x32xbf16, #tpu.memory_space<vmem>>, vector<288x32xbf16>
    %c0_154 = arith.constant 0 : index
    %c0_155 = arith.constant 0 : index
    %c0_156 = arith.constant 0 : index
    %150 = vector.load %arg4[%c0_154, %c0_155, %c0_156] : memref<9x32x32xbf16, #tpu.memory_space<vmem>>, vector<1x32x32xbf16>
    %151 = vector.shape_cast %150 : vector<1x32x32xbf16> to vector<32x32xbf16>
    %cst_157 = arith.constant dense<0.000000e+00> : vector<288x32xf32>
    %152 = tpu.matmul %149, %151, %cst_157 {dimension_numbers = #tpu.dot_dimension_numbers<[1], [0], [0], [1], [0, 0, 1, 1], [], []>} : vector<288x32xbf16>, vector<32x32xbf16>, vector<288x32xf32> -> vector<288x32xf32>
    %c0_158 = arith.constant 0 : index
    %c0_159 = arith.constant 0 : index
    %153 = vector.load %arg9[%c0_158, %c0_159] : memref<288x32xf32, #tpu.memory_space<vmem>>, vector<288x32xf32>
    tpu.vector_store %arg9[%c0_158, %c0_159], %152 {strides = array<i32>} : memref<288x32xf32, #tpu.memory_space<vmem>>, vector<288x32xf32>,
    %c0_160 = arith.constant 0 : index
    %c0_161 = arith.constant 0 : index
    %154 = vector.load %arg9[%c0_160, %c0_161] : memref<288x32xf32, #tpu.memory_space<vmem>>, vector<288x32xf32>
    %c1_162 = arith.constant 1 : index
    %c0_163 = arith.constant 0 : index
    %155 = vector.load %arg10[%c1_162, %c0_163] : memref<336x32xbf16, #tpu.memory_space<vmem>>, vector<288x32xbf16>
    %c1_164 = arith.constant 1 : index
    %c0_165 = arith.constant 0 : index
    %c0_166 = arith.constant 0 : index
    %156 = vector.load %arg4[%c1_164, %c0_165, %c0_166] : memref<9x32x32xbf16, #tpu.memory_space<vmem>>, vector<1x32x32xbf16>
    %157 = vector.shape_cast %156 : vector<1x32x32xbf16> to vector<32x32xbf16>
    %cst_167 = arith.constant dense<0.000000e+00> : vector<288x32xf32>
    %158 = tpu.matmul %155, %157, %cst_167 {dimension_numbers = #tpu.dot_dimension_numbers<[1], [0], [0], [1], [0, 0, 1, 1], [], []>} : vector<288x32xbf16>, vector<32x32xbf16>, vector<288x32xf32> -> vector<288x32xf32>
    %159 = arith.addf %154, %158 : vector<288x32xf32>
    %c0_168 = arith.constant 0 : index
    %c0_169 = arith.constant 0 : index
    %160 = vector.load %arg9[%c0_168, %c0_169] : memref<288x32xf32, #tpu.memory_space<vmem>>, vector<288x32xf32>
    tpu.vector_store %arg9[%c0_168, %c0_169], %159 {strides = array<i32>} : memref<288x32xf32, #tpu.memory_space<vmem>>, vector<288x32xf32>,
    %c0_170 = arith.constant 0 : index
    %c0_171 = arith.constant 0 : index
    %161 = vector.load %arg9[%c0_170, %c0_171] : memref<288x32xf32, #tpu.memory_space<vmem>>, vector<288x32xf32>
    %c2_172 = arith.constant 2 : index
    %c0_173 = arith.constant 0 : index
    %162 = vector.load %arg10[%c2_172, %c0_173] : memref<336x32xbf16, #tpu.memory_space<vmem>>, vector<288x32xbf16>
    %c2_174 = arith.constant 2 : index
    %c0_175 = arith.constant 0 : index
    %c0_176 = arith.constant 0 : index
    %163 = vector.load %arg4[%c2_174, %c0_175, %c0_176] : memref<9x32x32xbf16, #tpu.memory_space<vmem>>, vector<1x32x32xbf16>
    %164 = vector.shape_cast %163 : vector<1x32x32xbf16> to vector<32x32xbf16>
    %cst_177 = arith.constant dense<0.000000e+00> : vector<288x32xf32>
    %165 = tpu.matmul %162, %164, %cst_177 {dimension_numbers = #tpu.dot_dimension_numbers<[1], [0], [0], [1], [0, 0, 1, 1], [], []>} : vector<288x32xbf16>, vector<32x32xbf16>, vector<288x32xf32> -> vector<288x32xf32>
    %166 = arith.addf %161, %165 : vector<288x32xf32>
    %c0_178 = arith.constant 0 : index
    %c0_179 = arith.constant 0 : index
    %167 = vector.load %arg9[%c0_178, %c0_179] : memref<288x32xf32, #tpu.memory_space<vmem>>, vector<288x32xf32>
    tpu.vector_store %arg9[%c0_178, %c0_179], %166 {strides = array<i32>} : memref<288x32xf32, #tpu.memory_space<vmem>>, vector<288x32xf32>,
    %c0_180 = arith.constant 0 : index
    %c0_181 = arith.constant 0 : index
    %168 = vector.load %arg9[%c0_180, %c0_181] : memref<288x32xf32, #tpu.memory_space<vmem>>, vector<288x32xf32>
    %c18_182 = arith.constant 18 : index
    %c0_183 = arith.constant 0 : index
    %169 = vector.load %arg10[%c18_182, %c0_183] : memref<336x32xbf16, #tpu.memory_space<vmem>>, vector<288x32xbf16>
    %c3_184 = arith.constant 3 : index
    %c0_185 = arith.constant 0 : index
    %c0_186 = arith.constant 0 : index
    %170 = vector.load %arg4[%c3_184, %c0_185, %c0_186] : memref<9x32x32xbf16, #tpu.memory_space<vmem>>, vector<1x32x32xbf16>
    %171 = vector.shape_cast %170 : vector<1x32x32xbf16> to vector<32x32xbf16>
    %cst_187 = arith.constant dense<0.000000e+00> : vector<288x32xf32>
    %172 = tpu.matmul %169, %171, %cst_187 {dimension_numbers = #tpu.dot_dimension_numbers<[1], [0], [0], [1], [0, 0, 1, 1], [], []>} : vector<288x32xbf16>, vector<32x32xbf16>, vector<288x32xf32> -> vector<288x32xf32>
    %173 = arith.addf %168, %172 : vector<288x32xf32>
    %c0_188 = arith.constant 0 : index
    %c0_189 = arith.constant 0 : index
    %174 = vector.load %arg9[%c0_188, %c0_189] : memref<288x32xf32, #tpu.memory_space<vmem>>, vector<288x32xf32>
    tpu.vector_store %arg9[%c0_188, %c0_189], %173 {strides = array<i32>} : memref<288x32xf32, #tpu.memory_space<vmem>>, vector<288x32xf32>,
    %c0_190 = arith.constant 0 : index
    %c0_191 = arith.constant 0 : index
    %175 = vector.load %arg9[%c0_190, %c0_191] : memref<288x32xf32, #tpu.memory_space<vmem>>, vector<288x32xf32>
    %c19_192 = arith.constant 19 : index
    %c0_193 = arith.constant 0 : index
    %176 = vector.load %arg10[%c19_192, %c0_193] : memref<336x32xbf16, #tpu.memory_space<vmem>>, vector<288x32xbf16>
    %c4_194 = arith.constant 4 : index
    %c0_195 = arith.constant 0 : index
    %c0_196 = arith.constant 0 : index
    %177 = vector.load %arg4[%c4_194, %c0_195, %c0_196] : memref<9x32x32xbf16, #tpu.memory_space<vmem>>, vector<1x32x32xbf16>
    %178 = vector.shape_cast %177 : vector<1x32x32xbf16> to vector<32x32xbf16>
    %cst_197 = arith.constant dense<0.000000e+00> : vector<288x32xf32>
    %179 = tpu.matmul %176, %178, %cst_197 {dimension_numbers = #tpu.dot_dimension_numbers<[1], [0], [0], [1], [0, 0, 1, 1], [], []>} : vector<288x32xbf16>, vector<32x32xbf16>, vector<288x32xf32> -> vector<288x32xf32>
    %180 = arith.addf %175, %179 : vector<288x32xf32>
    %c0_198 = arith.constant 0 : index
    %c0_199 = arith.constant 0 : index
    %181 = vector.load %arg9[%c0_198, %c0_199] : memref<288x32xf32, #tpu.memory_space<vmem>>, vector<288x32xf32>
    tpu.vector_store %arg9[%c0_198, %c0_199], %180 {strides = array<i32>} : memref<288x32xf32, #tpu.memory_space<vmem>>, vector<288x32xf32>,
    %c0_200 = arith.constant 0 : index
    %c0_201 = arith.constant 0 : index
    %182 = vector.load %arg9[%c0_200, %c0_201] : memref<288x32xf32, #tpu.memory_space<vmem>>, vector<288x32xf32>
    %c20_202 = arith.constant 20 : index
    %c0_203 = arith.constant 0 : index
    %183 = vector.load %arg10[%c20_202, %c0_203] : memref<336x32xbf16, #tpu.memory_space<vmem>>, vector<288x32xbf16>
    %c5_204 = arith.constant 5 : index
    %c0_205 = arith.constant 0 : index
    %c0_206 = arith.constant 0 : index
    %184 = vector.load %arg4[%c5_204, %c0_205, %c0_206] : memref<9x32x32xbf16, #tpu.memory_space<vmem>>, vector<1x32x32xbf16>
    %185 = vector.shape_cast %184 : vector<1x32x32xbf16> to vector<32x32xbf16>
    %cst_207 = arith.constant dense<0.000000e+00> : vector<288x32xf32>
    %186 = tpu.matmul %183, %185, %cst_207 {dimension_numbers = #tpu.dot_dimension_numbers<[1], [0], [0], [1], [0, 0, 1, 1], [], []>} : vector<288x32xbf16>, vector<32x32xbf16>, vector<288x32xf32> -> vector<288x32xf32>
    %187 = arith.addf %182, %186 : vector<288x32xf32>
    %c0_208 = arith.constant 0 : index
    %c0_209 = arith.constant 0 : index
    %188 = vector.load %arg9[%c0_208, %c0_209] : memref<288x32xf32, #tpu.memory_space<vmem>>, vector<288x32xf32>
    tpu.vector_store %arg9[%c0_208, %c0_209], %187 {strides = array<i32>} : memref<288x32xf32, #tpu.memory_space<vmem>>, vector<288x32xf32>,
    %c0_210 = arith.constant 0 : index
    %c0_211 = arith.constant 0 : index
    %189 = vector.load %arg9[%c0_210, %c0_211] : memref<288x32xf32, #tpu.memory_space<vmem>>, vector<288x32xf32>
    %c36_212 = arith.constant 36 : index
    %c0_213 = arith.constant 0 : index
    %190 = vector.load %arg10[%c36_212, %c0_213] : memref<336x32xbf16, #tpu.memory_space<vmem>>, vector<288x32xbf16>
    %c6_214 = arith.constant 6 : index
    %c0_215 = arith.constant 0 : index
    %c0_216 = arith.constant 0 : index
    %191 = vector.load %arg4[%c6_214, %c0_215, %c0_216] : memref<9x32x32xbf16, #tpu.memory_space<vmem>>, vector<1x32x32xbf16>
    %192 = vector.shape_cast %191 : vector<1x32x32xbf16> to vector<32x32xbf16>
    %cst_217 = arith.constant dense<0.000000e+00> : vector<288x32xf32>
    %193 = tpu.matmul %190, %192, %cst_217 {dimension_numbers = #tpu.dot_dimension_numbers<[1], [0], [0], [1], [0, 0, 1, 1], [], []>} : vector<288x32xbf16>, vector<32x32xbf16>, vector<288x32xf32> -> vector<288x32xf32>
    %194 = arith.addf %189, %193 : vector<288x32xf32>
    %c0_218 = arith.constant 0 : index
    %c0_219 = arith.constant 0 : index
    %195 = vector.load %arg9[%c0_218, %c0_219] : memref<288x32xf32, #tpu.memory_space<vmem>>, vector<288x32xf32>
    tpu.vector_store %arg9[%c0_218, %c0_219], %194 {strides = array<i32>} : memref<288x32xf32, #tpu.memory_space<vmem>>, vector<288x32xf32>,
    %c0_220 = arith.constant 0 : index
    %c0_221 = arith.constant 0 : index
    %196 = vector.load %arg9[%c0_220, %c0_221] : memref<288x32xf32, #tpu.memory_space<vmem>>, vector<288x32xf32>
    %c37_222 = arith.constant 37 : index
    %c0_223 = arith.constant 0 : index
    %197 = vector.load %arg10[%c37_222, %c0_223] : memref<336x32xbf16, #tpu.memory_space<vmem>>, vector<288x32xbf16>
    %c7_224 = arith.constant 7 : index
    %c0_225 = arith.constant 0 : index
    %c0_226 = arith.constant 0 : index
    %198 = vector.load %arg4[%c7_224, %c0_225, %c0_226] : memref<9x32x32xbf16, #tpu.memory_space<vmem>>, vector<1x32x32xbf16>
    %199 = vector.shape_cast %198 : vector<1x32x32xbf16> to vector<32x32xbf16>
    %cst_227 = arith.constant dense<0.000000e+00> : vector<288x32xf32>
    %200 = tpu.matmul %197, %199, %cst_227 {dimension_numbers = #tpu.dot_dimension_numbers<[1], [0], [0], [1], [0, 0, 1, 1], [], []>} : vector<288x32xbf16>, vector<32x32xbf16>, vector<288x32xf32> -> vector<288x32xf32>
    %201 = arith.addf %196, %200 : vector<288x32xf32>
    %c0_228 = arith.constant 0 : index
    %c0_229 = arith.constant 0 : index
    %202 = vector.load %arg9[%c0_228, %c0_229] : memref<288x32xf32, #tpu.memory_space<vmem>>, vector<288x32xf32>
    tpu.vector_store %arg9[%c0_228, %c0_229], %201 {strides = array<i32>} : memref<288x32xf32, #tpu.memory_space<vmem>>, vector<288x32xf32>,
    %c0_230 = arith.constant 0 : index
    %c0_231 = arith.constant 0 : index
    %203 = vector.load %arg9[%c0_230, %c0_231] : memref<288x32xf32, #tpu.memory_space<vmem>>, vector<288x32xf32>
    %c38_232 = arith.constant 38 : index
    %c0_233 = arith.constant 0 : index
    %204 = vector.load %arg10[%c38_232, %c0_233] : memref<336x32xbf16, #tpu.memory_space<vmem>>, vector<288x32xbf16>
    %c8_234 = arith.constant 8 : index
    %c0_235 = arith.constant 0 : index
    %c0_236 = arith.constant 0 : index
    %205 = vector.load %arg4[%c8_234, %c0_235, %c0_236] : memref<9x32x32xbf16, #tpu.memory_space<vmem>>, vector<1x32x32xbf16>
    %206 = vector.shape_cast %205 : vector<1x32x32xbf16> to vector<32x32xbf16>
    %cst_237 = arith.constant dense<0.000000e+00> : vector<288x32xf32>
    %207 = tpu.matmul %204, %206, %cst_237 {dimension_numbers = #tpu.dot_dimension_numbers<[1], [0], [0], [1], [0, 0, 1, 1], [], []>} : vector<288x32xbf16>, vector<32x32xbf16>, vector<288x32xf32> -> vector<288x32xf32>
    %208 = arith.addf %203, %207 : vector<288x32xf32>
    %c0_238 = arith.constant 0 : index
    %c0_239 = arith.constant 0 : index
    %209 = vector.load %arg9[%c0_238, %c0_239] : memref<288x32xf32, #tpu.memory_space<vmem>>, vector<288x32xf32>
    tpu.vector_store %arg9[%c0_238, %c0_239], %208 {strides = array<i32>} : memref<288x32xf32, #tpu.memory_space<vmem>>, vector<288x32xf32>,
    %c0_240 = arith.constant 0 : index
    %c19_241 = arith.constant 19 : index
    %c0_242 = arith.constant 0 : index
    %210 = vector.load %arg1[%c0_240, %c19_241, %c0_242] : memref<1x336x32xbf16, #tpu.memory_space<vmem>>, vector<1x288x32xbf16>
    %211 = vector.shape_cast %210 : vector<1x288x32xbf16> to vector<288x32xbf16>
    %212 = arith.extf %211 : vector<288x32xbf16> to vector<288x32xf32>
    %c0_243 = arith.constant 0 : index
    %c0_244 = arith.constant 0 : index
    %213 = vector.load %arg9[%c0_243, %c0_244] : memref<288x32xf32, #tpu.memory_space<vmem>>, vector<288x32xf32>
    %c0_245 = arith.constant 0 : index
    %c0_246 = arith.constant 0 : index
    %214 = vector.load %arg5[%c0_245, %c0_246] : memref<1x32xf32, #tpu.memory_space<vmem>>, vector<1x32xf32>
    %215 = vector.broadcast %214 : vector<1x32xf32> to vector<288x32xf32>
    %216 = arith.addf %213, %215 : vector<288x32xf32>
    %217 = arith.addf %216, %212 : vector<288x32xf32>
    %cst_247 = arith.constant 0.000000e+00 : f32
    %218 = vector.broadcast %cst_247 : f32 to vector<288x32xf32>
    %219 = arith.maximumf %217, %218 : vector<288x32xf32>
    %220 = vector.extract_strided_slice %219 {offsets = [0, 0], sizes = [16, 32], strides = [1, 1]} : vector<288x32xf32> to vector<16x32xf32>
    %c0_248 = arith.constant 0 : index
    %c0_249 = arith.constant 0 : index
    %c0_250 = arith.constant 0 : index
    %c0_251 = arith.constant 0 : index
    %221 = vector.load %arg7[%c0_248, %c0_249, %c0_250, %c0_251] : memref<1x16x16x32xf32, #tpu.memory_space<vmem>>, vector<1x1x16x32xf32>
    %222 = vector.shape_cast %221 : vector<1x1x16x32xf32> to vector<16x32xf32>
    %223 = vector.shape_cast %220 : vector<16x32xf32> to vector<1x1x16x32xf32>
    tpu.vector_store %arg7[%c0_248, %c0_249, %c0_250, %c0_251], %223 {strides = array<i32>} : memref<1x16x16x32xf32, #tpu.memory_space<vmem>>, vector<1x1x16x32xf32>,
    %224 = vector.extract_strided_slice %219 {offsets = [18, 0], sizes = [16, 32], strides = [1, 1]} : vector<288x32xf32> to vector<16x32xf32>
    %c0_252 = arith.constant 0 : index
    %c1_253 = arith.constant 1 : index
    %c0_254 = arith.constant 0 : index
    %c0_255 = arith.constant 0 : index
    %225 = vector.load %arg7[%c0_252, %c1_253, %c0_254, %c0_255] : memref<1x16x16x32xf32, #tpu.memory_space<vmem>>, vector<1x1x16x32xf32>
    %226 = vector.shape_cast %225 : vector<1x1x16x32xf32> to vector<16x32xf32>
    %227 = vector.shape_cast %224 : vector<16x32xf32> to vector<1x1x16x32xf32>
    tpu.vector_store %arg7[%c0_252, %c1_253, %c0_254, %c0_255], %227 {strides = array<i32>} : memref<1x16x16x32xf32, #tpu.memory_space<vmem>>, vector<1x1x16x32xf32>,
    %228 = vector.extract_strided_slice %219 {offsets = [36, 0], sizes = [16, 32], strides = [1, 1]} : vector<288x32xf32> to vector<16x32xf32>
    %c0_256 = arith.constant 0 : index
    %c2_257 = arith.constant 2 : index
    %c0_258 = arith.constant 0 : index
    %c0_259 = arith.constant 0 : index
    %229 = vector.load %arg7[%c0_256, %c2_257, %c0_258, %c0_259] : memref<1x16x16x32xf32, #tpu.memory_space<vmem>>, vector<1x1x16x32xf32>
    %230 = vector.shape_cast %229 : vector<1x1x16x32xf32> to vector<16x32xf32>
    %231 = vector.shape_cast %228 : vector<16x32xf32> to vector<1x1x16x32xf32>
    tpu.vector_store %arg7[%c0_256, %c2_257, %c0_258, %c0_259], %231 {strides = array<i32>} : memref<1x16x16x32xf32, #tpu.memory_space<vmem>>, vector<1x1x16x32xf32>,
    %232 = vector.extract_strided_slice %219 {offsets = [54, 0], sizes = [16, 32], strides = [1, 1]} : vector<288x32xf32> to vector<16x32xf32>
    %c0_260 = arith.constant 0 : index
    %c3_261 = arith.constant 3 : index
    %c0_262 = arith.constant 0 : index
    %c0_263 = arith.constant 0 : index
    %233 = vector.load %arg7[%c0_260, %c3_261, %c0_262, %c0_263] : memref<1x16x16x32xf32, #tpu.memory_space<vmem>>, vector<1x1x16x32xf32>
    %234 = vector.shape_cast %233 : vector<1x1x16x32xf32> to vector<16x32xf32>
    %235 = vector.shape_cast %232 : vector<16x32xf32> to vector<1x1x16x32xf32>
    tpu.vector_store %arg7[%c0_260, %c3_261, %c0_262, %c0_263], %235 {strides = array<i32>} : memref<1x16x16x32xf32, #tpu.memory_space<vmem>>, vector<1x1x16x32xf32>,
    %236 = vector.extract_strided_slice %219 {offsets = [72, 0], sizes = [16, 32], strides = [1, 1]} : vector<288x32xf32> to vector<16x32xf32>
    %c0_264 = arith.constant 0 : index
    %c4_265 = arith.constant 4 : index
    %c0_266 = arith.constant 0 : index
    %c0_267 = arith.constant 0 : index
    %237 = vector.load %arg7[%c0_264, %c4_265, %c0_266, %c0_267] : memref<1x16x16x32xf32, #tpu.memory_space<vmem>>, vector<1x1x16x32xf32>
    %238 = vector.shape_cast %237 : vector<1x1x16x32xf32> to vector<16x32xf32>
    %239 = vector.shape_cast %236 : vector<16x32xf32> to vector<1x1x16x32xf32>
    tpu.vector_store %arg7[%c0_264, %c4_265, %c0_266, %c0_267], %239 {strides = array<i32>} : memref<1x16x16x32xf32, #tpu.memory_space<vmem>>, vector<1x1x16x32xf32>,
    %240 = vector.extract_strided_slice %219 {offsets = [90, 0], sizes = [16, 32], strides = [1, 1]} : vector<288x32xf32> to vector<16x32xf32>
    %c0_268 = arith.constant 0 : index
    %c5_269 = arith.constant 5 : index
    %c0_270 = arith.constant 0 : index
    %c0_271 = arith.constant 0 : index
    %241 = vector.load %arg7[%c0_268, %c5_269, %c0_270, %c0_271] : memref<1x16x16x32xf32, #tpu.memory_space<vmem>>, vector<1x1x16x32xf32>
    %242 = vector.shape_cast %241 : vector<1x1x16x32xf32> to vector<16x32xf32>
    %243 = vector.shape_cast %240 : vector<16x32xf32> to vector<1x1x16x32xf32>
    tpu.vector_store %arg7[%c0_268, %c5_269, %c0_270, %c0_271], %243 {strides = array<i32>} : memref<1x16x16x32xf32, #tpu.memory_space<vmem>>, vector<1x1x16x32xf32>,
    %244 = vector.extract_strided_slice %219 {offsets = [108, 0], sizes = [16, 32], strides = [1, 1]} : vector<288x32xf32> to vector<16x32xf32>
    %c0_272 = arith.constant 0 : index
    %c6_273 = arith.constant 6 : index
    %c0_274 = arith.constant 0 : index
    %c0_275 = arith.constant 0 : index
    %245 = vector.load %arg7[%c0_272, %c6_273, %c0_274, %c0_275] : memref<1x16x16x32xf32, #tpu.memory_space<vmem>>, vector<1x1x16x32xf32>
    %246 = vector.shape_cast %245 : vector<1x1x16x32xf32> to vector<16x32xf32>
    %247 = vector.shape_cast %244 : vector<16x32xf32> to vector<1x1x16x32xf32>
    tpu.vector_store %arg7[%c0_272, %c6_273, %c0_274, %c0_275], %247 {strides = array<i32>} : memref<1x16x16x32xf32, #tpu.memory_space<vmem>>, vector<1x1x16x32xf32>,
    %248 = vector.extract_strided_slice %219 {offsets = [126, 0], sizes = [16, 32], strides = [1, 1]} : vector<288x32xf32> to vector<16x32xf32>
    %c0_276 = arith.constant 0 : index
    %c7_277 = arith.constant 7 : index
    %c0_278 = arith.constant 0 : index
    %c0_279 = arith.constant 0 : index
    %249 = vector.load %arg7[%c0_276, %c7_277, %c0_278, %c0_279] : memref<1x16x16x32xf32, #tpu.memory_space<vmem>>, vector<1x1x16x32xf32>
    %250 = vector.shape_cast %249 : vector<1x1x16x32xf32> to vector<16x32xf32>
    %251 = vector.shape_cast %248 : vector<16x32xf32> to vector<1x1x16x32xf32>
    tpu.vector_store %arg7[%c0_276, %c7_277, %c0_278, %c0_279], %251 {strides = array<i32>} : memref<1x16x16x32xf32, #tpu.memory_space<vmem>>, vector<1x1x16x32xf32>,
    %252 = vector.extract_strided_slice %219 {offsets = [144, 0], sizes = [16, 32], strides = [1, 1]} : vector<288x32xf32> to vector<16x32xf32>
    %c0_280 = arith.constant 0 : index
    %c8_281 = arith.constant 8 : index
    %c0_282 = arith.constant 0 : index
    %c0_283 = arith.constant 0 : index
    %253 = vector.load %arg7[%c0_280, %c8_281, %c0_282, %c0_283] : memref<1x16x16x32xf32, #tpu.memory_space<vmem>>, vector<1x1x16x32xf32>
    %254 = vector.shape_cast %253 : vector<1x1x16x32xf32> to vector<16x32xf32>
    %255 = vector.shape_cast %252 : vector<16x32xf32> to vector<1x1x16x32xf32>
    tpu.vector_store %arg7[%c0_280, %c8_281, %c0_282, %c0_283], %255 {strides = array<i32>} : memref<1x16x16x32xf32, #tpu.memory_space<vmem>>, vector<1x1x16x32xf32>,
    %256 = vector.extract_strided_slice %219 {offsets = [162, 0], sizes = [16, 32], strides = [1, 1]} : vector<288x32xf32> to vector<16x32xf32>
    %c0_284 = arith.constant 0 : index
    %c9_285 = arith.constant 9 : index
    %c0_286 = arith.constant 0 : index
    %c0_287 = arith.constant 0 : index
    %257 = vector.load %arg7[%c0_284, %c9_285, %c0_286, %c0_287] : memref<1x16x16x32xf32, #tpu.memory_space<vmem>>, vector<1x1x16x32xf32>
    %258 = vector.shape_cast %257 : vector<1x1x16x32xf32> to vector<16x32xf32>
    %259 = vector.shape_cast %256 : vector<16x32xf32> to vector<1x1x16x32xf32>
    tpu.vector_store %arg7[%c0_284, %c9_285, %c0_286, %c0_287], %259 {strides = array<i32>} : memref<1x16x16x32xf32, #tpu.memory_space<vmem>>, vector<1x1x16x32xf32>,
    %260 = vector.extract_strided_slice %219 {offsets = [180, 0], sizes = [16, 32], strides = [1, 1]} : vector<288x32xf32> to vector<16x32xf32>
    %c0_288 = arith.constant 0 : index
    %c10_289 = arith.constant 10 : index
    %c0_290 = arith.constant 0 : index
    %c0_291 = arith.constant 0 : index
    %261 = vector.load %arg7[%c0_288, %c10_289, %c0_290, %c0_291] : memref<1x16x16x32xf32, #tpu.memory_space<vmem>>, vector<1x1x16x32xf32>
    %262 = vector.shape_cast %261 : vector<1x1x16x32xf32> to vector<16x32xf32>
    %263 = vector.shape_cast %260 : vector<16x32xf32> to vector<1x1x16x32xf32>
    tpu.vector_store %arg7[%c0_288, %c10_289, %c0_290, %c0_291], %263 {strides = array<i32>} : memref<1x16x16x32xf32, #tpu.memory_space<vmem>>, vector<1x1x16x32xf32>,
    %264 = vector.extract_strided_slice %219 {offsets = [198, 0], sizes = [16, 32], strides = [1, 1]} : vector<288x32xf32> to vector<16x32xf32>
    %c0_292 = arith.constant 0 : index
    %c11_293 = arith.constant 11 : index
    %c0_294 = arith.constant 0 : index
    %c0_295 = arith.constant 0 : index
    %265 = vector.load %arg7[%c0_292, %c11_293, %c0_294, %c0_295] : memref<1x16x16x32xf32, #tpu.memory_space<vmem>>, vector<1x1x16x32xf32>
    %266 = vector.shape_cast %265 : vector<1x1x16x32xf32> to vector<16x32xf32>
    %267 = vector.shape_cast %264 : vector<16x32xf32> to vector<1x1x16x32xf32>
    tpu.vector_store %arg7[%c0_292, %c11_293, %c0_294, %c0_295], %267 {strides = array<i32>} : memref<1x16x16x32xf32, #tpu.memory_space<vmem>>, vector<1x1x16x32xf32>,
    %268 = vector.extract_strided_slice %219 {offsets = [216, 0], sizes = [16, 32], strides = [1, 1]} : vector<288x32xf32> to vector<16x32xf32>
    %c0_296 = arith.constant 0 : index
    %c12_297 = arith.constant 12 : index
    %c0_298 = arith.constant 0 : index
    %c0_299 = arith.constant 0 : index
    %269 = vector.load %arg7[%c0_296, %c12_297, %c0_298, %c0_299] : memref<1x16x16x32xf32, #tpu.memory_space<vmem>>, vector<1x1x16x32xf32>
    %270 = vector.shape_cast %269 : vector<1x1x16x32xf32> to vector<16x32xf32>
    %271 = vector.shape_cast %268 : vector<16x32xf32> to vector<1x1x16x32xf32>
    tpu.vector_store %arg7[%c0_296, %c12_297, %c0_298, %c0_299], %271 {strides = array<i32>} : memref<1x16x16x32xf32, #tpu.memory_space<vmem>>, vector<1x1x16x32xf32>,
    %272 = vector.extract_strided_slice %219 {offsets = [234, 0], sizes = [16, 32], strides = [1, 1]} : vector<288x32xf32> to vector<16x32xf32>
    %c0_300 = arith.constant 0 : index
    %c13_301 = arith.constant 13 : index
    %c0_302 = arith.constant 0 : index
    %c0_303 = arith.constant 0 : index
    %273 = vector.load %arg7[%c0_300, %c13_301, %c0_302, %c0_303] : memref<1x16x16x32xf32, #tpu.memory_space<vmem>>, vector<1x1x16x32xf32>
    %274 = vector.shape_cast %273 : vector<1x1x16x32xf32> to vector<16x32xf32>
    %275 = vector.shape_cast %272 : vector<16x32xf32> to vector<1x1x16x32xf32>
    tpu.vector_store %arg7[%c0_300, %c13_301, %c0_302, %c0_303], %275 {strides = array<i32>} : memref<1x16x16x32xf32, #tpu.memory_space<vmem>>, vector<1x1x16x32xf32>,
    %276 = vector.extract_strided_slice %219 {offsets = [252, 0], sizes = [16, 32], strides = [1, 1]} : vector<288x32xf32> to vector<16x32xf32>
    %c0_304 = arith.constant 0 : index
    %c14_305 = arith.constant 14 : index
    %c0_306 = arith.constant 0 : index
    %c0_307 = arith.constant 0 : index
    %277 = vector.load %arg7[%c0_304, %c14_305, %c0_306, %c0_307] : memref<1x16x16x32xf32, #tpu.memory_space<vmem>>, vector<1x1x16x32xf32>
    %278 = vector.shape_cast %277 : vector<1x1x16x32xf32> to vector<16x32xf32>
    %279 = vector.shape_cast %276 : vector<16x32xf32> to vector<1x1x16x32xf32>
    tpu.vector_store %arg7[%c0_304, %c14_305, %c0_306, %c0_307], %279 {strides = array<i32>} : memref<1x16x16x32xf32, #tpu.memory_space<vmem>>, vector<1x1x16x32xf32>,
    %280 = vector.extract_strided_slice %219 {offsets = [270, 0], sizes = [16, 32], strides = [1, 1]} : vector<288x32xf32> to vector<16x32xf32>
    %c0_308 = arith.constant 0 : index
    %c15_309 = arith.constant 15 : index
    %c0_310 = arith.constant 0 : index
    %c0_311 = arith.constant 0 : index
    %281 = vector.load %arg7[%c0_308, %c15_309, %c0_310, %c0_311] : memref<1x16x16x32xf32, #tpu.memory_space<vmem>>, vector<1x1x16x32xf32>
    %282 = vector.shape_cast %281 : vector<1x1x16x32xf32> to vector<16x32xf32>
    %283 = vector.shape_cast %280 : vector<16x32xf32> to vector<1x1x16x32xf32>
    tpu.vector_store %arg7[%c0_308, %c15_309, %c0_310, %c0_311], %283 {strides = array<i32>} : memref<1x16x16x32xf32, #tpu.memory_space<vmem>>, vector<1x1x16x32xf32>,
    return
  }
  func.func @transform_0(%arg0: i32) -> (i32, i32, i32) {
    %c0_i32 = arith.constant 0 : i32
    %c0_i32_0 = arith.constant 0 : i32
    %c0_i32_1 = arith.constant 0 : i32
    return %arg0, %c0_i32, %c0_i32_0 : i32, i32, i32
  }
  func.func @transform_1(%arg0: i32) -> (i32, i32, i32) {
    %c0_i32 = arith.constant 0 : i32
    %c0_i32_0 = arith.constant 0 : i32
    %c0_i32_1 = arith.constant 0 : i32
    %c0_i32_2 = arith.constant 0 : i32
    return %c0_i32, %c0_i32_0, %c0_i32_1 : i32, i32, i32
  }
  func.func @transform_2(%arg0: i32) -> (i32, i32) {
    %c0_i32 = arith.constant 0 : i32
    %c0_i32_0 = arith.constant 0 : i32
    %c0_i32_1 = arith.constant 0 : i32
    return %c0_i32, %c0_i32_0 : i32, i32
  }
  func.func @transform_3(%arg0: i32) -> (i32, i32, i32) {
    %c0_i32 = arith.constant 0 : i32
    %c0_i32_0 = arith.constant 0 : i32
    %c0_i32_1 = arith.constant 0 : i32
    %c0_i32_2 = arith.constant 0 : i32
    return %c0_i32, %c0_i32_0, %c0_i32_1 : i32, i32, i32
  }
  func.func @transform_4(%arg0: i32) -> (i32, i32) {
    %c0_i32 = arith.constant 0 : i32
    %c0_i32_0 = arith.constant 0 : i32
    %c0_i32_1 = arith.constant 0 : i32
    return %c0_i32, %c0_i32_0 : i32, i32
  }
  func.func @transform_5(%arg0: i32) -> (i32, i32) {
    %c0_i32 = arith.constant 0 : i32
    %c0_i32_0 = arith.constant 0 : i32
    %c0_i32_1 = arith.constant 0 : i32
    return %c0_i32, %c0_i32_0 : i32, i32
  }
  func.func @transform_6(%arg0: i32) -> (i32, i32, i32, i32) {
    %c0_i32 = arith.constant 0 : i32
    %c0_i32_0 = arith.constant 0 : i32
    %c0_i32_1 = arith.constant 0 : i32
    %c0_i32_2 = arith.constant 0 : i32
    return %arg0, %c0_i32, %c0_i32_0, %c0_i32_1 : i32, i32, i32, i32
  }
  func.func @transform_7(%arg0: i32) -> (i32, i32, i32, i32) {
    %c0_i32 = arith.constant 0 : i32
    %c0_i32_0 = arith.constant 0 : i32
    %c0_i32_1 = arith.constant 0 : i32
    %c0_i32_2 = arith.constant 0 : i32
    return %arg0, %c0_i32, %c0_i32_0, %c0_i32_1 : i32, i32, i32, i32
  }
}

</mosaic_0001>

<bundles_post_ra>
// kernel: residual_block_incr.1
= control target key start
LH: loop header
LB: loop body
LE: loop exit
PB: predicated region body
PF: predicated region fallthrough
CT: control target
= control target key end

     0   :  { %s17015_s0 = inlined_call_operand.vmem [shape: bf16[2,336,32], index: 0, kind: input, shape index: {}]   ;;  %s17016_s1 = inlined_call_operand.vmem [shape: bf16[9,32,32], index: 1, kind: input, shape index: {}]   ;;  %s17017_s2 = inlined_call_operand.vmem [shape: f32[1,32], index: 2, kind: input, shape index: {}]   ;;  %s17018_s3 = inlined_call_operand.vmem [shape: bf16[9,32,32], index: 3, kind: input, shape index: {}]   ;;  %s17019_s4 = inlined_call_operand.vmem [shape: f32[1,32], index: 4, kind: input, shape index: {}]   ;;  %s17020_s5 = inlined_call_operand.vmem [shape: f32[288,1], index: 5, kind: input, shape index: {}]   ;;  %s17021_s6 = inlined_call_operand.hbm [shape: f32[2,16,16,32], index: 6, kind: output, shape index: {0}]   ;;  %s17022_s7 = inlined_call_operand.hbm [shape: f32[2,16,16,32], index: 7, kind: output, shape index: {1}]  }
   0x1   :  { %17024 = sst [smem:[#allocation10_spill]] %s17015_s0 }
   0x2   :  { %13 = vsyncpa [#allocation5], 0 }
   0x3   :  { %15 = vsyncpa [#allocation5 + $0x1], 0 }
   0x4   :  { %16 = vsyncpa [#allocation7], 0 }
   0x5   :  { %18 = vsyncpa [#allocation7 + $0x1], 0  ;;  %s12887_s24 = smov 0   ;;  %s12889_s25 = smov 0  }
   0x6   :  { %s12891_s26 = smov 0   ;;  %s12893_s27 = smov 0  }
   0x7 LB: > { %s12908_s28 = sadd.s32 4294967295, %s12842_s27   ;;  %s10314_s29 = sadd.s32 4294967294, %s12842_s27   ;;  %s12842_s27 = sphi %s12893_s27, %s17038_s27   ;;  %s12838_s26 = sphi %s12891_s26, %s17037_s26   ;;  %s12834_s25 = sphi %s12889_s25, %s17036_s25   ;;  %s12830_s24 = sphi %s12887_s24, %s17035_s24  }
   0x8   : > { %s12912_s30 = sadd.s32 1, %s12842_s27   ;;  %s162_s8 = sadd.s32 1, %s12838_s26 }
   0x9   : > { %s159_s9 = ssub.s32 %s12842_s27, %s12912_s30  ;;  %p172_p0 = scmp.ne.s32.totalorder %s12838_s26, %s12834_s25 }
   0xa   : > { %p160_p1 = scmp.eq.s32.totalorder %s159_s9, 0  ;;  %p173_p2 = scmp.eq.s32.totalorder %s12908_s28, 1 }
   0xb   : > { %p178_p3 = scmp.ne.s32.totalorder %s12834_s25, %s12830_s24  ;;  %p179_p4 = scmp.eq.s32.totalorder %s10314_s29, 1 }
   0xc   : > { %s12923_s10 = scalar_select %p160_p1, %s12838_s26, %s162_s8  }
   0xd   : > { %p12925_p5 = por %p173_p2, %p172_p0  ;;  %p12929_p6 = por %p179_p4, %p178_p3 }
   0xe   : > { %p10317_p7 = scmp.ge.s32.totalorder %s12842_s27, 1  ;;  %p246_p8 = scmp.lt.s32.totalorder %s12842_s27, 3 }
  0x10   : > { %p247_p9 = pnand %p10317_p7, %p246_p8 }
  0x11   : > { %p283_p10 = scmp.lt.s32.totalorder (!%p247_p9), %s12908_s28, 1  ;;  %s17027_s0 = sld [smem:[#allocation10_spill]] (!%p247_p9) }
  0x12   : > { %250 = sbr.rel (%p247_p9) target bundleno = 1645 (0x66d), region = 44  ;;  %s14399_s16 = sand.u32 (!%p247_p9), 1, %s12834_s25  }
  0x13   : > { %s10187_s20 = scalar_lea.sflag (!%p247_p9), [#allocation7], %s14399_s16  ;;  %s12768_s9 = scalar_lea.hbm (!%p247_p9), %s17022_s7, 512 }
  0x17   : > { %v12260_v0 = vld [vmem:[%s17016_s1 + $0x8] sm:$0xff]  ;;  %v12280_v1 = vld [vmem:[%s17016_s1 + $0x18] sm:$0xff]  ;;  %v12259_v2 = vld [vmem:[%s17016_s1] sm:$0xff]  ;;  %s284_s19 = scalar_select %p283_p10, %s12908_s28, 1  ;;  %vm431_vm0 = vcmask 261120   ;;  %vm1349_vm2 = vcmask 1046528  }
  0x18   : > { %492 = vmatpush.bf16.msra.mxu0 %v12260_v0  ;;  %12688 = vmatpush.bf16.msra.mxu2 %v12260_v0  ;;  %v12300_v3 = vld [vmem:[%s17016_s1 + $0x28] sm:$0xff]  ;;  %v12279_v4 = vld [vmem:[%s17016_s1 + $0x10] sm:$0xff]  ;;  %v12320_v5 = vld [vmem:[%s17016_s1 + $0x38] sm:$0xff]  ;;  %vm792_vm1 = vsmask.f32 7424  ;;  %vm2819_vm4 = vcmask 1045504  }
  0x19   : > { %12690 = vmatpush.bf16.msra.mxu3 %v12280_v1  ;;  %1013 = vmatpush.bf16.msra.mxu1 %v12280_v1  ;;  %s12692_s29 = smul.u32 168, %s284_s19  ;;  %v12340_v6 = vld [vmem:[%s17016_s1 + $0x48] sm:$0xff]  ;;  %v12299_v55 = vld [vmem:[%s17016_s1 + $0x20] sm:$0xff]  ;;  %vm2240_vm3 = vsmask.f32 6400  ;;  %vm4688_vm5 = vcmask 257024  }
  0x1a   : > { %vm4289_vm6 = vcmask 1044480   ;;  %vm3710_vm7 = vsmask.f32 5376  ;;  %vm4682_vm8 = vcmask 254976   ;;  %vm4744_vm9 = vsmask.f32 1280 }
  0x1b   : > { %s12958_s15 = scalar_lea.vmem %s17027_s0, %s12692_s29  ;;  %vm14340_vm10 = vmand %vm4682_vm8, %vm4744_vm9  ;;  %s10318_s19 = sshll.u32 %s14399_s16, 8  ;;  %vm4749_vm11 = vcmask 257025   ;;  %vm4750_vm12 = vsmask.f32 7942  ;;  %vm5046_vm14 = vsmask.f32 5392 }
  0x1c   : > { %493 = vmatpush.bf16.msra.mxu0 %v12259_v2  ;;  %12689 = vmatpush.bf16.msra.mxu2 %v12259_v2  ;;  %v12241_v7 = vld [vmem:[%s12958_s15] sm:$0xff]  ;;  %v12250_v8 = vld [vmem:[%s12958_s15 + $0x48] sm:$0xff]  ;;  %v12271_v10 = vld [vmem:[%s12958_s15 + $0x50] sm:$0xff]  ;;  %s14445_s22 = scalar_lea.vmem [#allocation6], %s10318_s19  ;;  %vm4679_vm15 = vcmask 261122   ;;  %s16617_s8 = scalar_lea.vmem [#allocation4], %s10318_s19 }
  0x1d   : > { %12691 = vmatpush.bf16.msra.mxu3 %v12279_v4  ;;  %v12270_v9 = vld [vmem:[%s12958_s15 + $0x48] sm:$0xff]  ;;  %1014 = vmatpush.bf16.msra.mxu1 %v12279_v4  ;;  %v12261_v13 = vld [vmem:[%s12958_s15] sm:$0xff]  ;;  %v873_v15 = vshll.u32 %v12271_v10, 16  ;;  %v12272_v26 = vld [vmem:[%s12958_s15 + $0x58] sm:$0xff]  ;;  %v877_v31 = vshrl.u32 %v12271_v10, 16  ;;  %s17023_s19 = sshll.u32 %s12908_s28, 8 }
  0x1e   : > { %v865_v11 = vshll.u32 %v12270_v9, 16  ;;  %v869_v12 = vshrl.u32 %v12270_v9, 16  ;;  %v12262_v14 = vld [vmem:[%s12958_s15 + $0x8] sm:$0xff]  ;;  %v794_v17 = vshrl.u32 %v12261_v13, 16  ;;  %v796_v18 = vshll.u32 %v12261_v13, 16  ;;  %v12263_v28 = vld [vmem:[%s12958_s15 + $0x10] sm:$0xff]  ;;  %vm14470_vm13 = vmand %vm4749_vm11, %vm4750_vm12  ;;  %s10215_s14 = scalar_lea.hbm %s17022_s7, %s17023_s19 }
  0x1f   : > { %10401 = vmatmul.msk.bf16.vlgmr.msra.gmra.mxu0 %vm431_vm0, %v12241_v7  ;;  %10410 = vmatmul.msk.bf16.vlgmr.msra.gmra.mxu2 %vm431_vm0, %v12250_v8  ;;  %v875_v19 = vrot.slane %v873_v15, 1  ;;  %v801_v20 = vshll.u32 %v12262_v14, 16  ;;  %v12242_v29 = vld [vmem:[%s12958_s15 + $0x8] sm:$0xff]  ;;  %v12251_v30 = vld [vmem:[%s12958_s15 + $0x50] sm:$0xff]  ;;  %v881_v32 = vshll.u32 %v12272_v26, 16  ;;  %v805_v33 = vshrl.u32 %v12262_v14, 16  ;;  %vm14504_vm11 = vmor %vm4744_vm9, %vm5046_vm14 }
  0x20   : > { %1459 = vmatpush.bf16.msrb.mxu2 %v12300_v3  ;;  %2483 = vmatpush.bf16.msrb.mxu0 %v12340_v6  ;;  %v12971_v16 = vrot.slane %v865_v11, 1  ;;  %v798_v22 = vrot.slane %v796_v18, 1  ;;  %v809_v34 = vshll.u32 %v12263_v28, 16  ;;  %v12273_v41 = vld [vmem:[%s12958_s15 + $0x60] sm:$0xff]  ;;  %v12264_v42 = vld [vmem:[%s12958_s15 + $0x18] sm:$0xff]  ;;  %v12243_v43 = vld [vmem:[%s12958_s15 + $0x10] sm:$0xff] }
  0x21   : > { %1904 = vmatpush.bf16.msrb.mxu3 %v12320_v5  ;;  %v803_v23 = vrot.slane %v801_v20, 1  ;;  %v879_v35 = vor.u32 %v877_v31, %v875_v19  ;;  %v883_v36 = vrot.slane %v881_v32, 1  ;;  %v12252_v44 = vld [vmem:[%s12958_s15 + $0x58] sm:$0xff]  ;;  %v885_v45 = vshrl.u32 %v12272_v26, 16  ;;  %v12274_v56 = vld [vmem:[%s12958_s15 + $0x68] sm:$0xff]  ;;  %v12265_v57 = vld [vmem:[%s12958_s15 + $0x20] sm:$0xff] }
  0x22   : > { %v871_v21 = vor.u32 %v869_v12, %v12971_v16  ;;  %v799_v25 = vor.u32 %v798_v22, %v794_v17  ;;  %v811_v38 = vrot.slane %v809_v34, 1  ;;  %v889_v46 = vshll.u32 %v12273_v41, 16  ;;  %v12244_v58 = vld [vmem:[%s12958_s15 + $0x18] sm:$0xff]  ;;  %v12253_v59 = vld [vmem:[%s12958_s15 + $0x60] sm:$0xff]  ;;  %v12319_v2 = vld [vmem:[%s17016_s1 + $0x30] sm:$0xff]  ;;  %s10216_s17 = sshll.u32 %s14445_s22, 4  ;;  %s10217_s17 = int_to_ptr.vmem [resolvable:$true] %s10216_s17 }
  0x23   : > { %v807_v37 = vor.u32 %v805_v33, %v803_v23  ;;  %v884_v39 = vsel %vm792_vm1, %v879_v35, %v883_v36  ;;  %v813_v47 = vshrl.u32 %v12263_v28, 16  ;;  %v817_v48 = vshll.u32 %v12264_v42, 16  ;;  %v12275_v7 = vld [vmem:[%s12958_s15 + $0x70] sm:$0xff]  ;;  %v12266_v8 = vld [vmem:[%s12958_s15 + $0x28] sm:$0xff]  ;;  %v12245_v9 = vld [vmem:[%s12958_s15 + $0x20] sm:$0xff]  ;;  %s10218_s18 = sshll.u32 %s10215_s14, 4  ;;  %s10219_s18 = int_to_ptr.hbm [resolvable:$true] %s10218_s18 }
  0x24   : > { %v876_v24 = vsel %vm792_vm1, %v871_v21, %v875_v19  ;;  %v804_v27 = vsel %vm792_vm1, %v799_v25, %v803_v23  ;;  %v887_v49 = vor.u32 %v885_v45, %v883_v36  ;;  %v891_v50 = vrot.slane %v889_v46, 1  ;;  %1460 = vmatpush.bf16.msrb.mxu2 %v12299_v55  ;;  %v12254_v10 = vld [vmem:[%s12958_s15 + $0x68] sm:$0xff]  ;;  %v12339_v18 = vld [vmem:[%s17016_s1 + $0x40] sm:$0xff]  ;;  %v12276_v23 = vld [vmem:[%s12958_s15 + $0x78] sm:$0xff] }
  0x25   : > { %10512 = vmatmul.msk.bf16.vlgmr.msra.gmra.mxu3 %vm431_vm0, %v876_v24  ;;  %10503 = vmatmul.msk.bf16.vlgmr.msra.gmra.mxu1 %vm431_vm0, %v804_v27  ;;  %v812_v40 = vsel %vm792_vm1, %v807_v37, %v811_v38  ;;  %v815_v51 = vor.u32 %v813_v47, %v811_v38  ;;  %v819_v52 = vrot.slane %v817_v48, 1  ;;  %v893_v60 = vshrl.u32 %v12273_v41, 16  ;;  %v12267_v24 = vld [vmem:[%s12958_s15 + $0x30] sm:$0xff]  ;;  %v12246_v25 = vld [vmem:[%s12958_s15 + $0x28] sm:$0xff]  ;;  %v12277_v37 = vld [vmem:[%s12958_s15 + $0x80] sm:$0xff] }
  0x26   : > { %v892_v53 = vsel %vm792_vm1, %v887_v49, %v891_v50  ;;  %v897_v61 = vshll.u32 %v12274_v56, 16  ;;  %v821_v62 = vshrl.u32 %v12264_v42, 16  ;;  %v825_v63 = vshll.u32 %v12265_v57, 16  ;;  %1905 = vmatpush.bf16.msrb.mxu3 %v12319_v2  ;;  %2484 = vmatpush.bf16.msrb.mxu0 %v12339_v18  ;;  %v12255_v26 = vld [vmem:[%s12958_s15 + $0x70] sm:$0xff]  ;;  %v12268_v38 = vld [vmem:[%s12958_s15 + $0x38] sm:$0xff] }
  0x27   : > { %v820_v54 = vsel %vm792_vm1, %v815_v51, %v819_v52  ;;  %v895_v0 = vor.u32 %v893_v60, %v891_v50  ;;  %v901_v11 = vshrl.u32 %v12274_v56, 16  ;;  %v905_v12 = vshll.u32 %v12275_v7, 16  ;;  %v12278_v51 = vld [vmem:[%s12958_s15 + $0x88] sm:$0xff] }
  0x28   : > { %v899_v1 = vrot.slane %v897_v61, 1  ;;  %v823_v3 = vor.u32 %v821_v62, %v819_v52  ;;  %v827_v4 = vrot.slane %v825_v63, 1  ;;  %v829_v13 = vshrl.u32 %v12265_v57, 16  ;;  %v12269_v52 = vld [vmem:[%s12958_s15 + $0x40] sm:$0xff]  ;;  %v12380_v61 = vld [vmem:[%s17016_s1 + $0x68] sm:$0xff] }
  0x29   : > { %v833_v14 = vshll.u32 %v12266_v8, 16  ;;  %v907_v17 = vrot.slane %v905_v12, 1  ;;  %v909_v27 = vshrl.u32 %v12275_v7, 16  ;;  %v913_v28 = vshll.u32 %v12276_v23, 16  ;;  %v693_v62 = vld [vmem:[%s12958_s15 + $0x90] sm:$0x1]  ;;  %3374 = vmatpush.bf16.msra.mxu2 %v12380_v61 }
  0x2a   : > { %v900_v5 = vsel %vm792_vm1, %v895_v0, %v899_v1  ;;  %v828_v6 = vsel %vm792_vm1, %v823_v3, %v827_v4  ;;  %v903_v15 = vor.u32 %v901_v11, %v899_v1  ;;  %v831_v19 = vor.u32 %v829_v13, %v827_v4  ;;  %v12249_v7 = vld [vmem:[%s12958_s15 + $0x40] sm:$0xff]  ;;  %v12322_v13 = vld [vmem:[%s12958_s15 + $0x10] sm:$0xff] }
  0x2b   : > { %v835_v20 = vrot.slane %v833_v14, 1  ;;  %v911_v31 = vor.u32 %v909_v27, %v907_v17  ;;  %v915_v32 = vrot.slane %v913_v28, 1  ;;  %v917_v41 = vshrl.u32 %v12276_v23, 16  ;;  %v12359_v61 = vld [vmem:[%s17016_s1 + $0x50] sm:$0xff] }
  0x2c   : > { %v908_v21 = vsel %vm792_vm1, %v903_v15, %v907_v17  ;;  %v921_v42 = vshll.u32 %v12277_v37, 16  ;;  %v925_v55 = vshrl.u32 %v12277_v37, 16  ;;  %v929_v56 = vshll.u32 %v12278_v51, 16  ;;  %v12400_v15 = vld [vmem:[%s17016_s1 + $0x78] sm:$0xff] }
  0x2d   : > { %v836_v22 = vsel %vm792_vm1, %v831_v19, %v835_v20  ;;  %v916_v35 = vsel %vm792_vm1, %v911_v31, %v915_v32  ;;  %v919_v45 = vor.u32 %v917_v41, %v915_v32  ;;  %v853_v57 = vshrl.u32 %v12268_v38, 16  ;;  %3953 = vmatpush.bf16.msra.mxu3 %v12400_v15 }
  0x2e   : > { %v923_v46 = vrot.slane %v921_v42, 1  ;;  %v931_v60 = vrot.slane %v929_v56, 1  ;;  %v772_v2 = vunpack.c.l.b16 %v693_v62  ;;  %v861_v14 = vshrl.u32 %v12269_v52, 16  ;;  %v13114_v62 = vld [vmem:[%s12958_s15 + $0x10] sm:$0xff] }
  0x2f   : > { %10402 = vmatmul.msk.bf16.gmra.mxu0 %vm431_vm0, %v12242_v29  ;;  %10411 = vmatmul.msk.bf16.gmra.mxu2 %vm431_vm0, %v12251_v30  ;;  %v837_v29 = vshrl.u32 %v12266_v8, 16  ;;  %v841_v30 = vshll.u32 %v12267_v24, 16  ;;  %v12258_v8 = vld [vmem:[%s12958_s15 + $0x88] sm:$0xff]  ;;  %v2250_v23 = vshrl.u32 %v12322_v13, 16  ;;  %vm4685_vm9 = vcmask 261124  }
  0x30   : > { %v924_v49 = vsel %vm792_vm1, %v919_v45, %v923_v46  ;;  %v791_v4 = vpack.c.b16 %v772_v2, %v772_v2  ;;  %vm4691_vm12 = vcmask 261126   ;;  %vm4694_vm14 = vcmask 259072  }
  0x31   : > { %v839_v33 = vor.u32 %v837_v29, %v835_v20  ;;  %v843_v34 = vrot.slane %v841_v30, 1  ;;  %v13077_v30 = vld [vmem:[%s12958_s15 + $0x8] sm:$0xff] }
  0x33   : > { %v844_v36 = vsel %vm792_vm1, %v839_v33, %v843_v34  ;;  %v2252_v33 = vrot.slane %v2250_v23, 1 }
  0x35   : > { %10513 = vmatmul.msk.bf16.gmra.mxu3 %vm431_vm0, %v884_v39  ;;  %10504 = vmatmul.msk.bf16.gmra.mxu1 %vm431_vm0, %v812_v40  ;;  %v12247_v39 = vld [vmem:[%s12958_s15 + $0x30] sm:$0xff]  ;;  %v12256_v40 = vld [vmem:[%s12958_s15 + $0x78] sm:$0xff] }
  0x3f   : > { %10403 = vmatmul.msk.bf16.gmra.mxu0 %vm431_vm0, %v12243_v43  ;;  %10412 = vmatmul.msk.bf16.gmra.mxu2 %vm431_vm0, %v12252_v44  ;;  %v845_v43 = vshrl.u32 %v12267_v24, 16  ;;  %v849_v44 = vshll.u32 %v12268_v38, 16  ;;  %v2253_v24 = vshll.u32 %v12322_v13, 16 }
  0x41   : > { %v847_v47 = vor.u32 %v845_v43, %v843_v34  ;;  %v851_v48 = vrot.slane %v849_v44, 1  ;;  %v2255_v34 = vrot.slane %v2253_v24, 2  ;;  %v10629_v43 = vld [vmem:[%s12958_s15 + $0x8] sm:$0xe]  ;;  %v12301_v44 = vld [vmem:[%s12958_s15 + $0x8] sm:$0xf0] }
  0x43   : > { %v852_v50 = vsel %vm792_vm1, %v847_v47, %v851_v48  ;;  %v855_v63 = vor.u32 %v853_v57, %v851_v48  ;;  %v13084_v42 = vor.u32 %v2255_v34, %v2252_v33  ;;  %v12360_v47 = vld [vmem:[%s17016_s1 + $0x58] sm:$0xff]  ;;  %v12420_v57 = vld [vmem:[%s17016_s1 + $0x88] sm:$0xff] }
  0x44   : > { %2929 = vmatpush.bf16.msrb.mxu1 %v12360_v47  ;;  %4399 = vmatpush.bf16.msra.mxu0 %v12420_v57  ;;  %v13167_v57 = vld [vmem:[%s12958_s15 + $0x20] sm:$0xff] }
  0x45   : > { %10514 = vmatmul.msk.bf16.gmra.mxu3 %vm431_vm0, %v892_v53  ;;  %10505 = vmatmul.msk.bf16.gmra.mxu1 %vm431_vm0, %v820_v54  ;;  %v12248_v53 = vld [vmem:[%s12958_s15 + $0x38] sm:$0xff]  ;;  %v12257_v54 = vld [vmem:[%s12958_s15 + $0x80] sm:$0xff] }
  0x48   : > { %2930 = vmatpush.bf16.msrb.mxu1 %v12359_v61  ;;  %v12325_v61 = vld [vmem:[%s12958_s15 + $0x28] sm:$0xff] }
  0x4f   : > { %10404 = vmatmul.msk.bf16.gmra.mxu0 %vm431_vm0, %v12244_v58  ;;  %10413 = vmatmul.msk.bf16.gmra.mxu2 %vm431_vm0, %v12253_v59  ;;  %v857_v58 = vshll.u32 %v12269_v52, 16  ;;  %v927_v59 = vor.u32 %v925_v55, %v923_v46  ;;  %v12323_v55 = vld [vmem:[%s12958_s15 + $0x18] sm:$0xff] }
  0x50   : > { %v2259_v2 = vshrl.u32 %v12323_v55, 16 }
  0x51   : > { %v859_v0 = vrot.slane %v857_v58, 1  ;;  %v932_v1 = vsel %vm792_vm1, %v927_v59, %v931_v60  ;;  %v10833_v58 = vld [vmem:[%s12958_s15 + $0x8] sm:$0xc]  ;;  %v12341_v59 = vld [vmem:[%s12958_s15 + $0x8] sm:$0xf0] }
  0x52   : > { %v2261_v13 = vrot.slane %v2259_v2, 1  ;;  %v1800_v2 = vrot.slane %v13167_v57, 1  ;;  %v13225_v57 = vld [vmem:[%s12958_s15 + $0x30] sm:$0xff] }
  0x53   : > { %v860_v3 = vsel %vm792_vm1, %v855_v63, %v859_v0  ;;  %v10834_v63 = vor.u32 %v12341_v59, %v10833_v58 }
  0x55   : > { %10515 = vmatmul.msk.bf16.gmra.mxu3 %vm431_vm0, %v900_v5  ;;  %10506 = vmatmul.msk.bf16.gmra.mxu1 %vm431_vm0, %v828_v6  ;;  %v10731_v5 = vld [vmem:[%s12958_s15 + $0x8] sm:$0xe]  ;;  %v12321_v6 = vld [vmem:[%s12958_s15 + $0x8] sm:$0xf0] }
  0x56   : > { %v10732_v11 = vor.u32 %v12321_v6, %v10731_v5  ;;  %v2820_v5 = vrot.slane %v10834_v63, 2  ;;  %v2821_v6 = vrot.slane %v13114_v62, 2 }
  0x58   : > { %v2242_v19 = vshrl.u32 %v10732_v11, 16  ;;  %v2245_v20 = vshll.u32 %v10732_v11, 16 }
  0x5a   : > { %v2244_v31 = vrot.slane %v2242_v19, 1  ;;  %v2247_v32 = vrot.slane %v2245_v20, 2 }
  0x5c   : > { %v2248_v41 = vor.u32 %v2247_v32, %v2244_v31  ;;  %v12324_v31 = vld [vmem:[%s12958_s15 + $0x20] sm:$0xff] }
  0x5f   : > { %10405 = vmatmul.msk.bf16.gmra.mxu0 %vm431_vm0, %v12245_v9  ;;  %10414 = vmatmul.msk.bf16.gmra.mxu2 %vm431_vm0, %v12254_v10  ;;  %v933_v9 = vshrl.u32 %v12278_v51, 16  ;;  %v937_v10 = vshll.u32 %v791_v4, 16 }
  0x61   : > { %v935_v17 = vor.u32 %v933_v9, %v931_v60  ;;  %v939_v18 = vrot.slane %v937_v10, 1 }
  0x63   : > { %v940_v27 = vsel %vm792_vm1, %v935_v17, %v939_v18  ;;  %v2822_v18 = vsel %vm2819_vm4, %v2820_v5, %v2821_v6 }
  0x65   : > { %10516 = vmatmul.msk.bf16.gmra.mxu3 %vm431_vm0, %v908_v21  ;;  %10507 = vmatmul.msk.bf16.gmra.mxu1 %vm431_vm0, %v836_v22  ;;  %v10527_v21 = vld [vmem:[%s12958_s15] sm:$0xe]  ;;  %v12281_v22 = vld [vmem:[%s12958_s15] sm:$0xf0] }
  0x66   : > { %v10528_v28 = vor.u32 %v12281_v22, %v10527_v21 }
  0x6f   : > { %10406 = vmatmul.msk.bf16.gmra.mxu0 %vm431_vm0, %v12246_v25  ;;  %10415 = vmatmul.msk.bf16.gmra.mxu2 %vm431_vm0, %v12255_v26  ;;  %v863_v25 = vor.u32 %v861_v14, %v859_v0 }
  0x71   : > { %v868_v37 = vsel %vm792_vm1, %v863_v25, %v12971_v16 }
  0x75   : > { %10517 = vmatmul.msk.bf16.gmra.mxu3 %vm431_vm0, %v916_v35  ;;  %10508 = vmatmul.msk.bf16.gmra.mxu1 %vm431_vm0, %v844_v36 }
  0x7f   : > { %10407 = vmatmul.msk.bf16.gmra.mxu0 %vm431_vm0, %v12247_v39  ;;  %10416 = vmatmul.msk.bf16.gmra.mxu2 %vm431_vm0, %v12256_v40  ;;  %v1350_v39 = vrot.slane %v10528_v28, 1  ;;  %v1351_v40 = vrot.slane %v13077_v30, 1 }
  0x81   : > { %v1352_v52 = vsel %vm1349_vm2, %v1350_v39, %v1351_v40 }
  0x85   : > { %10518 = vmatmul.msk.bf16.gmra.mxu3 %vm431_vm0, %v924_v49  ;;  %10509 = vmatmul.msk.bf16.gmra.mxu1 %vm431_vm0, %v852_v50  ;;  %v13095_v49 = vld [vmem:[%s12958_s15 + $0x10] sm:$0xff]  ;;  %v10630_v50 = vor.u32 %v12301_v44, %v10629_v43 }
  0x87   : > { %v1795_v0 = vrot.slane %v10630_v50, 1 }
  0x8f   : > { %10408 = vmatmul.msk.bf16.gmra.mxu0 %vm431_vm0, %v12248_v53  ;;  %10417 = vmatmul.msk.bf16.gmra.mxu2 %vm431_vm0, %v12257_v54  ;;  %v2257_v53 = vsel %vm2240_vm3, %v2248_v41, %v13084_v42 }
  0x95   : > { %10519 = vmatmul.msk.bf16.gmra.mxu3 %vm431_vm0, %v932_v1  ;;  %10510 = vmatmul.msk.bf16.gmra.mxu1 %vm431_vm0, %v860_v3  ;;  %v1796_v1 = vrot.slane %v13095_v49, 1  ;;  %v2262_v3 = vshll.u32 %v12323_v55, 16 }
  0x97   : > { %v1797_v10 = vsel %vm1349_vm2, %v1795_v0, %v1796_v1  ;;  %v2264_v14 = vrot.slane %v2262_v3, 2  ;;  %v2277_v3 = vshrl.u32 %v12325_v61, 16 }
  0x99   : > { %v2265_v21 = vor.u32 %v2264_v14, %v2261_v13  ;;  %v2279_v13 = vrot.slane %v2277_v3, 1 }
  0x9c   : > { %v495_v12 = vpop.f32.mrf.mxu0 }
  0x9d   : > { %585 = vst.msk [vmem:[#allocation2] sm:$0xff] %vm431_vm0, %v495_v12  ;;  %v13124_v12 = vld [vmem:[%s12958_s15 + $0x10] sm:$0xff] }
  0x9e   : > { %v1353_v20 = vrot.slane %v13124_v12, 1  ;;  %v13185_v12 = vld [vmem:[%s12958_s15 + $0x20] sm:$0xff] }
  0x9f   : > { %10409 = vmatmul.msk.bf16.gmra.mxu0 %vm431_vm0, %v12249_v7  ;;  %10418 = vmatmul.msk.bf16.gmra.mxu2 %vm431_vm0, %v12258_v8 }
  0xa0   : > { %v1354_v28 = vsel %vm1349_vm2, %v1351_v40, %v1353_v20 }
  0xa2   : > { %v540_v26 = vpop.f32.mrf.mxu2  ;;  %v1016_v36 = vpop.f32.mrf.mxu1 }
  0xa3   : > { %603 = vst.msk [vmem:[#allocation2 + $0x90] sm:$0xff] %vm431_vm0, %v540_v26  ;;  %v13135_v26 = vld [vmem:[%s12958_s15 + $0x18] sm:$0xff] }
  0xa4   : > { %v497_v29 = vpop.f32.mrf.mxu0  ;;  %v621_v35 = vld [vmem:[#allocation2] sm:$0xff]  ;;  %v1798_v30 = vrot.slane %v13135_v26, 1  ;;  %v13196_v26 = vld [vmem:[%s12958_s15 + $0x28] sm:$0xff] }
  0xa5   : > { %586 = vst.msk [vmem:[#allocation2 + $0x8] sm:$0xff] %vm431_vm0, %v497_v29  ;;  %10520 = vmatmul.msk.bf16.gmra.mxu3 %vm431_vm0, %v940_v27  ;;  %v1106_v38 = vadd.f32 %v1016_v36, %v621_v35  ;;  %10511 = vmatmul.msk.bf16.gmra.mxu1 %vm431_vm0, %v868_v37  ;;  %v2266_v29 = vsel %vm2240_vm3, %v13084_v42, %v2265_v21  ;;  %v13146_v35 = vld [vmem:[%s12958_s15 + $0x18] sm:$0xff]  ;;  %v2268_v36 = vshrl.u32 %v12324_v31, 16  ;;  %v2271_v37 = vshll.u32 %v12324_v31, 16  ;;  %v12326_v31 = vld [vmem:[%s12958_s15 + $0x30] sm:$0xff] }
  0xa6   : > { %v2823_v39 = vrot.slane %v13146_v35, 2  ;;  %v1799_v43 = vsel %vm1349_vm2, %v1796_v1, %v1798_v30  ;;  %v13175_v1 = vld [vmem:[%s12958_s15 + $0x20] sm:$0xff]  ;;  %v13204_v35 = vld [vmem:[%s12958_s15 + $0x28] sm:$0xff] }
  0xa7   : > { %1142 = vst.msk [vmem:[#allocation2] sm:$0xff] %vm431_vm0, %v1106_v38 }
  0xa8   : > { %v1061_v45 = vpop.f32.mrf.mxu3  ;;  %v2824_v49 = vsel %vm2819_vm4, %v2821_v6, %v2823_v39  ;;  %v2825_v6 = vrot.slane %v13175_v1, 2  ;;  %v13233_v1 = vld [vmem:[%s12958_s15 + $0x30] sm:$0xff] }
  0xaa   : > { %v639_v16 = vld [vmem:[#allocation2 + $0x90] sm:$0xff]  ;;  %v542_v46 = vpop.f32.mrf.mxu2  ;;  %v1018_v56 = vpop.f32.mrf.mxu1 }
  0xab   : > { %v1124_v48 = vadd.f32 %v1061_v45, %v639_v16  ;;  %604 = vst.msk [vmem:[#allocation2 + $0x98] sm:$0xff] %vm431_vm0, %v542_v46  ;;  %v13156_v45 = vld [vmem:[%s12958_s15 + $0x18] sm:$0xff]  ;;  %v2270_v16 = vrot.slane %v2268_v36, 1  ;;  %v2273_v46 = vrot.slane %v2271_v37, 2  ;;  %v2286_v36 = vshrl.u32 %v12326_v31, 16 }
  0xac   : > { %v500_v51 = vpop.f32.mrf.mxu0  ;;  %v622_v54 = vld [vmem:[#allocation2 + $0x8] sm:$0xff]  ;;  %v2289_v37 = vshll.u32 %v12326_v31, 16  ;;  %v12328_v31 = vld [vmem:[%s12958_s15 + $0x40] sm:$0xff] }
  0xad   : > { %1160 = vst.msk [vmem:[#allocation2 + $0x90] sm:$0xff] %vm431_vm0, %v1124_v48  ;;  %v1107_v60 = vadd.f32 %v1018_v56, %v622_v54 }
  0xae   : > { %587 = vst.msk [vmem:[#allocation2 + $0x10] sm:$0xff] %vm431_vm0, %v500_v51  ;;  %v1355_v51 = vrot.slane %v13156_v45, 1  ;;  %v13214_v45 = vld [vmem:[%s12958_s15 + $0x28] sm:$0xff] }
  0xaf   : > { %10605 = vmatmul.msk.bf16.vlgmr.msrb.gmra.mxu2 %vm431_vm0, %v1352_v52  ;;  %10809 = vmatmul.msk.bf16.vlgmr.msrb.gmra.mxu0 %vm431_vm0, %v2257_v53  ;;  %1143 = vst.msk [vmem:[#allocation2 + $0x8] sm:$0xff] %vm431_vm0, %v1107_v60  ;;  %v2274_v52 = vor.u32 %v2273_v46, %v2270_v16  ;;  %v2288_v16 = vrot.slane %v2286_v36, 1  ;;  %v2291_v46 = vrot.slane %v2289_v37, 2  ;;  %v2304_v36 = vshrl.u32 %v12328_v31, 16 }
  0xb0   : > { %v1063_v4 = vpop.f32.mrf.mxu3  ;;  %v1356_v59 = vsel %vm1349_vm2, %v1353_v20, %v1355_v51  ;;  %v1357_v20 = vrot.slane %v13185_v12, 1  ;;  %v13243_v12 = vld [vmem:[%s12958_s15 + $0x30] sm:$0xff]  ;;  %v2307_v37 = vshll.u32 %v12328_v31, 16 }
  0xb1   : > { %v2275_v60 = vsel %vm2240_vm3, %v2265_v21, %v2274_v52  ;;  %v12330_v31 = vld [vmem:[%s12958_s15 + $0x50] sm:$0xff] }
  0xb2   : > { %v640_v7 = vld [vmem:[#allocation2 + $0x98] sm:$0xff]  ;;  %v545_v8 = vpop.f32.mrf.mxu2  ;;  %v1021_v17 = vpop.f32.mrf.mxu1 }
  0xb3   : > { %v1125_v9 = vadd.f32 %v1063_v4, %v640_v7  ;;  %605 = vst.msk [vmem:[#allocation2 + $0xa0] sm:$0xff] %vm431_vm0, %v545_v8  ;;  %v2280_v4 = vshll.u32 %v12325_v61, 16  ;;  %v12327_v61 = vld [vmem:[%s12958_s15 + $0x38] sm:$0xff] }
  0xb4   : > { %v502_v11 = vpop.f32.mrf.mxu0  ;;  %v2295_v3 = vshrl.u32 %v12327_v61, 16 }
  0xb5   : > { %1161 = vst.msk [vmem:[#allocation2 + $0x98] sm:$0xff] %vm431_vm0, %v1125_v9  ;;  %v623_v15 = vld [vmem:[#allocation2 + $0x10] sm:$0xff]  ;;  %10707 = vmatmul.msk.bf16.vlgmr.msrb.gmra.mxu3 %vm431_vm0, %v1797_v10  ;;  %10911 = vmatmul.msk.bf16.vlgmr.msrb.gmra.mxu1 %vm431_vm0, %v2822_v18  ;;  %v1801_v10 = vsel %vm1349_vm2, %v1798_v30, %v1800_v2  ;;  %v2282_v14 = vrot.slane %v2280_v4, 2  ;;  %v2826_v18 = vsel %vm2819_vm4, %v2823_v39, %v2825_v6  ;;  %v1802_v30 = vrot.slane %v13196_v26, 1  ;;  %v13254_v26 = vld [vmem:[%s12958_s15 + $0x38] sm:$0xff] }
  0xb6   : > { %588 = vst.msk [vmem:[#allocation2 + $0x18] sm:$0xff] %vm431_vm0, %v502_v11  ;;  %v1108_v19 = vadd.f32 %v1021_v17, %v623_v15  ;;  %v2827_v39 = vrot.slane %v13204_v35, 2  ;;  %v2298_v4 = vshll.u32 %v12327_v61, 16  ;;  %v13262_v35 = vld [vmem:[%s12958_s15 + $0x38] sm:$0xff]  ;;  %v12329_v61 = vld [vmem:[%s12958_s15 + $0x48] sm:$0xff] }
  0xb7   : > { %v2283_v21 = vor.u32 %v2282_v14, %v2279_v13  ;;  %v2297_v13 = vrot.slane %v2295_v3, 1  ;;  %v2313_v3 = vshrl.u32 %v12329_v61, 16 }
  0xb8   : > { %1144 = vst.msk [vmem:[#allocation2 + $0x10] sm:$0xff] %vm431_vm0, %v1108_v19  ;;  %v1066_v22 = vpop.f32.mrf.mxu3  ;;  %v2300_v14 = vrot.slane %v2298_v4, 2  ;;  %v2316_v4 = vshll.u32 %v12329_v61, 16 }
  0xba   : > { %v641_v23 = vld [vmem:[#allocation2 + $0xa0] sm:$0xff]  ;;  %v547_v24 = vpop.f32.mrf.mxu2  ;;  %v1023_v33 = vpop.f32.mrf.mxu1 }
  0xbb   : > { %v1126_v25 = vadd.f32 %v1066_v22, %v641_v23  ;;  %606 = vst.msk [vmem:[#allocation2 + $0xa8] sm:$0xff] %vm431_vm0, %v547_v24 }
  0xbc   : > { %v505_v27 = vpop.f32.mrf.mxu0 }
  0xbd   : > { %1162 = vst.msk [vmem:[#allocation2 + $0xa0] sm:$0xff] %vm431_vm0, %v1126_v25  ;;  %v624_v32 = vld [vmem:[#allocation2 + $0x18] sm:$0xff] }
  0xbe   : > { %589 = vst.msk [vmem:[#allocation2 + $0x20] sm:$0xff] %vm431_vm0, %v505_v27  ;;  %v1109_v34 = vadd.f32 %v1023_v33, %v624_v32 }
  0xbf   : > { %10606 = vmatmul.msk.bf16.gmra.mxu2 %vm431_vm0, %v1354_v28  ;;  %10810 = vmatmul.msk.bf16.gmra.mxu0 %vm431_vm0, %v2266_v29  ;;  %v1358_v28 = vsel %vm1349_vm2, %v1355_v51, %v1357_v20  ;;  %v2284_v29 = vsel %vm2240_vm3, %v2274_v52, %v2283_v21  ;;  %v1359_v51 = vrot.slane %v13214_v45, 1  ;;  %v2292_v52 = vor.u32 %v2291_v46, %v2288_v16  ;;  %v13272_v45 = vld [vmem:[%s12958_s15 + $0x38] sm:$0xff] }
  0xc0   : > { %1145 = vst.msk [vmem:[#allocation2 + $0x18] sm:$0xff] %vm431_vm0, %v1109_v34  ;;  %v1068_v38 = vpop.f32.mrf.mxu3  ;;  %v2306_v16 = vrot.slane %v2304_v36, 1  ;;  %v2309_v46 = vrot.slane %v2307_v37, 2  ;;  %v2322_v36 = vshrl.u32 %v12330_v31, 16  ;;  %v2325_v37 = vshll.u32 %v12330_v31, 16 }
  0xc2   : > { %v642_v40 = vld [vmem:[#allocation2 + $0xa8] sm:$0xff]  ;;  %v550_v41 = vpop.f32.mrf.mxu2  ;;  %v1026_v48 = vpop.f32.mrf.mxu1 }
  0xc3   : > { %v1127_v42 = vadd.f32 %v1068_v38, %v642_v40  ;;  %607 = vst.msk [vmem:[#allocation2 + $0xb0] sm:$0xff] %vm431_vm0, %v550_v41 }
  0xc4   : > { %v507_v44 = vpop.f32.mrf.mxu0 }
  0xc5   : > { %1163 = vst.msk [vmem:[#allocation2 + $0xa8] sm:$0xff] %vm431_vm0, %v1127_v42  ;;  %v625_v47 = vld [vmem:[#allocation2 + $0x20] sm:$0xff]  ;;  %10708 = vmatmul.msk.bf16.gmra.mxu3 %vm431_vm0, %v1799_v43  ;;  %10912 = vmatmul.msk.bf16.gmra.mxu1 %vm431_vm0, %v2824_v49  ;;  %v1803_v43 = vsel %vm1349_vm2, %v1800_v2, %v1802_v30  ;;  %v2828_v49 = vsel %vm2819_vm4, %v2825_v6, %v2827_v39  ;;  %v1804_v2 = vrot.slane %v13225_v57, 1  ;;  %v2829_v6 = vrot.slane %v13233_v1, 2 }
  0xc6   : > { %590 = vst.msk [vmem:[#allocation2 + $0x28] sm:$0xff] %vm431_vm0, %v507_v44  ;;  %v1110_v50 = vadd.f32 %v1026_v48, %v625_v47  ;;  %v13283_v57 = vld [vmem:[%s12958_s15 + $0x40] sm:$0xff] }
  0xc7   : > { %v1808_v1 = vrot.slane %v13283_v57, 1 }
  0xc8   : > { %1146 = vst.msk [vmem:[#allocation2 + $0x20] sm:$0xff] %vm431_vm0, %v1110_v50  ;;  %v1071_v53 = vpop.f32.mrf.mxu3 }
  0xca   : > { %v643_v54 = vld [vmem:[#allocation2 + $0xb0] sm:$0xff]  ;;  %v552_v55 = vpop.f32.mrf.mxu2  ;;  %v1028_v63 = vpop.f32.mrf.mxu1 }
  0xcb   : > { %v1128_v56 = vadd.f32 %v1071_v53, %v643_v54  ;;  %608 = vst.msk [vmem:[#allocation2 + $0xb8] sm:$0xff] %vm431_vm0, %v552_v55 }
  0xcc   : > { %v510_v58 = vpop.f32.mrf.mxu0 }
  0xcd   : > { %1164 = vst.msk [vmem:[#allocation2 + $0xb0] sm:$0xff] %vm431_vm0, %v1128_v56  ;;  %v626_v62 = vld [vmem:[#allocation2 + $0x28] sm:$0xff] }
  0xce   : > { %591 = vst.msk [vmem:[#allocation2 + $0x30] sm:$0xff] %vm431_vm0, %v510_v58  ;;  %v1111_v0 = vadd.f32 %v1028_v63, %v626_v62 }
  0xcf   : > { %10607 = vmatmul.msk.bf16.gmra.mxu2 %vm431_vm0, %v1356_v59  ;;  %10811 = vmatmul.msk.bf16.gmra.mxu0 %vm431_vm0, %v2275_v60  ;;  %v1360_v59 = vsel %vm1349_vm2, %v1357_v20, %v1359_v51  ;;  %v2293_v60 = vsel %vm2240_vm3, %v2283_v21, %v2292_v52  ;;  %v1361_v20 = vrot.slane %v13243_v12, 1  ;;  %v2301_v21 = vor.u32 %v2300_v14, %v2297_v13  ;;  %v13301_v12 = vld [vmem:[%s12958_s15 + $0x40] sm:$0xff] }
  0xd0   : > { %1147 = vst.msk [vmem:[#allocation2 + $0x28] sm:$0xff] %vm431_vm0, %v1111_v0  ;;  %v1073_v5 = vpop.f32.mrf.mxu3  ;;  %v2315_v13 = vrot.slane %v2313_v3, 1  ;;  %v2318_v14 = vrot.slane %v2316_v4, 2  ;;  %v12399_v3 = vld [vmem:[%s17016_s1 + $0x70] sm:$0xff] }
  0xd1   : > { %v13359_v4 = vld [vmem:[%s12958_s15 + $0x50] sm:$0xff]  ;;  %3954 = vmatpush.bf16.msra.mxu3 %v12399_v3 }
  0xd2   : > { %v644_v7 = vld [vmem:[#allocation2 + $0xb8] sm:$0xff]  ;;  %v555_v8 = vpop.f32.mrf.mxu2  ;;  %v1031_v17 = vpop.f32.mrf.mxu1 }
  0xd3   : > { %v1129_v9 = vadd.f32 %v1073_v5, %v644_v7  ;;  %609 = vst.msk [vmem:[#allocation2 + $0xc0] sm:$0xff] %vm431_vm0, %v555_v8 }
  0xd4   : > { %v512_v11 = vpop.f32.mrf.mxu0 }
  0xd5   : > { %1165 = vst.msk [vmem:[#allocation2 + $0xb8] sm:$0xff] %vm431_vm0, %v1129_v9  ;;  %v627_v15 = vld [vmem:[#allocation2 + $0x30] sm:$0xff]  ;;  %10709 = vmatmul.msk.bf16.gmra.mxu3 %vm431_vm0, %v1801_v10  ;;  %10913 = vmatmul.msk.bf16.gmra.mxu1 %vm431_vm0, %v2826_v18  ;;  %v1805_v10 = vsel %vm1349_vm2, %v1802_v30, %v1804_v2  ;;  %v2830_v18 = vsel %vm2819_vm4, %v2827_v39, %v2829_v6  ;;  %v1806_v30 = vrot.slane %v13254_v26, 1  ;;  %v2831_v39 = vrot.slane %v13262_v35, 2  ;;  %v13312_v26 = vld [vmem:[%s12958_s15 + $0x48] sm:$0xff] }
  0xd6   : > { %592 = vst.msk [vmem:[#allocation2 + $0x38] sm:$0xff] %vm431_vm0, %v512_v11  ;;  %v1112_v19 = vadd.f32 %v1031_v17, %v627_v15  ;;  %v1810_v35 = vrot.slane %v13312_v26, 1 }
  0xd8   : > { %1148 = vst.msk [vmem:[#allocation2 + $0x30] sm:$0xff] %vm431_vm0, %v1112_v19  ;;  %v1076_v22 = vpop.f32.mrf.mxu3 }
  0xda   : > { %v645_v23 = vld [vmem:[#allocation2 + $0xc0] sm:$0xff]  ;;  %v557_v24 = vpop.f32.mrf.mxu2  ;;  %v1033_v33 = vpop.f32.mrf.mxu1 }
  0xdb   : > { %v1130_v25 = vadd.f32 %v1076_v22, %v645_v23  ;;  %610 = vst.msk [vmem:[#allocation2 + $0xc8] sm:$0xff] %vm431_vm0, %v557_v24 }
  0xdc   : > { %v515_v27 = vpop.f32.mrf.mxu0 }
  0xdd   : > { %1166 = vst.msk [vmem:[#allocation2 + $0xc0] sm:$0xff] %vm431_vm0, %v1130_v25  ;;  %v628_v32 = vld [vmem:[#allocation2 + $0x38] sm:$0xff] }
  0xde   : > { %593 = vst.msk [vmem:[#allocation2 + $0x40] sm:$0xff] %vm431_vm0, %v515_v27  ;;  %v1113_v34 = vadd.f32 %v1033_v33, %v628_v32 }
  0xdf   : > { %10608 = vmatmul.msk.bf16.gmra.mxu2 %vm431_vm0, %v1358_v28  ;;  %10812 = vmatmul.msk.bf16.gmra.mxu0 %vm431_vm0, %v2284_v29  ;;  %v1362_v28 = vsel %vm1349_vm2, %v1359_v51, %v1361_v20  ;;  %v2302_v29 = vsel %vm2240_vm3, %v2292_v52, %v2301_v21  ;;  %v1363_v51 = vrot.slane %v13272_v45, 1  ;;  %v2310_v52 = vor.u32 %v2309_v46, %v2306_v16  ;;  %v13333_v16 = vld [vmem:[%s12958_s15 + $0x48] sm:$0xff] }
  0xe0   : > { %1149 = vst.msk [vmem:[#allocation2 + $0x38] sm:$0xff] %vm431_vm0, %v1113_v34  ;;  %v1078_v38 = vpop.f32.mrf.mxu3  ;;  %v2324_v46 = vrot.slane %v2322_v36, 1 }
  0xe2   : > { %v646_v40 = vld [vmem:[#allocation2 + $0xc8] sm:$0xff]  ;;  %v560_v41 = vpop.f32.mrf.mxu2  ;;  %v1036_v48 = vpop.f32.mrf.mxu1 }
  0xe3   : > { %v1131_v42 = vadd.f32 %v1078_v38, %v646_v40  ;;  %611 = vst.msk [vmem:[#allocation2 + $0xd0] sm:$0xff] %vm431_vm0, %v560_v41 }
  0xe4   : > { %v517_v44 = vpop.f32.mrf.mxu0 }
  0xe5   : > { %1167 = vst.msk [vmem:[#allocation2 + $0xc8] sm:$0xff] %vm431_vm0, %v1131_v42  ;;  %v629_v47 = vld [vmem:[#allocation2 + $0x40] sm:$0xff]  ;;  %10710 = vmatmul.msk.bf16.gmra.mxu3 %vm431_vm0, %v1803_v43  ;;  %10914 = vmatmul.msk.bf16.gmra.mxu1 %vm431_vm0, %v2828_v49  ;;  %v1807_v43 = vsel %vm1349_vm2, %v1804_v2, %v1806_v30  ;;  %v2832_v49 = vsel %vm2819_vm4, %v2829_v6, %v2831_v39 }
  0xe6   : > { %594 = vst.msk [vmem:[#allocation2 + $0x48] sm:$0xff] %vm431_vm0, %v517_v44  ;;  %v1114_v50 = vadd.f32 %v1036_v48, %v629_v47  ;;  %v13294_v2 = vld [vmem:[%s12958_s15 + $0x40] sm:$0xff] }
  0xe7   : > { %v2833_v6 = vrot.slane %v13294_v2, 2 }
  0xe8   : > { %1150 = vst.msk [vmem:[#allocation2 + $0x40] sm:$0xff] %vm431_vm0, %v1114_v50  ;;  %v1081_v53 = vpop.f32.mrf.mxu3 }
  0xea   : > { %v647_v54 = vld [vmem:[#allocation2 + $0xd0] sm:$0xff]  ;;  %v562_v55 = vpop.f32.mrf.mxu2  ;;  %v1038_v63 = vpop.f32.mrf.mxu1 }
  0xeb   : > { %v1132_v56 = vadd.f32 %v1081_v53, %v647_v54  ;;  %612 = vst.msk [vmem:[#allocation2 + $0xd8] sm:$0xff] %vm431_vm0, %v562_v55 }
  0xec   : > { %v520_v58 = vpop.f32.mrf.mxu0 }
  0xed   : > { %1168 = vst.msk [vmem:[#allocation2 + $0xd0] sm:$0xff] %vm431_vm0, %v1132_v56  ;;  %v630_v62 = vld [vmem:[#allocation2 + $0x48] sm:$0xff] }
  0xee   : > { %595 = vst.msk [vmem:[#allocation2 + $0x50] sm:$0xff] %vm431_vm0, %v520_v58  ;;  %v1115_v0 = vadd.f32 %v1038_v63, %v630_v62 }
  0xef   : > { %10609 = vmatmul.msk.bf16.gmra.mxu2 %vm431_vm0, %v1360_v59  ;;  %10813 = vmatmul.msk.bf16.gmra.mxu0 %vm431_vm0, %v2293_v60  ;;  %v1364_v59 = vsel %vm1349_vm2, %v1361_v20, %v1363_v51  ;;  %v2311_v60 = vsel %vm2240_vm3, %v2301_v21, %v2310_v52  ;;  %v1365_v20 = vrot.slane %v13301_v12, 1  ;;  %v2319_v21 = vor.u32 %v2318_v14, %v2315_v13 }
  0xf0   : > { %1151 = vst.msk [vmem:[#allocation2 + $0x48] sm:$0xff] %vm431_vm0, %v1115_v0  ;;  %v1083_v5 = vpop.f32.mrf.mxu3 }
  0xf2   : > { %v648_v7 = vld [vmem:[#allocation2 + $0xd8] sm:$0xff]  ;;  %v565_v8 = vpop.f32.mrf.mxu2  ;;  %v1041_v17 = vpop.f32.mrf.mxu1 }
  0xf3   : > { %v1133_v9 = vadd.f32 %v1083_v5, %v648_v7  ;;  %613 = vst.msk [vmem:[#allocation2 + $0xe0] sm:$0xff] %vm431_vm0, %v565_v8 }
  0xf4   : > { %v522_v11 = vpop.f32.mrf.mxu0 }
  0xf5   : > { %1169 = vst.msk [vmem:[#allocation2 + $0xd8] sm:$0xff] %vm431_vm0, %v1133_v9  ;;  %v631_v15 = vld [vmem:[#allocation2 + $0x50] sm:$0xff]  ;;  %10711 = vmatmul.msk.bf16.gmra.mxu3 %vm431_vm0, %v1805_v10  ;;  %10915 = vmatmul.msk.bf16.gmra.mxu1 %vm431_vm0, %v2830_v18  ;;  %v1809_v10 = vsel %vm1349_vm2, %v1806_v30, %v1808_v1  ;;  %v2834_v18 = vsel %vm2819_vm4, %v2831_v39, %v2833_v6  ;;  %v13323_v30 = vld [vmem:[%s12958_s15 + $0x48] sm:$0xff] }
  0xf6   : > { %596 = vst.msk [vmem:[#allocation2 + $0x58] sm:$0xff] %vm431_vm0, %v522_v11  ;;  %v1116_v19 = vadd.f32 %v1041_v17, %v631_v15 }
  0xf8   : > { %1152 = vst.msk [vmem:[#allocation2 + $0x50] sm:$0xff] %vm431_vm0, %v1116_v19  ;;  %v1086_v22 = vpop.f32.mrf.mxu3 }
  0xfa   : > { %v649_v23 = vld [vmem:[#allocation2 + $0xe0] sm:$0xff]  ;;  %v567_v24 = vpop.f32.mrf.mxu2  ;;  %v1043_v33 = vpop.f32.mrf.mxu1 }
  0xfb   : > { %v1134_v25 = vadd.f32 %v1086_v22, %v649_v23  ;;  %614 = vst.msk [vmem:[#allocation2 + $0xe8] sm:$0xff] %vm431_vm0, %v567_v24 }
  0xfc   : > { %v525_v27 = vpop.f32.mrf.mxu0 }
  0xfd   : > { %1170 = vst.msk [vmem:[#allocation2 + $0xe0] sm:$0xff] %vm431_vm0, %v1134_v25  ;;  %v632_v32 = vld [vmem:[#allocation2 + $0x58] sm:$0xff] }
  0xfe   : > { %597 = vst.msk [vmem:[#allocation2 + $0x60] sm:$0xff] %vm431_vm0, %v525_v27  ;;  %v1117_v34 = vadd.f32 %v1043_v33, %v632_v32 }
  0xff   : > { %10610 = vmatmul.msk.bf16.gmra.mxu2 %vm431_vm0, %v1362_v28  ;;  %10814 = vmatmul.msk.bf16.gmra.mxu0 %vm431_vm0, %v2302_v29  ;;  %v1366_v28 = vsel %vm1349_vm2, %v1363_v51, %v1365_v20  ;;  %v2320_v29 = vsel %vm2240_vm3, %v2310_v52, %v2319_v21  ;;  %v1367_v52 = vrot.slane %v13333_v16, 1 }
 0x100   : > { %1153 = vst.msk [vmem:[#allocation2 + $0x58] sm:$0xff] %vm431_vm0, %v1117_v34  ;;  %v1088_v38 = vpop.f32.mrf.mxu3 }
 0x102   : > { %v650_v40 = vld [vmem:[#allocation2 + $0xe8] sm:$0xff]  ;;  %v570_v41 = vpop.f32.mrf.mxu2  ;;  %v1046_v48 = vpop.f32.mrf.mxu1 }
 0x103   : > { %v1135_v42 = vadd.f32 %v1088_v38, %v650_v40  ;;  %615 = vst.msk [vmem:[#allocation2 + $0xf0] sm:$0xff] %vm431_vm0, %v570_v41  ;;  %v12379_v38 = vld [vmem:[%s17016_s1 + $0x60] sm:$0xff]  ;;  %v2835_v40 = vrot.slane %v13323_v30, 2 }
 0x104   : > { %v527_v44 = vpop.f32.mrf.mxu0  ;;  %3375 = vmatpush.bf16.msra.mxu2 %v12379_v38  ;;  %v13395_v38 = vld [vmem:[%s12958_s15 + $0x58] sm:$0xff] }
 0x105   : > { %1171 = vst.msk [vmem:[#allocation2 + $0xe8] sm:$0xff] %vm431_vm0, %v1135_v42  ;;  %v633_v47 = vld [vmem:[#allocation2 + $0x60] sm:$0xff]  ;;  %10712 = vmatmul.msk.bf16.gmra.mxu3 %vm431_vm0, %v1807_v43  ;;  %10916 = vmatmul.msk.bf16.gmra.mxu1 %vm431_vm0, %v2832_v49 }
 0x106   : > { %598 = vst.msk [vmem:[#allocation2 + $0x68] sm:$0xff] %vm431_vm0, %v527_v44  ;;  %v1118_v50 = vadd.f32 %v1046_v48, %v633_v47  ;;  %v1811_v44 = vsel %vm1349_vm2, %v1808_v1, %v1810_v35  ;;  %v2327_v47 = vrot.slane %v2325_v37, 2  ;;  %v12419_v37 = vld [vmem:[%s17016_s1 + $0x80] sm:$0xff] }
 0x107   : > { %4400 = vmatpush.bf16.msra.mxu0 %v12419_v37 }
 0x108   : > { %1154 = vst.msk [vmem:[#allocation2 + $0x60] sm:$0xff] %vm431_vm0, %v1118_v50  ;;  %v1091_v53 = vpop.f32.mrf.mxu3  ;;  %v2836_v50 = vsel %vm2819_vm4, %v2833_v6, %v2835_v40 }
 0x10a   : > { %v651_v54 = vld [vmem:[#allocation2 + $0xf0] sm:$0xff]  ;;  %v572_v55 = vpop.f32.mrf.mxu2  ;;  %v1048_v63 = vpop.f32.mrf.mxu1 }
 0x10b   : > { %v1136_v56 = vadd.f32 %v1091_v53, %v651_v54  ;;  %616 = vst.msk [vmem:[#allocation2 + $0xf8] sm:$0xff] %vm431_vm0, %v572_v55  ;;  %v2328_v53 = vor.u32 %v2327_v47, %v2324_v46 }
 0x10c   : > { %v530_v58 = vpop.f32.mrf.mxu0 }
 0x10d   : > { %1172 = vst.msk [vmem:[#allocation2 + $0xf0] sm:$0xff] %vm431_vm0, %v1136_v56  ;;  %v634_v62 = vld [vmem:[#allocation2 + $0x68] sm:$0xff]  ;;  %v2329_v61 = vsel %vm2240_vm3, %v2319_v21, %v2328_v53 }
 0x10e   : > { %599 = vst.msk [vmem:[#allocation2 + $0x70] sm:$0xff] %vm431_vm0, %v530_v58  ;;  %v1119_v0 = vadd.f32 %v1048_v63, %v634_v62  ;;  %v13344_v58 = vld [vmem:[%s12958_s15 + $0x50] sm:$0xff]  ;;  %v12331_v62 = vld [vmem:[%s12958_s15 + $0x58] sm:$0xff] }
 0x10f   : > { %10611 = vmatmul.msk.bf16.gmra.mxu2 %vm431_vm0, %v1364_v59  ;;  %10815 = vmatmul.msk.bf16.gmra.mxu0 %vm431_vm0, %v2311_v60  ;;  %v1368_v60 = vsel %vm1349_vm2, %v1365_v20, %v1367_v52  ;;  %v1812_v2 = vrot.slane %v13344_v58, 1  ;;  %v2334_v6 = vshll.u32 %v12331_v62, 16 }
 0x110   : > { %1155 = vst.msk [vmem:[#allocation2 + $0x68] sm:$0xff] %vm431_vm0, %v1119_v0  ;;  %v1093_v5 = vpop.f32.mrf.mxu3 }
 0x111   : > { %v1813_v14 = vsel %vm1349_vm2, %v1810_v35, %v1812_v2 }
 0x112   : > { %v652_v7 = vld [vmem:[#allocation2 + $0xf8] sm:$0xff]  ;;  %v575_v8 = vpop.f32.mrf.mxu2  ;;  %v1051_v17 = vpop.f32.mrf.mxu1 }
 0x113   : > { %v1137_v9 = vadd.f32 %v1093_v5, %v652_v7  ;;  %617 = vst.msk [vmem:[#allocation2 + $0x100] sm:$0xff] %vm431_vm0, %v575_v8  ;;  %v2331_v5 = vshrl.u32 %v12331_v62, 16  ;;  %v2837_v8 = vrot.slane %v13359_v4, 2  ;;  %v12333_v4 = vld [vmem:[%s12958_s15 + $0x68] sm:$0xff] }
 0x114   : > { %v532_v11 = vpop.f32.mrf.mxu0 }
 0x115   : > { %1173 = vst.msk [vmem:[#allocation2 + $0xf8] sm:$0xff] %vm431_vm0, %v1137_v9  ;;  %v635_v15 = vld [vmem:[#allocation2 + $0x70] sm:$0xff]  ;;  %10713 = vmatmul.msk.bf16.gmra.mxu3 %vm431_vm0, %v1809_v10  ;;  %10917 = vmatmul.msk.bf16.gmra.mxu1 %vm431_vm0, %v2834_v18  ;;  %v1178_v10 = vld [vmem:[#allocation2] sm:$0xff]  ;;  %v2333_v18 = vrot.slane %v2331_v5, 1  ;;  %v2838_v21 = vsel %vm2819_vm4, %v2835_v40, %v2837_v8 }
 0x116   : > { %600 = vst.msk [vmem:[#allocation2 + $0x78] sm:$0xff] %vm431_vm0, %v532_v11  ;;  %v1120_v19 = vadd.f32 %v1051_v17, %v635_v15  ;;  %v13367_v17 = vld [vmem:[%s12958_s15 + $0x50] sm:$0xff] }
 0x118   : > { %1156 = vst.msk [vmem:[#allocation2 + $0x70] sm:$0xff] %vm431_vm0, %v1120_v19  ;;  %v1096_v22 = vpop.f32.mrf.mxu3  ;;  %v2336_v19 = vrot.slane %v2334_v6, 2 }
 0x11a   : > { %v653_v23 = vld [vmem:[#allocation2 + $0x100] sm:$0xff]  ;;  %v577_v24 = vpop.f32.mrf.mxu2  ;;  %v1053_v33 = vpop.f32.mrf.mxu1 }
 0x11b   : > { %v1138_v25 = vadd.f32 %v1096_v22, %v653_v23  ;;  %618 = vst.msk [vmem:[#allocation2 + $0x108] sm:$0xff] %vm431_vm0, %v577_v24  ;;  %v1369_v22 = vrot.slane %v13367_v17, 1  ;;  %v2337_v23 = vor.u32 %v2336_v19, %v2333_v18  ;;  %v1182_v19 = vld [vmem:[#allocation2 + $0x20] sm:$0xff] }
 0x11c   : > { %v535_v27 = vpop.f32.mrf.mxu0 }
 0x11d   : > { %1174 = vst.msk [vmem:[#allocation2 + $0x100] sm:$0xff] %vm431_vm0, %v1138_v25  ;;  %v636_v32 = vld [vmem:[#allocation2 + $0x78] sm:$0xff]  ;;  %v1179_v25 = vld [vmem:[#allocation2 + $0x8] sm:$0xff]  ;;  %v1370_v31 = vsel %vm1349_vm2, %v1367_v52, %v1369_v22 }
 0x11e   : > { %601 = vst.msk [vmem:[#allocation2 + $0x80] sm:$0xff] %vm431_vm0, %v535_v27  ;;  %v1121_v34 = vadd.f32 %v1053_v33, %v636_v32  ;;  %v2338_v32 = vsel %vm2240_vm3, %v2328_v53, %v2337_v23  ;;  %v12332_v33 = vld [vmem:[%s12958_s15 + $0x60] sm:$0xff] }
 0x11f   : > { %10612 = vmatmul.msk.bf16.gmra.mxu2 %vm431_vm0, %v1366_v28  ;;  %10816 = vmatmul.msk.bf16.gmra.mxu0 %vm431_vm0, %v2320_v29  ;;  %v13378_v28 = vld [vmem:[%s12958_s15 + $0x58] sm:$0xff]  ;;  %v2343_v40 = vshll.u32 %v12332_v33, 16 }
 0x120   : > { %1157 = vst.msk [vmem:[#allocation2 + $0x78] sm:$0xff] %vm431_vm0, %v1121_v34  ;;  %v1098_v39 = vpop.f32.mrf.mxu3  ;;  %v1814_v36 = vrot.slane %v13378_v28, 1 }
 0x122   : > { %v654_v41 = vld [vmem:[#allocation2 + $0x108] sm:$0xff]  ;;  %v580_v42 = vpop.f32.mrf.mxu2  ;;  %v1056_v49 = vpop.f32.mrf.mxu1  ;;  %v1815_v16 = vsel %vm1349_vm2, %v1812_v2, %v1814_v36 }
 0x123   : > { %v1139_v43 = vadd.f32 %v1098_v39, %v654_v41  ;;  %619 = vst.msk [vmem:[#allocation2 + $0x110] sm:$0xff] %vm431_vm0, %v580_v42  ;;  %v2340_v39 = vshrl.u32 %v12332_v33, 16  ;;  %v2839_v42 = vrot.slane %v13395_v38, 2 }
 0x124   : > { %v537_v45 = vpop.f32.mrf.mxu0 }
 0x125   : > { %1175 = vst.msk [vmem:[#allocation2 + $0x108] sm:$0xff] %vm431_vm0, %v1139_v43  ;;  %v637_v48 = vld [vmem:[#allocation2 + $0x80] sm:$0xff]  ;;  %10714 = vmatmul.msk.bf16.gmra.mxu3 %vm431_vm0, %v1811_v44  ;;  %10918 = vmatmul.msk.bf16.gmra.mxu1 %vm431_vm0, %v2836_v50  ;;  %v1180_v43 = vld [vmem:[#allocation2 + $0x10] sm:$0xff]  ;;  %v2345_v50 = vrot.slane %v2343_v40, 2  ;;  %v2840_v53 = vsel %vm2819_vm4, %v2837_v8, %v2839_v42 }
 0x126   : > { %602 = vst.msk [vmem:[#allocation2 + $0x88] sm:$0xff] %vm431_vm0, %v537_v45  ;;  %v1122_v51 = vadd.f32 %v1056_v49, %v637_v48  ;;  %v13405_v48 = vld [vmem:[%s12958_s15 + $0x58] sm:$0xff]  ;;  %v2342_v49 = vrot.slane %v2340_v39, 1  ;;  %v1183_v39 = vld [vmem:[#allocation2 + $0x28] sm:$0xff] }
 0x128   : > { %1158 = vst.msk [vmem:[#allocation2 + $0x80] sm:$0xff] %vm431_vm0, %v1122_v51  ;;  %v1101_v54 = vpop.f32.mrf.mxu3 }
 0x12a   : > { %v655_v55 = vld [vmem:[#allocation2 + $0x110] sm:$0xff]  ;;  %v582_v56 = vpop.f32.mrf.mxu2  ;;  %v1058_v0 = vpop.f32.mrf.mxu1 }
 0x12b   : > { %v1140_v57 = vadd.f32 %v1101_v54, %v655_v55  ;;  %620 = vst.msk [vmem:[#allocation2 + $0x118] sm:$0xff] %vm431_vm0, %v582_v56  ;;  %v12440_v55 = vld [vmem:[%s17018_s3 + $0x8] sm:$0xff]  ;;  %v1371_v56 = vrot.slane %v13405_v48, 1 }
 0x12c   : > { %v13346_v59 = vpop.f32.mrf.mxu0  ;;  %5687 = vmatpush.bf16.msra.mxu1 %v12440_v55 }
 0x12d   : > { %1176 = vst.msk [vmem:[#allocation2 + $0x110] sm:$0xff] %vm431_vm0, %v1140_v57  ;;  %v638_v63 = vld [vmem:[#allocation2 + $0x88] sm:$0xff]  ;;  %v13419_v57 = vor.u32 %v2345_v50, %v2342_v49  ;;  %v1372_v3 = vsel %vm1349_vm2, %v1369_v22, %v1371_v56 }
 0x12e   : > { %v1123_v1 = vadd.f32 %v1058_v0, %v638_v63  ;;  %v13425_v0 = vld [vmem:[%s12958_s15 + $0x60] sm:$0xff] }
 0x12f   : > { %10613 = vmatmul.msk.bf16.gmra.mxu2 %vm431_vm0, %v1368_v60  ;;  %10817 = vmatmul.msk.bf16.gmra.mxu0 %vm431_vm0, %v2329_v61  ;;  %v1181_v61 = vld [vmem:[#allocation2 + $0x18] sm:$0xff]  ;;  %v1816_v8 = vrot.slane %v13425_v0, 1 }
 0x130   : > { %1159 = vst.msk [vmem:[#allocation2 + $0x88] sm:$0xff] %vm431_vm0, %v1123_v1  ;;  %v1103_v7 = vpop.f32.mrf.mxu3 }
 0x132   : > { %v656_v9 = vld [vmem:[#allocation2 + $0x118] sm:$0xff]  ;;  %v1462_v11 = vpop.f32.mrf.mxu2  ;;  %v13370_v20 = vpop.f32.mrf.mxu1 }
 0x133   : > { %v1141_v12 = vadd.f32 %v1103_v7, %v656_v9  ;;  %v1552_v13 = vadd.f32 %v1462_v11, %v1178_v10  ;;  %v13444_v10 = vld [vmem:[%s12958_s15 + $0x60] sm:$0xff]  ;;  %v2349_v11 = vshrl.u32 %v12333_v4, 16 }
 0x134   : > { %v13364_v15 = vpop.f32.mrf.mxu0  ;;  %v2841_v17 = vrot.slane %v13444_v10, 2 }
 0x135   : > { %1177 = vst.msk [vmem:[#allocation2 + $0x118] sm:$0xff] %vm431_vm0, %v1141_v12  ;;  %10715 = vmatmul.msk.bf16.gmra.mxu3 %vm431_vm0, %v1813_v14  ;;  %10919 = vmatmul.msk.bf16.gmra.mxu1 %vm431_vm0, %v2838_v21  ;;  %v2352_v12 = vshll.u32 %v12333_v4, 16 }
 0x136   : > { %1588 = vst.msk [vmem:[#allocation2] sm:$0xff] %vm431_vm0, %v1552_v13  ;;  %v2842_v28 = vsel %vm2819_vm4, %v2839_v42, %v2841_v17 }
 0x138   : > { %v1907_v24 = vpop.f32.mrf.mxu3 }
 0x13a   : > { %v1464_v26 = vpop.f32.mrf.mxu2  ;;  %v13386_v35 = vpop.f32.mrf.mxu1 }
 0x13b   : > { %v1553_v27 = vadd.f32 %v1464_v26, %v1179_v25  ;;  %v13458_v25 = vld [vmem:[%s12958_s15 + $0x60] sm:$0xff]  ;;  %v2351_v26 = vrot.slane %v2349_v11, 1 }
 0x13c   : > { %v13380_v29 = vpop.f32.mrf.mxu0 }
 0x13d   : > { %v1624_v34 = vld [vmem:[#allocation2] sm:$0xff]  ;;  %1589 = vst.msk [vmem:[#allocation2 + $0x8] sm:$0xff] %vm431_vm0, %v1553_v27  ;;  %v2354_v27 = vrot.slane %v2352_v12, 2 }
 0x13e   : > { %v1997_v30 = vadd.f32 %v1907_v24, %v1624_v34 }
 0x13f   : > { %10614 = vmatmul.msk.bf16.gmra.mxu2 %vm431_vm0, %v1370_v31  ;;  %10818 = vmatmul.msk.bf16.gmra.mxu0 %vm431_vm0, %v2338_v32 }
 0x140   : > { %2033 = vst.msk [vmem:[#allocation2] sm:$0xff] %vm431_vm0, %v1997_v30  ;;  %v1909_v41 = vpop.f32.mrf.mxu3  ;;  %v1373_v30 = vrot.slane %v13458_v25, 1 }
 0x142   : > { %v1467_v44 = vpop.f32.mrf.mxu2  ;;  %v13408_v52 = vpop.f32.mrf.mxu1 }
 0x143   : > { %v1554_v45 = vadd.f32 %v1467_v44, %v1180_v43 }
 0x144   : > { %v1625_v46 = vld [vmem:[#allocation2 + $0x8] sm:$0xff]  ;;  %v13402_v47 = vpop.f32.mrf.mxu0 }
 0x145   : > { %v1998_v51 = vadd.f32 %v1909_v41, %v1625_v46  ;;  %1590 = vst.msk [vmem:[#allocation2 + $0x10] sm:$0xff] %vm431_vm0, %v1554_v45  ;;  %10716 = vmatmul.msk.bf16.gmra.mxu3 %vm431_vm0, %v1815_v16  ;;  %10920 = vmatmul.msk.bf16.gmra.mxu1 %vm431_vm0, %v2840_v53  ;;  %v12334_v45 = vld [vmem:[%s12958_s15 + $0x70] sm:$0xff] }
 0x146   : > { %v2361_v55 = vshll.u32 %v12334_v45, 16 }
 0x147   : > { %2034 = vst.msk [vmem:[#allocation2 + $0x8] sm:$0xff] %vm431_vm0, %v1998_v51  ;;  %v2069_v54 = vld [vmem:[#allocation2] sm:$0xff]  ;;  %v13501_v51 = vld [vmem:[%s12958_s15 + $0x68] sm:$0xff] }
 0x148   : > { %v2576_v58 = vadd.f32 %v13346_v59, %v2069_v54  ;;  %v1912_v60 = vpop.f32.mrf.mxu3  ;;  %v2347_v59 = vsel %vm2240_vm3, %v2337_v23, %v13419_v57  ;;  %v2358_v54 = vshrl.u32 %v12334_v45, 16 }
 0x14a   : > { %v1469_v62 = vpop.f32.mrf.mxu2  ;;  %2612 = vst.msk [vmem:[#allocation2] sm:$0xff] %vm431_vm0, %v2576_v58  ;;  %v13436_v6 = vpop.f32.mrf.mxu1  ;;  %v2843_v58 = vrot.slane %v13501_v51, 2 }
 0x14b   : > { %v1555_v63 = vadd.f32 %v1469_v62, %v1181_v61 }
 0x14c   : > { %v1626_v1 = vld [vmem:[#allocation2 + $0x10] sm:$0xff]  ;;  %v13427_v2 = vpop.f32.mrf.mxu0  ;;  %v2844_v0 = vsel %vm2819_vm4, %v2841_v17, %v2843_v58 }
 0x14d   : > { %v1999_v5 = vadd.f32 %v1912_v60, %v1626_v1  ;;  %1591 = vst.msk [vmem:[#allocation2 + $0x18] sm:$0xff] %vm431_vm0, %v1555_v63  ;;  %v1184_v60 = vld [vmem:[#allocation2 + $0x30] sm:$0xff] }
 0x14e   : > { %v2070_v7 = vld [vmem:[#allocation2 + $0x8] sm:$0xff] }
 0x14f   : > { %2035 = vst.msk [vmem:[#allocation2 + $0x10] sm:$0xff] %vm431_vm0, %v1999_v5  ;;  %10615 = vmatmul.msk.bf16.gmra.mxu2 %vm431_vm0, %v1372_v3  ;;  %10819 = vmatmul.msk.bf16.gmra.mxu0 %vm431_vm0, %v2347_v59  ;;  %v2577_v9 = vadd.f32 %v13364_v15, %v2070_v7  ;;  %v1817_v15 = vsel %vm1349_vm2, %v1814_v36, %v1816_v8  ;;  %v2360_v3 = vrot.slane %v2358_v54, 1  ;;  %v2363_v59 = vrot.slane %v2361_v55, 2 }
 0x150   : > { %v1914_v14 = vpop.f32.mrf.mxu3  ;;  %v13472_v36 = vor.u32 %v2354_v27, %v2351_v26 }
 0x151   : > { %v2648_v13 = vld [vmem:[#allocation2] sm:$0xff]  ;;  %2613 = vst.msk [vmem:[#allocation2 + $0x8] sm:$0xff] %vm431_vm0, %v2577_v9  ;;  %v13529_v12 = vor.u32 %v2363_v59, %v2360_v3 }
 0x152   : > { %v3022_v18 = vadd.f32 %v13370_v20, %v2648_v13  ;;  %v1472_v21 = vpop.f32.mrf.mxu2  ;;  %v13461_v20 = vpop.f32.mrf.mxu1  ;;  %v2356_v44 = vsel %vm2240_vm3, %v13419_v57, %v13472_v36 }
 0x153   : > { %v1556_v22 = vadd.f32 %v1472_v21, %v1182_v19 }
 0x154   : > { %3058 = vst.msk [vmem:[#allocation2] sm:$0xff] %vm431_vm0, %v3022_v18  ;;  %v1627_v23 = vld [vmem:[#allocation2 + $0x18] sm:$0xff]  ;;  %v13455_v24 = vpop.f32.mrf.mxu0 }
 0x155   : > { %v2000_v31 = vadd.f32 %v1914_v14, %v1627_v23  ;;  %1592 = vst.msk [vmem:[#allocation2 + $0x20] sm:$0xff] %vm431_vm0, %v1556_v22  ;;  %10717 = vmatmul.msk.bf16.gmra.mxu3 %vm431_vm0, %v1817_v15  ;;  %10921 = vmatmul.msk.bf16.gmra.mxu1 %vm431_vm0, %v2842_v28  ;;  %v1185_v14 = vld [vmem:[#allocation2 + $0x38] sm:$0xff]  ;;  %v2365_v22 = vsel %vm2240_vm3, %v13472_v36, %v13529_v12  ;;  %v13558_v28 = vld [vmem:[%s12958_s15 + $0x70] sm:$0xff] }
 0x156   : > { %v2071_v32 = vld [vmem:[#allocation2 + $0x10] sm:$0xff]  ;;  %v12335_v15 = vld [vmem:[%s12958_s15 + $0x78] sm:$0xff] }
 0x157   : > { %2036 = vst.msk [vmem:[#allocation2 + $0x18] sm:$0xff] %vm431_vm0, %v2000_v31  ;;  %v2578_v33 = vadd.f32 %v13380_v29, %v2071_v32  ;;  %v13479_v29 = vld [vmem:[%s12958_s15 + $0x68] sm:$0xff] }
 0x158   : > { %v2649_v34 = vld [vmem:[#allocation2 + $0x8] sm:$0xff]  ;;  %v1917_v38 = vpop.f32.mrf.mxu3  ;;  %v1818_v48 = vrot.slane %v13479_v29, 1 }
 0x159   : > { %v3023_v37 = vadd.f32 %v13386_v35, %v2649_v34  ;;  %2614 = vst.msk [vmem:[#allocation2 + $0x10] sm:$0xff] %vm431_vm0, %v2578_v33  ;;  %v1374_v35 = vsel %vm1349_vm2, %v1371_v56, %v1373_v30  ;;  %v2367_v33 = vshrl.u32 %v12335_v15, 16  ;;  %v2370_v34 = vshll.u32 %v12335_v15, 16 }
 0x15a   : > { %v1474_v40 = vpop.f32.mrf.mxu2  ;;  %v13493_v46 = vpop.f32.mrf.mxu1 }
 0x15b   : > { %3059 = vst.msk [vmem:[#allocation2 + $0x8] sm:$0xff] %vm431_vm0, %v3023_v37  ;;  %v1557_v41 = vadd.f32 %v1474_v40, %v1183_v39  ;;  %v2845_v37 = vrot.slane %v13558_v28, 2 }
 0x15c   : > { %v1628_v42 = vld [vmem:[#allocation2 + $0x20] sm:$0xff]  ;;  %v13481_v43 = vpop.f32.mrf.mxu0 }
 0x15d   : > { %v2001_v16 = vadd.f32 %v1917_v38, %v1628_v42  ;;  %1593 = vst.msk [vmem:[#allocation2 + $0x28] sm:$0xff] %vm431_vm0, %v1557_v41  ;;  %v1186_v38 = vld [vmem:[#allocation2 + $0x40] sm:$0xff]  ;;  %v2846_v29 = vsel %vm2819_vm4, %v2843_v58, %v2845_v37 }
 0x15e   : > { %v2072_v49 = vld [vmem:[#allocation2 + $0x18] sm:$0xff] }
 0x15f   : > { %2037 = vst.msk [vmem:[#allocation2 + $0x20] sm:$0xff] %vm431_vm0, %v2001_v16  ;;  %10616 = vmatmul.msk.bf16.gmra.mxu2 %vm431_vm0, %v1374_v35  ;;  %10820 = vmatmul.msk.bf16.gmra.mxu0 %vm431_vm0, %v2356_v44  ;;  %v2579_v50 = vadd.f32 %v13402_v47, %v2072_v49  ;;  %v1819_v47 = vsel %vm1349_vm2, %v1816_v8, %v1818_v48  ;;  %v2369_v35 = vrot.slane %v2367_v33, 1  ;;  %v2372_v44 = vrot.slane %v2370_v34, 2 }
 0x160   : > { %v2650_v53 = vld [vmem:[#allocation2 + $0x10] sm:$0xff]  ;;  %v1919_v57 = vpop.f32.mrf.mxu3 }
 0x161   : > { %v3024_v56 = vadd.f32 %v13408_v52, %v2650_v53  ;;  %2615 = vst.msk [vmem:[#allocation2 + $0x18] sm:$0xff] %vm431_vm0, %v2579_v50  ;;  %v13515_v52 = vld [vmem:[%s12958_s15 + $0x68] sm:$0xff]  ;;  %v13586_v54 = vor.u32 %v2372_v44, %v2369_v35 }
 0x162   : > { %v1477_v61 = vpop.f32.mrf.mxu2  ;;  %v13518_v5 = vpop.f32.mrf.mxu1  ;;  %v1375_v11 = vrot.slane %v13515_v52, 1  ;;  %v12337_v35 = vld [vmem:[%s12958_s15 + $0x88] sm:$0xff] }
 0x163   : > { %3060 = vst.msk [vmem:[#allocation2 + $0x10] sm:$0xff] %vm431_vm0, %v3024_v56  ;;  %v1558_v62 = vadd.f32 %v1477_v61, %v1184_v60  ;;  %v1187_v56 = vld [vmem:[#allocation2 + $0x48] sm:$0xff] }
 0x164   : > { %v1629_v63 = vld [vmem:[#allocation2 + $0x28] sm:$0xff]  ;;  %v13512_v1 = vpop.f32.mrf.mxu0 }
 0x165   : > { %v2002_v4 = vadd.f32 %v1919_v57, %v1629_v63  ;;  %1594 = vst.msk [vmem:[#allocation2 + $0x30] sm:$0xff] %vm431_vm0, %v1558_v62  ;;  %10718 = vmatmul.msk.bf16.gmra.mxu3 %vm431_vm0, %v1819_v47  ;;  %10922 = vmatmul.msk.bf16.gmra.mxu1 %vm431_vm0, %v2844_v0  ;;  %v2374_v62 = vsel %vm2240_vm3, %v13529_v12, %v13586_v54  ;;  %v12336_v47 = vld [vmem:[%s12958_s15 + $0x80] sm:$0xff]  ;;  %v13615_v0 = vld [vmem:[%s12958_s15 + $0x78] sm:$0xff] }
 0x166   : > { %v2073_v7 = vld [vmem:[#allocation2 + $0x20] sm:$0xff] }
 0x167   : > { %2038 = vst.msk [vmem:[#allocation2 + $0x28] sm:$0xff] %vm431_vm0, %v2002_v4  ;;  %v2580_v8 = vadd.f32 %v13427_v2, %v2073_v7  ;;  %v13536_v2 = vld [vmem:[%s12958_s15 + $0x70] sm:$0xff] }
 0x168   : > { %v2651_v9 = vld [vmem:[#allocation2 + $0x18] sm:$0xff]  ;;  %v1922_v13 = vpop.f32.mrf.mxu3  ;;  %v1820_v25 = vrot.slane %v13536_v2, 1 }
 0x169   : > { %v3025_v10 = vadd.f32 %v13436_v6, %v2651_v9  ;;  %2616 = vst.msk [vmem:[#allocation2 + $0x20] sm:$0xff] %vm431_vm0, %v2580_v8  ;;  %v1376_v6 = vsel %vm1349_vm2, %v1373_v30, %v1375_v11  ;;  %v2376_v8 = vshrl.u32 %v12336_v47, 16  ;;  %v2379_v9 = vshll.u32 %v12336_v47, 16  ;;  %v13696_v47 = vld [vmem:[%s12958_s15 + $0x80] sm:$0xff] }
 0x16a   : > { %v1479_v17 = vpop.f32.mrf.mxu2  ;;  %v13550_v26 = vpop.f32.mrf.mxu1 }
 0x16b   : > { %3061 = vst.msk [vmem:[#allocation2 + $0x18] sm:$0xff] %vm431_vm0, %v3025_v10  ;;  %v1559_v18 = vadd.f32 %v1479_v17, %v1185_v14  ;;  %v2847_v10 = vrot.slane %v13615_v0, 2 }
 0x16c   : > { %v1630_v19 = vld [vmem:[#allocation2 + $0x30] sm:$0xff]  ;;  %v13538_v21 = vpop.f32.mrf.mxu0 }
 0x16d   : > { %v2003_v23 = vadd.f32 %v1922_v13, %v1630_v19  ;;  %1595 = vst.msk [vmem:[#allocation2 + $0x38] sm:$0xff] %vm431_vm0, %v1559_v18  ;;  %v1188_v13 = vld [vmem:[#allocation2 + $0x50] sm:$0xff]  ;;  %v2848_v2 = vsel %vm2819_vm4, %v2845_v37, %v2847_v10  ;;  %v12844_v37 = vmov 0  }
 0x16e   : > { %v2074_v27 = vld [vmem:[#allocation2 + $0x28] sm:$0xff]  ;;  %12740 = vset.pattern.permute.xlu0 %v12844_v37  ;;  %12741 = vset.pattern.permute.xlu1 %v12844_v37  ;;  %4741 = vst.msk [vmem:[#allocation3] sm:$0xf] %vm4688_vm5, %v12844_v37 }
 0x16f   : > { %2039 = vst.msk [vmem:[#allocation2 + $0x30] sm:$0xff] %vm431_vm0, %v2003_v23  ;;  %10617 = vmatmul.msk.bf16.gmra.mxu2 %vm431_vm0, %v1376_v6  ;;  %10821 = vmatmul.msk.bf16.gmra.mxu0 %vm431_vm0, %v2365_v22  ;;  %v2581_v31 = vadd.f32 %v13455_v24, %v2074_v27  ;;  %v1821_v24 = vsel %vm1349_vm2, %v1818_v48, %v1820_v25  ;;  %v2378_v6 = vrot.slane %v2376_v8, 1  ;;  %v2381_v22 = vrot.slane %v2379_v9, 2 }
 0x170   : > { %v2652_v32 = vld [vmem:[#allocation2 + $0x20] sm:$0xff]  ;;  %v1924_v36 = vpop.f32.mrf.mxu3  ;;  %12742 = vset.pattern.permute.xlu2 %v12844_v37  ;;  %4742 = vst.msk [vmem:[#allocation3 + $0x4] sm:$0xf] %vm4688_vm5, %v12844_v37 }
 0x171   : > { %v3026_v30 = vadd.f32 %v13461_v20, %v2652_v32  ;;  %2617 = vst.msk [vmem:[#allocation2 + $0x28] sm:$0xff] %vm431_vm0, %v2581_v31  ;;  %v13572_v20 = vld [vmem:[%s12958_s15 + $0x70] sm:$0xff]  ;;  %v13643_v33 = vor.u32 %v2381_v22, %v2378_v6 }
 0x172   : > { %v1482_v39 = vpop.f32.mrf.mxu2  ;;  %v13575_v16 = vpop.f32.mrf.mxu1  ;;  %v1377_v53 = vrot.slane %v13572_v20, 1  ;;  %4755 = vst.msk [vmem:[#allocation3 + $0x9c] sm:$0xf] %vm4688_vm5, %v12844_v37 }
 0x173   : > { %3062 = vst.msk [vmem:[#allocation2 + $0x20] sm:$0xff] %vm431_vm0, %v3026_v30  ;;  %v1560_v40 = vadd.f32 %v1482_v39, %v1186_v38  ;;  %v1189_v30 = vld [vmem:[#allocation2 + $0x58] sm:$0xff]  ;;  %v13653_v39 = vld [vmem:[%s12958_s15 + $0x80] sm:$0xff] }
 0x174   : > { %v1631_v41 = vld [vmem:[#allocation2 + $0x38] sm:$0xff]  ;;  %v13569_v42 = vpop.f32.mrf.mxu0  ;;  %v1824_v20 = vrot.slane %v13653_v39, 1  ;;  %4756 = vst.msk [vmem:[#allocation3 + $0xa0] sm:$0xf] %vm4688_vm5, %v12844_v37 }
 0x175   : > { %v2004_v45 = vadd.f32 %v1924_v36, %v1631_v41  ;;  %1596 = vst.msk [vmem:[#allocation2 + $0x40] sm:$0xff] %vm431_vm0, %v1560_v40  ;;  %10719 = vmatmul.msk.bf16.gmra.mxu3 %vm431_vm0, %v1821_v24  ;;  %10923 = vmatmul.msk.bf16.gmra.mxu1 %vm431_vm0, %v2846_v29  ;;  %v2383_v41 = vsel %vm2240_vm3, %v13586_v54, %v13643_v33  ;;  %v2388_v54 = vshll.u32 %v12337_v35, 16 }
 0x176   : > { %v2075_v49 = vld [vmem:[#allocation2 + $0x30] sm:$0xff] }
 0x177   : > { %2040 = vst.msk [vmem:[#allocation2 + $0x38] sm:$0xff] %vm431_vm0, %v2004_v45  ;;  %v2582_v48 = vadd.f32 %v13481_v43, %v2075_v49  ;;  %v13593_v43 = vld [vmem:[%s12958_s15 + $0x78] sm:$0xff] }
 0x178   : > { %v2653_v50 = vld [vmem:[#allocation2 + $0x28] sm:$0xff]  ;;  %v1927_v55 = vpop.f32.mrf.mxu3  ;;  %v1822_v52 = vrot.slane %v13593_v43, 1 }
 0x179   : > { %v3027_v51 = vadd.f32 %v13493_v46, %v2653_v50  ;;  %2618 = vst.msk [vmem:[#allocation2 + $0x30] sm:$0xff] %vm431_vm0, %v2582_v48  ;;  %v1378_v46 = vsel %vm1349_vm2, %v1375_v11, %v1377_v53  ;;  %v13677_v48 = vld [vmem:[%s12958_s15 + $0x80] sm:$0xff] }
 0x17a   : > { %v1484_v57 = vpop.f32.mrf.mxu2  ;;  %v13607_v3 = vpop.f32.mrf.mxu1 }
 0x17b   : > { %3063 = vst.msk [vmem:[#allocation2 + $0x28] sm:$0xff] %vm431_vm0, %v3027_v51  ;;  %v1561_v58 = vadd.f32 %v1484_v57, %v1187_v56  ;;  %v2849_v56 = vrot.slane %v13677_v48, 2  ;;  %v1190_v57 = vld [vmem:[#allocation2 + $0x60] sm:$0xff] }
 0x17c   : > { %v1632_v60 = vld [vmem:[#allocation2 + $0x40] sm:$0xff]  ;;  %v13595_v61 = vpop.f32.mrf.mxu0 }
 0x17d   : > { %v2005_v63 = vadd.f32 %v1927_v55, %v1632_v60  ;;  %1597 = vst.msk [vmem:[#allocation2 + $0x48] sm:$0xff] %vm431_vm0, %v1561_v58  ;;  %v2850_v43 = vsel %vm2819_vm4, %v2847_v10, %v2849_v56  ;;  %v1191_v10 = vld [vmem:[#allocation2 + $0x68] sm:$0xff] }
 0x17e   : > { %v2076_v59 = vld [vmem:[#allocation2 + $0x38] sm:$0xff] }
 0x17f   : > { %2041 = vst.msk [vmem:[#allocation2 + $0x40] sm:$0xff] %vm431_vm0, %v2005_v63  ;;  %10618 = vmatmul.msk.bf16.gmra.mxu2 %vm431_vm0, %v1378_v46  ;;  %10822 = vmatmul.msk.bf16.gmra.mxu0 %vm431_vm0, %v2374_v62  ;;  %v2583_v4 = vadd.f32 %v13512_v1, %v2076_v59  ;;  %v1823_v1 = vsel %vm1349_vm2, %v1820_v25, %v1822_v52  ;;  %v2390_v59 = vrot.slane %v2388_v54, 2  ;;  %v2141_v54 = vld [vmem:[%s12958_s15 + $0x98] sm:$0x3] }
 0x180   : > { %v2654_v7 = vld [vmem:[#allocation2 + $0x30] sm:$0xff]  ;;  %v1929_v12 = vpop.f32.mrf.mxu3 }
 0x181   : > { %v3028_v11 = vadd.f32 %v13518_v5, %v2654_v7  ;;  %2619 = vst.msk [vmem:[#allocation2 + $0x38] sm:$0xff] %vm431_vm0, %v2583_v4  ;;  %v13629_v5 = vld [vmem:[%s12958_s15 + $0x78] sm:$0xff] }
 0x182   : > { %v1487_v14 = vpop.f32.mrf.mxu2  ;;  %v13632_v23 = vpop.f32.mrf.mxu1  ;;  %v1379_v32 = vrot.slane %v13629_v5, 1 }
 0x183   : > { %3064 = vst.msk [vmem:[#allocation2 + $0x30] sm:$0xff] %vm431_vm0, %v3028_v11  ;;  %v1562_v17 = vadd.f32 %v1487_v14, %v1188_v13  ;;  %v1381_v11 = vrot.slane %v13696_v47, 1 }
 0x184   : > { %v1633_v18 = vld [vmem:[#allocation2 + $0x48] sm:$0xff]  ;;  %v13626_v19 = vpop.f32.mrf.mxu0  ;;  %v1380_v24 = vsel %vm1349_vm2, %v1377_v53, %v1379_v32  ;;  %v2385_v53 = vshrl.u32 %v12337_v35, 16 }
 0x185   : > { %v2006_v15 = vadd.f32 %v1929_v12, %v1633_v18  ;;  %1598 = vst.msk [vmem:[#allocation2 + $0x50] sm:$0xff] %vm431_vm0, %v1562_v17  ;;  %10720 = vmatmul.msk.bf16.gmra.mxu3 %vm431_vm0, %v1823_v1  ;;  %10924 = vmatmul.msk.bf16.gmra.mxu1 %vm431_vm0, %v2848_v2  ;;  %v4760_v17 = vld [vmem:[%s17020_s5 + $0x10] sm:$0xff]  ;;  %v13723_v18 = vld [vmem:[%s12958_s15 + $0x88] sm:$0xff]  ;;  %v1382_v22 = vsel %vm1349_vm2, %v1379_v32, %v1381_v11 }
 0x186   : > { %v2077_v27 = vld [vmem:[#allocation2 + $0x40] sm:$0xff]  ;;  %v2387_v63 = vrot.slane %v2385_v53, 1  ;;  %4806 = vperm.xlu1 %12741, %v4760_v17   ;;  %v12338_v2 = vld [vmem:[%s12958_s15 + $0x90] sm:$0xff]  ;;  %v1826_v5 = vrot.slane %v13723_v18, 1 }
 0x187   : > { %2042 = vst.msk [vmem:[#allocation2 + $0x48] sm:$0xff] %vm431_vm0, %v2006_v15  ;;  %v2584_v25 = vadd.f32 %v13538_v21, %v2077_v27  ;;  %v4758_v21 = vld [vmem:[%s17020_s5] sm:$0xff]  ;;  %v13815_v17 = vld [vmem:[%s12958_s15 + $0x90] sm:$0xff] }
 0x188   : > { %v2655_v31 = vld [vmem:[#allocation2 + $0x38] sm:$0xff]  ;;  %v1932_v28 = vpop.f32.mrf.mxu3  ;;  %4796 = vperm.xlu0 %12740, %v4758_v21   ;;  %v13710_v12 = vor.u32 %v2390_v59, %v2387_v63  ;;  %v4770_v63 = vld [vmem:[%s17020_s5 + $0x60] sm:$0xff] }
 0x189   : > { %v3029_v34 = vadd.f32 %v13550_v26, %v2655_v31  ;;  %2620 = vst.msk [vmem:[#allocation2 + $0x40] sm:$0xff] %vm431_vm0, %v2584_v25 }
 0x18a   : > { %v1489_v36 = vpop.f32.mrf.mxu2  ;;  %v13668_v45 = vpop.f32.mrf.mxu1  ;;  %v2392_v15 = vsel %vm2240_vm3, %v13643_v33, %v13710_v12 }
 0x18b   : > { %3065 = vst.msk [vmem:[#allocation2 + $0x38] sm:$0xff] %vm431_vm0, %v3029_v34  ;;  %v1563_v38 = vadd.f32 %v1489_v36, %v1189_v30  ;;  %v13745_v34 = vld [vmem:[%s12958_s15 + $0x88] sm:$0xff]  ;;  %v2397_v30 = vshll.u32 %v12338_v2, 16 }
 0x18c   : > { %v1634_v26 = vld [vmem:[#allocation2 + $0x50] sm:$0xff]  ;;  %v13655_v40 = vpop.f32.mrf.mxu0  ;;  %v2851_v21 = vrot.slane %v13745_v34, 2  ;;  %v1195_v34 = vld [vmem:[#allocation2 + $0x88] sm:$0xff] }
 0x18d   : > { %v2007_v44 = vadd.f32 %v1932_v28, %v1634_v26  ;;  %1599 = vst.msk [vmem:[#allocation2 + $0x58] sm:$0xff] %vm431_vm0, %v1563_v38  ;;  %v2394_v28 = vshrl.u32 %v12338_v2, 16  ;;  %v1192_v38 = vld [vmem:[#allocation2 + $0x70] sm:$0xff]  ;;  %v2853_v2 = vrot.slane %v13815_v17, 2 }
 0x18e   : > { %v2078_v29 = vld [vmem:[#allocation2 + $0x48] sm:$0xff]  ;;  %v2852_v39 = vsel %vm2819_vm4, %v2849_v56, %v2851_v21  ;;  %v1193_v56 = vld [vmem:[#allocation2 + $0x78] sm:$0xff] }
 0x18f   : > { %2043 = vst.msk [vmem:[#allocation2 + $0x50] sm:$0xff] %vm431_vm0, %v2007_v44  ;;  %10619 = vmatmul.msk.bf16.gmra.mxu2 %vm431_vm0, %v1380_v24  ;;  %10823 = vmatmul.msk.bf16.gmra.mxu0 %vm431_vm0, %v2383_v41  ;;  %v2585_v49 = vadd.f32 %v13569_v42, %v2078_v29  ;;  %v4759_v42 = vld [vmem:[%s17020_s5 + $0x8] sm:$0xff]  ;;  %v2854_v18 = vsel %vm2819_vm4, %v2851_v21, %v2853_v2 }
 0x190   : > { %v2656_v50 = vld [vmem:[#allocation2 + $0x40] sm:$0xff]  ;;  %v1934_v55 = vpop.f32.mrf.mxu3  ;;  %4801 = vperm.xlu0 %12740, %v4759_v42   ;;  %v4767_v24 = vld [vmem:[%s17020_s5 + $0x48] sm:$0xff] }
 0x191   : > { %v3030_v51 = vadd.f32 %v13575_v16, %v2656_v50  ;;  %2621 = vst.msk [vmem:[#allocation2 + $0x48] sm:$0xff] %vm431_vm0, %v2585_v49  ;;  %v1825_v16 = vsel %vm1349_vm2, %v1822_v52, %v1824_v20  ;;  %v13765_v29 = vld [vmem:[%s12958_s15 + $0x88] sm:$0xff]  ;;  %v2396_v49 = vrot.slane %v2394_v28, 1  ;;  %v2399_v50 = vrot.slane %v2397_v30, 2 }
 0x192   : > { %v1492_v58 = vpop.f32.mrf.mxu2  ;;  %v13699_v7 = vpop.f32.mrf.mxu1 }
 0x193   : > { %3066 = vst.msk [vmem:[#allocation2 + $0x40] sm:$0xff] %vm431_vm0, %v3030_v51  ;;  %v1564_v60 = vadd.f32 %v1492_v58, %v1190_v57  ;;  %v1383_v58 = vrot.slane %v13765_v29, 1  ;;  %v13780_v42 = vor.u32 %v2399_v50, %v2396_v49 }
 0x194   : > { %v1635_v46 = vld [vmem:[#allocation2 + $0x58] sm:$0xff]  ;;  %v13693_v62 = vpop.f32.mrf.mxu0 }
 0x195   : > { %v2008_v4 = vadd.f32 %v1934_v55, %v1635_v46  ;;  %1600 = vst.msk [vmem:[#allocation2 + $0x60] sm:$0xff] %vm431_vm0, %v1564_v60  ;;  %10721 = vmatmul.msk.bf16.gmra.mxu3 %vm431_vm0, %v1825_v16  ;;  %10925 = vmatmul.msk.bf16.gmra.mxu1 %vm431_vm0, %v2850_v43  ;;  %v2220_v60 = vunpack.c.l.b16 %v2141_v54 }
 0x196   : > { %v2079_v52 = vld [vmem:[#allocation2 + $0x50] sm:$0xff] }
 0x197   : > { %2044 = vst.msk [vmem:[#allocation2 + $0x58] sm:$0xff] %vm431_vm0, %v2008_v4  ;;  %v2586_v8 = vadd.f32 %v13595_v61, %v2079_v52  ;;  %v4764_v61 = vld [vmem:[%s17020_s5 + $0x30] sm:$0xff]  ;;  %v1384_v52 = vsel %vm1349_vm2, %v1381_v11, %v1383_v58 }
 0x198   : > { %v2657_v9 = vld [vmem:[#allocation2 + $0x48] sm:$0xff]  ;;  %v1937_v0 = vpop.f32.mrf.mxu3  ;;  %4826 = vperm.xlu0 %12740, %v4764_v61   ;;  %v13793_v4 = vld [vmem:[%s12958_s15 + $0x90] sm:$0xff] }
 0x199   : > { %v3031_v13 = vadd.f32 %v13607_v3, %v2657_v9  ;;  %2622 = vst.msk [vmem:[#allocation2 + $0x50] sm:$0xff] %vm431_vm0, %v2586_v8  ;;  %v2401_v8 = vsel %vm2240_vm3, %v13710_v12, %v13780_v42  ;;  %v2239_v9 = vpack.c.b16 %v2220_v60, %v2220_v60  ;;  %v1828_v47 = vrot.slane %v13793_v4, 1 }
 0x19a   : > { %v1494_v14 = vpop.f32.mrf.mxu2  ;;  %v13737_v25 = vpop.f32.mrf.mxu1 }
 0x19b   : > { %3067 = vst.msk [vmem:[#allocation2 + $0x48] sm:$0xff] %vm431_vm0, %v3031_v13  ;;  %v1565_v1 = vadd.f32 %v1494_v14, %v1191_v10 }
 0x19c   : > { %v1636_v3 = vld [vmem:[#allocation2 + $0x60] sm:$0xff]  ;;  %v13725_v6 = vpop.f32.mrf.mxu0 }
 0x19d   : > { %v2009_v27 = vadd.f32 %v1937_v0, %v1636_v3  ;;  %1601 = vst.msk [vmem:[#allocation2 + $0x68] sm:$0xff] %vm431_vm0, %v1565_v1  ;;  %v1250_v0 = vld [vmem:[%s12958_s15 + $0x90] sm:$0x1]  ;;  %v2403_v1 = vshrl.u32 %v2239_v9, 16  ;;  %v2406_v3 = vshll.u32 %v2239_v9, 16 }
 0x19e   : > { %v2080_v31 = vld [vmem:[#allocation2 + $0x58] sm:$0xff]  ;;  %v1329_v61 = vunpack.c.l.b16 %v1250_v0 }
 0x19f   : > { %2045 = vst.msk [vmem:[#allocation2 + $0x60] sm:$0xff] %vm431_vm0, %v2009_v27  ;;  %10620 = vmatmul.msk.bf16.gmra.mxu2 %vm431_vm0, %v1382_v22  ;;  %10824 = vmatmul.msk.bf16.gmra.mxu0 %vm431_vm0, %v2392_v15  ;;  %v2587_v32 = vadd.f32 %v13626_v19, %v2080_v31  ;;  %v4761_v19 = vld [vmem:[%s17020_s5 + $0x18] sm:$0xff]  ;;  %v1194_v27 = vld [vmem:[#allocation2 + $0x80] sm:$0xff] }
 0x1a0   : > { %v2658_v33 = vld [vmem:[#allocation2 + $0x50] sm:$0xff]  ;;  %v1939_v37 = vpop.f32.mrf.mxu3  ;;  %4811 = vperm.xlu1 %12741, %v4761_v19   ;;  %4841 = vperm.xlu0 %12740, %v4767_v24  }
 0x1a1   : > { %v3032_v36 = vadd.f32 %v13632_v23, %v2658_v33  ;;  %2623 = vst.msk [vmem:[#allocation2 + $0x58] sm:$0xff] %vm431_vm0, %v2587_v32  ;;  %v1827_v23 = vsel %vm1349_vm2, %v1824_v20, %v1826_v5  ;;  %v4773_v32 = vld [vmem:[%s17020_s5 + $0x78] sm:$0xff] }
 0x1a2   : > { %v1497_v26 = vpop.f32.mrf.mxu2  ;;  %v13769_v51 = vpop.f32.mrf.mxu1 }
 0x1a3   : > { %3068 = vst.msk [vmem:[#allocation2 + $0x50] sm:$0xff] %vm431_vm0, %v3032_v36  ;;  %v1566_v41 = vadd.f32 %v1497_v26, %v1192_v38  ;;  %v1348_v36 = vpack.c.b16 %v1329_v61, %v1329_v61  ;;  %v2408_v38 = vrot.slane %v2406_v3, 2  ;;  %v1696_v26 = vld [vmem:[%s12958_s15 + $0x98] sm:$0x1]  ;;  %v4774_v3 = vld [vmem:[%s17020_s5 + $0x80] sm:$0xff] }
 0x1a4   : > { %v1637_v35 = vld [vmem:[#allocation2 + $0x68] sm:$0xff]  ;;  %v13762_v44 = vpop.f32.mrf.mxu0 }
 0x1a5   : > { %v2010_v53 = vadd.f32 %v1939_v37, %v1637_v35  ;;  %1602 = vst.msk [vmem:[#allocation2 + $0x70] sm:$0xff] %vm431_vm0, %v1566_v41  ;;  %10722 = vmatmul.msk.bf16.gmra.mxu3 %vm431_vm0, %v1827_v23  ;;  %10926 = vmatmul.msk.bf16.gmra.mxu1 %vm431_vm0, %v2852_v39  ;;  %v2405_v37 = vrot.slane %v2403_v1, 1  ;;  %v1775_v23 = vunpack.c.l.b16 %v1696_v26  ;;  %v1385_v49 = vrot.slane %v1348_v36, 1  ;;  %v4771_v39 = vld [vmem:[%s17020_s5 + $0x68] sm:$0xff] }
 0x1a6   : > { %v2081_v20 = vld [vmem:[#allocation2 + $0x60] sm:$0xff] }
 0x1a7   : > { %2046 = vst.msk [vmem:[#allocation2 + $0x68] sm:$0xff] %vm431_vm0, %v2010_v53  ;;  %v2588_v55 = vadd.f32 %v13655_v40, %v2081_v20  ;;  %v4765_v40 = vld [vmem:[%s17020_s5 + $0x38] sm:$0xff]  ;;  %v2409_v50 = vor.u32 %v2408_v38, %v2405_v37  ;;  %v1386_v60 = vsel %vm1349_vm2, %v1383_v58, %v1385_v49 }
 0x1a8   : > { %v2659_v57 = vld [vmem:[#allocation2 + $0x58] sm:$0xff]  ;;  %v1942_v16 = vpop.f32.mrf.mxu3  ;;  %4831 = vperm.xlu1 %12741, %v4765_v40   ;;  %4856 = vperm.xlu0 %12740, %v4770_v63  }
 0x1a9   : > { %v3033_v48 = vadd.f32 %v13668_v45, %v2659_v57  ;;  %2624 = vst.msk [vmem:[#allocation2 + $0x60] sm:$0xff] %vm431_vm0, %v2588_v55  ;;  %v1794_v55 = vpack.c.b16 %v1775_v23, %v1775_v23 }
 0x1aa   : > { %v1499_v46 = vpop.f32.mrf.mxu2  ;;  %v13807_v10 = vpop.f32.mrf.mxu1 }
 0x1ab   : > { %3069 = vst.msk [vmem:[#allocation2 + $0x58] sm:$0xff] %vm431_vm0, %v3033_v48  ;;  %v1567_v59 = vadd.f32 %v1499_v46, %v1193_v56  ;;  %v2410_v48 = vsel %vm2240_vm3, %v13780_v42, %v2409_v50  ;;  %v1830_v29 = vrot.slane %v1794_v55, 1  ;;  %v11037_v42 = vld [vmem:[%s12958_s15 + $0x10] sm:$0xc] }
 0x1ac   : > { %v1638_v45 = vld [vmem:[#allocation2 + $0x70] sm:$0xff]  ;;  %v13795_v43 = vpop.f32.mrf.mxu0 }
 0x1ad   : > { %v2011_v13 = vadd.f32 %v1942_v16, %v1638_v45  ;;  %1603 = vst.msk [vmem:[#allocation2 + $0x78] sm:$0xff] %vm431_vm0, %v1567_v59  ;;  %v2720_v16 = vld [vmem:[%s12958_s15 + $0x98] sm:$0x3]  ;;  %v12381_v59 = vld [vmem:[%s12958_s15 + $0x10] sm:$0xf0] }
 0x1ae   : > { %v2082_v14 = vld [vmem:[#allocation2 + $0x68] sm:$0xff]  ;;  %v2799_v40 = vunpack.c.l.b16 %v2720_v16  ;;  %v11038_v1 = vor.u32 %v12381_v59, %v11037_v42 }
 0x1af   : > { %2047 = vst.msk [vmem:[#allocation2 + $0x70] sm:$0xff] %vm431_vm0, %v2011_v13  ;;  %10621 = vmatmul.msk.bf16.gmra.mxu2 %vm431_vm0, %v1384_v52  ;;  %10825 = vmatmul.msk.bf16.gmra.mxu0 %vm431_vm0, %v2401_v8  ;;  %v2589_v11 = vadd.f32 %v13693_v62, %v2082_v14  ;;  %v4768_v62 = vld [vmem:[%s17020_s5 + $0x50] sm:$0xff] }
 0x1b0   : > { %v2660_v12 = vld [vmem:[#allocation2 + $0x60] sm:$0xff]  ;;  %v1944_v15 = vpop.f32.mrf.mxu3  ;;  %4846 = vperm.xlu1 %12741, %v4768_v62   ;;  %4871 = vperm.xlu0 %12740, %v4773_v32   ;;  %v10935_v52 = vld [vmem:[%s12958_s15 + $0x10] sm:$0xc]  ;;  %v12361_v8 = vld [vmem:[%s12958_s15 + $0x10] sm:$0xf0]  ;;  %v2818_v9 = vpack.c.b16 %v2799_v40, %v2799_v40  ;;  %v3712_v26 = vshrl.u32 %v11038_v1, 16 }
 0x1b1   : > { %v3034_v22 = vadd.f32 %v13699_v7, %v2660_v12  ;;  %2625 = vst.msk [vmem:[#allocation2 + $0x68] sm:$0xff] %vm431_vm0, %v2589_v11  ;;  %v1829_v7 = vsel %vm1349_vm2, %v1826_v5, %v1828_v47  ;;  %v1196_v14 = vld [vmem:[#allocation2 + $0x90] sm:$0xff] }
 0x1b2   : > { %v1502_v31 = vpop.f32.mrf.mxu2  ;;  %v13836_v24 = vpop.f32.mrf.mxu1  ;;  %v11139_v11 = vld [vmem:[%s12958_s15 + $0x10] sm:$0x8]  ;;  %v12401_v12 = vld [vmem:[%s12958_s15 + $0x10] sm:$0xf0] }
 0x1b3   : > { %3070 = vst.msk [vmem:[#allocation2 + $0x60] sm:$0xff] %vm431_vm0, %v3034_v22  ;;  %v1568_v33 = vadd.f32 %v1502_v31, %v1194_v27  ;;  %v2855_v22 = vrot.slane %v2818_v9, 2  ;;  %v1831_v27 = vsel %vm1349_vm2, %v1828_v47, %v1830_v29  ;;  %v12382_v31 = vld [vmem:[%s12958_s15 + $0x18] sm:$0xff]  ;;  %v11140_v36 = vor.u32 %v12401_v12, %v11139_v11  ;;  %v1198_v9 = vld [vmem:[#allocation2 + $0xa0] sm:$0xff] }
 0x1b4   : > { %v1639_v28 = vld [vmem:[#allocation2 + $0x78] sm:$0xff]  ;;  %v13832_v30 = vpop.f32.mrf.mxu0  ;;  %v12383_v12 = vld [vmem:[%s12958_s15 + $0x20] sm:$0xff] }
 0x1b5   : > { %v2012_v19 = vadd.f32 %v1944_v15, %v1639_v28  ;;  %1604 = vst.msk [vmem:[#allocation2 + $0x80] sm:$0xff] %vm431_vm0, %v1568_v33  ;;  %10723 = vmatmul.msk.bf16.gmra.mxu3 %vm431_vm0, %v1829_v7  ;;  %10927 = vmatmul.msk.bf16.gmra.mxu1 %vm431_vm0, %v2854_v18  ;;  %v13896_v33 = vld [vmem:[%s12958_s15 + $0x18] sm:$0xff]  ;;  %v10936_v7 = vor.u32 %v12361_v8, %v10935_v52  ;;  %v3715_v18 = vshll.u32 %v11038_v1, 16  ;;  %v4290_v50 = vrot.slane %v11140_v36, 3 }
 0x1b6   : > { %v2083_v5 = vld [vmem:[#allocation2 + $0x70] sm:$0xff]  ;;  %v13899_v28 = vld [vmem:[%s12958_s15 + $0x18] sm:$0xff]  ;;  %v2856_v4 = vsel %vm2819_vm4, %v2853_v2, %v2855_v22  ;;  %v3266_v49 = vrot.slane %v13896_v33, 2 }
 0x1b7   : > { %2048 = vst.msk [vmem:[#allocation2 + $0x78] sm:$0xff] %vm431_vm0, %v2012_v19  ;;  %v2590_v41 = vadd.f32 %v13725_v6, %v2083_v5  ;;  %v4776_v6 = vld [vmem:[%s17020_s5 + $0x90] sm:$0xff]  ;;  %v3720_v5 = vshrl.u32 %v12382_v31, 16  ;;  %v4291_v17 = vrot.slane %v13899_v28, 3 }
 0x1b8   : > { %v2661_v35 = vld [vmem:[#allocation2 + $0x68] sm:$0xff]  ;;  %v1947_v54 = vpop.f32.mrf.mxu3  ;;  %4861 = vperm.xlu1 %12741, %v4771_v39   ;;  %4886 = vperm.xlu0 %12740, %v4776_v6   ;;  %v4777_v39 = vld [vmem:[%s17020_s5 + $0x98] sm:$0xff]  ;;  %v4782_v6 = vld [vmem:[%s17020_s5 + $0xc0] sm:$0xff] }
 0x1b9   : > { %v3035_v53 = vadd.f32 %v13737_v25, %v2661_v35  ;;  %2626 = vst.msk [vmem:[#allocation2 + $0x70] sm:$0xff] %vm431_vm0, %v2590_v41  ;;  %v3723_v41 = vshll.u32 %v12382_v31, 16  ;;  %v3265_v35 = vrot.slane %v10936_v7, 2  ;;  %v3722_v55 = vrot.slane %v3720_v5, 2  ;;  %v12439_v7 = vld [vmem:[%s17018_s3] sm:$0xff]  ;;  %v4783_v5 = vld [vmem:[%s17020_s5 + $0xc8] sm:$0xff] }
 0x1ba   : > { %v1504_v21 = vpop.f32.mrf.mxu2  ;;  %v13865_v46 = vpop.f32.mrf.mxu1  ;;  %v3729_v31 = vshrl.u32 %v12383_v12, 16  ;;  %5688 = vmatpush.bf16.msra.mxu1 %v12439_v7 }
 0x1bb   : > { %3071 = vst.msk [vmem:[#allocation2 + $0x68] sm:$0xff] %vm431_vm0, %v3035_v53  ;;  %v1569_v20 = vadd.f32 %v1504_v21, %v1195_v34  ;;  %v3714_v34 = vrot.slane %v3712_v26, 2  ;;  %v4763_v21 = vld [vmem:[%s17020_s5 + $0x28] sm:$0xff]  ;;  %v3267_v16 = vsel %vm2819_vm4, %v3265_v35, %v3266_v49 }
 0x1bc   : > { %v1640_v25 = vld [vmem:[#allocation2 + $0x80] sm:$0xff]  ;;  %v13856_v57 = vpop.f32.mrf.mxu0 }
 0x1bd   : > { %v2013_v56 = vadd.f32 %v1947_v54, %v1640_v25  ;;  %1605 = vst.msk [vmem:[#allocation2 + $0x88] sm:$0xff] %vm431_vm0, %v1569_v20  ;;  %v1197_v54 = vld [vmem:[#allocation2 + $0x98] sm:$0xff]  ;;  %v3717_v20 = vrot.slane %v3715_v18, 3  ;;  %v3725_v25 = vrot.slane %v3723_v41, 3  ;;  %v4788_v41 = vld [vmem:[%s17020_s5 + $0xf0] sm:$0xff] }
 0x1be   : > { %v2084_v63 = vld [vmem:[#allocation2 + $0x78] sm:$0xff] }
 0x1bf   : > { %2049 = vst.msk [vmem:[#allocation2 + $0x80] sm:$0xff] %vm431_vm0, %v2013_v56  ;;  %10622 = vmatmul.msk.bf16.gmra.mxu2 %vm431_vm0, %v1386_v60  ;;  %10826 = vmatmul.msk.bf16.gmra.mxu0 %vm431_vm0, %v2410_v48  ;;  %v2591_v58 = vadd.f32 %v13762_v44, %v2084_v63  ;;  %v4762_v44 = vld [vmem:[%s17020_s5 + $0x20] sm:$0xff]  ;;  %v4292_v56 = vsel %vm4289_vm6, %v4290_v50, %v4291_v17 }
 0x1c0   : > { %v2662_v45 = vld [vmem:[#allocation2 + $0x70] sm:$0xff]  ;;  %v1949_v0 = vpop.f32.mrf.mxu3  ;;  %4816 = vperm.xlu2 %12742, %v4762_v44   ;;  %4876 = vperm.xlu1 %12741, %v4774_v3   ;;  %v13939_v42 = vor.u32 %v3725_v25, %v3722_v55  ;;  %v13960_v44 = vld [vmem:[%s12958_s15 + $0x20] sm:$0xff] }
 0x1c1   : > { %v3036_v13 = vadd.f32 %v13769_v51, %v2662_v45  ;;  %2627 = vst.msk [vmem:[#allocation2 + $0x78] sm:$0xff] %vm431_vm0, %v2591_v58  ;;  %v4779_v51 = vld [vmem:[%s17020_s5 + $0xa8] sm:$0xff]  ;;  %v3718_v58 = vor.u32 %v3717_v20, %v3714_v34  ;;  %v13963_v3 = vld [vmem:[%s12958_s15 + $0x20] sm:$0xff]  ;;  %v4772_v20 = vld [vmem:[%s17020_s5 + $0x70] sm:$0xff] }
 0x1c2   : > { %v1507_v61 = vpop.f32.mrf.mxu2  ;;  %4901 = vperm.xlu0 %12740, %v4779_v51   ;;  %v13902_v38 = vpop.f32.mrf.mxu1  ;;  %v4786_v55 = vld [vmem:[%s17020_s5 + $0xe0] sm:$0xff] }
 0x1c3   : > { %3072 = vst.msk [vmem:[#allocation2 + $0x70] sm:$0xff] %vm431_vm0, %v3036_v13  ;;  %v1570_v15 = vadd.f32 %v1507_v61, %v1196_v14  ;;  %v4780_v14 = vld [vmem:[%s17020_s5 + $0xb0] sm:$0xff]  ;;  %v3727_v11 = vsel %vm3710_vm7, %v3718_v58, %v13939_v42 }
 0x1c4   : > { %v1641_v62 = vld [vmem:[#allocation2 + $0x88] sm:$0xff]  ;;  %v13893_v32 = vpop.f32.mrf.mxu0 }
 0x1c5   : > { %v2014_v37 = vadd.f32 %v1949_v0, %v1641_v62  ;;  %1606 = vst.msk [vmem:[#allocation2 + $0x90] sm:$0xff] %vm431_vm0, %v1570_v15  ;;  %10724 = vmatmul.msk.bf16.gmra.mxu3 %vm431_vm0, %v1831_v27  ;;  %10928 = vmatmul.msk.bf16.gmra.mxu1 %vm431_vm0, %v2856_v4  ;;  %v4766_v0 = vld [vmem:[%s17020_s5 + $0x40] sm:$0xff]  ;;  %v3732_v62 = vshll.u32 %v12383_v12, 16  ;;  %v4293_v4 = vrot.slane %v13963_v3, 3  ;;  %v4775_v12 = vld [vmem:[%s17020_s5 + $0x88] sm:$0xff] }
 0x1c6   : > { %v2085_v47 = vld [vmem:[#allocation2 + $0x80] sm:$0xff] }
 0x1c7   : > { %2050 = vst.msk [vmem:[#allocation2 + $0x88] sm:$0xff] %vm431_vm0, %v2014_v37  ;;  %v2592_v19 = vadd.f32 %v13795_v43, %v2085_v47  ;;  %v3268_v37 = vrot.slane %v13960_v44, 2  ;;  %v3734_v35 = vrot.slane %v3732_v62, 3 }
 0x1c8   : > { %v2663_v23 = vld [vmem:[#allocation2 + $0x78] sm:$0xff]  ;;  %v1952_v53 = vpop.f32.mrf.mxu3  ;;  %4821 = vperm.xlu2 %12742, %v4763_v21   ;;  %4891 = vperm.xlu1 %12741, %v4777_v39  }
 0x1c9   : > { %v3037_v2 = vadd.f32 %v13807_v10, %v2663_v23  ;;  %2628 = vst.msk [vmem:[#allocation2 + $0x80] sm:$0xff] %vm431_vm0, %v2592_v19  ;;  %v1199_v19 = vld [vmem:[#allocation2 + $0xa8] sm:$0xff]  ;;  %v3731_v23 = vrot.slane %v3729_v31, 2 }
 0x1ca   : > { %v1509_v43 = vpop.f32.mrf.mxu2  ;;  %4916 = vperm.xlu0 %12740, %v4782_v6   ;;  %v13934_v63 = vpop.f32.mrf.mxu1  ;;  %v1200_v6 = vld [vmem:[#allocation2 + $0xb0] sm:$0xff] }
 0x1cb   : > { %3073 = vst.msk [vmem:[#allocation2 + $0x78] sm:$0xff] %vm431_vm0, %v3037_v2  ;;  %v1571_v10 = vadd.f32 %v1509_v43, %v1197_v54  ;;  %v4294_v54 = vsel %vm4289_vm6, %v4291_v17, %v4293_v4  ;;  %v14006_v33 = vor.u32 %v3734_v35, %v3731_v23  ;;  %v14087_v35 = vld [vmem:[%s12958_s15 + $0x30] sm:$0xff] }
 0x1cc   : > { %v1642_v60 = vld [vmem:[#allocation2 + $0x90] sm:$0xff]  ;;  %v13925_v48 = vpop.f32.mrf.mxu0 }
 0x1cd   : > { %v2015_v40 = vadd.f32 %v1952_v53, %v1642_v60  ;;  %1607 = vst.msk [vmem:[#allocation2 + $0x98] sm:$0xff] %vm431_vm0, %v1571_v10  ;;  %v3269_v53 = vsel %vm2819_vm4, %v3266_v49, %v3268_v37  ;;  %v3736_v25 = vsel %vm3710_vm7, %v13939_v42, %v14006_v33  ;;  %v12384_v60 = vld [vmem:[%s12958_s15 + $0x28] sm:$0xff] }
 0x1ce   : > { %v2086_v29 = vld [vmem:[#allocation2 + $0x88] sm:$0xff] }
 0x1cf   : > { %2051 = vst.msk [vmem:[#allocation2 + $0x90] sm:$0xff] %vm431_vm0, %v2015_v40  ;;  %11013 = vmatmul.msk.bf16.vlgmr.msra.gmra.mxu2 %vm431_vm0, %v3267_v16  ;;  %11217 = vmatmul.msk.bf16.vlgmr.msra.gmra.mxu0 %vm431_vm0, %v4292_v56  ;;  %v2593_v59 = vadd.f32 %v13832_v30, %v2086_v29  ;;  %v4785_v30 = vld [vmem:[%s17020_s5 + $0xd8] sm:$0xff]  ;;  %v14028_v40 = vld [vmem:[%s12958_s15 + $0x28] sm:$0xff] }
 0x1d0   : > { %v2664_v45 = vld [vmem:[#allocation2 + $0x80] sm:$0xff]  ;;  %v1954_v8 = vpop.f32.mrf.mxu3  ;;  %4836 = vperm.xlu2 %12742, %v4766_v0   ;;  %4906 = vperm.xlu1 %12741, %v4780_v14   ;;  %v14031_v29 = vld [vmem:[%s12958_s15 + $0x28] sm:$0xff] }
 0x1d1   : > { %v3038_v52 = vadd.f32 %v13836_v24, %v2664_v45  ;;  %2629 = vst.msk [vmem:[#allocation2 + $0x88] sm:$0xff] %vm431_vm0, %v2593_v59  ;;  %v4295_v0 = vrot.slane %v14031_v29, 3 }
 0x1d2   : > { %v1512_v13 = vpop.f32.mrf.mxu2  ;;  %4931 = vperm.xlu0 %12740, %v4785_v30   ;;  %v13966_v22 = vpop.f32.mrf.mxu1 }
 0x1d3   : > { %3074 = vst.msk [vmem:[#allocation2 + $0x80] sm:$0xff] %vm431_vm0, %v3038_v52  ;;  %v1572_v24 = vadd.f32 %v1512_v13, %v1198_v9  ;;  %v3738_v52 = vshrl.u32 %v12384_v60, 16  ;;  %v3270_v13 = vrot.slane %v14028_v40, 2  ;;  %v4296_v62 = vsel %vm4289_vm6, %v4293_v4, %v4295_v0 }
 0x1d4   : > { %v1643_v61 = vld [vmem:[#allocation2 + $0x98] sm:$0xff]  ;;  %v13957_v1 = vpop.f32.mrf.mxu0 }
 0x1d5   : > { %v2016_v51 = vadd.f32 %v1954_v8, %v1643_v61  ;;  %1608 = vst.msk [vmem:[#allocation2 + $0xa0] sm:$0xff] %vm431_vm0, %v1572_v24  ;;  %11115 = vmatmul.msk.bf16.vlgmr.msra.gmra.mxu3 %vm431_vm0, %v3727_v11  ;;  %v3741_v8 = vshll.u32 %v12384_v60, 16  ;;  %v1201_v24 = vld [vmem:[#allocation2 + $0xb8] sm:$0xff]  ;;  %v3271_v31 = vsel %vm2819_vm4, %v3268_v37, %v3270_v13 }
 0x1d6   : > { %v2087_v15 = vld [vmem:[#allocation2 + $0x90] sm:$0xff] }
 0x1d7   : > { %2052 = vst.msk [vmem:[#allocation2 + $0x98] sm:$0xff] %vm431_vm0, %v2016_v51  ;;  %v2594_v27 = vadd.f32 %v13856_v57, %v2087_v15  ;;  %v4769_v57 = vld [vmem:[%s17020_s5 + $0x58] sm:$0xff]  ;;  %v3740_v51 = vrot.slane %v3738_v52, 2  ;;  %v3743_v15 = vrot.slane %v3741_v8, 3 }
 0x1d8   : > { %v2665_v36 = vld [vmem:[#allocation2 + $0x88] sm:$0xff]  ;;  %v1957_v26 = vpop.f32.mrf.mxu3  ;;  %4851 = vperm.xlu2 %12742, %v4769_v57   ;;  %4921 = vperm.xlu1 %12741, %v4783_v5   ;;  %v4778_v57 = vld [vmem:[%s17020_s5 + $0xa0] sm:$0xff]  ;;  %v4792_v5 = vld [vmem:[%s17020_s5 + $0x110] sm:$0xff] }
 0x1d9   : > { %v3039_v47 = vadd.f32 %v13865_v46, %v2665_v36  ;;  %2630 = vst.msk [vmem:[#allocation2 + $0x90] sm:$0xff] %vm431_vm0, %v2594_v27  ;;  %v14068_v44 = vor.u32 %v3743_v15, %v3740_v51 }
 0x1da   : > { %v1514_v18 = vpop.f32.mrf.mxu2  ;;  %4946 = vperm.xlu0 %12740, %v4788_v41   ;;  %v14001_v34 = vpop.f32.mrf.mxu1  ;;  %v12385_v41 = vld [vmem:[%s12958_s15 + $0x30] sm:$0xff] }
 0x1db   : > { %3075 = vst.msk [vmem:[#allocation2 + $0x88] sm:$0xff] %vm431_vm0, %v3039_v47  ;;  %v1573_v46 = vadd.f32 %v1514_v18, %v1199_v19  ;;  %v1202_v19 = vld [vmem:[#allocation2 + $0xc0] sm:$0xff] }
 0x1dc   : > { %v1644_v50 = vld [vmem:[#allocation2 + $0xa0] sm:$0xff]  ;;  %v13988_v2 = vpop.f32.mrf.mxu0 }
 0x1dd   : > { %v2017_v43 = vadd.f32 %v1957_v26, %v1644_v50  ;;  %1609 = vst.msk [vmem:[#allocation2 + $0xa8] sm:$0xff] %vm431_vm0, %v1573_v46  ;;  %v14090_v50 = vld [vmem:[%s12958_s15 + $0x30] sm:$0xff] }
 0x1de   : > { %v2088_v21 = vld [vmem:[#allocation2 + $0x98] sm:$0xff] }
 0x1df   : > { %2053 = vst.msk [vmem:[#allocation2 + $0xa0] sm:$0xff] %vm431_vm0, %v2017_v43  ;;  %11014 = vmatmul.msk.bf16.gmra.mxu2 %vm431_vm0, %v3269_v53  ;;  %11218 = vmatmul.msk.bf16.gmra.mxu0 %vm431_vm0, %v4294_v54  ;;  %v2595_v28 = vadd.f32 %v13893_v32, %v2088_v21  ;;  %v4791_v32 = vld [vmem:[%s17020_s5 + $0x108] sm:$0xff]  ;;  %v3747_v21 = vshrl.u32 %v12385_v41, 16 }
 0x1e0   : > { %v2666_v49 = vld [vmem:[#allocation2 + $0x90] sm:$0xff]  ;;  %v1959_v39 = vpop.f32.mrf.mxu3  ;;  %4866 = vperm.xlu2 %12742, %v4772_v20   ;;  %4936 = vperm.xlu1 %12741, %v4786_v55   ;;  %v1203_v20 = vld [vmem:[#allocation2 + $0xc8] sm:$0xff] }
 0x1e1   : > { %v3040_v17 = vadd.f32 %v13902_v38, %v2666_v49  ;;  %2631 = vst.msk [vmem:[#allocation2 + $0x98] sm:$0xff] %vm431_vm0, %v2595_v28  ;;  %v3272_v49 = vrot.slane %v14087_v35, 2 }
 0x1e2   : > { %v1517_v10 = vpop.f32.mrf.mxu2  ;;  %4961 = vperm.xlu0 %12740, %v4791_v32   ;;  %v14034_v59 = vpop.f32.mrf.mxu1 }
 0x1e3   : > { %3076 = vst.msk [vmem:[#allocation2 + $0x90] sm:$0xff] %vm431_vm0, %v3040_v17  ;;  %v1574_v38 = vadd.f32 %v1517_v10, %v1200_v6  ;;  %v4297_v17 = vrot.slane %v14090_v50, 3 }
 0x1e4   : > { %v1645_v16 = vld [vmem:[#allocation2 + $0xa8] sm:$0xff]  ;;  %v14025_v56 = vpop.f32.mrf.mxu0 }
 0x1e5   : > { %v2018_v58 = vadd.f32 %v1959_v39, %v1645_v16  ;;  %1610 = vst.msk [vmem:[#allocation2 + $0xb0] sm:$0xff] %vm431_vm0, %v1574_v38  ;;  %11116 = vmatmul.msk.bf16.gmra.mxu3 %vm431_vm0, %v3736_v25  ;;  %v3749_v38 = vrot.slane %v3747_v21, 2 }
 0x1e6   : > { %v2089_v45 = vld [vmem:[#allocation2 + $0xa0] sm:$0xff] }
 0x1e7   : > { %2054 = vst.msk [vmem:[#allocation2 + $0xa8] sm:$0xff] %vm431_vm0, %v2018_v58  ;;  %v2596_v42 = vadd.f32 %v13925_v48, %v2089_v45  ;;  %v4789_v48 = vld [vmem:[%s17020_s5 + $0xf8] sm:$0xff]  ;;  %v4298_v58 = vsel %vm4289_vm6, %v4295_v0, %v4297_v17 }
 0x1e8   : > { %v2667_v9 = vld [vmem:[#allocation2 + $0x98] sm:$0xff]  ;;  %v1962_v30 = vpop.f32.mrf.mxu3  ;;  %4881 = vperm.xlu2 %12742, %v4775_v12   ;;  %4951 = vperm.xlu1 %12741, %v4789_v48  }
 0x1e9   : > { %v3041_v14 = vadd.f32 %v13934_v63, %v2667_v9  ;;  %2632 = vst.msk [vmem:[#allocation2 + $0xa0] sm:$0xff] %vm431_vm0, %v2596_v42  ;;  %v14140_v48 = vld [vmem:[%s12958_s15 + $0x38] sm:$0xff] }
 0x1ea   : > { %v1519_v11 = vpop.f32.mrf.mxu2  ;;  %v14063_v47 = vpop.f32.mrf.mxu1 }
 0x1eb   : > { %3077 = vst.msk [vmem:[#allocation2 + $0x98] sm:$0xff] %vm431_vm0, %v3041_v14  ;;  %v1575_v61 = vadd.f32 %v1519_v11, %v1201_v24  ;;  %v12386_v11 = vld [vmem:[%s12958_s15 + $0x38] sm:$0xff] }
 0x1ec   : > { %v1646_v63 = vld [vmem:[#allocation2 + $0xb0] sm:$0xff]  ;;  %v14050_v27 = vpop.f32.mrf.mxu0 }
 0x1ed   : > { %v2019_v7 = vadd.f32 %v1962_v30, %v1646_v63  ;;  %1611 = vst.msk [vmem:[#allocation2 + $0xb8] sm:$0xff] %vm431_vm0, %v1575_v61  ;;  %v4784_v30 = vld [vmem:[%s17020_s5 + $0xd0] sm:$0xff]  ;;  %v14143_v61 = vld [vmem:[%s12958_s15 + $0x38] sm:$0xff] }
 0x1ee   : > { %v2090_v36 = vld [vmem:[#allocation2 + $0xa8] sm:$0xff] }
 0x1ef   : > { %2055 = vst.msk [vmem:[#allocation2 + $0xb0] sm:$0xff] %vm431_vm0, %v2019_v7  ;;  %11015 = vmatmul.msk.bf16.gmra.mxu2 %vm431_vm0, %v3271_v31  ;;  %11219 = vmatmul.msk.bf16.gmra.mxu0 %vm431_vm0, %v4296_v62  ;;  %v2597_v37 = vadd.f32 %v13957_v1, %v2090_v36  ;;  %v3756_v31 = vshrl.u32 %v12386_v11, 16  ;;  %v3759_v62 = vshll.u32 %v12386_v11, 16  ;;  %v3274_v36 = vrot.slane %v14140_v48, 2 }
 0x1f0   : > { %v2668_v3 = vld [vmem:[#allocation2 + $0xa0] sm:$0xff]  ;;  %v1964_v26 = vpop.f32.mrf.mxu3  ;;  %4896 = vperm.xlu2 %12742, %v4778_v57   ;;  %4966 = vperm.xlu1 %12741, %v4792_v5  }
 0x1f1   : > { %v3042_v4 = vadd.f32 %v13966_v22, %v2668_v3  ;;  %2633 = vst.msk [vmem:[#allocation2 + $0xa8] sm:$0xff] %vm431_vm0, %v2597_v37  ;;  %v3745_v22 = vsel %vm3710_vm7, %v14006_v33, %v14068_v44  ;;  %v3750_v33 = vshll.u32 %v12385_v41, 16  ;;  %v3761_v57 = vrot.slane %v3759_v62, 3  ;;  %v1208_v62 = vld [vmem:[#allocation2 + $0xf0] sm:$0xff] }
 0x1f2   : > { %v1522_v18 = vpop.f32.mrf.mxu2  ;;  %v14098_v39 = vpop.f32.mrf.mxu1 }
 0x1f3   : > { %3078 = vst.msk [vmem:[#allocation2 + $0xa0] sm:$0xff] %vm431_vm0, %v3042_v4  ;;  %v1576_v1 = vadd.f32 %v1522_v18, %v1202_v19  ;;  %v3752_v25 = vrot.slane %v3750_v33, 3  ;;  %v1205_v4 = vld [vmem:[#allocation2 + $0xd8] sm:$0xff]  ;;  %v4787_v19 = vld [vmem:[%s17020_s5 + $0xe8] sm:$0xff]  ;;  %v3758_v18 = vrot.slane %v3756_v31, 2  ;;  %v1206_v33 = vld [vmem:[#allocation2 + $0xe0] sm:$0xff] }
 0x1f4   : > { %v1647_v46 = vld [vmem:[#allocation2 + $0xb8] sm:$0xff]  ;;  %v14084_v23 = vpop.f32.mrf.mxu0 }
 0x1f5   : > { %v2020_v53 = vadd.f32 %v1964_v26, %v1647_v46  ;;  %1612 = vst.msk [vmem:[#allocation2 + $0xc0] sm:$0xff] %vm431_vm0, %v1576_v1  ;;  %11117 = vmatmul.msk.bf16.gmra.mxu3 %vm431_vm0, %v3745_v22  ;;  %v14122_v40 = vor.u32 %v3752_v25, %v3749_v38  ;;  %v14173_v35 = vor.u32 %v3761_v57, %v3758_v18 }
 0x1f6   : > { %v2091_v54 = vld [vmem:[#allocation2 + $0xb0] sm:$0xff] }
 0x1f7   : > { %2056 = vst.msk [vmem:[#allocation2 + $0xb8] sm:$0xff] %vm431_vm0, %v2020_v53  ;;  %v2598_v43 = vadd.f32 %v13988_v2, %v2091_v54  ;;  %v4781_v2 = vld [vmem:[%s17020_s5 + $0xb8] sm:$0xff] }
 0x1f8   : > { %v2669_v28 = vld [vmem:[#allocation2 + $0xa8] sm:$0xff]  ;;  %v1967_v10 = vpop.f32.mrf.mxu3  ;;  %4911 = vperm.xlu2 %12742, %v4781_v2  }
 0x1f9   : > { %v3043_v6 = vadd.f32 %v14001_v34, %v2669_v28  ;;  %2634 = vst.msk [vmem:[#allocation2 + $0xb0] sm:$0xff] %vm431_vm0, %v2598_v43  ;;  %v3273_v34 = vsel %vm2819_vm4, %v3270_v13, %v3272_v49  ;;  %v1204_v13 = vld [vmem:[#allocation2 + $0xd0] sm:$0xff] }
 0x1fa   : > { %v1524_v55 = vpop.f32.mrf.mxu2  ;;  %v14127_v14 = vpop.f32.mrf.mxu1 }
 0x1fb   : > { %3079 = vst.msk [vmem:[#allocation2 + $0xa8] sm:$0xff] %vm431_vm0, %v3043_v6  ;;  %v1577_v32 = vadd.f32 %v1524_v55, %v1203_v20  ;;  %v12387_v6 = vld [vmem:[%s12958_s15 + $0x40] sm:$0xff] }
 0x1fc   : > { %v1648_v60 = vld [vmem:[#allocation2 + $0xc0] sm:$0xff]  ;;  %v14106_v16 = vpop.f32.mrf.mxu0 }
 0x1fd   : > { %v2021_v45 = vadd.f32 %v1967_v10, %v1648_v60  ;;  %1613 = vst.msk [vmem:[#allocation2 + $0xc8] sm:$0xff] %vm431_vm0, %v1577_v32  ;;  %v14189_v20 = vld [vmem:[%s12958_s15 + $0x40] sm:$0xff]  ;;  %v3765_v60 = vshrl.u32 %v12387_v6, 16 }
 0x1fe   : > { %v2092_v42 = vld [vmem:[#allocation2 + $0xb8] sm:$0xff]  ;;  %v14192_v55 = vld [vmem:[%s12958_s15 + $0x40] sm:$0xff] }
 0x1ff   : > { %2057 = vst.msk [vmem:[#allocation2 + $0xc0] sm:$0xff] %vm431_vm0, %v2021_v45  ;;  %11016 = vmatmul.msk.bf16.gmra.mxu2 %vm431_vm0, %v3273_v34  ;;  %11220 = vmatmul.msk.bf16.gmra.mxu0 %vm431_vm0, %v4298_v58  ;;  %v2599_v52 = vadd.f32 %v14025_v56, %v2092_v42  ;;  %v3754_v56 = vsel %vm3710_vm7, %v14068_v44, %v14122_v40  ;;  %v4299_v44 = vrot.slane %v14143_v61, 3  ;;  %v3768_v34 = vshll.u32 %v12387_v6, 16 }
 0x200   : > { %v2670_v8 = vld [vmem:[#allocation2 + $0xb0] sm:$0xff]  ;;  %v1969_v9 = vpop.f32.mrf.mxu3  ;;  %4926 = vperm.xlu2 %12742, %v4784_v30   ;;  %v3276_v45 = vrot.slane %v14189_v20, 2  ;;  %v4301_v42 = vrot.slane %v14192_v55, 3 }
 0x201   : > { %v3044_v29 = vadd.f32 %v14034_v59, %v2670_v8  ;;  %2635 = vst.msk [vmem:[#allocation2 + $0xb8] sm:$0xff] %vm431_vm0, %v2599_v52  ;;  %v4300_v22 = vsel %vm4289_vm6, %v4297_v17, %v4299_v44  ;;  %v1207_v8 = vld [vmem:[#allocation2 + $0xe8] sm:$0xff] }
 0x202   : > { %v1527_v0 = vpop.f32.mrf.mxu2  ;;  %v2997_v41 = vpop.f32.mrf.mxu1 }
 0x203   : > { %3080 = vst.msk [vmem:[#allocation2 + $0xb0] sm:$0xff] %vm431_vm0, %v3044_v29  ;;  %v1578_v24 = vadd.f32 %v1527_v0, %v1204_v13  ;;  %v3767_v13 = vrot.slane %v3765_v60, 2  ;;  %v3770_v0 = vrot.slane %v3768_v34, 3 }
 0x204   : > { %v1649_v59 = vld [vmem:[#allocation2 + $0xc8] sm:$0xff]  ;;  %v14137_v12 = vpop.f32.mrf.mxu0 }
 0x205   : > { %v2022_v51 = vadd.f32 %v1969_v9, %v1649_v59  ;;  %1614 = vst.msk [vmem:[#allocation2 + $0xd0] sm:$0xff] %vm431_vm0, %v1578_v24  ;;  %11118 = vmatmul.msk.bf16.gmra.mxu3 %vm431_vm0, %v3754_v56  ;;  %v4793_v9 = vld [vmem:[%s17020_s5 + $0x118] sm:$0xff]  ;;  %v4302_v56 = vsel %vm4289_vm6, %v4299_v44, %v4301_v42  ;;  %v3771_v48 = vor.u32 %v3770_v0, %v3767_v13 }
 0x206   : > { %v2093_v15 = vld [vmem:[#allocation2 + $0xc0] sm:$0xff] }
 0x207   : > { %2058 = vst.msk [vmem:[#allocation2 + $0xc8] sm:$0xff] %vm431_vm0, %v2022_v51  ;;  %v2600_v63 = vadd.f32 %v14050_v27, %v2093_v15  ;;  %v3772_v44 = vsel %vm3710_vm7, %v14173_v35, %v3771_v48 }
 0x208   : > { %v2671_v7 = vld [vmem:[#allocation2 + $0xb8] sm:$0xff]  ;;  %v1972_v3 = vpop.f32.mrf.mxu3  ;;  %4941 = vperm.xlu2 %12742, %v4787_v19  }
 0x209   : > { %v3045_v37 = vadd.f32 %v14063_v47, %v2671_v7  ;;  %2636 = vst.msk [vmem:[#allocation2 + $0xc0] sm:$0xff] %vm431_vm0, %v2600_v63  ;;  %v3275_v47 = vsel %vm2819_vm4, %v3272_v49, %v3274_v36  ;;  %v4790_v49 = vld [vmem:[%s17020_s5 + $0x100] sm:$0xff] }
 0x20a   : > { %v1529_v26 = vpop.f32.mrf.mxu2  ;;  %v2999_v38 = vpop.f32.mrf.mxu1 }
 0x20b   : > { %3081 = vst.msk [vmem:[#allocation2 + $0xb8] sm:$0xff] %vm431_vm0, %v3045_v37  ;;  %v1579_v27 = vadd.f32 %v1529_v26, %v1205_v4  ;;  %v12388_v37 = vld [vmem:[%s12958_s15 + $0x48] sm:$0xff] }
 0x20c   : > { %v1650_v5 = vld [vmem:[#allocation2 + $0xd0] sm:$0xff]  ;;  %v14157_v1 = vpop.f32.mrf.mxu0  ;;  %v14231_v26 = vld [vmem:[%s12958_s15 + $0x48] sm:$0xff]  ;;  %v3774_v57 = vshrl.u32 %v12388_v37, 16 }
 0x20d   : > { %v2023_v46 = vadd.f32 %v1972_v3, %v1650_v5  ;;  %1615 = vst.msk [vmem:[#allocation2 + $0xd8] sm:$0xff] %vm431_vm0, %v1579_v27  ;;  %v3777_v5 = vshll.u32 %v12388_v37, 16 }
 0x20e   : > { %v2094_v53 = vld [vmem:[#allocation2 + $0xc8] sm:$0xff] }
 0x20f   : > { %2059 = vst.msk [vmem:[#allocation2 + $0xd0] sm:$0xff] %vm431_vm0, %v2023_v46  ;;  %11017 = vmatmul.msk.bf16.gmra.mxu2 %vm431_vm0, %v3275_v47  ;;  %11221 = vmatmul.msk.bf16.gmra.mxu0 %vm431_vm0, %v4300_v22  ;;  %v2601_v54 = vadd.f32 %v14084_v23, %v2094_v53  ;;  %v3763_v23 = vsel %vm3710_vm7, %v14122_v40, %v14173_v35  ;;  %v3278_v22 = vrot.slane %v14231_v26, 2  ;;  %v1209_v35 = vld [vmem:[#allocation2 + $0xf8] sm:$0xff] }
 0x210   : > { %v2672_v50 = vld [vmem:[#allocation2 + $0xc0] sm:$0xff]  ;;  %v1974_v21 = vpop.f32.mrf.mxu3  ;;  %4956 = vperm.xlu2 %12742, %v4790_v49  }
 0x211   : > { %v3046_v43 = vadd.f32 %v14098_v39, %v2672_v50  ;;  %2637 = vst.msk [vmem:[#allocation2 + $0xc8] sm:$0xff] %vm431_vm0, %v2601_v54  ;;  %v3279_v49 = vsel %vm2819_vm4, %v3276_v45, %v3278_v22 }
 0x212   : > { %v1532_v28 = vpop.f32.mrf.mxu2  ;;  %v3002_v61 = vpop.f32.mrf.mxu1 }
 0x213   : > { %3082 = vst.msk [vmem:[#allocation2 + $0xc0] sm:$0xff] %vm431_vm0, %v3046_v43  ;;  %v1580_v17 = vadd.f32 %v1532_v28, %v1206_v33  ;;  %v3779_v33 = vrot.slane %v3777_v5, 3 }
 0x214   : > { %v1651_v10 = vld [vmem:[#allocation2 + $0xd8] sm:$0xff]  ;;  %v14186_v39 = vpop.f32.mrf.mxu0 }
 0x215   : > { %v2024_v2 = vadd.f32 %v1974_v21, %v1651_v10  ;;  %1616 = vst.msk [vmem:[#allocation2 + $0xe0] sm:$0xff] %vm431_vm0, %v1580_v17  ;;  %11119 = vmatmul.msk.bf16.gmra.mxu3 %vm431_vm0, %v3763_v23  ;;  %v3776_v21 = vrot.slane %v3774_v57, 2 }
 0x216   : > { %v2095_v32 = vld [vmem:[#allocation2 + $0xd0] sm:$0xff] }
 0x217   : > { %2060 = vst.msk [vmem:[#allocation2 + $0xd8] sm:$0xff] %vm431_vm0, %v2024_v2  ;;  %v2602_v25 = vadd.f32 %v14106_v16, %v2095_v32  ;;  %v3780_v10 = vor.u32 %v3779_v33, %v3776_v21 }
 0x218   : > { %v2673_v58 = vld [vmem:[#allocation2 + $0xc8] sm:$0xff]  ;;  %v1977_v52 = vpop.f32.mrf.mxu3  ;;  %4971 = vperm.xlu2 %12742, %v4793_v9  }
 0x219   : > { %v3047_v40 = vadd.f32 %v14127_v14, %v2673_v58  ;;  %2638 = vst.msk [vmem:[#allocation2 + $0xd0] sm:$0xff] %vm431_vm0, %v2602_v25  ;;  %v3277_v14 = vsel %vm2819_vm4, %v3274_v36, %v3276_v45  ;;  %v3781_v34 = vsel %vm3710_vm7, %v3771_v48, %v3780_v10  ;;  %v12389_v58 = vld [vmem:[%s12958_s15 + $0x50] sm:$0xff] }
 0x21a   : > { %v1534_v29 = vpop.f32.mrf.mxu2  ;;  %v3004_v50 = vpop.f32.mrf.mxu1  ;;  %v3786_v13 = vshll.u32 %v12389_v58, 16 }
 0x21b   : > { %3083 = vst.msk [vmem:[#allocation2 + $0xc8] sm:$0xff] %vm431_vm0, %v3047_v40  ;;  %v1581_v16 = vadd.f32 %v1534_v29, %v1207_v8  ;;  %v14264_v40 = vld [vmem:[%s12958_s15 + $0x50] sm:$0xff] }
 0x21c   : > { %v1652_v30 = vld [vmem:[#allocation2 + $0xe0] sm:$0xff]  ;;  %v14206_v24 = vpop.f32.mrf.mxu0 }
 0x21d   : > { %v2025_v11 = vadd.f32 %v1977_v52, %v1652_v30  ;;  %1617 = vst.msk [vmem:[#allocation2 + $0xe8] sm:$0xff] %vm431_vm0, %v1581_v16  ;;  %v14267_v52 = vld [vmem:[%s12958_s15 + $0x50] sm:$0xff]  ;;  %v3783_v16 = vshrl.u32 %v12389_v58, 16  ;;  %v3280_v30 = vrot.slane %v14264_v40, 2 }
 0x21e   : > { %v2096_v59 = vld [vmem:[#allocation2 + $0xd8] sm:$0xff] }
 0x21f   : > { %2061 = vst.msk [vmem:[#allocation2 + $0xe0] sm:$0xff] %vm431_vm0, %v2025_v11  ;;  %11018 = vmatmul.msk.bf16.gmra.mxu2 %vm431_vm0, %v3277_v14  ;;  %11222 = vmatmul.msk.bf16.gmra.mxu0 %vm431_vm0, %v4302_v56  ;;  %v2603_v51 = vadd.f32 %v14137_v12, %v2096_v59  ;;  %v14234_v12 = vld [vmem:[%s12958_s15 + $0x48] sm:$0xff]  ;;  %v4305_v14 = vrot.slane %v14267_v52, 3 }
 0x220   : > { %v2674_v15 = vld [vmem:[#allocation2 + $0xd0] sm:$0xff]  ;;  %v1979_v31 = vpop.f32.mrf.mxu3  ;;  %v1211_v59 = vld [vmem:[#allocation2 + $0x108] sm:$0xff] }
 0x221   : > { %v3048_v63 = vadd.f32 %v2997_v41, %v2674_v15  ;;  %2639 = vst.msk [vmem:[#allocation2 + $0xd8] sm:$0xff] %vm431_vm0, %v2603_v51  ;;  %v4303_v41 = vrot.slane %v14234_v12, 3  ;;  %v3785_v15 = vrot.slane %v3783_v16, 2 }
 0x222   : > { %v1537_v7 = vpop.f32.mrf.mxu2 }
 0x223   : > { %3084 = vst.msk [vmem:[#allocation2 + $0xd0] sm:$0xff] %vm431_vm0, %v3048_v63  ;;  %v1582_v36 = vadd.f32 %v1537_v7, %v1208_v62  ;;  %v4304_v17 = vsel %vm4289_vm6, %v4301_v42, %v4303_v41  ;;  %v4306_v62 = vsel %vm4289_vm6, %v4303_v41, %v4305_v14 }
 0x224   : > { %v1653_v3 = vld [vmem:[#allocation2 + $0xe8] sm:$0xff]  ;;  %v14228_v4 = vpop.f32.mrf.mxu0 }
 0x225   : > { %v2026_v19 = vadd.f32 %v1979_v31, %v1653_v3  ;;  %1618 = vst.msk [vmem:[#allocation2 + $0xf0] sm:$0xff] %vm431_vm0, %v1582_v36  ;;  %11120 = vmatmul.msk.bf16.gmra.mxu3 %vm431_vm0, %v3772_v44  ;;  %v3281_v31 = vsel %vm2819_vm4, %v3278_v22, %v3280_v30 }
 0x226   : > { %v2097_v27 = vld [vmem:[#allocation2 + $0xe0] sm:$0xff] }
 0x227   : > { %2062 = vst.msk [vmem:[#allocation2 + $0xe8] sm:$0xff] %vm431_vm0, %v2026_v19  ;;  %v2604_v18 = vadd.f32 %v14157_v1, %v2097_v27  ;;  %v1212_v27 = vld [vmem:[#allocation2 + $0x110] sm:$0xff] }
 0x228   : > { %v2675_v47 = vld [vmem:[#allocation2 + $0xd8] sm:$0xff]  ;;  %v1982_v53 = vpop.f32.mrf.mxu3 }
 0x229   : > { %v3049_v46 = vadd.f32 %v2999_v38, %v2675_v47  ;;  %2640 = vst.msk [vmem:[#allocation2 + $0xe0] sm:$0xff] %vm431_vm0, %v2604_v18  ;;  %v1210_v38 = vld [vmem:[#allocation2 + $0x100] sm:$0xff]  ;;  %v12390_v47 = vld [vmem:[%s12958_s15 + $0x58] sm:$0xff] }
 0x22a   : > { %v1539_v54 = vpop.f32.mrf.mxu2 }
 0x22b   : > { %3085 = vst.msk [vmem:[#allocation2 + $0xd8] sm:$0xff] %vm431_vm0, %v3049_v46  ;;  %v1583_v43 = vadd.f32 %v1539_v54, %v1209_v35  ;;  %v14293_v46 = vld [vmem:[%s12958_s15 + $0x58] sm:$0xff] }
 0x22c   : > { %v1654_v1 = vld [vmem:[#allocation2 + $0xf0] sm:$0xff]  ;;  %v14244_v28 = vpop.f32.mrf.mxu0  ;;  %v3282_v33 = vrot.slane %v14293_v46, 2 }
 0x22d   : > { %v2027_v23 = vadd.f32 %v1982_v53, %v1654_v1  ;;  %1619 = vst.msk [vmem:[#allocation2 + $0xf8] sm:$0xff] %vm431_vm0, %v1583_v43  ;;  %v14296_v53 = vld [vmem:[%s12958_s15 + $0x58] sm:$0xff]  ;;  %v3795_v43 = vshll.u32 %v12390_v47, 16 }
 0x22e   : > { %v2098_v6 = vld [vmem:[#allocation2 + $0xe8] sm:$0xff]  ;;  %v4307_v1 = vrot.slane %v14296_v53, 3 }
 0x22f   : > { %2063 = vst.msk [vmem:[#allocation2 + $0xf0] sm:$0xff] %vm431_vm0, %v2027_v23  ;;  %11019 = vmatmul.msk.bf16.gmra.mxu2 %vm431_vm0, %v3279_v49  ;;  %11223 = vmatmul.msk.bf16.gmra.mxu0 %vm431_vm0, %v4304_v17  ;;  %v2605_v20 = vadd.f32 %v14186_v39, %v2098_v6  ;;  %v3007_v39 = vpop.f32.mrf.mxu1  ;;  %v1213_v6 = vld [vmem:[#allocation2 + $0x118] sm:$0xff] }
 0x230   : > { %v2676_v2 = vld [vmem:[#allocation2 + $0xe0] sm:$0xff]  ;;  %v1984_v32 = vpop.f32.mrf.mxu3 }
 0x231   : > { %v3050_v55 = vadd.f32 %v3002_v61, %v2676_v2  ;;  %2641 = vst.msk [vmem:[#allocation2 + $0xe8] sm:$0xff] %vm431_vm0, %v2605_v20  ;;  %v3788_v61 = vrot.slane %v3786_v13, 3 }
 0x232   : > { %v1542_v25 = vpop.f32.mrf.mxu2 }
 0x233   : > { %3086 = vst.msk [vmem:[#allocation2 + $0xe0] sm:$0xff] %vm431_vm0, %v3050_v55  ;;  %v1584_v60 = vadd.f32 %v1542_v25, %v1210_v38  ;;  %v3789_v37 = vor.u32 %v3788_v61, %v3785_v15  ;;  %v3797_v55 = vrot.slane %v3795_v43, 3  ;;  %v3283_v38 = vsel %vm2819_vm4, %v3280_v30, %v3282_v33 }
 0x234   : > { %v1655_v45 = vld [vmem:[#allocation2 + $0xf8] sm:$0xff]  ;;  %v14261_v42 = vpop.f32.mrf.mxu0  ;;  %v4308_v25 = vsel %vm4289_vm6, %v4305_v14, %v4307_v1 }
 0x235   : > { %v2028_v8 = vadd.f32 %v1984_v32, %v1655_v45  ;;  %1620 = vst.msk [vmem:[#allocation2 + $0x100] sm:$0xff] %vm431_vm0, %v1584_v60  ;;  %11121 = vmatmul.msk.bf16.gmra.mxu3 %vm431_vm0, %v3781_v34  ;;  %v3790_v5 = vsel %vm3710_vm7, %v3780_v10, %v3789_v37 }
 0x236   : > { %v2099_v29 = vld [vmem:[#allocation2 + $0xf0] sm:$0xff] }
 0x237   : > { %2064 = vst.msk [vmem:[#allocation2 + $0xf8] sm:$0xff] %vm431_vm0, %v2028_v8  ;;  %v2606_v9 = vadd.f32 %v14206_v24, %v2099_v29  ;;  %v3009_v44 = vpop.f32.mrf.mxu1  ;;  %v3094_v8 = vld [vmem:[#allocation2] sm:$0xff] }
 0x238   : > { %v2677_v0 = vld [vmem:[#allocation2 + $0xe8] sm:$0xff]  ;;  %v1987_v11 = vpop.f32.mrf.mxu3 }
 0x239   : > { %v3051_v56 = vadd.f32 %v3004_v50, %v2677_v0  ;;  %2642 = vst.msk [vmem:[#allocation2 + $0xf0] sm:$0xff] %vm431_vm0, %v2606_v9  ;;  %v3792_v50 = vshrl.u32 %v12390_v47, 16  ;;  %v12391_v0 = vld [vmem:[%s12958_s15 + $0x60] sm:$0xff] }
 0x23a   : > { %v1544_v48 = vpop.f32.mrf.mxu2  ;;  %v3804_v15 = vshll.u32 %v12391_v0, 16 }
 0x23b   : > { %3087 = vst.msk [vmem:[#allocation2 + $0xe8] sm:$0xff] %vm431_vm0, %v3051_v56  ;;  %v1585_v51 = vadd.f32 %v1544_v48, %v1211_v59  ;;  %v3794_v2 = vrot.slane %v3792_v50, 2  ;;  %v14329_v56 = vld [vmem:[%s12958_s15 + $0x60] sm:$0xff]  ;;  %v12480_v50 = vld [vmem:[%s17018_s3 + $0x28] sm:$0xff] }
 0x23c   : > { %v1656_v63 = vld [vmem:[#allocation2 + $0x100] sm:$0xff]  ;;  %v14277_v24 = vpop.f32.mrf.mxu0  ;;  %6652 = vmatpush.bf16.msrb.mxu3 %v12480_v50 }
 0x23d   : > { %v2029_v7 = vadd.f32 %v1987_v11, %v1656_v63  ;;  %1621 = vst.msk [vmem:[#allocation2 + $0x108] sm:$0xff] %vm431_vm0, %v1585_v51  ;;  %v14318_v58 = vor.u32 %v3797_v55, %v3794_v2  ;;  %v3801_v51 = vshrl.u32 %v12391_v0, 16  ;;  %v4746_v63 = vld [vmem:[#allocation3 + $0x8] sm:$0x3] }
 0x23e   : > { %v2100_v36 = vld [vmem:[#allocation2 + $0xf8] sm:$0xff]  ;;  %v14388_v2 = vld [vmem:[%s12958_s15 + $0x68] sm:$0xff] }
 0x23f   : > { %2065 = vst.msk [vmem:[#allocation2 + $0x100] sm:$0xff] %vm431_vm0, %v2029_v7  ;;  %11020 = vmatmul.msk.bf16.gmra.mxu2 %vm431_vm0, %v3281_v31  ;;  %11224 = vmatmul.msk.bf16.gmra.mxu0 %vm431_vm0, %v4306_v62  ;;  %v2607_v3 = vadd.f32 %v14228_v4, %v2100_v36  ;;  %v3012_v49 = vpop.f32.mrf.mxu1  ;;  %v3799_v13 = vsel %vm3710_vm7, %v3789_v37, %v14318_v58  ;;  %v3284_v62 = vrot.slane %v14329_v56, 2  ;;  %v4747_v36 = vsel %vm14340_vm10, 0, %v4746_v63 }
 0x240   : > { %v2678_v26 = vld [vmem:[#allocation2 + $0xf0] sm:$0xff]  ;;  %v1989_v19 = vpop.f32.mrf.mxu3  ;;  %4748 = vst [vmem:[#allocation3 + $0x8] sm:$0x3] %v4747_v36 }
 0x241   : > { %v3052_v12 = vadd.f32 %v3007_v39, %v2678_v26  ;;  %2643 = vst.msk [vmem:[#allocation2 + $0xf8] sm:$0xff] %vm431_vm0, %v2607_v3  ;;  %v3095_v3 = vld [vmem:[#allocation2 + $0x8] sm:$0xff]  ;;  %v3285_v47 = vsel %vm2819_vm4, %v3282_v33, %v3284_v62 }
 0x242   : > { %v1547_v18 = vpop.f32.mrf.mxu2 }
 0x243   : > { %3088 = vst.msk [vmem:[#allocation2 + $0xf0] sm:$0xff] %vm431_vm0, %v3052_v12  ;;  %v1586_v57 = vadd.f32 %v1547_v18, %v1212_v27  ;;  %v3803_v27 = vrot.slane %v3801_v51, 2  ;;  %v3806_v18 = vrot.slane %v3804_v15, 3  ;;  %v12500_v15 = vld [vmem:[%s17018_s3 + $0x38] sm:$0xff] }
 0x244   : > { %v1657_v22 = vld [vmem:[#allocation2 + $0x108] sm:$0xff]  ;;  %v14290_v41 = vpop.f32.mrf.mxu0  ;;  %7097 = vmatpush.bf16.msrb.mxu0 %v12500_v15 }
 0x245   : > { %v2030_v4 = vadd.f32 %v1989_v19, %v1657_v22  ;;  %1622 = vst.msk [vmem:[#allocation2 + $0x110] sm:$0xff] %vm431_vm0, %v1586_v57  ;;  %11122 = vmatmul.msk.bf16.gmra.mxu3 %vm431_vm0, %v3790_v5  ;;  %v12460_v19 = vld [vmem:[%s17018_s3 + $0x18] sm:$0xff]  ;;  %v14370_v46 = vor.u32 %v3806_v18, %v3803_v27  ;;  %v14441_v27 = vld [vmem:[%s12958_s15 + $0x70] sm:$0xff] }
 0x246   : > { %v2101_v35 = vld [vmem:[#allocation2 + $0x100] sm:$0xff]  ;;  %6207 = vmatpush.bf16.msrb.mxu2 %v12460_v19  ;;  %v14438_v19 = vld [vmem:[%s12958_s15 + $0x70] sm:$0xff]  ;;  %v4313_v50 = vrot.slane %v14441_v27, 3 }
 0x247   : > { %2066 = vst.msk [vmem:[#allocation2 + $0x108] sm:$0xff] %vm431_vm0, %v2030_v4  ;;  %v2608_v54 = vadd.f32 %v14244_v28, %v2101_v35  ;;  %v3014_v9 = vpop.f32.mrf.mxu1 }
 0x248   : > { %v2679_v21 = vld [vmem:[#allocation2 + $0xf8] sm:$0xff]  ;;  %v1992_v23 = vpop.f32.mrf.mxu3 }
 0x249   : > { %v3053_v17 = vadd.f32 %v3009_v44, %v2679_v21  ;;  %2644 = vst.msk [vmem:[#allocation2 + $0x100] sm:$0xff] %vm431_vm0, %v2608_v54 }
 0x24a   : > { %v1549_v10 = vpop.f32.mrf.mxu2 }
 0x24b   : > { %3089 = vst.msk [vmem:[#allocation2 + $0xf8] sm:$0xff] %vm431_vm0, %v3053_v17  ;;  %v1587_v20 = vadd.f32 %v1549_v10, %v1213_v6 }
 0x24c   : > { %v1658_v28 = vld [vmem:[#allocation2 + $0x110] sm:$0xff]  ;;  %v14306_v32 = vpop.f32.mrf.mxu0 }
 0x24d   : > { %v2031_v60 = vadd.f32 %v1992_v23, %v1658_v28  ;;  %1623 = vst.msk [vmem:[#allocation2 + $0x118] sm:$0xff] %vm431_vm0, %v1587_v20  ;;  %v12392_v23 = vld [vmem:[%s12958_s15 + $0x68] sm:$0xff] }
 0x24e   : > { %v2102_v34 = vld [vmem:[#allocation2 + $0x108] sm:$0xff] }
 0x24f   : > { %2067 = vst.msk [vmem:[#allocation2 + $0x110] sm:$0xff] %vm431_vm0, %v2031_v60  ;;  %11021 = vmatmul.msk.bf16.gmra.mxu2 %vm431_vm0, %v3283_v38  ;;  %11225 = vmatmul.msk.bf16.gmra.mxu0 %vm431_vm0, %v4308_v25  ;;  %v2609_v45 = vadd.f32 %v14261_v42, %v2102_v34  ;;  %v14332_v42 = vld [vmem:[%s12958_s15 + $0x60] sm:$0xff]  ;;  %v3017_v4 = vpop.f32.mrf.mxu1  ;;  %v14385_v20 = vld [vmem:[%s12958_s15 + $0x68] sm:$0xff]  ;;  %v3810_v60 = vshrl.u32 %v12392_v23, 16  ;;  %v3813_v34 = vshll.u32 %v12392_v23, 16 }
 0x250   : > { %v2680_v40 = vld [vmem:[#allocation2 + $0x100] sm:$0xff]  ;;  %v1994_v39 = vpop.f32.mrf.mxu3  ;;  %v4309_v7 = vrot.slane %v14332_v42, 3 }
 0x251   : > { %v3054_v52 = vadd.f32 %v3012_v49, %v2680_v40  ;;  %2645 = vst.msk [vmem:[#allocation2 + $0x108] sm:$0xff] %vm431_vm0, %v2609_v45  ;;  %v3286_v45 = vrot.slane %v14385_v20, 2  ;;  %v4311_v40 = vrot.slane %v14388_v2, 3 }
 0x252   : > { %v3377_v29 = vpop.f32.mrf.mxu2  ;;  %v4310_v22 = vsel %vm4289_vm6, %v4307_v1, %v4309_v7  ;;  %v3096_v1 = vld [vmem:[#allocation2 + $0x10] sm:$0xff] }
 0x253   : > { %3090 = vst.msk [vmem:[#allocation2 + $0x100] sm:$0xff] %vm431_vm0, %v3054_v52  ;;  %v3467_v16 = vadd.f32 %v3377_v29, %v3094_v8  ;;  %v3097_v8 = vld [vmem:[#allocation2 + $0x18] sm:$0xff] }
 0x254   : > { %v1659_v30 = vld [vmem:[#allocation2 + $0x118] sm:$0xff]  ;;  %v14326_v14 = vpop.f32.mrf.mxu0 }
 0x255   : > { %v2032_v11 = vadd.f32 %v1994_v39, %v1659_v30  ;;  %3503 = vst.msk [vmem:[#allocation2] sm:$0xff] %vm431_vm0, %v3467_v16  ;;  %11123 = vmatmul.msk.bf16.gmra.mxu3 %vm431_vm0, %v3799_v13  ;;  %v3815_v16 = vrot.slane %v3813_v34, 3  ;;  %v3287_v30 = vsel %vm2819_vm4, %v3284_v62, %v3286_v45  ;;  %v4797_v62 = vpop.permute.xlu0 %4796  ;;  %v4314_v34 = vsel %vm4289_vm6, %v4311_v40, %v4313_v50 }
 0x256   : > { %v2103_v59 = vld [vmem:[#allocation2 + $0x110] sm:$0xff] }
 0x257   : > { %2068 = vst.msk [vmem:[#allocation2 + $0x118] sm:$0xff] %vm431_vm0, %v2032_v11  ;;  %v2610_v48 = vadd.f32 %v14277_v24, %v2103_v59  ;;  %v12421_v24 = vld [vmem:[#allocation3] sm:$0xff]  ;;  %v3019_v38 = vpop.f32.mrf.mxu1  ;;  %v4312_v11 = vsel %vm4289_vm6, %v4309_v7, %v4311_v40 }
 0x258   : > { %v2681_v31 = vld [vmem:[#allocation2 + $0x108] sm:$0xff]  ;;  %v3956_v37 = vpop.f32.mrf.mxu3  ;;  %11357 = vmatmul.msk.bf16.vlgmr.msra.gmra.mxu1 %vm431_vm0, %v12421_v24  ;;  %v14416_v59 = vld [vmem:[%s17017_s2] ss:$0 sm:$0xff] }
 0x259   : > { %v3055_v44 = vadd.f32 %v3014_v9, %v2681_v31  ;;  %2646 = vst.msk [vmem:[#allocation2 + $0x110] sm:$0xff] %vm431_vm0, %v2610_v48  ;;  %v3098_v7 = vld [vmem:[#allocation2 + $0x20] sm:$0xff] }
 0x25a   : > { %v3379_v26 = vpop.f32.mrf.mxu2 }
 0x25b   : > { %3091 = vst.msk [vmem:[#allocation2 + $0x108] sm:$0xff] %vm431_vm0, %v3055_v44  ;;  %v3468_v12 = vadd.f32 %v3379_v26, %v3095_v3  ;;  %v12393_v44 = vld [vmem:[%s12958_s15 + $0x70] sm:$0xff] }
 0x25c   : > { %v3539_v57 = vld [vmem:[#allocation2] sm:$0xff]  ;;  %v14354_v5 = vpop.f32.mrf.mxu0 }
 0x25d   : > { %v4046_v35 = vadd.f32 %v3956_v37, %v3539_v57  ;;  %3504 = vst.msk [vmem:[#allocation2 + $0x8] sm:$0xff] %vm431_vm0, %v3468_v12 }
 0x25e   : > { %v2104_v54 = vld [vmem:[#allocation2 + $0x118] sm:$0xff] }
 0x25f   : > { %4082 = vst.msk [vmem:[#allocation2] sm:$0xff] %vm431_vm0, %v4046_v35  ;;  %11022 = vmatmul.msk.bf16.gmra.mxu2 %vm431_vm0, %v3285_v47  ;;  %11226 = vmatmul.msk.bf16.gmra.mxu0 %vm431_vm0, %v4310_v22  ;;  %v2611_v53 = vadd.f32 %v14290_v41, %v2104_v54  ;;  %v3808_v41 = vsel %vm3710_vm7, %v14318_v58, %v14370_v46  ;;  %v3819_v22 = vshrl.u32 %v12393_v44, 16 }
 0x260   : > { %v2682_v43 = vld [vmem:[#allocation2 + $0x110] sm:$0xff]  ;;  %v3958_v33 = vpop.f32.mrf.mxu3 }
 0x261   : > { %v3056_v21 = vadd.f32 %v3017_v4, %v2682_v43  ;;  %2647 = vst.msk [vmem:[#allocation2 + $0x118] sm:$0xff] %vm431_vm0, %v2611_v53  ;;  %v3822_v4 = vshll.u32 %v12393_v44, 16  ;;  %v3288_v53 = vrot.slane %v14438_v19, 2 }
 0x262   : > { %v3382_v49 = vpop.f32.mrf.mxu2 }
 0x263   : > { %3092 = vst.msk [vmem:[#allocation2 + $0x110] sm:$0xff] %vm431_vm0, %v3056_v21  ;;  %v3469_v17 = vadd.f32 %v3382_v49, %v3096_v1  ;;  %v3099_v49 = vld [vmem:[#allocation2 + $0x28] sm:$0xff] }
 0x264   : > { %v3540_v6 = vld [vmem:[#allocation2 + $0x8] sm:$0xff]  ;;  %v14382_v10 = vpop.f32.mrf.mxu0 }
 0x265   : > { %v4047_v55 = vadd.f32 %v3958_v33, %v3540_v6  ;;  %3505 = vst.msk [vmem:[#allocation2 + $0x10] sm:$0xff] %vm431_vm0, %v3469_v17  ;;  %11124 = vmatmul.msk.bf16.gmra.mxu3 %vm431_vm0, %v3808_v41  ;;  %v3824_v41 = vrot.slane %v3822_v4, 3 }
 0x266   : > { %v4118_v28 = vld [vmem:[#allocation2] sm:$0xff] }
 0x267   : > { %v4492_v25 = vadd.f32 %v14306_v32, %v4118_v28  ;;  %4083 = vst.msk [vmem:[#allocation2 + $0x8] sm:$0xff] %vm431_vm0, %v4047_v55  ;;  %v3812_v32 = vrot.slane %v3810_v60, 2  ;;  %v3289_v60 = vsel %vm2819_vm4, %v3286_v45, %v3288_v53 }
 0x268   : > { %v2683_v58 = vld [vmem:[#allocation2 + $0x118] sm:$0xff]  ;;  %v3961_v39 = vpop.f32.mrf.mxu3 }
 0x269   : > { %4528 = vst.msk [vmem:[#allocation2] sm:$0xff] %vm431_vm0, %v4492_v25  ;;  %v3057_v52 = vadd.f32 %v3019_v38, %v2683_v58  ;;  %v14424_v42 = vor.u32 %v3815_v16, %v3812_v32  ;;  %v4802_v38 = vpop.permute.xlu0 %4801 }
 0x26a   : > { %v3384_v29 = vpop.f32.mrf.mxu2 }
 0x26b   : > { %3093 = vst.msk [vmem:[#allocation2 + $0x118] sm:$0xff] %vm431_vm0, %v3057_v52  ;;  %v3470_v9 = vadd.f32 %v3384_v29, %v3097_v8  ;;  %v3817_v3 = vsel %vm3710_vm7, %v14370_v46, %v14424_v42  ;;  %v5444_v52 = vld [vmem:[#allocation3 + $0x8] sm:$0xe] }
 0x26c   : > { %v3541_v13 = vld [vmem:[#allocation2 + $0x10] sm:$0xff]  ;;  %v14401_v0 = vpop.f32.mrf.mxu0 }
 0x26d   : > { %v4048_v48 = vadd.f32 %v3961_v39, %v3541_v13  ;;  %3506 = vst.msk [vmem:[#allocation2 + $0x18] sm:$0xff] %vm431_vm0, %v3470_v9  ;;  %v12520_v13 = vld [vmem:[%s17018_s3 + $0x48] sm:$0xff] }
 0x26e   : > { %v4119_v51 = vld [vmem:[#allocation2 + $0x8] sm:$0xff]  ;;  %7675 = vmatpush.bf16.msrb.mxu1 %v12520_v13 }
 0x26f   : > { %v4493_v56 = vadd.f32 %v14326_v14, %v4119_v51  ;;  %4084 = vst.msk [vmem:[#allocation2 + $0x10] sm:$0xff] %vm431_vm0, %v4048_v48  ;;  %11023 = vmatmul.msk.bf16.gmra.mxu2 %vm431_vm0, %v3287_v30  ;;  %11227 = vmatmul.msk.bf16.gmra.mxu0 %vm431_vm0, %v4312_v11  ;;  %v4807_v51 = vpop.permute.xlu1 %4806 }
 0x270   : > { %v4564_v63 = vld [vmem:[#allocation2] sm:$0xff]  ;;  %v3963_v14 = vpop.f32.mrf.mxu3 }
 0x271   : > { %v4604_v31 = vadd.f32 %v14416_v59, %v4564_v63  ;;  %4529 = vst.msk [vmem:[#allocation2 + $0x8] sm:$0xff] %vm431_vm0, %v4493_v56  ;;  %v3100_v56 = vld [vmem:[#allocation2 + $0x30] sm:$0xff] }
 0x272   : > { %v3387_v36 = vpop.f32.mrf.mxu2 }
 0x273   : > { %v4640_v37 = vmax.f32 %v4604_v31, 0.0  ;;  %v3471_v24 = vadd.f32 %v3387_v36, %v3098_v7  ;;  %v12394_v31 = vld [vmem:[%s12958_s15 + $0x78] sm:$0xff] }
 0x274   : > { %v3542_v26 = vld [vmem:[#allocation2 + $0x18] sm:$0xff]  ;;  %v14435_v12 = vpop.f32.mrf.mxu0  ;;  %v3831_v4 = vshll.u32 %v12394_v31, 16 }
 0x275   : > { %4676 = vst.msk [vmem:[%s14445_s22] sm:$0xff] %vm431_vm0, %v4640_v37  ;;  %v4974_v18 = vmul.f32 %v4797_v62, %v4640_v37  ;;  %v4049_v57 = vadd.f32 %v3963_v14, %v3542_v26  ;;  %11125 = vmatmul.msk.bf16.gmra.mxu3 %vm431_vm0, %v3817_v3  ;;  %v14497_v37 = vld [vmem:[%s12958_s15 + $0x78] sm:$0xff] }
 0x276   : > { %v4120_v47 = vld [vmem:[#allocation2 + $0x10] sm:$0xff]  ;;  %3507 = vst.msk [vmem:[#allocation2 + $0x20] sm:$0xff] %vm431_vm0, %v3471_v24  ;;  %v14500_v24 = vld [vmem:[%s12958_s15 + $0x78] sm:$0xff] }
 0x277   : > { %v5010_v35 = vpack.c.bf16 %v4974_v18, %v4974_v18  ;;  %v4494_v54 = vadd.f32 %v14354_v5, %v4120_v47  ;;  %4085 = vst.msk [vmem:[#allocation2 + $0x18] sm:$0xff] %vm431_vm0, %v4049_v57  ;;  %v3821_v5 = vrot.slane %v3819_v22, 2  ;;  %v3828_v22 = vshrl.u32 %v12394_v31, 16 }
 0x278   : > { %v4565_v46 = vld [vmem:[#allocation2 + $0x8] sm:$0xff]  ;;  %v3966_v1 = vpop.f32.mrf.mxu3 }
 0x279   : > { %v5049_v43 = vshrl.u32 %v5010_v35, 16  ;;  %v5052_v21 = vshll.u32 %v5010_v35, 16  ;;  %v4605_v33 = vadd.f32 %v14416_v59, %v4565_v46  ;;  %4530 = vst.msk [vmem:[#allocation2 + $0x10] sm:$0xff] %vm431_vm0, %v4494_v54  ;;  %v14477_v45 = vor.u32 %v3824_v41, %v3821_v5 }
 0x27a   : > { %v3389_v17 = vpop.f32.mrf.mxu2 }
 0x27b   : > { %v5051_v23 = vrot.slane %v5049_v43, 6  ;;  %v5054_v6 = vrot.slane %v5052_v21, 7  ;;  %v4641_v55 = vmax.f32 %v4605_v33, 0.0  ;;  %v3472_v28 = vadd.f32 %v3389_v17, %v3099_v49 }
 0x27c   : > { %v14457_v25 = vpop.f32.mrf.mxu0  ;;  %v3826_v63 = vsel %vm3710_vm7, %v14424_v42, %v14477_v45  ;;  %v3290_v33 = vrot.slane %v14497_v37, 2 }
 0x27d   : > { %4677 = vst.msk [vmem:[%s14445_s22 + $0x8] sm:$0xff] %vm431_vm0, %v4641_v55  ;;  %v4975_v39 = vmul.f32 %v4802_v38, %v4641_v55  ;;  %v3543_v8 = vld [vmem:[#allocation2 + $0x20] sm:$0xff]  ;;  %v5055_v29 = vor.u32 %v5054_v6, %v5051_v23  ;;  %v3101_v23 = vld [vmem:[#allocation2 + $0x38] sm:$0xff]  ;;  %v3830_v55 = vrot.slane %v3828_v22, 2 }
 0x27e   : > { %v4121_v20 = vld [vmem:[#allocation2 + $0x18] sm:$0xff]  ;;  %v4050_v9 = vadd.f32 %v3966_v1, %v3543_v8  ;;  %3508 = vst.msk [vmem:[#allocation2 + $0x28] sm:$0xff] %vm431_vm0, %v3472_v28  ;;  %v4315_v1 = vrot.slane %v14500_v24, 3  ;;  %v3291_v8 = vsel %vm2819_vm4, %v3288_v53, %v3290_v33 }
 0x27f   : > { %v5011_v2 = vpack.c.bf16 %v4975_v39, %v4975_v39  ;;  %v4495_v40 = vadd.f32 %v14382_v10, %v4121_v20  ;;  %11024 = vmatmul.msk.bf16.gmra.mxu2 %vm431_vm0, %v3289_v60  ;;  %11228 = vmatmul.msk.bf16.gmra.mxu0 %vm431_vm0, %v4314_v34  ;;  %v5445_v32 = vsel %vm14470_vm13, %v5055_v29, %v5444_v52  ;;  %v5056_v18 = vrot.slane %v5055_v29, 4  ;;  %v4812_v52 = vpop.permute.xlu1 %4811 }
 0x280   : > { %v4566_v16 = vld [vmem:[#allocation2 + $0x10] sm:$0xff]  ;;  %4086 = vst.msk [vmem:[#allocation2 + $0x20] sm:$0xff] %vm431_vm0, %v4050_v9  ;;  %v3968_v10 = vpop.f32.mrf.mxu3  ;;  %v4316_v29 = vsel %vm4289_vm6, %v4313_v50, %v4315_v1 }
 0x281   : > { %v4606_v30 = vadd.f32 %v14416_v59, %v4566_v16  ;;  %4531 = vst.msk [vmem:[#allocation2 + $0x18] sm:$0xff] %vm431_vm0, %v4495_v40  ;;  %v5058_v11 = vshrl.u32 %v5011_v2, 16  ;;  %v5061_v48 = vshll.u32 %v5011_v2, 16 }
 0x282   : > { %v3392_v15 = vpop.f32.mrf.mxu2  ;;  %5446 = vst [vmem:[#allocation3 + $0x8] sm:$0xe] %v5445_v32 }
 0x283   : > { %v4642_v14 = vmax.f32 %v4606_v30, 0.0  ;;  %v3473_v62 = vadd.f32 %v3392_v15, %v3100_v56  ;;  %v5060_v7 = vrot.slane %v5058_v11, 6  ;;  %v5063_v36 = vrot.slane %v5061_v48, 7  ;;  %v3102_v56 = vld [vmem:[#allocation2 + $0x40] sm:$0xff] }
 0x284   : > { %v14494_v44 = vpop.f32.mrf.mxu0 }
 0x285   : > { %11235 = vst.msk [vmem:[%s14445_s22 + $0xe] sm:$0xfc] %vm4679_vm15, %v4642_v14  ;;  %v4976_v42 = vmul.f32 %v4807_v51, %v4642_v14  ;;  %v3544_v26 = vld [vmem:[#allocation2 + $0x28] sm:$0xff]  ;;  %v5064_v57 = vor.u32 %v5063_v36, %v5060_v7  ;;  %11126 = vmatmul.msk.bf16.gmra.mxu3 %vm431_vm0, %v3826_v63  ;;  %v14552_v14 = vld [vmem:[%s12958_s15 + $0x80] sm:$0xff] }
 0x286   : > { %v4051_v47 = vadd.f32 %v3968_v10, %v3544_v26  ;;  %3509 = vst.msk [vmem:[#allocation2 + $0x30] sm:$0xff] %vm431_vm0, %v3473_v62  ;;  %v12395_v36 = vld [vmem:[%s12958_s15 + $0x80] sm:$0xff] }
 0x287   : > { %v5012_v35 = vpack.c.bf16 %v4976_v42, %v4976_v42  ;;  %v4122_v54 = vld [vmem:[#allocation2 + $0x20] sm:$0xff]  ;;  %v5065_v46 = vsel %vm14504_vm11, %v5056_v18, %v5064_v57  ;;  %v5066_v2 = vrot.slane %v5064_v57, 4 }
 0x288   : > { %v4567_v43 = vld [vmem:[#allocation2 + $0x18] sm:$0xff]  ;;  %v4496_v21 = vadd.f32 %v14401_v0, %v4122_v54  ;;  %4087 = vst.msk [vmem:[#allocation2 + $0x28] sm:$0xff] %vm431_vm0, %v4051_v47  ;;  %v3971_v41 = vpop.f32.mrf.mxu3  ;;  %v3833_v0 = vrot.slane %v3831_v4, 3  ;;  %v14558_v18 = vld [vmem:[%s12958_s15 + $0x80] sm:$0xff]  ;;  %v3292_v54 = vrot.slane %v14552_v14, 2 }
 0x289   : > { %v5068_v49 = vshrl.u32 %v5012_v35, 16  ;;  %v5071_v17 = vshll.u32 %v5012_v35, 16  ;;  %v4607_v5 = vadd.f32 %v14416_v59, %v4567_v43  ;;  %5447 = vst.msk [vmem:[#allocation3 + $0xc] sm:$0xf] %vm4688_vm5, %v5065_v46  ;;  %v3837_v43 = vshrl.u32 %v12395_v36, 16 }
 0x28a   : > { %4532 = vst.msk [vmem:[#allocation2 + $0x20] sm:$0xff] %vm431_vm0, %v4496_v21  ;;  %v3394_v6 = vpop.f32.mrf.mxu2  ;;  %v14538_v19 = vor.u32 %v3833_v0, %v3830_v55  ;;  %v3840_v21 = vshll.u32 %v12395_v36, 16  ;;  %v3103_v55 = vld [vmem:[#allocation2 + $0x48] sm:$0xff] }
 0x28b   : > { %v4643_v28 = vmax.f32 %v4607_v5, 0.0  ;;  %v3474_v38 = vadd.f32 %v3394_v6, %v3101_v23  ;;  %v5070_v60 = vrot.slane %v5068_v49, 6  ;;  %v5073_v34 = vrot.slane %v5071_v17, 7 }
 0x28c   : > { %v14521_v39 = vpop.f32.mrf.mxu0  ;;  %v3835_v31 = vsel %vm3710_vm7, %v14477_v45, %v14538_v19  ;;  %v4317_v5 = vrot.slane %v14558_v18, 3 }
 0x28d   : > { %11236 = vst.msk [vmem:[%s14445_s22 + $0x16] sm:$0xff] %vm431_vm0, %v4643_v28  ;;  %v4977_v20 = vmul.f32 %v4812_v52, %v4643_v28  ;;  %v3545_v9 = vld [vmem:[#allocation2 + $0x30] sm:$0xff]  ;;  %v5074_v40 = vor.u32 %v5073_v34, %v5070_v60  ;;  %v3839_v34 = vrot.slane %v3837_v43, 2  ;;  %v3842_v52 = vrot.slane %v3840_v21, 3 }
 0x28e   : > { %v4052_v32 = vadd.f32 %v3971_v41, %v3545_v9  ;;  %3510 = vst.msk [vmem:[#allocation2 + $0x38] sm:$0xff] %vm431_vm0, %v3474_v38  ;;  %v4318_v9 = vsel %vm4289_vm6, %v4315_v1, %v4317_v5 }
 0x28f   : > { %v5013_v16 = vpack.c.bf16 %v4977_v20, %v4977_v20  ;;  %v4123_v13 = vld [vmem:[#allocation2 + $0x28] sm:$0xff]  ;;  %11025 = vmatmul.msk.bf16.gmra.mxu2 %vm431_vm0, %v3291_v8  ;;  %11229 = vmatmul.msk.bf16.gmra.mxu0 %vm431_vm0, %v4316_v29  ;;  %v5075_v27 = vsel %vm14504_vm11, %v5066_v2, %v5074_v40  ;;  %v5076_v47 = vrot.slane %v5074_v40, 4  ;;  %v14593_v24 = vor.u32 %v3842_v52, %v3839_v34 }
 0x290   : > { %v4497_v53 = vadd.f32 %v14435_v12, %v4123_v13  ;;  %4088 = vst.msk [vmem:[#allocation2 + $0x30] sm:$0xff] %vm431_vm0, %v4052_v32  ;;  %v12422_v50 = vld [vmem:[#allocation3 + $0x8] sm:$0xff]  ;;  %v3973_v10 = vpop.f32.mrf.mxu3  ;;  %v4817_v12 = vpop.permute.xlu2 %4816 }
 0x291   : > { %v4568_v30 = vld [vmem:[#allocation2 + $0x20] sm:$0xff]  ;;  %v5078_v11 = vshrl.u32 %v5013_v16, 16  ;;  %v5081_v48 = vshll.u32 %v5013_v16, 16  ;;  %5448 = vst.msk [vmem:[#allocation3 + $0x10] sm:$0xf] %vm4688_vm5, %v5075_v27  ;;  %11358 = vmatmul.msk.bf16.gmra.mxu1 %vm431_vm0, %v12422_v50 }
 0x292   : > { %v4608_v51 = vadd.f32 %v14416_v59, %v4568_v30  ;;  %4533 = vst.msk [vmem:[#allocation2 + $0x28] sm:$0xff] %vm431_vm0, %v4497_v53  ;;  %v3397_v15 = vpop.f32.mrf.mxu2 }
 0x293   : > { %v3475_v63 = vadd.f32 %v3397_v15, %v3102_v56  ;;  %v5080_v62 = vrot.slane %v5078_v11, 6  ;;  %v5083_v7 = vrot.slane %v5081_v48, 7 }
 0x294   : > { %v4644_v42 = vmax.f32 %v4608_v51, 0.0  ;;  %v14555_v26 = vpop.f32.mrf.mxu0  ;;  %v3104_v51 = vld [vmem:[#allocation2 + $0x50] sm:$0xff] }
 0x295   : > { %v3546_v57 = vld [vmem:[#allocation2 + $0x38] sm:$0xff]  ;;  %3511 = vst.msk [vmem:[#allocation2 + $0x40] sm:$0xff] %vm431_vm0, %v3475_v63  ;;  %v5084_v22 = vor.u32 %v5083_v7, %v5080_v62  ;;  %11127 = vmatmul.msk.bf16.gmra.mxu3 %vm431_vm0, %v3835_v31  ;;  %v3844_v63 = vsel %vm3710_vm7, %v14538_v19, %v14593_v24  ;;  %v14606_v31 = vld [vmem:[%s12958_s15 + $0x88] sm:$0xff] }
 0x296   : > { %11237 = vst.msk [vmem:[%s14445_s22 + $0x1e] sm:$0x3] %vm4682_vm8, %v4644_v42  ;;  %v4978_v45 = vmul.f32 %v4817_v12, %v4644_v42  ;;  %v4053_v4 = vadd.f32 %v3973_v10, %v3546_v57  ;;  %v12396_v62 = vld [vmem:[%s12958_s15 + $0x88] sm:$0xff] }
 0x297   : > { %11238 = vst.msk [vmem:[%s14445_s22 + $0x1c] sm:$0xf0] %vm4685_vm9, %v4644_v42  ;;  %v4124_v35 = vld [vmem:[#allocation2 + $0x30] sm:$0xff]  ;;  %v5085_v46 = vsel %vm14504_vm11, %v5076_v47, %v5084_v22  ;;  %v14612_v57 = vld [vmem:[%s12958_s15 + $0x88] sm:$0xff] }
 0x298   : > { %v5014_v49 = vpack.c.bf16 %v4978_v45, %v4978_v45  ;;  %v4498_v17 = vadd.f32 %v14457_v25, %v4124_v35  ;;  %4089 = vst.msk [vmem:[#allocation2 + $0x38] sm:$0xff] %vm431_vm0, %v4053_v4  ;;  %v3976_v23 = vpop.f32.mrf.mxu3  ;;  %v3293_v25 = vsel %vm2819_vm4, %v3290_v33, %v3292_v54  ;;  %v4822_v32 = vpop.permute.xlu2 %4821  ;;  %v5086_v33 = vrot.slane %v5084_v22, 4 }
 0x299   : > { %v4569_v41 = vld [vmem:[#allocation2 + $0x28] sm:$0xff]  ;;  %5449 = vst.msk [vmem:[#allocation3 + $0x14] sm:$0xf] %vm4688_vm5, %v5085_v46  ;;  %v4827_v45 = vpop.permute.xlu0 %4826 }
 0x29a   : > { %v4609_v6 = vadd.f32 %v14416_v59, %v4569_v41  ;;  %4534 = vst.msk [vmem:[#allocation2 + $0x30] sm:$0xff] %vm431_vm0, %v4498_v17  ;;  %v3399_v0 = vpop.f32.mrf.mxu2  ;;  %v5088_v28 = vshrl.u32 %v5014_v49, 16  ;;  %v5091_v38 = vshll.u32 %v5014_v49, 16  ;;  %v3294_v49 = vrot.slane %v14606_v31, 2 }
 0x29b   : > { %v3476_v60 = vadd.f32 %v3399_v0, %v3103_v55  ;;  %v3846_v17 = vshrl.u32 %v12396_v62, 16  ;;  %v3849_v41 = vshll.u32 %v12396_v62, 16 }
 0x29c   : > { %v4645_v8 = vmax.f32 %v4609_v6, 0.0  ;;  %v3547_v29 = vld [vmem:[#allocation2 + $0x40] sm:$0xff]  ;;  %v14580_v20 = vpop.f32.mrf.mxu0  ;;  %v5090_v2 = vrot.slane %v5088_v28, 6  ;;  %v5093_v40 = vrot.slane %v5091_v38, 7  ;;  %v4319_v6 = vrot.slane %v14612_v57, 3 }
 0x29d   : > { %v4054_v16 = vadd.f32 %v3976_v23, %v3547_v29  ;;  %3512 = vst.msk [vmem:[#allocation2 + $0x48] sm:$0xff] %vm431_vm0, %v3476_v60  ;;  %v3105_v60 = vld [vmem:[#allocation2 + $0x58] sm:$0xff]  ;;  %v3848_v29 = vrot.slane %v3846_v17, 2 }
 0x29e   : > { %11239 = vst.msk [vmem:[%s14445_s22 + $0x24] sm:$0xff] %vm431_vm0, %v4645_v8  ;;  %v4979_v37 = vmul.f32 %v4822_v32, %v4645_v8  ;;  %v5094_v13 = vor.u32 %v5093_v40, %v5090_v2  ;;  %v3295_v8 = vsel %vm2819_vm4, %v3292_v54, %v3294_v49 }
 0x29f   : > { %v4125_v27 = vld [vmem:[#allocation2 + $0x38] sm:$0xff]  ;;  %4090 = vst.msk [vmem:[#allocation2 + $0x40] sm:$0xff] %vm431_vm0, %v4054_v16  ;;  %11026 = vmatmul.msk.bf16.gmra.mxu2 %vm431_vm0, %v3293_v25  ;;  %11230 = vmatmul.msk.bf16.gmra.mxu0 %vm431_vm0, %v4318_v9  ;;  %v3851_v9 = vrot.slane %v3849_v41, 3  ;;  %v4320_v16 = vsel %vm4289_vm6, %v4317_v5, %v4319_v6 }
 0x2a0   : > { %v5015_v1 = vpack.c.bf16 %v4979_v37, %v4979_v37  ;;  %v4499_v53 = vadd.f32 %v14494_v44, %v4125_v27  ;;  %v12423_v50 = vld [vmem:[#allocation3 + $0x10] sm:$0xff]  ;;  %v5095_v30 = vsel %vm14504_vm11, %v5086_v33, %v5094_v13  ;;  %v3978_v11 = vpop.f32.mrf.mxu3  ;;  %v5096_v46 = vrot.slane %v5094_v13, 4  ;;  %v4832_v13 = vpop.permute.xlu1 %4831 }
 0x2a1   : > { %v4570_v10 = vld [vmem:[#allocation2 + $0x30] sm:$0xff]  ;;  %5450 = vst.msk [vmem:[#allocation3 + $0x18] sm:$0xf] %vm4688_vm5, %v5095_v30  ;;  %11359 = vmatmul.msk.bf16.gmra.mxu1 %vm431_vm0, %v12423_v50  ;;  %v14647_v18 = vor.u32 %v3851_v9, %v3848_v29  ;;  %v3107_v29 = vld [vmem:[#allocation2 + $0x68] sm:$0xff] }
 0x2a2   : > { %v4610_v48 = vadd.f32 %v14416_v59, %v4570_v10  ;;  %4535 = vst.msk [vmem:[#allocation2 + $0x38] sm:$0xff] %vm431_vm0, %v4499_v53  ;;  %v3402_v56 = vpop.f32.mrf.mxu2  ;;  %v5098_v15 = vshrl.u32 %v5015_v1, 16  ;;  %v5101_v44 = vshll.u32 %v5015_v1, 16 }
 0x2a3   : > { %v3477_v12 = vadd.f32 %v3402_v56, %v3104_v51  ;;  %v3106_v56 = vld [vmem:[#allocation2 + $0x60] sm:$0xff] }
 0x2a4   : > { %v4646_v7 = vmax.f32 %v4610_v48, 0.0  ;;  %v3548_v36 = vld [vmem:[#allocation2 + $0x48] sm:$0xff]  ;;  %v14609_v42 = vpop.f32.mrf.mxu0  ;;  %v5100_v47 = vrot.slane %v5098_v15, 6  ;;  %v5103_v22 = vrot.slane %v5101_v44, 7 }
 0x2a5   : > { %v4055_v4 = vadd.f32 %v3978_v11, %v3548_v36  ;;  %3513 = vst.msk [vmem:[#allocation2 + $0x50] sm:$0xff] %vm431_vm0, %v3477_v12  ;;  %11128 = vmatmul.msk.bf16.gmra.mxu3 %vm431_vm0, %v3844_v63  ;;  %v4837_v36 = vpop.permute.xlu2 %4836 }
 0x2a6   : > { %11240 = vst.msk [vmem:[%s14445_s22 + $0x2c] sm:$0xf] %vm4688_vm5, %v4646_v7  ;;  %v4980_v19 = vmul.f32 %v4827_v45, %v4646_v7  ;;  %v4126_v35 = vld [vmem:[#allocation2 + $0x40] sm:$0xff]  ;;  %v5104_v43 = vor.u32 %v5103_v22, %v5100_v47  ;;  %v14663_v45 = vld [vmem:[%s12958_s15 + $0x90] sm:$0xff] }
 0x2a7   : > { %11241 = vst.msk [vmem:[%s14445_s22 + $0x2a] sm:$0xc0] %vm4691_vm12, %v4646_v7  ;;  %v4500_v21 = vadd.f32 %v14521_v39, %v4126_v35  ;;  %v3853_v7 = vsel %vm3710_vm7, %v14593_v24, %v14647_v18 }
 0x2a8   : > { %v5016_v23 = vpack.c.bf16 %v4980_v19, %v4980_v19  ;;  %4091 = vst.msk [vmem:[#allocation2 + $0x48] sm:$0xff] %vm431_vm0, %v4055_v4  ;;  %v5105_v55 = vsel %vm14504_vm11, %v5096_v46, %v5104_v43  ;;  %v3981_v28 = vpop.f32.mrf.mxu3  ;;  %v5106_v54 = vrot.slane %v5104_v43, 4  ;;  %v14666_v4 = vld [vmem:[%s12958_s15 + $0x90] sm:$0xff] }
 0x2a9   : > { %v4571_v0 = vld [vmem:[#allocation2 + $0x38] sm:$0xff]  ;;  %4536 = vst.msk [vmem:[#allocation2 + $0x40] sm:$0xff] %vm431_vm0, %v4500_v21 }
 0x2aa   : > { %v4611_v38 = vadd.f32 %v14416_v59, %v4571_v0  ;;  %v3404_v39 = vpop.f32.mrf.mxu2  ;;  %5451 = vst.msk [vmem:[#allocation3 + $0x1c] sm:$0xf] %vm4688_vm5, %v5105_v55  ;;  %v5108_v25 = vshrl.u32 %v5016_v23, 16  ;;  %v5111_v34 = vshll.u32 %v5016_v23, 16 }
 0x2ab   : > { %v3478_v52 = vadd.f32 %v3404_v39, %v3105_v60 }
 0x2ac   : > { %v4647_v2 = vmax.f32 %v4611_v38, 0.0  ;;  %v3549_v40 = vld [vmem:[#allocation2 + $0x50] sm:$0xff]  ;;  %v14634_v32 = vpop.f32.mrf.mxu0  ;;  %v5110_v37 = vrot.slane %v5108_v25, 6  ;;  %v5113_v33 = vrot.slane %v5111_v34, 7  ;;  %v4321_v38 = vrot.slane %v14666_v4, 3 }
 0x2ad   : > { %v4056_v27 = vadd.f32 %v3981_v28, %v3549_v40  ;;  %3514 = vst.msk [vmem:[#allocation2 + $0x58] sm:$0xff] %vm431_vm0, %v3478_v52  ;;  %v3296_v28 = vrot.slane %v14663_v45, 2  ;;  %v12459_v4 = vld [vmem:[%s17018_s3 + $0x10] sm:$0xff] }
 0x2ae   : > { %11242 = vst.msk [vmem:[%s14445_s22 + $0x32] sm:$0xff] %vm431_vm0, %v4647_v2  ;;  %v4981_v14 = vmul.f32 %v4832_v13, %v4647_v2  ;;  %v5114_v1 = vor.u32 %v5113_v33, %v5110_v37  ;;  %6208 = vmatpush.bf16.msrb.mxu2 %v12459_v4 }
 0x2af   : > { %v4127_v53 = vld [vmem:[#allocation2 + $0x48] sm:$0xff]  ;;  %4092 = vst.msk [vmem:[#allocation2 + $0x50] sm:$0xff] %vm431_vm0, %v4056_v27  ;;  %11027 = vmatmul.msk.bf16.gmra.mxu2 %vm431_vm0, %v3295_v8  ;;  %11231 = vmatmul.msk.bf16.gmra.mxu0 %vm431_vm0, %v4320_v16  ;;  %v3297_v27 = vsel %vm2819_vm4, %v3294_v49, %v3296_v28 }
 0x2b0   : > { %v5017_v5 = vpack.c.bf16 %v4981_v14, %v4981_v14  ;;  %v4572_v50 = vld [vmem:[#allocation2 + $0x40] sm:$0xff]  ;;  %v4501_v30 = vadd.f32 %v14555_v26, %v4127_v53  ;;  %v5115_v10 = vsel %vm14504_vm11, %v5106_v54, %v5114_v1  ;;  %v3983_v48 = vpop.f32.mrf.mxu3  ;;  %v12397_v26 = vld [vmem:[%s12958_s15 + $0x90] sm:$0xff]  ;;  %v5116_v24 = vrot.slane %v5114_v1, 4  ;;  %v4842_v54 = vpop.permute.xlu0 %4841 }
 0x2b1   : > { %v4612_v11 = vadd.f32 %v14416_v59, %v4572_v50  ;;  %v12424_v51 = vld [vmem:[#allocation3 + $0x18] sm:$0xff]  ;;  %5452 = vst.msk [vmem:[#allocation3 + $0x20] sm:$0xf] %vm4688_vm5, %v5115_v10  ;;  %v3855_v41 = vshrl.u32 %v12397_v26, 16  ;;  %v3858_v0 = vshll.u32 %v12397_v26, 16  ;;  %v4322_v14 = vsel %vm4289_vm6, %v4319_v6, %v4321_v38 }
 0x2b2   : > { %4537 = vst.msk [vmem:[#allocation2 + $0x48] sm:$0xff] %vm431_vm0, %v4501_v30  ;;  %v3407_v15 = vpop.f32.mrf.mxu2  ;;  %v5118_v44 = vshrl.u32 %v5017_v5, 16  ;;  %v5121_v12 = vshll.u32 %v5017_v5, 16  ;;  %11360 = vmatmul.msk.bf16.gmra.mxu1 %vm431_vm0, %v12424_v51  ;;  %v12398_v26 = vld [vmem:[%s12958_s15 + $0x98] sm:$0xff] }
 0x2b3   : > { %v4648_v63 = vmax.f32 %v4612_v11, 0.0  ;;  %v3479_v62 = vadd.f32 %v3407_v15, %v3106_v56  ;;  %v3857_v9 = vrot.slane %v3855_v41, 2  ;;  %v3860_v40 = vrot.slane %v3858_v0, 3  ;;  %v3108_v56 = vld [vmem:[#allocation2 + $0x70] sm:$0xff] }
 0x2b4   : > { %v3550_v47 = vld [vmem:[#allocation2 + $0x58] sm:$0xff]  ;;  %v14660_v22 = vpop.f32.mrf.mxu0  ;;  %v5120_v19 = vrot.slane %v5118_v44, 6  ;;  %v5123_v35 = vrot.slane %v5121_v12, 7 }
 0x2b5   : > { %11243 = vst.msk [vmem:[%s14445_s22 + $0x3a] sm:$0x3f] %vm4694_vm14, %v4648_v63  ;;  %v4982_v46 = vmul.f32 %v4837_v36, %v4648_v63  ;;  %v4057_v43 = vadd.f32 %v3983_v48, %v3550_v47  ;;  %11129 = vmatmul.msk.bf16.gmra.mxu3 %vm431_vm0, %v3853_v7  ;;  %v14699_v57 = vor.u32 %v3860_v40, %v3857_v9  ;;  %v4847_v36 = vpop.permute.xlu1 %4846 }
 0x2b6   : > { %v4128_v21 = vld [vmem:[#allocation2 + $0x50] sm:$0xff]  ;;  %3515 = vst.msk [vmem:[#allocation2 + $0x60] sm:$0xff] %vm431_vm0, %v3479_v62  ;;  %v5124_v17 = vor.u32 %v5123_v35, %v5120_v19  ;;  %v14715_v35 = vld [vmem:[%s12958_s15 + $0x98] sm:$0xff] }
 0x2b7   : > { %v5018_v23 = vpack.c.bf16 %v4982_v46, %v4982_v46  ;;  %v4502_v55 = vadd.f32 %v14580_v20, %v4128_v21  ;;  %4093 = vst.msk [vmem:[#allocation2 + $0x58] sm:$0xff] %vm431_vm0, %v4057_v43  ;;  %v3862_v7 = vsel %vm3710_vm7, %v14647_v18, %v14699_v57  ;;  %v14718_v46 = vld [vmem:[%s12958_s15 + $0x98] sm:$0xff] }
 0x2b8   : > { %v5125_v60 = vsel %vm14504_vm11, %v5116_v24, %v5124_v17  ;;  %v3986_v52 = vpop.f32.mrf.mxu3  ;;  %v5126_v53 = vrot.slane %v5124_v17, 4 }
 0x2b9   : > { %v5128_v39 = vshrl.u32 %v5018_v23, 16  ;;  %v5131_v25 = vshll.u32 %v5018_v23, 16  ;;  %v4573_v34 = vld [vmem:[#allocation2 + $0x48] sm:$0xff]  ;;  %4538 = vst.msk [vmem:[#allocation2 + $0x50] sm:$0xff] %vm431_vm0, %v4502_v55  ;;  %v3864_v23 = vshrl.u32 %v12398_v26, 16  ;;  %v3867_v55 = vshll.u32 %v12398_v26, 16 }
 0x2ba   : > { %v4613_v8 = vadd.f32 %v14416_v59, %v4573_v34  ;;  %v3409_v20 = vpop.f32.mrf.mxu2  ;;  %5453 = vst.msk [vmem:[#allocation3 + $0x24] sm:$0xf] %vm4688_vm5, %v5125_v60  ;;  %v3298_v34 = vrot.slane %v14715_v35, 2 }
 0x2bb   : > { %v3480_v2 = vadd.f32 %v3409_v20, %v3107_v29  ;;  %v5130_v16 = vrot.slane %v5128_v39, 6  ;;  %v5133_v37 = vrot.slane %v5131_v25, 7 }
 0x2bc   : > { %v4649_v33 = vmax.f32 %v4613_v8, 0.0  ;;  %v14681_v13 = vpop.f32.mrf.mxu0 }
 0x2bd   : > { %v3551_v1 = vld [vmem:[#allocation2 + $0x60] sm:$0xff]  ;;  %3516 = vst.msk [vmem:[#allocation2 + $0x68] sm:$0xff] %vm431_vm0, %v3480_v2  ;;  %v5134_v5 = vor.u32 %v5133_v37, %v5130_v16  ;;  %v3866_v16 = vrot.slane %v3864_v23, 2  ;;  %v3869_v37 = vrot.slane %v3867_v55, 3 }
 0x2be   : > { %11244 = vst.msk [vmem:[%s14445_s22 + $0x40] sm:$0xff] %vm431_vm0, %v4649_v33  ;;  %v4983_v50 = vmul.f32 %v4842_v54, %v4649_v33  ;;  %v4129_v30 = vld [vmem:[#allocation2 + $0x58] sm:$0xff]  ;;  %v4058_v10 = vadd.f32 %v3986_v52, %v3551_v1  ;;  %v4323_v52 = vrot.slane %v14718_v46, 3 }
 0x2bf   : > { %v4503_v31 = vadd.f32 %v14609_v42, %v4129_v30  ;;  %11028 = vmatmul.msk.bf16.gmra.mxu2 %vm431_vm0, %v3297_v27  ;;  %11232 = vmatmul.msk.bf16.gmra.mxu0 %vm431_vm0, %v4322_v14  ;;  %v5135_v49 = vsel %vm14504_vm11, %v5126_v53, %v5134_v5  ;;  %v5136_v41 = vrot.slane %v5134_v5, 4  ;;  %v3166_v14 = vld [vmem:[%s12958_s15 + $0xa0] sm:$0x3]  ;;  %v4852_v53 = vpop.permute.xlu2 %4851  ;;  %v14751_v45 = vor.u32 %v3869_v37, %v3866_v16 }
 0x2c0   : > { %v5019_v6 = vpack.c.bf16 %v4983_v50, %v4983_v50  ;;  %v4574_v11 = vld [vmem:[#allocation2 + $0x50] sm:$0xff]  ;;  %4094 = vst.msk [vmem:[#allocation2 + $0x60] sm:$0xff] %vm431_vm0, %v4058_v10  ;;  %v3988_v42 = vpop.f32.mrf.mxu3  ;;  %v3299_v50 = vsel %vm2819_vm4, %v3296_v28, %v3298_v34  ;;  %v4324_v30 = vsel %vm4289_vm6, %v4321_v38, %v4323_v52  ;;  %v3611_v10 = vld [vmem:[%s12958_s15 + $0xa0] sm:$0x7]  ;;  %v3245_v28 = vunpack.c.l.b16 %v3166_v14 }
 0x2c1   : > { %v4614_v48 = vadd.f32 %v14416_v59, %v4574_v11  ;;  %4539 = vst.msk [vmem:[#allocation2 + $0x58] sm:$0xff] %vm431_vm0, %v4503_v31  ;;  %v12425_v51 = vld [vmem:[#allocation3 + $0x20] sm:$0xff]  ;;  %v12499_v38 = vld [vmem:[%s17018_s3 + $0x30] sm:$0xff] }
 0x2c2   : > { %v3412_v15 = vpop.f32.mrf.mxu2  ;;  %v5138_v44 = vshrl.u32 %v5019_v6, 16  ;;  %v5141_v12 = vshll.u32 %v5019_v6, 16  ;;  %5454 = vst.msk [vmem:[#allocation3 + $0x28] sm:$0xf] %vm4688_vm5, %v5135_v49  ;;  %11361 = vmatmul.msk.bf16.gmra.mxu1 %vm431_vm0, %v12425_v51  ;;  %v4190_v6 = vld [vmem:[%s12958_s15 + $0xa0] sm:$0x7]  ;;  %7098 = vmatpush.bf16.msrb.mxu0 %v12499_v38 }
 0x2c3   : > { %v4650_v63 = vmax.f32 %v4614_v48, 0.0  ;;  %v3481_v62 = vadd.f32 %v3412_v15, %v3108_v56 }
 0x2c4   : > { %v3552_v47 = vld [vmem:[#allocation2 + $0x68] sm:$0xff]  ;;  %v14712_v19 = vpop.f32.mrf.mxu0  ;;  %v5140_v43 = vrot.slane %v5138_v44, 6  ;;  %v5143_v21 = vrot.slane %v5141_v12, 7  ;;  %v3690_v12 = vunpack.c.l.b16 %v3611_v10 }
 0x2c5   : > { %11245 = vst.msk [vmem:[%s14445_s22 + $0x48] sm:$0xff] %vm431_vm0, %v4650_v63  ;;  %v4984_v24 = vmul.f32 %v4847_v36, %v4650_v63  ;;  %v4059_v17 = vadd.f32 %v3988_v42, %v3552_v47  ;;  %11130 = vmatmul.msk.bf16.gmra.mxu3 %vm431_vm0, %v3862_v7  ;;  %v4269_v63 = vunpack.c.l.b16 %v4190_v6  ;;  %v3111_v6 = vld [vmem:[#allocation2 + $0x88] sm:$0xff] }
 0x2c6   : > { %3517 = vst.msk [vmem:[#allocation2 + $0x70] sm:$0xff] %vm431_vm0, %v3481_v62  ;;  %v5144_v18 = vor.u32 %v5143_v21, %v5140_v43  ;;  %v3110_v43 = vld [vmem:[#allocation2 + $0x80] sm:$0xff]  ;;  %v3709_v55 = vpack.c.b16 %v3690_v12, %v3690_v12 }
 0x2c7   : > { %v5020_v0 = vpack.c.bf16 %v4984_v24, %v4984_v24  ;;  %v4130_v60 = vld [vmem:[#allocation2 + $0x60] sm:$0xff]  ;;  %4095 = vst.msk [vmem:[#allocation2 + $0x68] sm:$0xff] %vm431_vm0, %v4059_v17  ;;  %v3871_v24 = vsel %vm3710_vm7, %v14699_v57, %v14751_v45  ;;  %v3264_v17 = vpack.c.b16 %v3245_v28, %v3245_v28 }
 0x2c8   : > { %v4575_v39 = vld [vmem:[#allocation2 + $0x58] sm:$0xff]  ;;  %v4504_v25 = vadd.f32 %v14634_v32, %v4130_v60  ;;  %v5145_v8 = vsel %vm14504_vm11, %v5136_v41, %v5144_v18  ;;  %v3991_v2 = vpop.f32.mrf.mxu3  ;;  %v5146_v11 = vrot.slane %v5144_v18, 4  ;;  %v3873_v37 = vshrl.u32 %v3709_v55, 16 }
 0x2c9   : > { %v5148_v29 = vshrl.u32 %v5020_v0, 16  ;;  %v5151_v20 = vshll.u32 %v5020_v0, 16  ;;  %v4615_v9 = vadd.f32 %v14416_v59, %v4575_v39  ;;  %5455 = vst.msk [vmem:[#allocation3 + $0x2c] sm:$0xf] %vm4688_vm5, %v5145_v8  ;;  %v3109_v32 = vld [vmem:[#allocation2 + $0x78] sm:$0xff]  ;;  %v4288_v39 = vpack.c.b16 %v4269_v63, %v4269_v63 }
 0x2ca   : > { %4540 = vst.msk [vmem:[#allocation2 + $0x60] sm:$0xff] %vm431_vm0, %v4504_v25  ;;  %v3414_v40 = vpop.f32.mrf.mxu2  ;;  %v4857_v25 = vpop.permute.xlu0 %4856 }
 0x2cb   : > { %v4651_v33 = vmax.f32 %v4615_v9, 0.0  ;;  %v3482_v27 = vadd.f32 %v3414_v40, %v3109_v32  ;;  %v5150_v54 = vrot.slane %v5148_v29, 6  ;;  %v5153_v1 = vrot.slane %v5151_v20, 7 }
 0x2cc   : > { %v14734_v5 = vpop.f32.mrf.mxu0  ;;  %v3300_v40 = vrot.slane %v3264_v17, 2 }
 0x2cd   : > { %11246 = vst.msk [vmem:[%s14445_s22 + $0x4e] sm:$0xfc] %vm4679_vm15, %v4651_v33  ;;  %v4985_v31 = vmul.f32 %v4852_v53, %v4651_v33  ;;  %v3553_v49 = vld [vmem:[#allocation2 + $0x70] sm:$0xff]  ;;  %v5154_v48 = vor.u32 %v5153_v1, %v5150_v54  ;;  %v3876_v33 = vshll.u32 %v3709_v55, 16  ;;  %v4325_v1 = vrot.slane %v4288_v39, 3 }
 0x2ce   : > { %v4131_v42 = vld [vmem:[#allocation2 + $0x68] sm:$0xff]  ;;  %v4060_v51 = vadd.f32 %v3991_v2, %v3553_v49  ;;  %3518 = vst.msk [vmem:[#allocation2 + $0x78] sm:$0xff] %vm431_vm0, %v3482_v27  ;;  %v12479_v2 = vld [vmem:[%s17018_s3 + $0x20] sm:$0xff] }
 0x2cf   : > { %v5021_v56 = vpack.c.bf16 %v4985_v31, %v4985_v31  ;;  %v4505_v15 = vadd.f32 %v14660_v22, %v4131_v42  ;;  %11029 = vmatmul.msk.bf16.gmra.mxu2 %vm431_vm0, %v3299_v50  ;;  %11233 = vmatmul.msk.bf16.gmra.mxu0 %vm431_vm0, %v4324_v30  ;;  %v5155_v44 = vsel %vm14504_vm11, %v5146_v11, %v5154_v48  ;;  %v5156_v29 = vrot.slane %v5154_v48, 4 }
 0x2d0   : > { %4096 = vst.msk [vmem:[#allocation2 + $0x70] sm:$0xff] %vm431_vm0, %v4060_v51  ;;  %v12426_v26 = vld [vmem:[#allocation3 + $0x28] sm:$0xff]  ;;  %v3993_v7 = vpop.f32.mrf.mxu3  ;;  %6653 = vmatpush.bf16.msrb.mxu3 %v12479_v2  ;;  %v3875_v11 = vrot.slane %v3873_v37, 2  ;;  %v3878_v48 = vrot.slane %v3876_v33, 3  ;;  %v4326_v38 = vsel %vm4289_vm6, %v4323_v52, %v4325_v1 }
 0x2d1   : > { %v4576_v62 = vld [vmem:[#allocation2 + $0x60] sm:$0xff]  ;;  %4541 = vst.msk [vmem:[#allocation2 + $0x68] sm:$0xff] %vm431_vm0, %v4505_v15  ;;  %v5158_v36 = vshrl.u32 %v5021_v56, 16  ;;  %v5161_v22 = vshll.u32 %v5021_v56, 16  ;;  %v11585_v1 = vld [vmem:[#allocation3 + $0x8] sm:$0xe] }
 0x2d2   : > { %v4616_v47 = vadd.f32 %v14416_v59, %v4576_v62  ;;  %v3417_v21 = vpop.f32.mrf.mxu2  ;;  %5456 = vst.msk [vmem:[#allocation3 + $0x30] sm:$0xf] %vm4688_vm5, %v5155_v44  ;;  %11362 = vmatmul.msk.bf16.gmra.mxu1 %vm431_vm0, %v12426_v26  ;;  %v14796_v56 = vld [vmem:[#allocation3] sm:$0xff]  ;;  %v3879_v46 = vor.u32 %v3878_v48, %v3875_v11 }
 0x2d3   : > { %v3483_v41 = vadd.f32 %v3417_v21, %v3110_v43  ;;  %v5160_v18 = vrot.slane %v5158_v36, 6  ;;  %v5163_v23 = vrot.slane %v5161_v22, 7  ;;  %v5990_v36 = vshll.u32 %v14796_v56, 16  ;;  %v14811_v21 = vld [vmem:[#allocation3 + $0x8] sm:$0xff]  ;;  %v11483_v48 = vld [vmem:[#allocation3] sm:$0xe] }
 0x2d4   : > { %v4652_v0 = vmax.f32 %v4616_v47, 0.0  ;;  %v14772_v60 = vpop.f32.mrf.mxu0 }
 0x2d5   : > { %v3554_v8 = vld [vmem:[#allocation2 + $0x78] sm:$0xff]  ;;  %3519 = vst.msk [vmem:[#allocation2 + $0x80] sm:$0xff] %vm431_vm0, %v3483_v41  ;;  %v5164_v57 = vor.u32 %v5163_v23, %v5160_v18  ;;  %11131 = vmatmul.msk.bf16.gmra.mxu3 %vm431_vm0, %v3871_v24  ;;  %v5690_v42 = vpop.f32.mrf.mxu1  ;;  %v3112_v18 = vld [vmem:[#allocation2 + $0x90] sm:$0xff]  ;;  %v5992_v2 = vrot.slane %v5990_v36, 1 }
 0x2d6   : > { %11247 = vst.msk [vmem:[%s14445_s22 + $0x56] sm:$0xff] %vm431_vm0, %v4652_v0  ;;  %v4986_v20 = vmul.f32 %v4857_v25, %v4652_v0  ;;  %v4061_v9 = vadd.f32 %v3993_v7, %v3554_v8  ;;  %v3880_v0 = vsel %vm3710_vm7, %v14751_v45, %v3879_v46 }
 0x2d7   : > { %v4132_v32 = vld [vmem:[#allocation2 + $0x70] sm:$0xff]  ;;  %v5165_v16 = vsel %vm14504_vm11, %v5156_v29, %v5164_v57  ;;  %5780 = vst.msk [vmem:[#allocation2] sm:$0xff] %vm431_vm0, %v5690_v42  ;;  %v5166_v12 = vrot.slane %v5164_v57, 4 }
 0x2d8   : > { %v5022_v27 = vpack.c.bf16 %v4986_v20, %v4986_v20  ;;  %v4577_v14 = vld [vmem:[#allocation2 + $0x68] sm:$0xff]  ;;  %v4506_v54 = vadd.f32 %v14681_v13, %v4132_v32  ;;  %4097 = vst.msk [vmem:[#allocation2 + $0x78] sm:$0xff] %vm431_vm0, %v4061_v9  ;;  %v3996_v50 = vpop.f32.mrf.mxu3  ;;  %v3301_v13 = vsel %vm2819_vm4, %v3298_v34, %v3300_v40  ;;  %v5988_v20 = vshrl.u32 %v14796_v56, 16  ;;  %v4867_v9 = vpop.permute.xlu2 %4866 }
 0x2d9   : > { %v4617_v53 = vadd.f32 %v14416_v59, %v4577_v14  ;;  %5457 = vst.msk [vmem:[#allocation3 + $0x34] sm:$0xf] %vm4688_vm5, %v5165_v16  ;;  %v4862_v59 = vpop.permute.xlu1 %4861  ;;  %v5995_v32 = vshll.u32 %v14811_v21, 16  ;;  %v12481_v40 = vld [vmem:[#allocation3 + $0x8] sm:$0xf0] }
 0x2da   : > { %v5168_v30 = vshrl.u32 %v5022_v27, 16  ;;  %v5171_v10 = vshll.u32 %v5022_v27, 16  ;;  %4542 = vst.msk [vmem:[#allocation2 + $0x70] sm:$0xff] %vm431_vm0, %v4506_v54  ;;  %v3419_v31 = vpop.f32.mrf.mxu2  ;;  %v14833_v27 = vld [vmem:[#allocation3 + $0x10] sm:$0xff] }
 0x2db   : > { %v4653_v49 = vmax.f32 %v4617_v53, 0.0  ;;  %v3484_v28 = vadd.f32 %v3419_v31, %v3111_v6  ;;  %v3113_v6 = vld [vmem:[#allocation2 + $0x98] sm:$0xff]  ;;  %v14840_v11 = vrot.slane %v5995_v32, 1 }
 0x2dc   : > { %v3555_v51 = vld [vmem:[#allocation2 + $0x80] sm:$0xff]  ;;  %v14791_v4 = vpop.f32.mrf.mxu0  ;;  %v5170_v15 = vrot.slane %v5168_v30, 6  ;;  %v5173_v44 = vrot.slane %v5171_v10, 7  ;;  %v11586_v10 = vor.u32 %v12481_v40, %v11585_v1 }
 0x2dd   : > { %11248 = vst.msk [vmem:[%s14445_s22 + $0x5e] sm:$0x3] %vm4682_vm8, %v4653_v49  ;;  %v4987_v35 = vmul.f32 %v4862_v59, %v4653_v49  ;;  %v4062_v34 = vadd.f32 %v3996_v50, %v3555_v51  ;;  %v5692_v8 = vpop.f32.mrf.mxu1 }
 0x2de   : > { %11249 = vst.msk [vmem:[%s14445_s22 + $0x5c] sm:$0xf0] %vm4685_vm9, %v4653_v49  ;;  %v5174_v26 = vor.u32 %v5173_v44, %v5170_v15 }
 0x2df   : > { %v5023_v63 = vpack.c.bf16 %v4987_v35, %v4987_v35  ;;  %v4133_v62 = vld [vmem:[#allocation2 + $0x78] sm:$0xff]  ;;  %4098 = vst.msk [vmem:[#allocation2 + $0x80] sm:$0xff] %vm431_vm0, %v4062_v34  ;;  %11030 = vmatmul.msk.bf16.gmra.mxu2 %vm431_vm0, %v3301_v13  ;;  %11234 = vmatmul.msk.bf16.gmra.mxu0 %vm431_vm0, %v4326_v38  ;;  %v5993_v13 = vor.u32 %v5992_v2, %v5988_v20  ;;  %v12461_v38 = vld [vmem:[#allocation3] sm:$0xf0]  ;;  %v6988_v34 = vrot.slane %v11586_v10, 1 }
 0x2e0   : > { %v4507_v52 = vadd.f32 %v14712_v19, %v4133_v62  ;;  %3520 = vst.msk [vmem:[#allocation2 + $0x88] sm:$0xff] %vm431_vm0, %v3484_v28  ;;  %v12427_v7 = vld [vmem:[#allocation3 + $0x30] sm:$0xff]  ;;  %v5175_v22 = vsel %vm14504_vm11, %v5166_v12, %v5174_v26  ;;  %v3998_v43 = vpop.f32.mrf.mxu3  ;;  %v14817_v19 = vld [vmem:[%s17017_s2] ss:$0 sm:$0xff]  ;;  %v5176_v16 = vrot.slane %v5174_v26, 4  ;;  %v6989_v28 = vrot.slane %v14833_v27, 1 }
 0x2e1   : > { %v4578_v47 = vld [vmem:[#allocation2 + $0x70] sm:$0xff]  ;;  %v5178_v24 = vshrl.u32 %v5023_v63, 16  ;;  %v5181_v17 = vshll.u32 %v5023_v63, 16  ;;  %5458 = vst.msk [vmem:[#allocation3 + $0x38] sm:$0xf] %vm4688_vm5, %v5175_v22  ;;  %v4872_v63 = vpop.permute.xlu0 %4871  ;;  %v5998_v46 = vsel %vm792_vm1, %v5993_v13, %v14840_v11  ;;  %v3114_v20 = vld [vmem:[#allocation2 + $0xa0] sm:$0xff] }
 0x2e2   : > { %v4618_v41 = vadd.f32 %v14817_v19, %v4578_v47  ;;  %4543 = vst.msk [vmem:[#allocation2 + $0x78] sm:$0xff] %vm431_vm0, %v4507_v52  ;;  %v3422_v23 = vpop.f32.mrf.mxu2  ;;  %11363 = vmatmul.msk.bf16.gmra.mxu1 %vm431_vm0, %v12427_v7  ;;  %v14850_v52 = vld [vmem:[#allocation3 + $0x8] sm:$0xff]  ;;  %v11484_v7 = vor.u32 %v12461_v38, %v11483_v48  ;;  %v6990_v22 = vsel %vm1349_vm2, %v6988_v34, %v6989_v28 }
 0x2e3   : > { %v3485_v55 = vadd.f32 %v3422_v23, %v3112_v18  ;;  %v5180_v39 = vrot.slane %v5178_v24, 6  ;;  %v5183_v25 = vrot.slane %v5181_v17, 7  ;;  %5781 = vst.msk [vmem:[#allocation2 + $0x8] sm:$0xff] %vm431_vm0, %v5692_v8  ;;  %v14866_v8 = vld [vmem:[#allocation3 + $0x10] sm:$0xff] }
 0x2e4   : > { %v4654_v29 = vmax.f32 %v4618_v41, 0.0  ;;  %v14824_v57 = vpop.f32.mrf.mxu0 }
 0x2e5   : > { %3521 = vst.msk [vmem:[#allocation2 + $0x90] sm:$0xff] %vm431_vm0, %v3485_v55  ;;  %v5184_v37 = vor.u32 %v5183_v25, %v5180_v39  ;;  %11132 = vmatmul.msk.bf16.gmra.mxu3 %vm431_vm0, %v3880_v0  ;;  %v6543_v39 = vrot.slane %v11484_v7, 1  ;;  %v6544_v25 = vrot.slane %v14850_v52, 1 }
 0x2e6   : > { %11250 = vst.msk [vmem:[%s14445_s22 + $0x64] sm:$0xff] %vm431_vm0, %v4654_v29  ;;  %v4988_v45 = vmul.f32 %v4867_v9, %v4654_v29  ;;  %v4134_v33 = vld [vmem:[#allocation2 + $0x80] sm:$0xff] }
 0x2e7   : > { %v4508_v14 = vadd.f32 %v14734_v5, %v4134_v33  ;;  %v3556_v54 = vld [vmem:[#allocation2 + $0x88] sm:$0xff]  ;;  %v5185_v53 = vsel %vm14504_vm11, %v5176_v16, %v5184_v37  ;;  %v5186_v47 = vrot.slane %v5184_v37, 4  ;;  %v4877_v37 = vpop.permute.xlu1 %4876 }
 0x2e8   : > { %v5024_v50 = vpack.c.bf16 %v4988_v45, %v4988_v45  ;;  %v4063_v30 = vadd.f32 %v3998_v43, %v3556_v54  ;;  %5459 = vst.msk [vmem:[#allocation3 + $0x3c] sm:$0xf] %vm4688_vm5, %v5185_v53  ;;  %v4001_v49 = vpop.f32.mrf.mxu3  ;;  %v6545_v53 = vsel %vm1349_vm2, %v6543_v39, %v6544_v25 }
 0x2e9   : > { %v4579_v31 = vld [vmem:[#allocation2 + $0x78] sm:$0xff]  ;;  %4544 = vst.msk [vmem:[#allocation2 + $0x80] sm:$0xff] %vm431_vm0, %v4508_v14 }
 0x2ea   : > { %v5188_v5 = vshrl.u32 %v5024_v50, 16  ;;  %v5191_v42 = vshll.u32 %v5024_v50, 16  ;;  %v4619_v59 = vadd.f32 %v14817_v19, %v4579_v31  ;;  %4099 = vst.msk [vmem:[#allocation2 + $0x88] sm:$0xff] %vm431_vm0, %v4063_v30  ;;  %v3424_v51 = vpop.f32.mrf.mxu2  ;;  %v6003_v50 = vshll.u32 %v14866_v8, 16  ;;  %v14882_v30 = vld [vmem:[#allocation3 + $0x18] sm:$0xff] }
 0x2eb   : > { %v3486_v56 = vadd.f32 %v3424_v51, %v3113_v6  ;;  %v5999_v51 = vshrl.u32 %v14811_v21, 16 }
 0x2ec   : > { %v4655_v15 = vmax.f32 %v4619_v59, 0.0  ;;  %v3557_v44 = vld [vmem:[#allocation2 + $0x90] sm:$0xff]  ;;  %v14845_v35 = vpop.f32.mrf.mxu0  ;;  %v5190_v12 = vrot.slane %v5188_v5, 6  ;;  %v5193_v26 = vrot.slane %v5191_v42, 7  ;;  %v14889_v38 = vrot.slane %v6003_v50, 1  ;;  %v14932_v50 = vld [vmem:[#allocation3 + $0x20] sm:$0xff] }
 0x2ed   : > { %v4064_v62 = vadd.f32 %v4001_v49, %v3557_v44  ;;  %3522 = vst.msk [vmem:[#allocation2 + $0x98] sm:$0xff] %vm431_vm0, %v3486_v56  ;;  %v3115_v56 = vld [vmem:[#allocation2 + $0xa8] sm:$0xff]  ;;  %v6991_v44 = vrot.slane %v14882_v30, 1 }
 0x2ee   : > { %11251 = vst.msk [vmem:[%s14445_s22 + $0x6c] sm:$0xf] %vm4688_vm5, %v4655_v15  ;;  %v4989_v36 = vmul.f32 %v4872_v63, %v4655_v15  ;;  %v5194_v43 = vor.u32 %v5193_v26, %v5190_v12  ;;  %v6001_v12 = vor.u32 %v5999_v51, %v14840_v11 }
 0x2ef   : > { %11252 = vst.msk [vmem:[%s14445_s22 + $0x6a] sm:$0xc0] %vm4691_vm12, %v4655_v15  ;;  %11459 = vmatmul.msk.bf16.vlgmr.msrb.gmra.mxu2 %vm431_vm0, %v5998_v46  ;;  %11663 = vmatmul.msk.bf16.vlgmr.msrb.gmra.mxu0 %vm431_vm0, %v6990_v22  ;;  %v12428_v24 = vld [vmem:[#allocation3 + $0x38] sm:$0xff]  ;;  %v6992_v11 = vsel %vm1349_vm2, %v6989_v28, %v6991_v44 }
 0x2f0   : > { %v5025_v17 = vpack.c.bf16 %v4989_v36, %v4989_v36  ;;  %v4580_v41 = vld [vmem:[#allocation2 + $0x80] sm:$0xff]  ;;  %4100 = vst.msk [vmem:[#allocation2 + $0x90] sm:$0xff] %vm431_vm0, %v4064_v62  ;;  %v5195_v18 = vsel %vm14504_vm11, %v5186_v47, %v5194_v43  ;;  %v4003_v0 = vpop.f32.mrf.mxu3  ;;  %v5196_v10 = vrot.slane %v5194_v43, 4  ;;  %v6006_v7 = vsel %vm792_vm1, %v6001_v12, %v14889_v38  ;;  %v14901_v36 = vld [vmem:[#allocation3 + $0x10] sm:$0xff]  ;;  %v3117_v12 = vld [vmem:[#allocation2 + $0xb8] sm:$0xff] }
 0x2f1   : > { %v4620_v23 = vadd.f32 %v14817_v19, %v4580_v41  ;;  %v4135_v55 = vld [vmem:[#allocation2 + $0x88] sm:$0xff]  ;;  %5460 = vst.msk [vmem:[#allocation3 + $0x40] sm:$0xf] %vm4688_vm5, %v5195_v18  ;;  %v4882_v41 = vpop.permute.xlu2 %4881  ;;  %v6546_v28 = vrot.slane %v14901_v36, 1 }
 0x2f2   : > { %v4509_v29 = vadd.f32 %v14772_v60, %v4135_v55  ;;  %v3427_v9 = vpop.f32.mrf.mxu2  ;;  %v5198_v2 = vshrl.u32 %v5025_v17, 16  ;;  %v5201_v32 = vshll.u32 %v5025_v17, 16  ;;  %11364 = vmatmul.msk.bf16.gmra.mxu1 %vm431_vm0, %v12428_v24 }
 0x2f3   : > { %v4656_v40 = vmax.f32 %v4620_v23, 0.0  ;;  %v3487_v16 = vadd.f32 %v3427_v9, %v3114_v20  ;;  %v3116_v9 = vld [vmem:[#allocation2 + $0xb0] sm:$0xff] }
 0x2f4   : > { %4545 = vst.msk [vmem:[#allocation2 + $0x88] sm:$0xff] %vm431_vm0, %v4509_v29  ;;  %v3558_v45 = vld [vmem:[#allocation2 + $0x98] sm:$0xff]  ;;  %v14872_v33 = vpop.f32.mrf.mxu0  ;;  %v5200_v14 = vrot.slane %v5198_v2, 6  ;;  %v5203_v54 = vrot.slane %v5201_v32, 7 }
 0x2f5   : > { %11253 = vst.msk [vmem:[%s14445_s22 + $0x72] sm:$0xff] %vm431_vm0, %v4656_v40  ;;  %v4990_v1 = vmul.f32 %v4877_v37, %v4656_v40  ;;  %v4065_v60 = vadd.f32 %v4003_v0, %v3558_v45  ;;  %11561 = vmatmul.msk.bf16.vlgmr.msrb.gmra.mxu3 %vm431_vm0, %v6545_v53  ;;  %v14917_v29 = vld [vmem:[#allocation3 + $0x18] sm:$0xff] }
 0x2f6   : > { %3523 = vst.msk [vmem:[#allocation2 + $0xa0] sm:$0xff] %vm431_vm0, %v3487_v16  ;;  %v5204_v31 = vor.u32 %v5203_v54, %v5200_v14  ;;  %v4887_v54 = vpop.permute.xlu0 %4886  ;;  %v6011_v53 = vshll.u32 %v14917_v29, 16 }
 0x2f7   : > { %v5026_v49 = vpack.c.bf16 %v4990_v1, %v4990_v1  ;;  %v4136_v6 = vld [vmem:[#allocation2 + $0x90] sm:$0xff]  ;;  %4101 = vst.msk [vmem:[#allocation2 + $0x98] sm:$0xff] %vm431_vm0, %v4065_v60  ;;  %v6547_v60 = vsel %vm1349_vm2, %v6544_v25, %v6546_v28 }
 0x2f8   : > { %v4510_v13 = vadd.f32 %v14791_v4, %v4136_v6  ;;  %v5205_v48 = vsel %vm14504_vm11, %v5196_v10, %v5204_v31  ;;  %v4006_v59 = vpop.f32.mrf.mxu3  ;;  %v5206_v17 = vrot.slane %v5204_v31, 4  ;;  %v14940_v51 = vrot.slane %v6011_v53, 1 }
 0x2f9   : > { %v5208_v5 = vshrl.u32 %v5026_v49, 16  ;;  %v5211_v42 = vshll.u32 %v5026_v49, 16  ;;  %5461 = vst.msk [vmem:[#allocation3 + $0x44] sm:$0xf] %vm4688_vm5, %v5205_v48 }
 0x2fa   : > { %4546 = vst.msk [vmem:[#allocation2 + $0x90] sm:$0xff] %vm431_vm0, %v4510_v13  ;;  %v3429_v15 = vpop.f32.mrf.mxu2 }
 0x2fb   : > { %v4581_v34 = vld [vmem:[#allocation2 + $0x88] sm:$0xff]  ;;  %v3488_v4 = vadd.f32 %v3429_v15, %v3115_v56  ;;  %v5210_v26 = vrot.slane %v5208_v5, 6  ;;  %v5213_v63 = vrot.slane %v5211_v42, 7  ;;  %v6993_v56 = vrot.slane %v14932_v50, 1 }
 0x2fc   : > { %v4621_v62 = vadd.f32 %v14817_v19, %v4581_v34  ;;  %v14896_v21 = vpop.f32.mrf.mxu0 }
 0x2fd   : > { %v3559_v46 = vld [vmem:[#allocation2 + $0xa0] sm:$0xff]  ;;  %3524 = vst.msk [vmem:[#allocation2 + $0xa8] sm:$0xff] %vm431_vm0, %v3488_v4  ;;  %v5214_v22 = vor.u32 %v5213_v63, %v5210_v26 }
 0x2fe   : > { %v4657_v47 = vmax.f32 %v4621_v62, 0.0  ;;  %v4137_v43 = vld [vmem:[#allocation2 + $0x98] sm:$0xff]  ;;  %v4066_v24 = vadd.f32 %v4006_v59, %v3559_v46  ;;  %v6007_v59 = vshrl.u32 %v14866_v8, 16 }
 0x2ff   : > { %v4511_v18 = vadd.f32 %v14824_v57, %v4137_v43  ;;  %11460 = vmatmul.msk.bf16.gmra.mxu2 %vm431_vm0, %v6006_v7  ;;  %11664 = vmatmul.msk.bf16.gmra.mxu0 %vm431_vm0, %v6992_v11  ;;  %v5215_v0 = vsel %vm14504_vm11, %v5206_v17, %v5214_v22  ;;  %v5216_v48 = vrot.slane %v5214_v22, 4  ;;  %v4892_v7 = vpop.permute.xlu1 %4891  ;;  %v14953_v17 = vld [vmem:[#allocation3 + $0x18] sm:$0xff] }
 0x300   : > { %11254 = vst.msk [vmem:[%s14445_s22 + $0x7a] sm:$0x3f] %vm4694_vm14, %v4657_v47  ;;  %v4991_v23 = vmul.f32 %v4882_v41, %v4657_v47  ;;  %v12429_v55 = vld [vmem:[#allocation3 + $0x40] sm:$0xff]  ;;  %v4008_v27 = vpop.f32.mrf.mxu3  ;;  %v6009_v47 = vor.u32 %v6007_v59, %v14889_v38  ;;  %v6994_v38 = vsel %vm1349_vm2, %v6991_v44, %v6993_v56 }
 0x301   : > { %v4582_v39 = vld [vmem:[#allocation2 + $0x90] sm:$0xff]  ;;  %4547 = vst.msk [vmem:[#allocation2 + $0x98] sm:$0xff] %vm431_vm0, %v4511_v18  ;;  %v3118_v44 = vld [vmem:[#allocation2 + $0xc0] sm:$0xff] }
 0x302   : > { %v5027_v57 = vpack.c.bf16 %v4991_v23, %v4991_v23  ;;  %v4622_v20 = vadd.f32 %v14817_v19, %v4582_v39  ;;  %4102 = vst.msk [vmem:[#allocation2 + $0xa0] sm:$0xff] %vm431_vm0, %v4066_v24  ;;  %v3432_v2 = vpop.f32.mrf.mxu2  ;;  %11365 = vmatmul.msk.bf16.gmra.mxu1 %vm431_vm0, %v12429_v55  ;;  %v6014_v18 = vsel %vm792_vm1, %v6009_v47, %v14940_v51 }
 0x303   : > { %v3489_v32 = vadd.f32 %v3432_v2, %v3116_v9  ;;  %5462 = vst.msk [vmem:[#allocation3 + $0x48] sm:$0xf] %vm4688_vm5, %v5215_v0 }
 0x304   : > { %v4658_v40 = vmax.f32 %v4622_v20, 0.0  ;;  %v3560_v16 = vld [vmem:[#allocation2 + $0xa8] sm:$0xff]  ;;  %v14923_v37 = vpop.f32.mrf.mxu0  ;;  %v5218_v45 = vshrl.u32 %v5027_v57, 16  ;;  %v5221_v14 = vshll.u32 %v5027_v57, 16  ;;  %v6548_v20 = vrot.slane %v14953_v17, 1 }
 0x305   : > { %v4067_v1 = vadd.f32 %v4008_v27, %v3560_v16  ;;  %3525 = vst.msk [vmem:[#allocation2 + $0xb0] sm:$0xff] %vm431_vm0, %v3489_v32  ;;  %11562 = vmatmul.msk.bf16.gmra.mxu3 %vm431_vm0, %v6547_v60  ;;  %v14975_v16 = vld [vmem:[#allocation3 + $0x20] sm:$0xff] }
 0x306   : > { %11255 = vst.msk [vmem:[%s14445_s22 + $0x80] sm:$0xff] %vm431_vm0, %v4658_v40  ;;  %v4992_v10 = vmul.f32 %v4887_v54, %v4658_v40  ;;  %v5220_v31 = vrot.slane %v5218_v45, 6  ;;  %v5223_v49 = vrot.slane %v5221_v14, 7  ;;  %v12519_v40 = vld [vmem:[%s17018_s3 + $0x40] sm:$0xff] }
 0x307   : > { %4103 = vst.msk [vmem:[#allocation2 + $0xa8] sm:$0xff] %vm431_vm0, %v4067_v1  ;;  %7676 = vmatpush.bf16.msrb.mxu1 %v12519_v40 }
 0x308   : > { %v5028_v6 = vpack.c.bf16 %v4992_v10, %v4992_v10  ;;  %v4583_v13 = vld [vmem:[#allocation2 + $0x98] sm:$0xff]  ;;  %v5224_v5 = vor.u32 %v5223_v49, %v5220_v31  ;;  %v4011_v42 = vpop.f32.mrf.mxu3  ;;  %v6549_v31 = vsel %vm1349_vm2, %v6546_v28, %v6548_v20 }
 0x309   : > { %v4623_v52 = vadd.f32 %v14817_v19, %v4583_v13  ;;  %v4138_v25 = vld [vmem:[#allocation2 + $0xa0] sm:$0xff] }
 0x30a   : > { %v5228_v15 = vshrl.u32 %v5028_v6, 16  ;;  %v5231_v34 = vshll.u32 %v5028_v6, 16  ;;  %v4512_v4 = vadd.f32 %v14845_v35, %v4138_v25  ;;  %v3434_v26 = vpop.f32.mrf.mxu2  ;;  %v5225_v63 = vsel %vm14504_vm11, %v5216_v48, %v5224_v5  ;;  %v4897_v25 = vpop.permute.xlu2 %4896 }
 0x30b   : > { %v4659_v62 = vmax.f32 %v4623_v52, 0.0  ;;  %v3490_v46 = vadd.f32 %v3434_v26, %v3117_v12  ;;  %5463 = vst.msk [vmem:[#allocation3 + $0x4c] sm:$0xf] %vm4688_vm5, %v5225_v63  ;;  %v5226_v23 = vrot.slane %v5224_v5, 4  ;;  %v6019_v5 = vshll.u32 %v14975_v16, 16  ;;  %v14992_v52 = vld [vmem:[#allocation3 + $0x28] sm:$0xff] }
 0x30c   : > { %4548 = vst.msk [vmem:[#allocation2 + $0xa0] sm:$0xff] %vm431_vm0, %v4512_v4  ;;  %v3561_v8 = vld [vmem:[#allocation2 + $0xb0] sm:$0xff]  ;;  %v14948_v22 = vpop.f32.mrf.mxu0  ;;  %v5230_v43 = vrot.slane %v5228_v15, 6  ;;  %v5233_v24 = vrot.slane %v5231_v34, 7 }
 0x30d   : > { %11256 = vst.msk [vmem:[%s14445_s22 + $0x88] sm:$0xff] %vm431_vm0, %v4659_v62  ;;  %v4993_v35 = vmul.f32 %v4892_v7, %v4659_v62  ;;  %v4068_v11 = vadd.f32 %v4011_v42, %v3561_v8  ;;  %v6015_v62 = vshrl.u32 %v14917_v29, 16  ;;  %v6995_v7 = vrot.slane %v14992_v52, 1 }
 0x30e   : > { %v4139_v41 = vld [vmem:[#allocation2 + $0xa8] sm:$0xff]  ;;  %3526 = vst.msk [vmem:[#allocation2 + $0xb8] sm:$0xff] %vm431_vm0, %v3490_v46  ;;  %v5234_v55 = vor.u32 %v5233_v24, %v5230_v43  ;;  %v5695_v27 = vpop.f32.mrf.mxu1  ;;  %v15004_v46 = vrot.slane %v6019_v5, 1  ;;  %v4902_v43 = vpop.permute.xlu0 %4901 }
 0x30f   : > { %v5029_v0 = vpack.c.bf16 %v4993_v35, %v4993_v35  ;;  %v4513_v39 = vadd.f32 %v14872_v33, %v4139_v41  ;;  %4104 = vst.msk [vmem:[#allocation2 + $0xb0] sm:$0xff] %vm431_vm0, %v4068_v11  ;;  %11461 = vmatmul.msk.bf16.gmra.mxu2 %vm431_vm0, %v6014_v18  ;;  %11665 = vmatmul.msk.bf16.gmra.mxu0 %vm431_vm0, %v6994_v38 }
 0x310   : > { %5782 = vst.msk [vmem:[#allocation2 + $0x10] sm:$0xff] %vm431_vm0, %v5695_v27  ;;  %v5235_v57 = vsel %vm14504_vm11, %v5226_v23, %v5234_v55  ;;  %v4013_v30 = vpop.f32.mrf.mxu3  ;;  %v5236_v15 = vrot.slane %v5234_v55, 4  ;;  %v6017_v18 = vor.u32 %v6015_v62, %v14940_v51  ;;  %v15014_v23 = vld [vmem:[#allocation3 + $0x20] sm:$0xff] }
 0x311   : > { %4549 = vst.msk [vmem:[#allocation2 + $0xa8] sm:$0xff] %vm431_vm0, %v4513_v39  ;;  %v5238_v9 = vshrl.u32 %v5029_v0, 16  ;;  %v5241_v33 = vshll.u32 %v5029_v0, 16  ;;  %v6996_v0 = vsel %vm1349_vm2, %v6993_v56, %v6995_v7 }
 0x312   : > { %v3437_v2 = vpop.f32.mrf.mxu2  ;;  %v12430_v32 = vld [vmem:[#allocation3 + $0x48] sm:$0xff]  ;;  %5464 = vst.msk [vmem:[#allocation3 + $0x50] sm:$0xf] %vm4688_vm5, %v5235_v57  ;;  %v6022_v55 = vsel %vm792_vm1, %v6017_v18, %v15004_v46 }
 0x313   : > { %v4584_v45 = vld [vmem:[#allocation2 + $0xa0] sm:$0xff]  ;;  %v3491_v14 = vadd.f32 %v3437_v2, %v3118_v44  ;;  %v5240_v54 = vrot.slane %v5238_v9, 6  ;;  %v5243_v1 = vrot.slane %v5241_v33, 7  ;;  %11366 = vmatmul.msk.bf16.gmra.mxu1 %vm431_vm0, %v12430_v32  ;;  %v6550_v2 = vrot.slane %v15014_v23, 1 }
 0x314   : > { %v4624_v60 = vadd.f32 %v14817_v19, %v4584_v45  ;;  %v14980_v53 = vpop.f32.mrf.mxu0 }
 0x315   : > { %v3562_v10 = vld [vmem:[#allocation2 + $0xb8] sm:$0xff]  ;;  %3527 = vst.msk [vmem:[#allocation2 + $0xc0] sm:$0xff] %vm431_vm0, %v3491_v14  ;;  %v14988_v49 = vor.u32 %v5243_v1, %v5240_v54  ;;  %11563 = vmatmul.msk.bf16.gmra.mxu3 %vm431_vm0, %v6549_v31  ;;  %v3120_v14 = vld [vmem:[#allocation2 + $0xd0] sm:$0xff]  ;;  %v15032_v1 = vld [vmem:[#allocation3 + $0x28] sm:$0xff] }
 0x316   : > { %v4660_v6 = vmax.f32 %v4624_v60, 0.0  ;;  %v4140_v13 = vld [vmem:[#allocation2 + $0xb0] sm:$0xff]  ;;  %v4069_v48 = vadd.f32 %v4013_v30, %v3562_v10  ;;  %v5697_v59 = vpop.f32.mrf.mxu1 }
 0x317   : > { %v4514_v42 = vadd.f32 %v14896_v21, %v4140_v13  ;;  %v5245_v12 = vsel %vm14504_vm11, %v5236_v15, %v14988_v49  ;;  %v3119_v21 = vld [vmem:[#allocation2 + $0xc8] sm:$0xff]  ;;  %5783 = vst.msk [vmem:[#allocation2 + $0x18] sm:$0xff] %vm431_vm0, %v5697_v59  ;;  %v5246_v44 = vrot.slane %v14988_v49, 4 }
 0x318   : > { %11257 = vst.msk [vmem:[%s14445_s22 + $0x8e] sm:$0xfc] %vm4679_vm15, %v4660_v6  ;;  %v4994_v36 = vmul.f32 %v4897_v25, %v4660_v6  ;;  %v4585_v28 = vld [vmem:[#allocation2 + $0xa8] sm:$0xff]  ;;  %v4016_v4 = vpop.f32.mrf.mxu3 }
 0x319   : > { %v4625_v34 = vadd.f32 %v14817_v19, %v4585_v28  ;;  %4550 = vst.msk [vmem:[#allocation2 + $0xb0] sm:$0xff] %vm431_vm0, %v4514_v42  ;;  %v6551_v42 = vsel %vm1349_vm2, %v6548_v20, %v6550_v2  ;;  %v6027_v28 = vshll.u32 %v15032_v1, 16 }
 0x31a   : > { %v5030_v26 = vpack.c.bf16 %v4994_v36, %v4994_v36  ;;  %4105 = vst.msk [vmem:[#allocation2 + $0xb8] sm:$0xff] %vm431_vm0, %v4069_v48  ;;  %v3439_v63 = vpop.f32.mrf.mxu2  ;;  %v4907_v48 = vpop.permute.xlu1 %4906 }
 0x31b   : > { %v4661_v8 = vmax.f32 %v4625_v34, 0.0  ;;  %v3492_v47 = vadd.f32 %v3439_v63, %v3119_v21  ;;  %5465 = vst.msk [vmem:[#allocation3 + $0x54] sm:$0xf] %vm4688_vm5, %v5245_v12  ;;  %v15052_v34 = vld [vmem:[#allocation3 + $0x30] sm:$0xff] }
 0x31c   : > { %v5248_v24 = vshrl.u32 %v5030_v26, 16  ;;  %v5251_v35 = vshll.u32 %v5030_v26, 16  ;;  %v3563_v11 = vld [vmem:[#allocation2 + $0xc0] sm:$0xff]  ;;  %v15008_v41 = vpop.f32.mrf.mxu0 }
 0x31d   : > { %11258 = vst.msk [vmem:[%s14445_s22 + $0x96] sm:$0xff] %vm431_vm0, %v4661_v8  ;;  %v4995_v29 = vmul.f32 %v4902_v43, %v4661_v8  ;;  %v4070_v38 = vadd.f32 %v4016_v4, %v3563_v11  ;;  %v3121_v8 = vld [vmem:[#allocation2 + $0xd8] sm:$0xff]  ;;  %v6023_v43 = vshrl.u32 %v14975_v16, 16  ;;  %v15071_v16 = vld [vmem:[#allocation3 + $0x28] sm:$0xff] }
 0x31e   : > { %3528 = vst.msk [vmem:[#allocation2 + $0xc8] sm:$0xff] %vm431_vm0, %v3492_v47  ;;  %v5250_v51 = vrot.slane %v5248_v24, 6  ;;  %v5253_v39 = vrot.slane %v5251_v35, 7  ;;  %v5700_v57 = vpop.f32.mrf.mxu1  ;;  %v6997_v24 = vrot.slane %v15052_v34, 1 }
 0x31f   : > { %v5031_v27 = vpack.c.bf16 %v4995_v29, %v4995_v29  ;;  %4106 = vst.msk [vmem:[#allocation2 + $0xc0] sm:$0xff] %vm431_vm0, %v4070_v38  ;;  %11462 = vmatmul.msk.bf16.gmra.mxu2 %vm431_vm0, %v6022_v55  ;;  %11666 = vmatmul.msk.bf16.gmra.mxu0 %vm431_vm0, %v6996_v0  ;;  %v6025_v0 = vor.u32 %v6023_v43, %v15004_v46 }
 0x320   : > { %v4586_v30 = vld [vmem:[#allocation2 + $0xb0] sm:$0xff]  ;;  %5784 = vst.msk [vmem:[#allocation2 + $0x20] sm:$0xff] %vm431_vm0, %v5700_v57  ;;  %v5254_v9 = vor.u32 %v5253_v39, %v5250_v51  ;;  %v4018_v56 = vpop.f32.mrf.mxu3 }
 0x321   : > { %v4626_v50 = vadd.f32 %v14817_v19, %v4586_v30  ;;  %v4141_v33 = vld [vmem:[#allocation2 + $0xb8] sm:$0xff]  ;;  %v5258_v32 = vshrl.u32 %v5031_v27, 16  ;;  %v5261_v40 = vshll.u32 %v5031_v27, 16  ;;  %v6998_v30 = vsel %vm1349_vm2, %v6995_v7, %v6997_v24 }
 0x322   : > { %v4515_v45 = vadd.f32 %v14923_v37, %v4141_v33  ;;  %v3442_v54 = vpop.f32.mrf.mxu2  ;;  %v5255_v60 = vsel %vm14504_vm11, %v5246_v44, %v5254_v9  ;;  %v12431_v49 = vld [vmem:[#allocation3 + $0x50] sm:$0xff]  ;;  %v5256_v4 = vrot.slane %v5254_v9, 4  ;;  %v4912_v44 = vpop.permute.xlu2 %4911  ;;  %v6552_v7 = vrot.slane %v15071_v16, 1 }
 0x323   : > { %v4662_v10 = vmax.f32 %v4626_v50, 0.0  ;;  %v3493_v31 = vadd.f32 %v3442_v54, %v3120_v14  ;;  %v5260_v6 = vrot.slane %v5258_v32, 6  ;;  %v5263_v13 = vrot.slane %v5261_v40, 7  ;;  %5466 = vst.msk [vmem:[#allocation3 + $0x58] sm:$0xf] %vm4688_vm5, %v5255_v60  ;;  %11367 = vmatmul.msk.bf16.gmra.mxu1 %vm431_vm0, %v12431_v49  ;;  %v3122_v49 = vld [vmem:[#allocation2 + $0xe0] sm:$0xff] }
 0x324   : > { %4551 = vst.msk [vmem:[#allocation2 + $0xb8] sm:$0xff] %vm431_vm0, %v4515_v45  ;;  %v15038_v5 = vpop.f32.mrf.mxu0 }
 0x325   : > { %11259 = vst.msk [vmem:[%s14445_s22 + $0x9e] sm:$0x3] %vm4682_vm8, %v4662_v10  ;;  %v4996_v37 = vmul.f32 %v4907_v48, %v4662_v10  ;;  %v3564_v25 = vld [vmem:[#allocation2 + $0xc8] sm:$0xff]  ;;  %v5264_v59 = vor.u32 %v5263_v13, %v5260_v6  ;;  %11564 = vmatmul.msk.bf16.gmra.mxu3 %vm431_vm0, %v6551_v42  ;;  %v4917_v6 = vpop.permute.xlu0 %4916 }
 0x326   : > { %11260 = vst.msk [vmem:[%s14445_s22 + $0x9c] sm:$0xf0] %vm4685_vm9, %v4662_v10  ;;  %v4142_v15 = vld [vmem:[#allocation2 + $0xc0] sm:$0xff]  ;;  %v4071_v36 = vadd.f32 %v4018_v56, %v3564_v25  ;;  %v5702_v17 = vpop.f32.mrf.mxu1 }
 0x327   : > { %v5032_v12 = vpack.c.bf16 %v4996_v37, %v4996_v37  ;;  %v4516_v26 = vadd.f32 %v14948_v22, %v4142_v15  ;;  %3529 = vst.msk [vmem:[#allocation2 + $0xd0] sm:$0xff] %vm431_vm0, %v3493_v31  ;;  %v5265_v20 = vsel %vm14504_vm11, %v5256_v4, %v5264_v59  ;;  %v15062_v22 = vrot.slane %v6027_v28, 1  ;;  %v15094_v31 = vld [vmem:[#allocation3 + $0x30] sm:$0xff]  ;;  %v15112_v4 = vld [vmem:[#allocation3 + $0x38] sm:$0xff] }
 0x328   : > { %4107 = vst.msk [vmem:[#allocation2 + $0xc8] sm:$0xff] %vm431_vm0, %v4071_v36  ;;  %v4021_v21 = vpop.f32.mrf.mxu3  ;;  %v5266_v50 = vrot.slane %v5264_v59, 4  ;;  %v6553_v36 = vsel %vm1349_vm2, %v6550_v2, %v6552_v7  ;;  %v6035_v28 = vshll.u32 %v15094_v31, 16 }
 0x329   : > { %4552 = vst.msk [vmem:[#allocation2 + $0xc0] sm:$0xff] %vm431_vm0, %v4516_v26  ;;  %v5268_v63 = vshrl.u32 %v5032_v12, 16  ;;  %v5271_v62 = vshll.u32 %v5032_v12, 16  ;;  %v6030_v57 = vsel %vm792_vm1, %v6025_v0, %v15062_v22  ;;  %v6999_v0 = vrot.slane %v15112_v4, 1 }
 0x32a   : > { %5785 = vst.msk [vmem:[#allocation2 + $0x28] sm:$0xff] %vm431_vm0, %v5702_v17  ;;  %v3444_v47 = vpop.f32.mrf.mxu2 }
 0x32b   : > { %v4587_v35 = vld [vmem:[#allocation2 + $0xb8] sm:$0xff]  ;;  %v3494_v11 = vadd.f32 %v3444_v47, %v3121_v8  ;;  %5467 = vst.msk [vmem:[#allocation3 + $0x5c] sm:$0xf] %vm4688_vm5, %v5265_v20  ;;  %v5270_v18 = vrot.slane %v5268_v63, 6  ;;  %v5273_v29 = vrot.slane %v5271_v62, 7  ;;  %v6031_v47 = vshrl.u32 %v15032_v1, 16 }
 0x32c   : > { %v4627_v38 = vadd.f32 %v14817_v19, %v4587_v35  ;;  %v15067_v55 = vpop.f32.mrf.mxu0 }
 0x32d   : > { %3530 = vst.msk [vmem:[#allocation2 + $0xd8] sm:$0xff] %vm431_vm0, %v3494_v11  ;;  %v15073_v51 = vor.u32 %v5273_v29, %v5270_v18  ;;  %v3123_v18 = vld [vmem:[#allocation2 + $0xe8] sm:$0xff] }
 0x32e   : > { %v4663_v39 = vmax.f32 %v4627_v38, 0.0  ;;  %v3565_v27 = vld [vmem:[#allocation2 + $0xd0] sm:$0xff]  ;;  %v15121_v38 = vrot.slane %v6035_v28, 1 }
 0x32f   : > { %v4143_v9 = vld [vmem:[#allocation2 + $0xc8] sm:$0xff]  ;;  %v4072_v46 = vadd.f32 %v4021_v21, %v3565_v27  ;;  %11463 = vmatmul.msk.bf16.gmra.mxu2 %vm431_vm0, %v6030_v57  ;;  %11667 = vmatmul.msk.bf16.gmra.mxu0 %vm431_vm0, %v6998_v30  ;;  %v5705_v40 = vpop.f32.mrf.mxu1  ;;  %v5275_v14 = vsel %vm14504_vm11, %v5266_v50, %v15073_v51  ;;  %v5276_v23 = vrot.slane %v15073_v51, 4  ;;  %v6033_v30 = vor.u32 %v6031_v47, %v15062_v22 }
 0x330   : > { %11261 = vst.msk [vmem:[%s14445_s22 + $0xa4] sm:$0xff] %vm431_vm0, %v4663_v39  ;;  %v4997_v33 = vmul.f32 %v4912_v44, %v4663_v39  ;;  %v4588_v56 = vld [vmem:[#allocation2 + $0xc0] sm:$0xff]  ;;  %v4517_v32 = vadd.f32 %v14980_v53, %v4143_v9  ;;  %v4023_v52 = vpop.f32.mrf.mxu3  ;;  %v4922_v44 = vpop.permute.xlu1 %4921  ;;  %v15132_v9 = vld [vmem:[#allocation3 + $0x30] sm:$0xff]  ;;  %v7000_v22 = vsel %vm1349_vm2, %v6997_v24, %v6999_v0 }
 0x331   : > { %v4628_v45 = vadd.f32 %v14817_v19, %v4588_v56  ;;  %4108 = vst.msk [vmem:[#allocation2 + $0xd0] sm:$0xff] %vm431_vm0, %v4072_v46  ;;  %v6554_v24 = vrot.slane %v15132_v9, 1 }
 0x332   : > { %v5033_v54 = vpack.c.bf16 %v4997_v33, %v4997_v33  ;;  %4553 = vst.msk [vmem:[#allocation2 + $0xc8] sm:$0xff] %vm431_vm0, %v4517_v32  ;;  %v3447_v60 = vpop.f32.mrf.mxu2  ;;  %v12432_v10 = vld [vmem:[#allocation3 + $0x58] sm:$0xff]  ;;  %v6038_v32 = vsel %vm792_vm1, %v6033_v30, %v15121_v38 }
 0x333   : > { %v4664_v53 = vmax.f32 %v4628_v45, 0.0  ;;  %5786 = vst.msk [vmem:[#allocation2 + $0x30] sm:$0xff] %vm431_vm0, %v5705_v40  ;;  %v3495_v48 = vadd.f32 %v3447_v60, %v3122_v49  ;;  %11368 = vmatmul.msk.bf16.gmra.mxu1 %vm431_vm0, %v12432_v10  ;;  %v15152_v49 = vld [vmem:[#allocation3 + $0x38] sm:$0xff] }
 0x334   : > { %v3566_v13 = vld [vmem:[#allocation2 + $0xd8] sm:$0xff]  ;;  %v15097_v37 = vpop.f32.mrf.mxu0  ;;  %v5278_v25 = vshrl.u32 %v5033_v54, 16  ;;  %v5281_v42 = vshll.u32 %v5033_v54, 16  ;;  %5468 = vst.msk [vmem:[#allocation3 + $0x60] sm:$0xf] %vm4688_vm5, %v5275_v14 }
 0x335   : > { %11262 = vst.msk [vmem:[%s14445_s22 + $0xac] sm:$0xf] %vm4688_vm5, %v4664_v53  ;;  %v4998_v59 = vmul.f32 %v4917_v6, %v4664_v53  ;;  %v4073_v15 = vadd.f32 %v4023_v52, %v3566_v13  ;;  %11565 = vmatmul.msk.bf16.gmra.mxu3 %vm431_vm0, %v6553_v36 }
 0x336   : > { %11263 = vst.msk [vmem:[%s14445_s22 + $0xaa] sm:$0xc0] %vm4691_vm12, %v4664_v53  ;;  %v5280_v12 = vrot.slane %v5278_v25, 6  ;;  %v5283_v26 = vrot.slane %v5281_v42, 7 }
 0x337   : > { %v5034_v17 = vpack.c.bf16 %v4998_v59, %v4998_v59  ;;  %4109 = vst.msk [vmem:[#allocation2 + $0xd8] sm:$0xff] %vm431_vm0, %v4073_v15  ;;  %v5707_v21 = vpop.f32.mrf.mxu1 }
 0x338   : > { %v4144_v20 = vld [vmem:[#allocation2 + $0xd0] sm:$0xff]  ;;  %3531 = vst.msk [vmem:[#allocation2 + $0xe0] sm:$0xff] %vm431_vm0, %v3495_v48  ;;  %v5284_v2 = vor.u32 %v5283_v26, %v5280_v12  ;;  %v4026_v8 = vpop.f32.mrf.mxu3 }
 0x339   : > { %v4589_v63 = vld [vmem:[#allocation2 + $0xc8] sm:$0xff]  ;;  %v4518_v62 = vadd.f32 %v15008_v41, %v4144_v20  ;;  %5787 = vst.msk [vmem:[#allocation2 + $0x38] sm:$0xff] %vm431_vm0, %v5707_v21  ;;  %v5288_v43 = vshrl.u32 %v5034_v17, 16  ;;  %v5291_v35 = vshll.u32 %v5034_v17, 16  ;;  %v6555_v17 = vsel %vm1349_vm2, %v6552_v7, %v6554_v24  ;;  %v4927_v20 = vpop.permute.xlu2 %4926 }
 0x33a   : > { %v4629_v11 = vadd.f32 %v14817_v19, %v4589_v63  ;;  %v3449_v29 = vpop.f32.mrf.mxu2  ;;  %v5285_v51 = vsel %vm14504_vm11, %v5276_v23, %v5284_v2  ;;  %v5286_v46 = vrot.slane %v5284_v2, 4  ;;  %v6043_v21 = vshll.u32 %v15152_v49, 16  ;;  %v15167_v23 = vld [vmem:[#allocation3 + $0x40] sm:$0xff] }
 0x33b   : > { %4554 = vst.msk [vmem:[#allocation2 + $0xd0] sm:$0xff] %vm431_vm0, %v4518_v62  ;;  %v3496_v41 = vadd.f32 %v3449_v29, %v3123_v18  ;;  %v5290_v39 = vrot.slane %v5288_v43, 6  ;;  %v5293_v27 = vrot.slane %v5291_v35, 7  ;;  %v3125_v29 = vld [vmem:[#allocation2 + $0xf8] sm:$0xff] }
 0x33c   : > { %v4665_v1 = vmax.f32 %v4629_v11, 0.0  ;;  %v15127_v57 = vpop.f32.mrf.mxu0  ;;  %5469 = vst.msk [vmem:[#allocation3 + $0x64] sm:$0xf] %vm4688_vm5, %v5285_v51 }
 0x33d   : > { %3532 = vst.msk [vmem:[#allocation2 + $0xe8] sm:$0xff] %vm431_vm0, %v3496_v41  ;;  %v5294_v50 = vor.u32 %v5293_v27, %v5290_v39  ;;  %v6039_v41 = vshrl.u32 %v15094_v31, 16  ;;  %v15178_v39 = vrot.slane %v6043_v21, 1  ;;  %v7001_v27 = vrot.slane %v15167_v23, 1 }
 0x33e   : > { %11264 = vst.msk [vmem:[%s14445_s22 + $0xb2] sm:$0xff] %vm431_vm0, %v4665_v1  ;;  %v4999_v33 = vmul.f32 %v4922_v44, %v4665_v1  ;;  %v4145_v56 = vld [vmem:[#allocation2 + $0xd8] sm:$0xff] }
 0x33f   : > { %v4519_v40 = vadd.f32 %v15038_v5, %v4145_v56  ;;  %v3567_v45 = vld [vmem:[#allocation2 + $0xe0] sm:$0xff]  ;;  %11464 = vmatmul.msk.bf16.gmra.mxu2 %vm431_vm0, %v6038_v32  ;;  %11668 = vmatmul.msk.bf16.gmra.mxu0 %vm431_vm0, %v7000_v22  ;;  %v5295_v52 = vsel %vm14504_vm11, %v5286_v46, %v5294_v50  ;;  %v5710_v60 = vpop.f32.mrf.mxu1  ;;  %v3124_v5 = vld [vmem:[#allocation2 + $0xf0] sm:$0xff]  ;;  %v5296_v2 = vrot.slane %v5294_v50, 4  ;;  %v4932_v46 = vpop.permute.xlu0 %4931  ;;  %v15188_v32 = vld [vmem:[#allocation3 + $0x38] sm:$0xff] }
 0x340   : > { %v5035_v14 = vpack.c.bf16 %v4999_v33, %v4999_v33  ;;  %v4074_v54 = vadd.f32 %v4026_v8, %v3567_v45  ;;  %5470 = vst.msk [vmem:[#allocation3 + $0x68] sm:$0xf] %vm4688_vm5, %v5295_v52  ;;  %v4028_v34 = vpop.f32.mrf.mxu3  ;;  %v6041_v33 = vor.u32 %v6039_v41, %v15121_v38  ;;  %v7002_v52 = vsel %vm1349_vm2, %v6999_v0, %v7001_v27  ;;  %v15204_v0 = vld [vmem:[#allocation3 + $0x40] sm:$0xff] }
 0x341   : > { %4555 = vst.msk [vmem:[#allocation2 + $0xd8] sm:$0xff] %vm431_vm0, %v4519_v40  ;;  %v6556_v4 = vrot.slane %v15188_v32, 1 }
 0x342   : > { %v4590_v10 = vld [vmem:[#allocation2 + $0xd0] sm:$0xff]  ;;  %4110 = vst.msk [vmem:[#allocation2 + $0xe0] sm:$0xff] %vm431_vm0, %v4074_v54  ;;  %v3452_v53 = vpop.f32.mrf.mxu2  ;;  %v5298_v6 = vshrl.u32 %v5035_v14, 16  ;;  %v5301_v13 = vshll.u32 %v5035_v14, 16  ;;  %v6046_v45 = vsel %vm792_vm1, %v6041_v33, %v15178_v39 }
 0x343   : > { %v4630_v48 = vadd.f32 %v14817_v19, %v4590_v10  ;;  %5788 = vst.msk [vmem:[#allocation2 + $0x40] sm:$0xff] %vm431_vm0, %v5710_v60  ;;  %v3497_v25 = vadd.f32 %v3452_v53, %v3124_v5  ;;  %v12433_v42 = vld [vmem:[#allocation3 + $0x60] sm:$0xff]  ;;  %v6557_v21 = vsel %vm1349_vm2, %v6554_v24, %v6556_v4 }
 0x344   : > { %v3568_v59 = vld [vmem:[#allocation2 + $0xe8] sm:$0xff]  ;;  %v15156_v15 = vpop.f32.mrf.mxu0  ;;  %v5300_v36 = vrot.slane %v5298_v6, 6  ;;  %v5303_v28 = vrot.slane %v5301_v13, 7  ;;  %11369 = vmatmul.msk.bf16.gmra.mxu1 %vm431_vm0, %v12433_v42 }
 0x345   : > { %v4666_v12 = vmax.f32 %v4630_v48, 0.0  ;;  %v4075_v26 = vadd.f32 %v4028_v34, %v3568_v59  ;;  %3533 = vst.msk [vmem:[#allocation2 + $0xf0] sm:$0xff] %vm431_vm0, %v3497_v25  ;;  %11566 = vmatmul.msk.bf16.gmra.mxu3 %vm431_vm0, %v6555_v17  ;;  %v3126_v25 = vld [vmem:[#allocation2 + $0x100] sm:$0xff] }
 0x346   : > { %v5304_v63 = vor.u32 %v5303_v28, %v5300_v36 }
 0x347   : > { %11265 = vst.msk [vmem:[%s14445_s22 + $0xba] sm:$0x3f] %vm4694_vm14, %v4666_v12  ;;  %v5000_v62 = vmul.f32 %v4927_v20, %v4666_v12  ;;  %v5712_v47 = vpop.f32.mrf.mxu1  ;;  %v15213_v12 = vld [vmem:[%s17017_s2] ss:$0 sm:$0xff] }
 0x348   : > { %v4591_v8 = vld [vmem:[#allocation2 + $0xd8] sm:$0xff]  ;;  %4111 = vst.msk [vmem:[#allocation2 + $0xe8] sm:$0xff] %vm431_vm0, %v4075_v26  ;;  %v5305_v16 = vsel %vm14504_vm11, %v5296_v2, %v5304_v63  ;;  %v4031_v11 = vpop.f32.mrf.mxu3  ;;  %v5306_v54 = vrot.slane %v5304_v63, 4  ;;  %v6051_v2 = vshll.u32 %v15204_v0, 16 }
 0x349   : > { %v5036_v7 = vpack.c.bf16 %v5000_v62, %v5000_v62  ;;  %v4631_v43 = vadd.f32 %v14817_v19, %v4591_v8  ;;  %v4146_v35 = vld [vmem:[#allocation2 + $0xe0] sm:$0xff]  ;;  %5789 = vst.msk [vmem:[#allocation2 + $0x48] sm:$0xff] %vm431_vm0, %v5712_v47 }
 0x34a   : > { %v4520_v18 = vadd.f32 %v15067_v55, %v4146_v35  ;;  %v3454_v51 = vpop.f32.mrf.mxu2  ;;  %5471 = vst.msk [vmem:[#allocation3 + $0x6c] sm:$0xf] %vm4688_vm5, %v5305_v16  ;;  %v15227_v16 = vld [vmem:[#allocation3 + $0x48] sm:$0xff] }
 0x34b   : > { %v5308_v1 = vshrl.u32 %v5036_v7, 16  ;;  %v5311_v30 = vshll.u32 %v5036_v7, 16  ;;  %v4667_v19 = vmax.f32 %v4631_v43, 0.0  ;;  %v3498_v44 = vadd.f32 %v3454_v51, %v3125_v29  ;;  %v4937_v7 = vpop.permute.xlu1 %4936 }
 0x34c   : > { %4556 = vst.msk [vmem:[#allocation2 + $0xe0] sm:$0xff] %vm431_vm0, %v4520_v18  ;;  %v3569_v50 = vld [vmem:[#allocation2 + $0xf0] sm:$0xff]  ;;  %v15183_v55 = vpop.f32.mrf.mxu0  ;;  %v6047_v29 = vshrl.u32 %v15152_v49, 16  ;;  %v15234_v51 = vrot.slane %v6051_v2, 1 }
 0x34d   : > { %11266 = vst.msk [vmem:[%s14445_s22 + $0xc0] sm:$0xff] %vm431_vm0, %v4667_v19  ;;  %v5001_v31 = vmul.f32 %v4932_v46, %v4667_v19  ;;  %v4076_v56 = vadd.f32 %v4031_v11, %v3569_v50  ;;  %v5310_v22 = vrot.slane %v5308_v1, 6  ;;  %v5313_v40 = vrot.slane %v5311_v30, 7 }
 0x34e   : > { %3534 = vst.msk [vmem:[#allocation2 + $0xf8] sm:$0xff] %vm431_vm0, %v3498_v44  ;;  %v7003_v44 = vrot.slane %v15227_v16, 1  ;;  %v6049_v49 = vor.u32 %v6047_v29, %v15178_v39 }
 0x34f   : > { %v5037_v38 = vpack.c.bf16 %v5001_v31, %v5001_v31  ;;  %v4147_v14 = vld [vmem:[#allocation2 + $0xe8] sm:$0xff]  ;;  %4112 = vst.msk [vmem:[#allocation2 + $0xf0] sm:$0xff] %vm431_vm0, %v4076_v56  ;;  %11465 = vmatmul.msk.bf16.gmra.mxu2 %vm431_vm0, %v6046_v45  ;;  %11669 = vmatmul.msk.bf16.gmra.mxu0 %vm431_vm0, %v7002_v52  ;;  %v5314_v60 = vor.u32 %v5313_v40, %v5310_v22  ;;  %v5715_v10 = vpop.f32.mrf.mxu1  ;;  %v4942_v40 = vpop.permute.xlu2 %4941 }
 0x350   : > { %v4521_v34 = vadd.f32 %v15097_v37, %v4147_v14  ;;  %5790 = vst.msk [vmem:[#allocation2 + $0x50] sm:$0xff] %vm431_vm0, %v5715_v10  ;;  %v4033_v5 = vpop.f32.mrf.mxu3  ;;  %v6054_v52 = vsel %vm792_vm1, %v6049_v49, %v15234_v51  ;;  %v7004_v14 = vsel %vm1349_vm2, %v7001_v27, %v7003_v44 }
 0x351   : > { %v12434_v53 = vld [vmem:[#allocation3 + $0x68] sm:$0xff]  ;;  %v5315_v6 = vsel %vm14504_vm11, %v5306_v54, %v5314_v60  ;;  %v5318_v13 = vshrl.u32 %v5037_v38, 16  ;;  %v5321_v48 = vshll.u32 %v5037_v38, 16  ;;  %v5316_v35 = vrot.slane %v5314_v60, 4  ;;  %v15249_v38 = vld [vmem:[#allocation3 + $0x40] sm:$0xff] }
 0x352   : > { %4557 = vst.msk [vmem:[#allocation2 + $0xe8] sm:$0xff] %vm431_vm0, %v4521_v34  ;;  %v3457_v42 = vpop.f32.mrf.mxu2  ;;  %v6558_v27 = vrot.slane %v15249_v38, 1  ;;  %v15350_v38 = vld [vmem:[#allocation3 + $0x58] sm:$0xff] }
 0x353   : > { %v4592_v59 = vld [vmem:[#allocation2 + $0xe0] sm:$0xff]  ;;  %v3499_v37 = vadd.f32 %v3457_v42, %v3126_v25  ;;  %v5320_v36 = vrot.slane %v5318_v13, 6  ;;  %v5323_v28 = vrot.slane %v5321_v48, 7  ;;  %5472 = vst.msk [vmem:[#allocation3 + $0x70] sm:$0xf] %vm4688_vm5, %v5315_v6  ;;  %v3128_v42 = vld [vmem:[#allocation2 + $0x110] sm:$0xff] }
 0x354   : > { %v4632_v26 = vadd.f32 %v15213_v12, %v4592_v59  ;;  %v15216_v17 = vpop.f32.mrf.mxu0  ;;  %11370 = vmatmul.msk.bf16.gmra.mxu1 %vm431_vm0, %v12434_v53 }
 0x355   : > { %v3570_v20 = vld [vmem:[#allocation2 + $0xf8] sm:$0xff]  ;;  %3535 = vst.msk [vmem:[#allocation2 + $0x100] sm:$0xff] %vm431_vm0, %v3499_v37  ;;  %v5324_v63 = vor.u32 %v5323_v28, %v5320_v36  ;;  %11567 = vmatmul.msk.bf16.gmra.mxu3 %vm431_vm0, %v6557_v21  ;;  %v15265_v37 = vld [vmem:[#allocation3 + $0x48] sm:$0xff] }
 0x356   : > { %v4668_v62 = vmax.f32 %v4632_v26, 0.0  ;;  %v4148_v8 = vld [vmem:[#allocation2 + $0xf0] sm:$0xff]  ;;  %v4077_v47 = vadd.f32 %v4033_v5, %v3570_v20 }
 0x357   : > { %v4522_v43 = vadd.f32 %v15127_v57, %v4148_v8  ;;  %v5717_v9 = vpop.f32.mrf.mxu1  ;;  %v5325_v41 = vsel %vm14504_vm11, %v5316_v35, %v5324_v63  ;;  %v3127_v57 = vld [vmem:[#allocation2 + $0x108] sm:$0xff]  ;;  %v5326_v53 = vrot.slane %v5324_v63, 4  ;;  %v4947_v63 = vpop.permute.xlu0 %4946 }
 0x358   : > { %11267 = vst.msk [vmem:[%s14445_s22 + $0xc8] sm:$0xff] %vm431_vm0, %v4668_v62  ;;  %v5002_v11 = vmul.f32 %v4937_v7, %v4668_v62  ;;  %v4036_v24 = vpop.f32.mrf.mxu3 }
 0x359   : > { %v4593_v18 = vld [vmem:[#allocation2 + $0xe8] sm:$0xff]  ;;  %4558 = vst.msk [vmem:[#allocation2 + $0xf0] sm:$0xff] %vm431_vm0, %v4522_v43  ;;  %v6559_v43 = vsel %vm1349_vm2, %v6556_v4, %v6558_v27 }
 0x35a   : > { %v5038_v1 = vpack.c.bf16 %v5002_v11, %v5002_v11  ;;  %v4633_v30 = vadd.f32 %v15213_v12, %v4593_v18  ;;  %4113 = vst.msk [vmem:[#allocation2 + $0xf8] sm:$0xff] %vm431_vm0, %v4077_v47  ;;  %v3459_v19 = vpop.f32.mrf.mxu2  ;;  %v15284_v18 = vld [vmem:[#allocation3 + $0x50] sm:$0xff] }
 0x35b   : > { %5791 = vst.msk [vmem:[#allocation2 + $0x58] sm:$0xff] %vm431_vm0, %v5717_v9  ;;  %v3500_v46 = vadd.f32 %v3459_v19, %v3127_v57  ;;  %v6059_v9 = vshll.u32 %v15265_v37, 16 }
 0x35c   : > { %v5328_v50 = vshrl.u32 %v5038_v1, 16  ;;  %v5331_v33 = vshll.u32 %v5038_v1, 16  ;;  %v4669_v31 = vmax.f32 %v4633_v30, 0.0  ;;  %v3571_v56 = vld [vmem:[#allocation2 + $0x100] sm:$0xff]  ;;  %v15243_v22 = vpop.f32.mrf.mxu0  ;;  %5473 = vst.msk [vmem:[#allocation3 + $0x74] sm:$0xf] %vm4688_vm5, %v5325_v41 }
 0x35d   : > { %v4078_v45 = vadd.f32 %v4036_v24, %v3571_v56  ;;  %3536 = vst.msk [vmem:[#allocation2 + $0x108] sm:$0xff] %vm431_vm0, %v3500_v46  ;;  %v3129_v46 = vld [vmem:[#allocation2 + $0x118] sm:$0xff] }
 0x35e   : > { %11268 = vst.msk [vmem:[%s14445_s22 + $0xce] sm:$0xfc] %vm4679_vm15, %v4669_v31  ;;  %v5003_v39 = vmul.f32 %v4942_v40, %v4669_v31  ;;  %v5330_v54 = vrot.slane %v5328_v50, 6  ;;  %v5333_v60 = vrot.slane %v5331_v33, 7  ;;  %v15296_v50 = vrot.slane %v6059_v9, 1 }
 0x35f   : > { %4114 = vst.msk [vmem:[#allocation2 + $0x100] sm:$0xff] %vm431_vm0, %v4078_v45  ;;  %11466 = vmatmul.msk.bf16.gmra.mxu2 %vm431_vm0, %v6054_v52  ;;  %11670 = vmatmul.msk.bf16.gmra.mxu0 %vm431_vm0, %v7004_v14  ;;  %v5720_v5 = vpop.f32.mrf.mxu1  ;;  %v7005_v33 = vrot.slane %v15284_v18, 1 }
 0x360   : > { %v5039_v34 = vpack.c.bf16 %v5003_v39, %v5003_v39  ;;  %v4594_v10 = vld [vmem:[#allocation2 + $0xf0] sm:$0xff]  ;;  %v5334_v6 = vor.u32 %v5333_v60, %v5330_v54  ;;  %5792 = vst.msk [vmem:[#allocation2 + $0x60] sm:$0xff] %vm431_vm0, %v5720_v5  ;;  %v4038_v23 = vpop.f32.mrf.mxu3  ;;  %v15304_v39 = vld [vmem:[#allocation3 + $0x48] sm:$0xff] }
 0x361   : > { %v4634_v13 = vadd.f32 %v15213_v12, %v4594_v10  ;;  %v4149_v48 = vld [vmem:[#allocation2 + $0xf8] sm:$0xff]  ;;  %v7006_v5 = vsel %vm1349_vm2, %v7003_v44, %v7005_v33 }
 0x362   : > { %v4523_v25 = vadd.f32 %v15156_v15, %v4149_v48  ;;  %v3462_v59 = vpop.f32.mrf.mxu2  ;;  %v5335_v36 = vsel %vm14504_vm11, %v5326_v53, %v5334_v6  ;;  %v5338_v28 = vshrl.u32 %v5039_v34, 16  ;;  %v5341_v2 = vshll.u32 %v5039_v34, 16 }
 0x363   : > { %v4670_v26 = vmax.f32 %v4634_v13, 0.0  ;;  %v3501_v20 = vadd.f32 %v3462_v59, %v3128_v42  ;;  %v12435_v21 = vld [vmem:[#allocation3 + $0x70] sm:$0xff]  ;;  %5474 = vst.msk [vmem:[#allocation3 + $0x78] sm:$0xf] %vm4688_vm5, %v5335_v36  ;;  %v5336_v41 = vrot.slane %v5334_v6, 4  ;;  %v12560_v36 = vld [vmem:[%s17018_s3 + $0x68] sm:$0xff] }
 0x364   : > { %4559 = vst.msk [vmem:[#allocation2 + $0xf8] sm:$0xff] %vm431_vm0, %v4523_v25  ;;  %v3572_v62 = vld [vmem:[#allocation2 + $0x108] sm:$0xff]  ;;  %v15271_v15 = vpop.f32.mrf.mxu0  ;;  %v5340_v8 = vrot.slane %v5338_v28, 6  ;;  %11371 = vmatmul.msk.bf16.gmra.mxu1 %vm431_vm0, %v12435_v21  ;;  %v5343_v35 = vrot.slane %v5341_v2, 7  ;;  %v6560_v25 = vrot.slane %v15304_v39, 1  ;;  %v15326_v42 = vld [vmem:[#allocation3 + $0x50] sm:$0xff]  ;;  %8565 = vmatpush.bf16.msra.mxu3 %v12560_v36 }
 0x365   : > { %11269 = vst.msk [vmem:[%s14445_s22 + $0xd6] sm:$0xff] %vm431_vm0, %v4670_v26  ;;  %v5004_v47 = vmul.f32 %v4947_v63, %v4670_v26  ;;  %v4079_v7 = vadd.f32 %v4038_v23, %v3572_v62  ;;  %11568 = vmatmul.msk.bf16.gmra.mxu3 %vm431_vm0, %v6559_v43 }
 0x366   : > { %v4150_v11 = vld [vmem:[#allocation2 + $0x100] sm:$0xff]  ;;  %3537 = vst.msk [vmem:[#allocation2 + $0x110] sm:$0xff] %vm431_vm0, %v3501_v20  ;;  %v15288_v1 = vor.u32 %v5343_v35, %v5340_v8  ;;  %v4957_v8 = vpop.permute.xlu2 %4956  ;;  %v6561_v43 = vsel %vm1349_vm2, %v6558_v27, %v6560_v25 }
 0x367   : > { %v5040_v24 = vpack.c.bf16 %v5004_v47, %v5004_v47  ;;  %v4524_v29 = vadd.f32 %v15183_v55, %v4150_v11  ;;  %4115 = vst.msk [vmem:[#allocation2 + $0x108] sm:$0xff] %vm431_vm0, %v4079_v7  ;;  %v5722_v32 = vpop.f32.mrf.mxu1  ;;  %v6055_v55 = vshrl.u32 %v15204_v0, 16  ;;  %v5816_v20 = vld [vmem:[#allocation2] sm:$0xff] }
 0x368   : > { %v4041_v57 = vpop.f32.mrf.mxu3  ;;  %v5345_v19 = vsel %vm14504_vm11, %v5336_v41, %v15288_v1  ;;  %5793 = vst.msk [vmem:[#allocation2 + $0x68] sm:$0xff] %vm431_vm0, %v5722_v32  ;;  %v5346_v62 = vrot.slane %v15288_v1, 4 }
 0x369   : > { %v5348_v4 = vshrl.u32 %v5040_v24, 16  ;;  %v5351_v30 = vshll.u32 %v5040_v24, 16  ;;  %4560 = vst.msk [vmem:[#allocation2 + $0x100] sm:$0xff] %vm431_vm0, %v4524_v29  ;;  %v6057_v52 = vor.u32 %v6055_v55, %v15234_v51  ;;  %v4952_v51 = vpop.permute.xlu1 %4951  ;;  %v6067_v29 = vshll.u32 %v15326_v42, 16 }
 0x36a   : > { %v3464_v49 = vpop.f32.mrf.mxu2  ;;  %5475 = vst.msk [vmem:[#allocation3 + $0x7c] sm:$0xf] %vm4688_vm5, %v5345_v19 }
 0x36b   : > { %v4595_v31 = vld [vmem:[#allocation2 + $0xf8] sm:$0xff]  ;;  %v3502_v56 = vadd.f32 %v3464_v49, %v3129_v46  ;;  %v5350_v0 = vrot.slane %v5348_v4, 6  ;;  %v5353_v54 = vrot.slane %v5351_v30, 7  ;;  %v6062_v10 = vsel %vm792_vm1, %v6057_v52, %v15296_v50 }
 0x36c   : > { %v4635_v40 = vadd.f32 %v15213_v12, %v4595_v31  ;;  %v15301_v45 = vpop.f32.mrf.mxu0  ;;  %v6063_v31 = vshrl.u32 %v15265_v37, 16 }
 0x36d   : > { %v3573_v14 = vld [vmem:[#allocation2 + $0x110] sm:$0xff]  ;;  %3538 = vst.msk [vmem:[#allocation2 + $0x118] sm:$0xff] %vm431_vm0, %v3502_v56  ;;  %v5354_v59 = vor.u32 %v5353_v54, %v5350_v0  ;;  %v15356_v56 = vrot.slane %v6067_v29, 1  ;;  %v7007_v0 = vrot.slane %v15350_v38, 1  ;;  %v12501_v38 = vld [vmem:[#allocation3 + $0x8] sm:$0xf0] }
 0x36e   : > { %v4671_v60 = vmax.f32 %v4635_v40, 0.0  ;;  %v4151_v34 = vld [vmem:[#allocation2 + $0x108] sm:$0xff]  ;;  %v4080_v6 = vadd.f32 %v4041_v57, %v3573_v14  ;;  %v6065_v37 = vor.u32 %v6063_v31, %v15296_v50 }
 0x36f   : > { %v4525_v53 = vadd.f32 %v15216_v17, %v4151_v34  ;;  %11467 = vmatmul.msk.bf16.gmra.mxu2 %vm431_vm0, %v6062_v10  ;;  %11671 = vmatmul.msk.bf16.gmra.mxu0 %vm431_vm0, %v7006_v5  ;;  %v5725_v23 = vpop.f32.mrf.mxu1  ;;  %v12540_v17 = vld [vmem:[%s17018_s3 + $0x58] sm:$0xff]  ;;  %v5355_v41 = vsel %vm14504_vm11, %v5346_v62, %v5354_v59  ;;  %v5356_v30 = vrot.slane %v5354_v59, 4  ;;  %v7008_v36 = vsel %vm1349_vm2, %v7005_v33, %v7007_v0  ;;  %v5818_v62 = vld [vmem:[#allocation2 + $0x10] sm:$0xff] }
 0x370   : > { %11270 = vst.msk [vmem:[%s14445_s22 + $0xde] sm:$0x3] %vm4682_vm8, %v4671_v60  ;;  %v5005_v13 = vmul.f32 %v4952_v51, %v4671_v60  ;;  %v4596_v48 = vld [vmem:[#allocation2 + $0x100] sm:$0xff]  ;;  %v4043_v44 = vpop.f32.mrf.mxu3  ;;  %8120 = vmatpush.bf16.msra.mxu2 %v12540_v17 }
 0x371   : > { %11271 = vst.msk [vmem:[%s14445_s22 + $0xdc] sm:$0xf0] %vm4685_vm9, %v4671_v60  ;;  %v4636_v16 = vadd.f32 %v15213_v12, %v4596_v48  ;;  %v12436_v26 = vld [vmem:[#allocation3 + $0x78] sm:$0xff]  ;;  %v5817_v48 = vld [vmem:[#allocation2 + $0x8] sm:$0xff] }
 0x372   : > { %v5041_v28 = vpack.c.bf16 %v5005_v13, %v5005_v13  ;;  %4561 = vst.msk [vmem:[#allocation2 + $0x108] sm:$0xff] %vm431_vm0, %v4525_v53  ;;  %v6210_v21 = vpop.f32.mrf.mxu2  ;;  %v12580_v60 = vld [vmem:[%s17018_s3 + $0x78] sm:$0xff] }
 0x373   : > { %v4672_v2 = vmax.f32 %v4636_v16, 0.0  ;;  %4116 = vst.msk [vmem:[#allocation2 + $0x110] sm:$0xff] %vm431_vm0, %v4080_v6  ;;  %v6300_v63 = vadd.f32 %v6210_v21, %v5816_v20  ;;  %9143 = vmatpush.bf16.msra.mxu0 %v12580_v60  ;;  %v4962_v6 = vpop.permute.xlu0 %4961 }
 0x374   : > { %5794 = vst.msk [vmem:[#allocation2 + $0x70] sm:$0xff] %vm431_vm0, %v5725_v23  ;;  %v3574_v47 = vld [vmem:[#allocation2 + $0x118] sm:$0xff]  ;;  %v15335_v7 = vpop.f32.mrf.mxu0  ;;  %v5358_v35 = vshrl.u32 %v5041_v28, 16  ;;  %v5361_v11 = vshll.u32 %v5041_v28, 16  ;;  %11372 = vmatmul.msk.bf16.gmra.mxu1 %vm431_vm0, %v12436_v26  ;;  %v6070_v23 = vsel %vm792_vm1, %v6065_v37, %v15356_v56 }
 0x375   : > { %11272 = vst.msk [vmem:[%s14445_s22 + $0xe4] sm:$0xff] %vm431_vm0, %v4672_v2  ;;  %v5006_v9 = vmul.f32 %v4957_v8, %v4672_v2  ;;  %v4081_v24 = vadd.f32 %v4043_v44, %v3574_v47  ;;  %11569 = vmatmul.msk.bf16.gmra.mxu3 %vm431_vm0, %v6561_v43  ;;  %v4752_v2 = vld [vmem:[#allocation3 + $0x98] sm:$0xe] }
 0x376   : > { %6336 = vst.msk [vmem:[#allocation2] sm:$0xff] %vm431_vm0, %v6300_v63  ;;  %v5360_v27 = vrot.slane %v5358_v35, 6  ;;  %v5363_v1 = vrot.slane %v5361_v11, 7  ;;  %v15393_v47 = vld [vmem:[#allocation3 + $0x58] sm:$0xff] }
 0x377   : > { %v5042_v32 = vpack.c.bf16 %v5006_v9, %v5006_v9  ;;  %4117 = vst.msk [vmem:[#allocation2 + $0x118] sm:$0xff] %vm431_vm0, %v4081_v24  ;;  %v5727_v4 = vpop.f32.mrf.mxu1  ;;  %v4753_v9 = vsel %vm14470_vm13, 0, %v4752_v2 }
 0x378   : > { %v5364_v57 = vor.u32 %v5363_v1, %v5360_v27  ;;  %5476 = vst.msk [vmem:[#allocation3 + $0x80] sm:$0xf] %vm4688_vm5, %v5355_v41  ;;  %v6655_v55 = vpop.f32.mrf.mxu3 }
 0x379   : > { %v5368_v19 = vshrl.u32 %v5042_v32, 16  ;;  %v5371_v46 = vshll.u32 %v5042_v32, 16  ;;  %v4597_v49 = vld [vmem:[#allocation2 + $0x108] sm:$0xff]  ;;  %5795 = vst.msk [vmem:[#allocation2 + $0x78] sm:$0xff] %vm431_vm0, %v5727_v4  ;;  %v6075_v32 = vshll.u32 %v15393_v47, 16  ;;  %v15411_v4 = vld [vmem:[#allocation3 + $0x60] sm:$0xff] }
 0x37a   : > { %v4637_v40 = vadd.f32 %v15213_v12, %v4597_v49  ;;  %v4152_v52 = vld [vmem:[#allocation2 + $0x110] sm:$0xff]  ;;  %v6212_v14 = vpop.f32.mrf.mxu2  ;;  %v5365_v54 = vsel %vm14504_vm11, %v5356_v30, %v5364_v57  ;;  %v5366_v26 = vrot.slane %v5364_v57, 4  ;;  %4754 = vst [vmem:[#allocation3 + $0x98] sm:$0xe] %v4753_v9  ;;  %v4967_v49 = vpop.permute.xlu1 %4966  ;;  %v15454_v9 = vld [vmem:[#allocation3 + $0x60] sm:$0xff] }
 0x37b   : > { %v4526_v34 = vadd.f32 %v15243_v22, %v4152_v52  ;;  %5477 = vst.msk [vmem:[#allocation3 + $0x84] sm:$0xf] %vm4688_vm5, %v5365_v54  ;;  %v5370_v10 = vrot.slane %v5368_v19, 6  ;;  %v5373_v5 = vrot.slane %v5371_v46, 7  ;;  %v15373_v22 = vld [vmem:[#allocation3 + $0x50] sm:$0xff]  ;;  %v6301_v59 = vadd.f32 %v6212_v14, %v5817_v48  ;;  %v12600_v46 = vld [vmem:[%s17018_s3 + $0x88] sm:$0xff] }
 0x37c   : > { %v4673_v51 = vmax.f32 %v4637_v40, 0.0  ;;  %v15368_v53 = vpop.f32.mrf.mxu0  ;;  %v6562_v18 = vrot.slane %v15373_v22, 1  ;;  %9588 = vmatpush.bf16.msra.mxu1 %v12600_v46 }
 0x37d   : > { %4562 = vst.msk [vmem:[#allocation2 + $0x110] sm:$0xff] %vm431_vm0, %v4526_v34  ;;  %v6372_v13 = vld [vmem:[#allocation2] sm:$0xff]  ;;  %v5374_v50 = vor.u32 %v5373_v5, %v5370_v10  ;;  %v5819_v34 = vld [vmem:[#allocation2 + $0x18] sm:$0xff]  ;;  %v6071_v10 = vshrl.u32 %v15326_v42, 16  ;;  %v15426_v5 = vrot.slane %v6075_v32, 1 }
 0x37e   : > { %11273 = vst.msk [vmem:[%s14445_s22 + $0xec] sm:$0xf] %vm4688_vm5, %v4673_v51  ;;  %v5007_v16 = vmul.f32 %v4962_v6, %v4673_v51  ;;  %v4153_v44 = vld [vmem:[#allocation2 + $0x118] sm:$0xff]  ;;  %v6745_v17 = vadd.f32 %v6655_v55, %v6372_v13  ;;  %v6563_v58 = vsel %vm1349_vm2, %v6560_v25, %v6562_v18 }
 0x37f   : > { %11274 = vst.msk [vmem:[%s14445_s22 + $0xea] sm:$0xc0] %vm4691_vm12, %v4673_v51  ;;  %v4527_v28 = vadd.f32 %v15271_v15, %v4153_v44  ;;  %11468 = vmatmul.msk.bf16.gmra.mxu2 %vm431_vm0, %v6070_v23  ;;  %11672 = vmatmul.msk.bf16.gmra.mxu0 %vm431_vm0, %v7008_v36  ;;  %v5730_v21 = vpop.f32.mrf.mxu1  ;;  %v5375_v33 = vsel %vm14504_vm11, %v5366_v26, %v5374_v50  ;;  %v5376_v30 = vrot.slane %v5374_v50, 4  ;;  %v7009_v51 = vrot.slane %v15411_v4, 1  ;;  %v15434_v44 = vld [vmem:[#allocation3 + $0x58] sm:$0xff]  ;;  %v5822_v4 = vld [vmem:[#allocation2 + $0x30] sm:$0xff] }
 0x380   : > { %v5043_v20 = vpack.c.bf16 %v5007_v16, %v5007_v16  ;;  %6781 = vst.msk [vmem:[#allocation2] sm:$0xff] %vm431_vm0, %v6745_v17  ;;  %v6657_v63 = vpop.f32.mrf.mxu3  ;;  %v6073_v16 = vor.u32 %v6071_v10, %v15356_v56  ;;  %v6564_v2 = vrot.slane %v15434_v44, 1  ;;  %v5823_v44 = vld [vmem:[#allocation2 + $0x38] sm:$0xff] }
 0x381   : > { %4563 = vst.msk [vmem:[#allocation2 + $0x118] sm:$0xff] %vm431_vm0, %v4527_v28  ;;  %v7010_v56 = vsel %vm1349_vm2, %v7007_v0, %v7009_v51 }
 0x382   : > { %6337 = vst.msk [vmem:[#allocation2 + $0x8] sm:$0xff] %vm431_vm0, %v6301_v59  ;;  %v12437_v15 = vld [vmem:[#allocation3 + $0x80] sm:$0xff]  ;;  %v6215_v8 = vpop.f32.mrf.mxu2  ;;  %v5378_v43 = vshrl.u32 %v5043_v20, 16  ;;  %v5381_v35 = vshll.u32 %v5043_v20, 16  ;;  %v6078_v26 = vsel %vm792_vm1, %v6073_v16, %v15426_v5  ;;  %v6565_v46 = vsel %vm1349_vm2, %v6562_v18, %v6564_v2 }
 0x383   : > { %5796 = vst.msk [vmem:[#allocation2 + $0x80] sm:$0xff] %vm431_vm0, %v5730_v21  ;;  %v6302_v11 = vadd.f32 %v6215_v8, %v5818_v62 }
 0x384   : > { %v4598_v24 = vld [vmem:[#allocation2 + $0x110] sm:$0xff]  ;;  %v15398_v29 = vpop.f32.mrf.mxu0  ;;  %v5380_v41 = vrot.slane %v5378_v43, 6  ;;  %v5383_v27 = vrot.slane %v5381_v35, 7  ;;  %5478 = vst.msk [vmem:[#allocation3 + $0x88] sm:$0xf] %vm4688_vm5, %v5375_v33  ;;  %11373 = vmatmul.msk.bf16.gmra.mxu1 %vm431_vm0, %v12437_v15  ;;  %v5820_v35 = vld [vmem:[#allocation2 + $0x20] sm:$0xff] }
 0x385   : > { %v4638_v1 = vadd.f32 %v15213_v12, %v4598_v24  ;;  %6338 = vst.msk [vmem:[#allocation2 + $0x10] sm:$0xff] %vm431_vm0, %v6302_v11  ;;  %11570 = vmatmul.msk.bf16.gmra.mxu3 %vm431_vm0, %v6563_v58 }
 0x386   : > { %v15413_v57 = vor.u32 %v5383_v27, %v5380_v41  ;;  %v12502_v41 = vld [vmem:[#allocation3 + $0x10] sm:$0xff] }
 0x387   : > { %v4674_v19 = vmax.f32 %v4638_v1, 0.0  ;;  %v5732_v39 = vpop.f32.mrf.mxu1  ;;  %v6817_v54 = vld [vmem:[#allocation2] sm:$0xff]  ;;  %v7445_v22 = vshll.u32 %v12502_v41, 16 }
 0x388   : > { %v4599_v55 = vld [vmem:[#allocation2 + $0x118] sm:$0xff]  ;;  %v5385_v25 = vsel %vm14504_vm11, %v5376_v30, %v15413_v57  ;;  %v6660_v14 = vpop.f32.mrf.mxu3  ;;  %5797 = vst.msk [vmem:[#allocation2 + $0x88] sm:$0xff] %vm431_vm0, %v5732_v39  ;;  %v7190_v42 = vadd.f32 %v15301_v45, %v6817_v54  ;;  %v5386_v0 = vrot.slane %v15413_v57, 4  ;;  %v11687_v30 = vld [vmem:[#allocation3 + $0x8] sm:$0xe]  ;;  %v7442_v54 = vshrl.u32 %v12502_v41, 16 }
 0x389   : > { %11275 = vst.msk [vmem:[%s14445_s22 + $0xf2] sm:$0xff] %vm431_vm0, %v4674_v19  ;;  %v5008_v31 = vmul.f32 %v4967_v49, %v4674_v19  ;;  %v4639_v40 = vadd.f32 %v15213_v12, %v4599_v55  ;;  %v6373_v52 = vld [vmem:[#allocation2 + $0x8] sm:$0xff]  ;;  %v4972_v12 = vpop.permute.xlu2 %4971  ;;  %v11688_v49 = vor.u32 %v12501_v38, %v11687_v30 }
 0x38a   : > { %v6746_v60 = vadd.f32 %v6657_v63, %v6373_v52  ;;  %v6217_v37 = vpop.f32.mrf.mxu2  ;;  %5479 = vst.msk [vmem:[#allocation3 + $0x8c] sm:$0xf] %vm4688_vm5, %v5385_v25  ;;  %v6083_v25 = vshll.u32 %v15454_v9, 16 }
 0x38b   : > { %v5044_v6 = vpack.c.bf16 %v5008_v31, %v5008_v31  ;;  %v4675_v13 = vmax.f32 %v4639_v40, 0.0  ;;  %v6303_v48 = vadd.f32 %v6217_v37, %v5819_v34  ;;  %7226 = vst.msk [vmem:[#allocation2] sm:$0xff] %vm431_vm0, %v7190_v42  ;;  %v15471_v31 = vld [vmem:[#allocation3 + $0x68] sm:$0xff] }
 0x38c   : > { %6782 = vst.msk [vmem:[#allocation2 + $0x8] sm:$0xff] %vm431_vm0, %v6746_v60  ;;  %v6374_v23 = vld [vmem:[#allocation2 + $0x10] sm:$0xff]  ;;  %v15431_v50 = vpop.f32.mrf.mxu0  ;;  %v5482_v60 = vld [vmem:[#allocation3 + $0x98] sm:$0x3]  ;;  %v6085_v16 = vrot.slane %v6083_v25, 1  ;;  %v7011_v42 = vrot.slane %v15471_v31, 1 }
 0x38d   : > { %v5388_v17 = vshrl.u32 %v5044_v6, 16  ;;  %v5391_v59 = vshll.u32 %v5044_v6, 16  ;;  %11276 = vst.msk [vmem:[%s14445_s22 + $0xfa] sm:$0x3f] %vm4694_vm14, %v4675_v13  ;;  %v5009_v36 = vmul.f32 %v4972_v12, %v4675_v13  ;;  %v6747_v28 = vadd.f32 %v6660_v14, %v6374_v23  ;;  %v5824_v31 = vld [vmem:[#allocation2 + $0x40] sm:$0xff]  ;;  %s12762_s22 = sshra.s32 %s10219_s18, 4  ;;  %s12763_s22 = int_to_ptr.hbm [resolvable:$true] %s12762_s22 }
 0x38e   : > { %6339 = vst.msk [vmem:[#allocation2 + $0x18] sm:$0xff] %vm431_vm0, %v6303_v48  ;;  %v7434_v6 = vshrl.u32 %v11688_v49, 16  ;;  %v7437_v13 = vshll.u32 %v11688_v49, 16  ;;  %v5821_v48 = vld [vmem:[#allocation2 + $0x28] sm:$0xff]  ;;  %v6079_v23 = vshrl.u32 %v15393_v47, 16  ;;  %v15489_v47 = vld [vmem:[#allocation3 + $0x60] sm:$0xff]  ;;  %v7012_v61 = vsel %vm1349_vm2, %v7009_v51, %v7011_v42  ;;  %p12769_p0 = scmp.lt.s32.totalorder %s12763_s22, %s17022_s7 }
 0x38f   : > { %v5390_v20 = vrot.slane %v5388_v17, 6  ;;  %v5393_v21 = vrot.slane %v5391_v59, 7  ;;  %v5045_v45 = vpack.c.bf16 %v5009_v36, %v5009_v36  ;;  %6783 = vst.msk [vmem:[#allocation2 + $0x10] sm:$0xff] %vm431_vm0, %v6747_v28  ;;  %11469 = vmatmul.msk.bf16.gmra.mxu2 %vm431_vm0, %v6078_v26  ;;  %11673 = vmatmul.msk.bf16.gmra.mxu0 %vm431_vm0, %v7010_v56  ;;  %v7444_v28 = vrot.slane %v7442_v54, 1  ;;  %s12764_s21 = scalar_lea.hbm %s12763_s22, 256 }
 0x390   : > { %v5735_v15 = vpop.f32.mrf.mxu1  ;;  %v6662_v62 = vpop.f32.mrf.mxu3  ;;  %v6081_v36 = vor.u32 %v6079_v23, %v15426_v5  ;;  %v7447_v26 = vrot.slane %v7445_v22, 2  ;;  %p12765_p11 = scmp.ne.s32.totalorder %s12763_s22, %s12764_s21  ;;  %p12770_p1 = scmp.lt.s32.totalorder %s12768_s9, %s12764_s21 }
 0x391   : > { %v5398_v63 = vshrl.u32 %v5045_v45, 16  ;;  %v5401_v33 = vshll.u32 %v5045_v45, 16  ;;  %v5394_v8 = vor.u32 %v5393_v21, %v5390_v20  ;;  %5798 = vst.msk [vmem:[#allocation2 + $0x90] sm:$0xff] %vm431_vm0, %v5735_v15  ;;  %v12438_v43 = vld [vmem:[#allocation3 + $0x88] sm:$0xff]  ;;  %v7436_v21 = vrot.slane %v7434_v6, 1 }
 0x392   : > { %v6220_v11 = vpop.f32.mrf.mxu2  ;;  %v6086_v20 = vsel %vm792_vm1, %v6081_v36, %v6085_v16  ;;  %v7439_v45 = vrot.slane %v7437_v13, 2  ;;  %p12766_p12 = pnand %p12765_p11, %p12925_p5  ;;  %p12771_p2 = por %p12770_p1, %p12769_p0 }
 0x393   : > { %v6304_v24 = vadd.f32 %v6220_v11, %v5820_v35  ;;  %v5395_v27 = vsel %vm14504_vm11, %v5386_v0, %v5394_v8  ;;  %v5400_v1 = vrot.slane %v5398_v63, 6  ;;  %v6818_v58 = vld [vmem:[#allocation2 + $0x8] sm:$0xff]  ;;  %v5403_v19 = vrot.slane %v5401_v33, 7 }
 0x394   : > { %v15458_v32 = vpop.f32.mrf.mxu0  ;;  %5480 = vst.msk [vmem:[#allocation3 + $0x90] sm:$0xf] %vm4688_vm5, %v5395_v27  ;;  %11374 = vmatmul.msk.bf16.gmra.mxu1 %vm431_vm0, %v12438_v43  ;;  %v7191_v55 = vadd.f32 %v15335_v7, %v6818_v58  ;;  %v5396_v40 = vrot.slane %v5394_v8, 4  ;;  %v15500_v63 = vor.u32 %v7447_v26, %v7444_v28  ;;  %v7440_v51 = vor.u32 %v7439_v45, %v7436_v21  ;;  %v15504_v8 = vld [vmem:[#allocation3 + $0x68] sm:$0xff]  ;;  %v15521_v58 = vld [vmem:[#allocation3 + $0x70] sm:$0xff]  ;;  %p12767_p13 = pneg %p12766_p12 }
 0x395   : > { %v6375_v57 = vld [vmem:[#allocation2 + $0x18] sm:$0xff]  ;;  %6340 = vst.msk [vmem:[#allocation2 + $0x20] sm:$0xff] %vm431_vm0, %v6304_v24  ;;  %11571 = vmatmul.msk.bf16.gmra.mxu3 %vm431_vm0, %v6565_v46  ;;  %v5404_v52 = vor.u32 %v5403_v19, %v5400_v1  ;;  %v6091_v1 = vshll.u32 %v15504_v8, 16 }
 0x396   : > { %v6748_v39 = vadd.f32 %v6662_v62, %v6375_v57  ;;  %v6819_v14 = vld [vmem:[#allocation2 + $0x10] sm:$0xff]  ;;  %7227 = vst.msk [vmem:[#allocation2 + $0x8] sm:$0xff] %vm431_vm0, %v7191_v55  ;;  %v6566_v62 = vrot.slane %v15489_v47, 1  ;;  %v7449_v11 = vsel %vm2240_vm3, %v7440_v51, %v15500_v63  ;;  %v5825_v47 = vld [vmem:[#allocation2 + $0x48] sm:$0xff]  ;;  %p12772_p3 = pnand %p12771_p2, %p12767_p13 }
 0x397   : > { %v5405_v7 = vsel %vm14504_vm11, %v5396_v40, %v5404_v52  ;;  %v5406_v18 = vrot.slane %v5404_v52, 4  ;;  %v7192_v34 = vadd.f32 %v15368_v53, %v6819_v14  ;;  %v6093_v25 = vrot.slane %v6091_v1, 1 }
 0x398   : > { %6784 = vst.msk [vmem:[#allocation2 + $0x18] sm:$0xff] %vm431_vm0, %v6748_v39  ;;  %v5737_v37 = vpop.f32.mrf.mxu1  ;;  %v6665_v10 = vpop.f32.mrf.mxu3  ;;  %v6567_v27 = vsel %vm1349_vm2, %v6564_v2, %v6566_v62  ;;  %v6087_v2 = vshrl.u32 %v15454_v9, 16  ;;  %v7013_v40 = vrot.slane %v15521_v58, 1  ;;  %v5826_v58 = vld [vmem:[#allocation2 + $0x50] sm:$0xff] }
 0x399   : > { %5481 = vst.msk [vmem:[#allocation3 + $0x94] sm:$0xf] %vm4688_vm5, %v5405_v7  ;;  %v5483_v3 = vsel %vm14340_vm10, %v5406_v18, %v5482_v60  ;;  %v15532_v18 = vld [vmem:[#allocation3 + $0x68] sm:$0xff] }
 0x39a   : > { %5799 = vst.msk [vmem:[#allocation2 + $0x98] sm:$0xff] %vm431_vm0, %v5737_v37  ;;  %v6222_v12 = vpop.f32.mrf.mxu2  ;;  %v7014_v9 = vsel %vm1349_vm2, %v7011_v42, %v7013_v40 }
 0x39b   : > { %v6305_v17 = vadd.f32 %v6222_v12, %v5821_v48  ;;  %5484 = vst [vmem:[#allocation3 + $0x98] sm:$0x3] %v5483_v3  ;;  %v6568_v48 = vrot.slane %v15532_v18, 1  ;;  %v5827_v18 = vld [vmem:[#allocation2 + $0x58] sm:$0xff] }
 0x39c   : > { %v6376_v53 = vld [vmem:[#allocation2 + $0x20] sm:$0xff]  ;;  %v15484_v59 = vpop.f32.mrf.mxu0  ;;  %7228 = vst.msk [vmem:[#allocation2 + $0x10] sm:$0xff] %vm431_vm0, %v7192_v34 }
 0x39d   : > { %v6749_v56 = vadd.f32 %v6665_v10, %v6376_v53  ;;  %6341 = vst.msk [vmem:[#allocation2 + $0x28] sm:$0xff] %vm431_vm0, %v6305_v17  ;;  %v12504_v53 = vld [vmem:[#allocation3 + $0x20] sm:$0xff]  ;;  %v6569_v28 = vsel %vm1349_vm2, %v6566_v62, %v6568_v48 }
 0x39e   : > { %v7460_v21 = vshrl.u32 %v12504_v53, 16  ;;  %v7463_v45 = vshll.u32 %v12504_v53, 16  ;;  %v15620_v53 = vld [vmem:[#allocation3 + $0x78] sm:$0xff] }
 0x39f   : > { %6785 = vst.msk [vmem:[#allocation2 + $0x20] sm:$0xff] %vm431_vm0, %v6749_v56  ;;  %11470 = vmatmul.msk.bf16.gmra.mxu2 %vm431_vm0, %v6086_v20  ;;  %11674 = vmatmul.msk.bf16.gmra.mxu0 %vm431_vm0, %v7012_v61  ;;  %v6820_v5 = vld [vmem:[#allocation2 + $0x18] sm:$0xff] }
 0x3a0   : > { %v7193_v33 = vadd.f32 %v15398_v29, %v6820_v5  ;;  %v6667_v15 = vpop.f32.mrf.mxu3  ;;  %v5740_v38 = vpop.f32.mrf.mxu1  ;;  %v12503_v29 = vld [vmem:[#allocation3 + $0x18] sm:$0xff] }
 0x3a1   : > { %5800 = vst.msk [vmem:[#allocation2 + $0xa0] sm:$0xff] %vm431_vm0, %v5740_v38  ;;  %v7451_v57 = vshrl.u32 %v12503_v29, 16  ;;  %v7454_v46 = vshll.u32 %v12503_v29, 16  ;;  %v15565_v56 = vld [vmem:[#allocation3 + $0x78] sm:$0xff]  ;;  %v15576_v29 = vld [vmem:[#allocation3 + $0x70] sm:$0xff] }
 0x3a2   : > { %v6225_v0 = vpop.f32.mrf.mxu2  ;;  %7229 = vst.msk [vmem:[#allocation2 + $0x18] sm:$0xff] %vm431_vm0, %v7193_v33  ;;  %v7015_v38 = vrot.slane %v15565_v56, 1  ;;  %v5828_v56 = vld [vmem:[#allocation2 + $0x60] sm:$0xff] }
 0x3a3   : > { %v6306_v43 = vadd.f32 %v6225_v0, %v5822_v4  ;;  %v7453_v60 = vrot.slane %v7451_v57, 1  ;;  %v7456_v22 = vrot.slane %v7454_v46, 2  ;;  %v6570_v57 = vrot.slane %v15576_v29, 1  ;;  %v5829_v29 = vld [vmem:[#allocation2 + $0x68] sm:$0xff] }
 0x3a4   : > { %v6377_v35 = vld [vmem:[#allocation2 + $0x28] sm:$0xff]  ;;  %v15510_v24 = vpop.f32.mrf.mxu0  ;;  %11765 = vmatmul.msk.bf16.vlgmr.msrb.gmra.mxu1 %vm431_vm0, %v7449_v11 }
 0x3a5   : > { %v6750_v41 = vadd.f32 %v6667_v15, %v6377_v35  ;;  %6342 = vst.msk [vmem:[#allocation2 + $0x30] sm:$0xff] %vm431_vm0, %v6306_v43  ;;  %11572 = vmatmul.msk.bf16.gmra.mxu3 %vm431_vm0, %v6567_v27  ;;  %v15544_v6 = vor.u32 %v7456_v22, %v7453_v60  ;;  %v6095_v15 = vshrl.u32 %v15504_v8, 16  ;;  %v7462_v43 = vrot.slane %v7460_v21, 1 }
 0x3a6   : > { %v6821_v30 = vld [vmem:[#allocation2 + $0x20] sm:$0xff]  ;;  %v7465_v35 = vrot.slane %v7463_v45, 2  ;;  %v7016_v8 = vsel %vm1349_vm2, %v7013_v40, %v7015_v38  ;;  %v6572_v21 = vrot.slane %v15620_v53, 1  ;;  %v5831_v53 = vld [vmem:[#allocation2 + $0x78] sm:$0xff] }
 0x3a7   : > { %6786 = vst.msk [vmem:[#allocation2 + $0x28] sm:$0xff] %vm431_vm0, %v6750_v41  ;;  %v7194_v19 = vadd.f32 %v15431_v50, %v6821_v30  ;;  %v6089_v50 = vor.u32 %v6087_v2, %v6085_v16  ;;  %v15548_v16 = vld [vmem:[#allocation3 + $0x70] sm:$0xff] }
 0x3a8   : > { %v6670_v49 = vpop.f32.mrf.mxu3  ;;  %v5742_v55 = vpop.f32.mrf.mxu1  ;;  %v6099_v26 = vshll.u32 %v15548_v16, 16  ;;  %v15588_v30 = vor.u32 %v7465_v35, %v7462_v43 }
 0x3a9   : > { %7230 = vst.msk [vmem:[#allocation2 + $0x20] sm:$0xff] %vm431_vm0, %v7194_v19  ;;  %v6094_v34 = vsel %vm792_vm1, %v6089_v50, %v6093_v25  ;;  %v15609_v50 = vld [vmem:[#allocation3 + $0x80] sm:$0xff] }
 0x3aa   : > { %v6227_v39 = vpop.f32.mrf.mxu2  ;;  %5801 = vst.msk [vmem:[#allocation2 + $0xa8] sm:$0xff] %vm431_vm0, %v5742_v55  ;;  %v6101_v62 = vrot.slane %v6099_v26, 1  ;;  %v15592_v55 = vld [vmem:[#allocation3 + $0x78] sm:$0xff] }
 0x3ab   : > { %v6307_v52 = vadd.f32 %v6227_v39, %v5823_v44 }
 0x3ac   : > { %v6378_v14 = vld [vmem:[#allocation2 + $0x30] sm:$0xff]  ;;  %v15529_v54 = vpop.f32.mrf.mxu0 }
 0x3ad   : > { %v6751_v7 = vadd.f32 %v6670_v49, %v6378_v14  ;;  %6343 = vst.msk [vmem:[#allocation2 + $0x38] sm:$0xff] %vm431_vm0, %v6307_v52  ;;  %v6571_v52 = vsel %vm1349_vm2, %v6568_v48, %v6570_v57  ;;  %v6107_v14 = vshll.u32 %v15592_v55, 16  ;;  %v7017_v48 = vrot.slane %v15609_v50, 1  ;;  %v5830_v50 = vld [vmem:[#allocation2 + $0x70] sm:$0xff] }
 0x3ae   : > { %v6822_v37 = vld [vmem:[#allocation2 + $0x28] sm:$0xff] }
 0x3af   : > { %6787 = vst.msk [vmem:[#allocation2 + $0x30] sm:$0xff] %vm431_vm0, %v6751_v7  ;;  %11471 = vmatmul.msk.bf16.gmra.mxu2 %vm431_vm0, %v6094_v34  ;;  %11675 = vmatmul.msk.bf16.gmra.mxu0 %vm431_vm0, %v7014_v9  ;;  %v7195_v10 = vadd.f32 %v15458_v32, %v6822_v37  ;;  %v7458_v32 = vsel %vm2240_vm3, %v15500_v63, %v15544_v6 }
 0x3b0   : > { %v6672_v13 = vpop.f32.mrf.mxu3  ;;  %v5745_v12 = vpop.f32.mrf.mxu1 }
 0x3b1   : > { %7231 = vst.msk [vmem:[#allocation2 + $0x28] sm:$0xff] %vm431_vm0, %v7195_v10 }
 0x3b2   : > { %v6230_v23 = vpop.f32.mrf.mxu2  ;;  %5802 = vst.msk [vmem:[#allocation2 + $0xb0] sm:$0xff] %vm431_vm0, %v5745_v12 }
 0x3b3   : > { %v6308_v42 = vadd.f32 %v6230_v23, %v5824_v31 }
 0x3b4   : > { %v6379_v3 = vld [vmem:[#allocation2 + $0x38] sm:$0xff]  ;;  %v15554_v17 = vpop.f32.mrf.mxu0  ;;  %11766 = vmatmul.msk.bf16.gmra.mxu1 %vm431_vm0, %v7458_v32 }
 0x3b5   : > { %v6752_v36 = vadd.f32 %v6672_v13, %v6379_v3  ;;  %6344 = vst.msk [vmem:[#allocation2 + $0x40] sm:$0xff] %vm431_vm0, %v6308_v42  ;;  %11573 = vmatmul.msk.bf16.gmra.mxu3 %vm431_vm0, %v6569_v28  ;;  %v6109_v13 = vrot.slane %v6107_v14, 1 }
 0x3b6   : > { %v6823_v20 = vld [vmem:[#allocation2 + $0x30] sm:$0xff] }
 0x3b7   : > { %6788 = vst.msk [vmem:[#allocation2 + $0x38] sm:$0xff] %vm431_vm0, %v6752_v36  ;;  %v7196_v61 = vadd.f32 %v15484_v59, %v6823_v20  ;;  %v6097_v59 = vor.u32 %v6095_v15, %v6093_v25  ;;  %v12505_v25 = vld [vmem:[#allocation3 + $0x28] sm:$0xff] }
 0x3b8   : > { %v6675_v5 = vpop.f32.mrf.mxu3  ;;  %v5747_v63 = vpop.f32.mrf.mxu1  ;;  %v7469_v7 = vshrl.u32 %v12505_v25, 16  ;;  %v7472_v34 = vshll.u32 %v12505_v25, 16  ;;  %v15664_v25 = vld [vmem:[#allocation3 + $0x80] sm:$0xff] }
 0x3b9   : > { %7232 = vst.msk [vmem:[#allocation2 + $0x30] sm:$0xff] %vm431_vm0, %v7196_v61  ;;  %v6102_v41 = vsel %vm792_vm1, %v6097_v59, %v6101_v62  ;;  %v15653_v59 = vld [vmem:[#allocation3 + $0x88] sm:$0xff] }
 0x3ba   : > { %v6232_v33 = vpop.f32.mrf.mxu2  ;;  %5803 = vst.msk [vmem:[#allocation2 + $0xb8] sm:$0xff] %vm431_vm0, %v5747_v63  ;;  %v7471_v42 = vrot.slane %v7469_v7, 1  ;;  %v7474_v3 = vrot.slane %v7472_v34, 2  ;;  %v15636_v63 = vld [vmem:[#allocation3 + $0x80] sm:$0xff]  ;;  %v6574_v7 = vrot.slane %v15664_v25, 1 }
 0x3bb   : > { %v6309_v4 = vadd.f32 %v6232_v33, %v5825_v47 }
 0x3bc   : > { %v6380_v0 = vld [vmem:[#allocation2 + $0x40] sm:$0xff]  ;;  %v15573_v51 = vpop.f32.mrf.mxu0  ;;  %v15632_v20 = vor.u32 %v7474_v3, %v7471_v42 }
 0x3bd   : > { %v6753_v11 = vadd.f32 %v6675_v5, %v6380_v0  ;;  %6345 = vst.msk [vmem:[#allocation2 + $0x48] sm:$0xff] %vm431_vm0, %v6309_v4  ;;  %v6573_v4 = vsel %vm1349_vm2, %v6570_v57, %v6572_v21  ;;  %v6115_v0 = vshll.u32 %v15636_v63, 16  ;;  %v7019_v57 = vrot.slane %v15653_v59, 1 }
 0x3be   : > { %v6824_v27 = vld [vmem:[#allocation2 + $0x38] sm:$0xff] }
 0x3bf   : > { %6789 = vst.msk [vmem:[#allocation2 + $0x40] sm:$0xff] %vm431_vm0, %v6753_v11  ;;  %11472 = vmatmul.msk.bf16.gmra.mxu2 %vm431_vm0, %v6102_v41  ;;  %11676 = vmatmul.msk.bf16.gmra.mxu0 %vm431_vm0, %v7016_v8  ;;  %v7197_v1 = vadd.f32 %v15510_v24, %v6824_v27  ;;  %v7467_v24 = vsel %vm2240_vm3, %v15544_v6, %v15588_v30  ;;  %v6103_v6 = vshrl.u32 %v15548_v16, 16 }
 0x3c0   : > { %v6677_v19 = vpop.f32.mrf.mxu3  ;;  %v7018_v16 = vsel %vm1349_vm2, %v7015_v38, %v7017_v48 }
 0x3c1   : > { %7233 = vst.msk [vmem:[#allocation2 + $0x38] sm:$0xff] %vm431_vm0, %v7197_v1  ;;  %v5750_v46 = vpop.f32.mrf.mxu1 }
 0x3c2   : > { %v6235_v49 = vpop.f32.mrf.mxu2  ;;  %5804 = vst.msk [vmem:[#allocation2 + $0xc0] sm:$0xff] %vm431_vm0, %v5750_v46 }
 0x3c3   : > { %v6310_v44 = vadd.f32 %v6235_v49, %v5826_v58 }
 0x3c4   : > { %v6381_v39 = vld [vmem:[#allocation2 + $0x48] sm:$0xff]  ;;  %v15598_v2 = vpop.f32.mrf.mxu0  ;;  %11767 = vmatmul.msk.bf16.gmra.mxu1 %vm431_vm0, %v7467_v24 }
 0x3c5   : > { %v6754_v40 = vadd.f32 %v6677_v19, %v6381_v39  ;;  %6346 = vst.msk [vmem:[#allocation2 + $0x50] sm:$0xff] %vm431_vm0, %v6310_v44  ;;  %11574 = vmatmul.msk.bf16.gmra.mxu3 %vm431_vm0, %v6571_v52  ;;  %v6117_v19 = vrot.slane %v6115_v0, 1 }
 0x3c6   : > { %v6825_v60 = vld [vmem:[#allocation2 + $0x40] sm:$0xff] }
 0x3c7   : > { %6790 = vst.msk [vmem:[#allocation2 + $0x48] sm:$0xff] %vm431_vm0, %v6754_v40  ;;  %v7198_v22 = vadd.f32 %v15529_v54, %v6825_v60  ;;  %v6105_v54 = vor.u32 %v6103_v6, %v6101_v62  ;;  %v12506_v62 = vld [vmem:[#allocation3 + $0x30] sm:$0xff] }
 0x3c8   : > { %v6680_v9 = vpop.f32.mrf.mxu3  ;;  %v7478_v11 = vshrl.u32 %v12506_v62, 16  ;;  %v7481_v41 = vshll.u32 %v12506_v62, 16 }
 0x3c9   : > { %7234 = vst.msk [vmem:[#allocation2 + $0x40] sm:$0xff] %vm431_vm0, %v7198_v22  ;;  %v5752_v37 = vpop.f32.mrf.mxu1  ;;  %v6110_v36 = vsel %vm792_vm1, %v6105_v54, %v6109_v13  ;;  %v15697_v54 = vld [vmem:[#allocation3 + $0x90] sm:$0xff] }
 0x3ca   : > { %v6237_v10 = vpop.f32.mrf.mxu2  ;;  %5805 = vst.msk [vmem:[#allocation2 + $0xc8] sm:$0xff] %vm431_vm0, %v5752_v37  ;;  %v7480_v44 = vrot.slane %v7478_v11, 1  ;;  %v7483_v39 = vrot.slane %v7481_v41, 2  ;;  %v15680_v37 = vld [vmem:[#allocation3 + $0x88] sm:$0xff]  ;;  %v12539_v11 = vld [vmem:[%s17018_s3 + $0x50] sm:$0xff] }
 0x3cb   : > { %v6311_v12 = vadd.f32 %v6237_v10, %v5827_v18  ;;  %v12579_v41 = vld [vmem:[%s17018_s3 + $0x70] sm:$0xff]  ;;  %8121 = vmatpush.bf16.msra.mxu2 %v12539_v11  ;;  %v12521_v11 = vld [vmem:[#allocation3 + $0x8] sm:$0xf0] }
 0x3cc   : > { %v6382_v31 = vld [vmem:[#allocation2 + $0x50] sm:$0xff]  ;;  %v15617_v23 = vpop.f32.mrf.mxu0  ;;  %v15676_v60 = vor.u32 %v7483_v39, %v7480_v44  ;;  %9144 = vmatpush.bf16.msra.mxu0 %v12579_v41  ;;  %v12508_v39 = vld [vmem:[#allocation3 + $0x40] sm:$0xff] }
 0x3cd   : > { %v6755_v32 = vadd.f32 %v6680_v9, %v6382_v31  ;;  %6347 = vst.msk [vmem:[#allocation2 + $0x58] sm:$0xff] %vm431_vm0, %v6311_v12  ;;  %v6575_v12 = vsel %vm1349_vm2, %v6572_v21, %v6574_v7  ;;  %v6123_v31 = vshll.u32 %v15680_v37, 16  ;;  %v7021_v21 = vrot.slane %v15697_v54, 1 }
 0x3ce   : > { %v6826_v28 = vld [vmem:[#allocation2 + $0x48] sm:$0xff] }
 0x3cf   : > { %6791 = vst.msk [vmem:[#allocation2 + $0x50] sm:$0xff] %vm431_vm0, %v6755_v32  ;;  %11473 = vmatmul.msk.bf16.gmra.mxu2 %vm431_vm0, %v6110_v36  ;;  %11677 = vmatmul.msk.bf16.gmra.mxu0 %vm431_vm0, %v7018_v16  ;;  %v7199_v26 = vadd.f32 %v15554_v17, %v6826_v28  ;;  %v7476_v17 = vsel %vm2240_vm3, %v15588_v30, %v15632_v20  ;;  %v6111_v30 = vshrl.u32 %v15592_v55, 16 }
 0x3d0   : > { %v6682_v61 = vpop.f32.mrf.mxu3  ;;  %v7020_v55 = vsel %vm1349_vm2, %v7017_v48, %v7019_v57 }
 0x3d1   : > { %7235 = vst.msk [vmem:[#allocation2 + $0x48] sm:$0xff] %vm431_vm0, %v7199_v26  ;;  %v5755_v45 = vpop.f32.mrf.mxu1 }
 0x3d2   : > { %v6240_v5 = vpop.f32.mrf.mxu2  ;;  %5806 = vst.msk [vmem:[#allocation2 + $0xd0] sm:$0xff] %vm431_vm0, %v5755_v45 }
 0x3d3   : > { %v6312_v47 = vadd.f32 %v6240_v5, %v5828_v56  ;;  %v5888_v56 = vld [vmem:[#allocation3 + $0x90] sm:$0x1] }
 0x3d4   : > { %v6383_v33 = vld [vmem:[#allocation2 + $0x58] sm:$0xff]  ;;  %v15642_v15 = vpop.f32.mrf.mxu0  ;;  %11768 = vmatmul.msk.bf16.gmra.mxu1 %vm431_vm0, %v7476_v17  ;;  %v5967_v0 = vunpack.c.l.b16 %v5888_v56 }
 0x3d5   : > { %v6756_v38 = vadd.f32 %v6682_v61, %v6383_v33  ;;  %6348 = vst.msk [vmem:[#allocation2 + $0x60] sm:$0xff] %vm431_vm0, %v6312_v47  ;;  %11575 = vmatmul.msk.bf16.gmra.mxu3 %vm431_vm0, %v6573_v4  ;;  %v15703_v61 = vrot.slane %v6123_v31, 1  ;;  %v7022_v4 = vsel %vm1349_vm2, %v7019_v57, %v7021_v21 }
 0x3d6   : > { %v6827_v43 = vld [vmem:[#allocation2 + $0x50] sm:$0xff]  ;;  %v5986_v57 = vpack.c.b16 %v5967_v0, %v5967_v0 }
 0x3d7   : > { %6792 = vst.msk [vmem:[#allocation2 + $0x58] sm:$0xff] %vm431_vm0, %v6756_v38  ;;  %v7200_v35 = vadd.f32 %v15573_v51, %v6827_v43  ;;  %v6113_v51 = vor.u32 %v6111_v30, %v6109_v13  ;;  %v12507_v13 = vld [vmem:[#allocation3 + $0x38] sm:$0xff]  ;;  %v15710_v38 = vld [vmem:[#allocation3 + $0x88] sm:$0xff]  ;;  %v5832_v30 = vld [vmem:[#allocation2 + $0x80] sm:$0xff] }
 0x3d8   : > { %v6685_v8 = vpop.f32.mrf.mxu3  ;;  %v7487_v32 = vshrl.u32 %v12507_v13, 16  ;;  %v7490_v36 = vshll.u32 %v12507_v13, 16  ;;  %v6127_v13 = vshrl.u32 %v15680_v37, 16 }
 0x3d9   : > { %7236 = vst.msk [vmem:[#allocation2 + $0x50] sm:$0xff] %vm431_vm0, %v7200_v35  ;;  %v5757_v27 = vpop.f32.mrf.mxu1  ;;  %v6118_v40 = vsel %vm792_vm1, %v6113_v51, %v6117_v19  ;;  %v6889_v35 = vld [vmem:[#allocation3 + $0x98] sm:$0x1] }
 0x3da   : > { %v6242_v1 = vpop.f32.mrf.mxu2  ;;  %5807 = vst.msk [vmem:[#allocation2 + $0xd8] sm:$0xff] %vm431_vm0, %v5757_v27  ;;  %v7489_v33 = vrot.slane %v7487_v32, 1  ;;  %v7492_v17 = vrot.slane %v7490_v36, 2 }
 0x3db   : > { %v6313_v46 = vadd.f32 %v6242_v1, %v5829_v29  ;;  %v6576_v29 = vrot.slane %v15710_v38, 1 }
 0x3dc   : > { %v6384_v58 = vld [vmem:[#allocation2 + $0x60] sm:$0xff]  ;;  %v15661_v49 = vpop.f32.mrf.mxu0 }
 0x3dd   : > { %v6757_v24 = vadd.f32 %v6685_v8, %v6384_v58  ;;  %6349 = vst.msk [vmem:[#allocation2 + $0x68] sm:$0xff] %vm431_vm0, %v6313_v46  ;;  %v15729_v8 = vor.u32 %v7492_v17, %v7489_v33  ;;  %v6968_v46 = vunpack.c.l.b16 %v6889_v35 }
 0x3de   : > { %v6828_v52 = vld [vmem:[#allocation2 + $0x58] sm:$0xff] }
 0x3df   : > { %6793 = vst.msk [vmem:[#allocation2 + $0x60] sm:$0xff] %vm431_vm0, %v6757_v24  ;;  %11474 = vmatmul.msk.bf16.gmra.mxu2 %vm431_vm0, %v6118_v40  ;;  %11678 = vmatmul.msk.bf16.gmra.mxu0 %vm431_vm0, %v7020_v55  ;;  %v7201_v14 = vadd.f32 %v15598_v2, %v6828_v52  ;;  %v7485_v2 = vsel %vm2240_vm3, %v15632_v20, %v15676_v60  ;;  %v6119_v20 = vshrl.u32 %v15636_v63, 16  ;;  %v6131_v55 = vshll.u32 %v5986_v57, 16  ;;  %v15782_v57 = vld [vmem:[#allocation3 + $0x10] sm:$0xff] }
 0x3e0   : > { %v6687_v22 = vpop.f32.mrf.mxu3  ;;  %v6577_v40 = vsel %vm1349_vm2, %v6574_v7, %v6576_v29  ;;  %v6987_v52 = vpack.c.b16 %v6968_v46, %v6968_v46 }
 0x3e1   : > { %7237 = vst.msk [vmem:[#allocation2 + $0x58] sm:$0xff] %vm431_vm0, %v7201_v14  ;;  %v5760_v34 = vpop.f32.mrf.mxu1  ;;  %v6121_v47 = vor.u32 %v6119_v20, %v6117_v19  ;;  %v6444_v14 = vld [vmem:[#allocation3 + $0x90] sm:$0x1]  ;;  %v12562_v20 = vld [vmem:[#allocation3 + $0x18] sm:$0xff] }
 0x3e2   : > { %v6245_v9 = vpop.f32.mrf.mxu2  ;;  %5808 = vst.msk [vmem:[#allocation2 + $0xe0] sm:$0xff] %vm431_vm0, %v5760_v34  ;;  %v6523_v25 = vunpack.c.l.b16 %v6444_v14 }
 0x3e3   : > { %v6314_v18 = vadd.f32 %v6245_v9, %v5830_v50  ;;  %v6126_v63 = vsel %vm792_vm1, %v6121_v47, %v15703_v61  ;;  %v7496_v50 = vshrl.u32 %v12508_v39, 16  ;;  %v7499_v9 = vshll.u32 %v12508_v39, 16 }
 0x3e4   : > { %v6385_v10 = vld [vmem:[#allocation2 + $0x68] sm:$0xff]  ;;  %v15686_v6 = vpop.f32.mrf.mxu0  ;;  %11769 = vmatmul.msk.bf16.gmra.mxu1 %vm431_vm0, %v7485_v2 }
 0x3e5   : > { %v6758_v48 = vadd.f32 %v6687_v22, %v6385_v10  ;;  %6350 = vst.msk [vmem:[#allocation2 + $0x70] sm:$0xff] %vm431_vm0, %v6314_v18  ;;  %11576 = vmatmul.msk.bf16.gmra.mxu3 %vm431_vm0, %v6575_v12  ;;  %v12559_v22 = vld [vmem:[%s17018_s3 + $0x60] sm:$0xff]  ;;  %v5833_v10 = vld [vmem:[#allocation2 + $0x88] sm:$0xff]  ;;  %v7023_v12 = vrot.slane %v6987_v52, 1  ;;  %v7498_v32 = vrot.slane %v7496_v50, 1  ;;  %v7501_v36 = vrot.slane %v7499_v9, 2 }
 0x3e6   : > { %v6829_v42 = vld [vmem:[#allocation2 + $0x60] sm:$0xff]  ;;  %8566 = vmatpush.bf16.msra.mxu3 %v12559_v22  ;;  %v5835_v52 = vld [vmem:[#allocation2 + $0x98] sm:$0xff] }
 0x3e7   : > { %6794 = vst.msk [vmem:[#allocation2 + $0x68] sm:$0xff] %vm431_vm0, %v6758_v48  ;;  %v7202_v3 = vadd.f32 %v15617_v23, %v6829_v42  ;;  %v6133_v48 = vrot.slane %v6131_v55, 1  ;;  %v7024_v37 = vsel %vm1349_vm2, %v7021_v21, %v7023_v12  ;;  %v5834_v21 = vld [vmem:[#allocation2 + $0x90] sm:$0xff] }
 0x3e8   : > { %v6690_v16 = vpop.f32.mrf.mxu3 }
 0x3e9   : > { %7238 = vst.msk [vmem:[#allocation2 + $0x60] sm:$0xff] %vm431_vm0, %v7202_v3  ;;  %v5762_v28 = vpop.f32.mrf.mxu1 }
 0x3ea   : > { %v6247_v26 = vpop.f32.mrf.mxu2  ;;  %5809 = vst.msk [vmem:[#allocation2 + $0xe8] sm:$0xff] %vm431_vm0, %v5762_v28  ;;  %v6542_v28 = vpack.c.b16 %v6523_v25, %v6523_v25 }
 0x3eb   : > { %v6315_v45 = vadd.f32 %v6247_v26, %v5831_v53  ;;  %v12561_v53 = vld [vmem:[#allocation3 + $0x10] sm:$0xf0] }
 0x3ec   : > { %v6386_v5 = vld [vmem:[#allocation2 + $0x70] sm:$0xff]  ;;  %v15707_v23 = vpop.f32.mrf.mxu0  ;;  %v6578_v17 = vrot.slane %v6542_v28, 1 }
 0x3ed   : > { %v6759_v62 = vadd.f32 %v6690_v16, %v6386_v5  ;;  %6351 = vst.msk [vmem:[#allocation2 + $0x78] sm:$0xff] %vm431_vm0, %v6315_v45  ;;  %v15767_v5 = vor.u32 %v7501_v36, %v7498_v32 }
 0x3ee   : > { %v6830_v43 = vld [vmem:[#allocation2 + $0x68] sm:$0xff] }
 0x3ef   : > { %6795 = vst.msk [vmem:[#allocation2 + $0x70] sm:$0xff] %vm431_vm0, %v6759_v62  ;;  %11475 = vmatmul.msk.bf16.gmra.mxu2 %vm431_vm0, %v6126_v63  ;;  %11679 = vmatmul.msk.bf16.gmra.mxu0 %vm431_vm0, %v7022_v4  ;;  %v7203_v59 = vadd.f32 %v15642_v15, %v6830_v43  ;;  %v7494_v15 = vsel %vm2240_vm3, %v15676_v60, %v15729_v8  ;;  %v8910_v63 = vshrl.u32 %v12562_v20, 16  ;;  %v8913_v4 = vshll.u32 %v12562_v20, 16 }
 0x3f0   : > { %v6692_v27 = vpop.f32.mrf.mxu3 }
 0x3f1   : > { %7239 = vst.msk [vmem:[#allocation2 + $0x68] sm:$0xff] %vm431_vm0, %v7203_v59  ;;  %v5765_v1 = vpop.f32.mrf.mxu1  ;;  %v8915_v46 = vrot.slane %v8913_v4, 3 }
 0x3f2   : > { %v6250_v19 = vpop.f32.mrf.mxu2  ;;  %5810 = vst.msk [vmem:[#allocation2 + $0xf0] sm:$0xff] %vm431_vm0, %v5765_v1 }
 0x3f3   : > { %v6316_v58 = vadd.f32 %v6250_v19, %v5832_v30  ;;  %v6579_v30 = vsel %vm1349_vm2, %v6576_v29, %v6578_v17  ;;  %v11789_v19 = vld [vmem:[#allocation3 + $0x8] sm:$0xc] }
 0x3f4   : > { %v6387_v51 = vld [vmem:[#allocation2 + $0x78] sm:$0xff]  ;;  %v15737_v44 = vpop.f32.mrf.mxu0  ;;  %11770 = vmatmul.msk.bf16.gmra.mxu1 %vm431_vm0, %v7494_v15 }
 0x3f5   : > { %v6760_v24 = vadd.f32 %v6692_v27, %v6387_v51  ;;  %6352 = vst.msk [vmem:[#allocation2 + $0x80] sm:$0xff] %vm431_vm0, %v6316_v58  ;;  %11577 = vmatmul.msk.bf16.gmra.mxu3 %vm431_vm0, %v6577_v40  ;;  %v12509_v27 = vld [vmem:[#allocation3 + $0x48] sm:$0xff]  ;;  %v11790_v51 = vor.u32 %v12521_v11, %v11789_v19 }
 0x3f6   : > { %v6831_v60 = vld [vmem:[#allocation2 + $0x70] sm:$0xff]  ;;  %v7505_v40 = vshrl.u32 %v12509_v27, 16  ;;  %v7508_v55 = vshll.u32 %v12509_v27, 16 }
 0x3f7   : > { %6796 = vst.msk [vmem:[#allocation2 + $0x78] sm:$0xff] %vm431_vm0, %v6760_v24  ;;  %v7204_v34 = vadd.f32 %v15661_v49, %v6831_v60  ;;  %v6129_v49 = vor.u32 %v6127_v13, %v15703_v61  ;;  %v11993_v61 = vld [vmem:[#allocation3 + $0x10] sm:$0xc]  ;;  %v8012_v60 = vrot.slane %v15782_v57, 2  ;;  %v15794_v13 = vld [vmem:[#allocation3 + $0x18] sm:$0xff] }
 0x3f8   : > { %v6695_v18 = vpop.f32.mrf.mxu3  ;;  %v11994_v47 = vor.u32 %v12561_v53, %v11993_v61  ;;  %v7507_v25 = vrot.slane %v7505_v40, 1  ;;  %v8457_v53 = vrot.slane %v15794_v13, 2  ;;  %v7263_v13 = vld [vmem:[#allocation2 + $0x8] sm:$0xff] }
 0x3f9   : > { %7240 = vst.msk [vmem:[#allocation2 + $0x70] sm:$0xff] %vm431_vm0, %v7204_v34  ;;  %v5767_v7 = vpop.f32.mrf.mxu1  ;;  %v6134_v26 = vsel %vm792_vm1, %v6129_v49, %v6133_v48 }
 0x3fa   : > { %v6252_v2 = vpop.f32.mrf.mxu2  ;;  %5811 = vst.msk [vmem:[#allocation2 + $0xf8] sm:$0xff] %vm431_vm0, %v5767_v7  ;;  %v8902_v41 = vshrl.u32 %v11994_v47, 16  ;;  %v8905_v59 = vshll.u32 %v11994_v47, 16  ;;  %v7510_v7 = vrot.slane %v7508_v55, 2 }
 0x3fb   : > { %v6317_v31 = vadd.f32 %v6252_v2, %v5833_v10  ;;  %v12541_v10 = vld [vmem:[#allocation3 + $0x10] sm:$0xf0] }
 0x3fc   : > { %v6388_v42 = vld [vmem:[#allocation2 + $0x80] sm:$0xff]  ;;  %v15755_v3 = vpop.f32.mrf.mxu0  ;;  %v8904_v39 = vrot.slane %v8902_v41, 2  ;;  %v8907_v24 = vrot.slane %v8905_v59, 3 }
 0x3fd   : > { %v6761_v16 = vadd.f32 %v6695_v18, %v6388_v42  ;;  %6353 = vst.msk [vmem:[#allocation2 + $0x88] sm:$0xff] %vm431_vm0, %v6317_v31  ;;  %v11891_v31 = vld [vmem:[#allocation3 + $0x10] sm:$0xc]  ;;  %v12563_v42 = vld [vmem:[#allocation3 + $0x20] sm:$0xff] }
 0x3fe   : > { %v6832_v45 = vld [vmem:[#allocation2 + $0x78] sm:$0xff]  ;;  %v8908_v18 = vor.u32 %v8907_v24, %v8904_v39  ;;  %v11892_v32 = vor.u32 %v12541_v10, %v11891_v31  ;;  %v8922_v61 = vshll.u32 %v12563_v42, 16  ;;  %v12599_v41 = vld [vmem:[%s17018_s3 + $0x80] sm:$0xff] }
 0x3ff   : > { %6797 = vst.msk [vmem:[#allocation2 + $0x80] sm:$0xff] %vm431_vm0, %v6761_v16  ;;  %11476 = vmatmul.msk.bf16.gmra.mxu2 %vm431_vm0, %v6134_v26  ;;  %11680 = vmatmul.msk.bf16.gmra.mxu0 %vm431_vm0, %v7024_v37  ;;  %v7205_v56 = vadd.f32 %v15686_v6, %v6832_v45  ;;  %v7503_v6 = vsel %vm2240_vm3, %v15729_v8, %v15767_v5  ;;  %v8912_v8 = vrot.slane %v8910_v63, 2  ;;  %v5836_v37 = vld [vmem:[#allocation2 + $0xa0] sm:$0xff]  ;;  %v8919_v45 = vshrl.u32 %v12563_v42, 16  ;;  %v15821_v63 = vld [vmem:[#allocation3 + $0x18] sm:$0xff] }
 0x400   : > { %v6697_v33 = vpop.f32.mrf.mxu3  ;;  %v15805_v16 = vor.u32 %v7510_v7, %v7507_v25  ;;  %v8456_v47 = vrot.slane %v11892_v32, 2  ;;  %v8014_v19 = vrot.slane %v15821_v63, 2  ;;  %9589 = vmatpush.bf16.msra.mxu1 %v12599_v41  ;;  %v15836_v24 = vld [vmem:[#allocation3 + $0x20] sm:$0xff] }
 0x401   : > { %7241 = vst.msk [vmem:[#allocation2 + $0x78] sm:$0xff] %vm431_vm0, %v7205_v56  ;;  %v5770_v54 = vpop.f32.mrf.mxu1  ;;  %v15788_v22 = vor.u32 %v8915_v46, %v8912_v8  ;;  %v8921_v4 = vrot.slane %v8919_v45, 2  ;;  %v8459_v57 = vrot.slane %v15836_v24, 2  ;;  %v5839_v45 = vld [vmem:[#allocation2 + $0xb8] sm:$0xff]  ;;  %v5840_v63 = vld [vmem:[#allocation2 + $0xc0] sm:$0xff] }
 0x402   : > { %v6255_v62 = vpop.f32.mrf.mxu2  ;;  %5812 = vst.msk [vmem:[#allocation2 + $0x100] sm:$0xff] %vm431_vm0, %v5770_v54  ;;  %v12510_v54 = vld [vmem:[#allocation3 + $0x50] sm:$0xff]  ;;  %v8015_v40 = vsel %vm2819_vm4, %v8012_v60, %v8014_v19 }
 0x403   : > { %v6318_v0 = vadd.f32 %v6255_v62, %v5834_v21  ;;  %v8917_v12 = vsel %vm3710_vm7, %v8908_v18, %v15788_v22  ;;  %v8458_v62 = vsel %vm2819_vm4, %v8456_v47, %v8457_v53  ;;  %v7517_v11 = vshll.u32 %v12510_v54, 16 }
 0x404   : > { %v6389_v43 = vld [vmem:[#allocation2 + $0x88] sm:$0xff]  ;;  %v15774_v35 = vpop.f32.mrf.mxu0  ;;  %11771 = vmatmul.msk.bf16.gmra.mxu1 %vm431_vm0, %v7503_v6  ;;  %v7514_v6 = vshrl.u32 %v12510_v54, 16  ;;  %v8460_v42 = vsel %vm2819_vm4, %v8457_v53, %v8459_v57 }
 0x405   : > { %v6762_v1 = vadd.f32 %v6697_v33, %v6389_v43  ;;  %6354 = vst.msk [vmem:[#allocation2 + $0x90] sm:$0xff] %vm431_vm0, %v6318_v0  ;;  %11578 = vmatmul.msk.bf16.gmra.mxu3 %vm431_vm0, %v6579_v30  ;;  %v8924_v0 = vrot.slane %v8922_v61, 3 }
 0x406   : > { %v6833_v58 = vld [vmem:[#allocation2 + $0x80] sm:$0xff] }
 0x407   : > { %6798 = vst.msk [vmem:[#allocation2 + $0x88] sm:$0xff] %vm431_vm0, %v6762_v1  ;;  %v7206_v15 = vadd.f32 %v15707_v23, %v6833_v58  ;;  %v8011_v23 = vrot.slane %v11790_v51, 2  ;;  %v5837_v1 = vld [vmem:[#allocation2 + $0xa8] sm:$0xff]  ;;  %v15830_v8 = vor.u32 %v8924_v0, %v8921_v4  ;;  %v7516_v51 = vrot.slane %v7514_v6, 1  ;;  %v12565_v6 = vld [vmem:[#allocation3 + $0x30] sm:$0xff] }
 0x408   : > { %v6700_v38 = vpop.f32.mrf.mxu3  ;;  %v15879_v4 = vld [vmem:[#allocation3 + $0x28] sm:$0xff] }
 0x409   : > { %7242 = vst.msk [vmem:[#allocation2 + $0x80] sm:$0xff] %vm431_vm0, %v7206_v15  ;;  %v5772_v29 = vpop.f32.mrf.mxu1  ;;  %v8013_v48 = vsel %vm2819_vm4, %v8011_v23, %v8012_v60  ;;  %v7519_v15 = vrot.slane %v7517_v11, 2  ;;  %v8926_v55 = vsel %vm3710_vm7, %v15788_v22, %v15830_v8  ;;  %v7262_v60 = vld [vmem:[#allocation2] sm:$0xff]  ;;  %v5838_v22 = vld [vmem:[#allocation2 + $0xb0] sm:$0xff] }
 0x40a   : > { %v6257_v14 = vpop.f32.mrf.mxu2  ;;  %5813 = vst.msk [vmem:[#allocation2 + $0x108] sm:$0xff] %vm431_vm0, %v5772_v29 }
 0x40b   : > { %v6319_v34 = vadd.f32 %v6257_v14, %v5835_v52  ;;  %v15850_v14 = vor.u32 %v7519_v15, %v7516_v51 }
 0x40c   : > { %v6390_v50 = vld [vmem:[#allocation2 + $0x90] sm:$0xff]  ;;  %v15791_v9 = vpop.f32.mrf.mxu0 }
 0x40d   : > { %v6763_v2 = vadd.f32 %v6700_v38, %v6390_v50  ;;  %6355 = vst.msk [vmem:[#allocation2 + $0x98] sm:$0xff] %vm431_vm0, %v6319_v34  ;;  %v12564_v38 = vld [vmem:[#allocation3 + $0x28] sm:$0xff] }
 0x40e   : > { %v6834_v49 = vld [vmem:[#allocation2 + $0x88] sm:$0xff]  ;;  %v8928_v18 = vshrl.u32 %v12564_v38, 16  ;;  %v8931_v25 = vshll.u32 %v12564_v38, 16 }
 0x40f   : > { %6799 = vst.msk [vmem:[#allocation2 + $0x90] sm:$0xff] %vm431_vm0, %v6763_v2  ;;  %11867 = vmatmul.msk.bf16.vlgmr.msra.gmra.mxu2 %vm431_vm0, %v8013_v48  ;;  %12071 = vmatmul.msk.bf16.vlgmr.msra.gmra.mxu0 %vm431_vm0, %v8917_v12  ;;  %v7207_v36 = vadd.f32 %v15737_v44, %v6834_v49  ;;  %v7512_v44 = vsel %vm2240_vm3, %v15767_v5, %v15805_v16  ;;  %v12511_v12 = vld [vmem:[#allocation3 + $0x58] sm:$0xff]  ;;  %v15868_v49 = vld [vmem:[#allocation3 + $0x20] sm:$0xff] }
 0x410   : > { %v6702_v28 = vpop.f32.mrf.mxu3  ;;  %v8930_v32 = vrot.slane %v8928_v18, 2  ;;  %v5841_v18 = vld [vmem:[#allocation2 + $0xc8] sm:$0xff] }
 0x411   : > { %7243 = vst.msk [vmem:[#allocation2 + $0x88] sm:$0xff] %vm431_vm0, %v7207_v36  ;;  %v5775_v26 = vpop.f32.mrf.mxu1  ;;  %v8933_v36 = vrot.slane %v8931_v25, 3 }
 0x412   : > { %v6260_v20 = vpop.f32.mrf.mxu2  ;;  %5814 = vst.msk [vmem:[#allocation2 + $0x110] sm:$0xff] %vm431_vm0, %v5775_v26  ;;  %v7523_v26 = vshrl.u32 %v12511_v12, 16 }
 0x413   : > { %v6320_v56 = vadd.f32 %v6260_v20, %v5836_v37  ;;  %v7526_v37 = vshll.u32 %v12511_v12, 16  ;;  %v15874_v47 = vor.u32 %v8933_v36, %v8930_v32 }
 0x414   : > { %v6391_v33 = vld [vmem:[#allocation2 + $0x98] sm:$0xff]  ;;  %v15813_v17 = vpop.f32.mrf.mxu0  ;;  %11772 = vmatmul.msk.bf16.gmra.mxu1 %vm431_vm0, %v7512_v44 }
 0x415   : > { %v6764_v21 = vadd.f32 %v6702_v28, %v6391_v33  ;;  %6356 = vst.msk [vmem:[#allocation2 + $0xa0] sm:$0xff] %vm431_vm0, %v6320_v56  ;;  %11969 = vmatmul.msk.bf16.vlgmr.msra.gmra.mxu3 %vm431_vm0, %v8458_v62  ;;  %v8016_v56 = vrot.slane %v15868_v49, 2  ;;  %v7528_v62 = vrot.slane %v7526_v37, 2 }
 0x416   : > { %v6835_v43 = vld [vmem:[#allocation2 + $0x90] sm:$0xff] }
 0x417   : > { %6800 = vst.msk [vmem:[#allocation2 + $0x98] sm:$0xff] %vm431_vm0, %v6764_v21  ;;  %v7208_v5 = vadd.f32 %v15755_v3, %v6835_v43  ;;  %v7525_v21 = vrot.slane %v7523_v26, 1  ;;  %v8017_v43 = vsel %vm2819_vm4, %v8014_v19, %v8016_v56  ;;  %v8937_v19 = vshrl.u32 %v12565_v6, 16 }
 0x418   : > { %v6705_v59 = vpop.f32.mrf.mxu3 }
 0x419   : > { %7244 = vst.msk [vmem:[#allocation2 + $0x90] sm:$0xff] %vm431_vm0, %v7208_v5  ;;  %v5777_v27 = vpop.f32.mrf.mxu1  ;;  %v8935_v5 = vsel %vm3710_vm7, %v15830_v8, %v15874_v47  ;;  %v7529_v11 = vor.u32 %v7528_v62, %v7525_v21  ;;  %v12513_v62 = vld [vmem:[#allocation3 + $0x68] sm:$0xff] }
 0x41a   : > { %v6262_v30 = vpop.f32.mrf.mxu2  ;;  %5815 = vst.msk [vmem:[#allocation2 + $0x118] sm:$0xff] %vm431_vm0, %v5777_v27  ;;  %v7264_v27 = vld [vmem:[#allocation2 + $0x10] sm:$0xff] }
 0x41b   : > { %v6321_v3 = vadd.f32 %v6262_v30, %v5837_v1  ;;  %v7530_v8 = vsel %vm2240_vm3, %v15850_v14, %v7529_v11 }
 0x41c   : > { %v6392_v46 = vld [vmem:[#allocation2 + $0xa0] sm:$0xff]  ;;  %v15833_v58 = vpop.f32.mrf.mxu0 }
 0x41d   : > { %v6765_v39 = vadd.f32 %v6705_v59, %v6392_v46  ;;  %6357 = vst.msk [vmem:[#allocation2 + $0xa8] sm:$0xff] %vm431_vm0, %v6321_v3  ;;  %v8461_v59 = vrot.slane %v15879_v4, 2  ;;  %v8940_v3 = vshll.u32 %v12565_v6, 16 }
 0x41e   : > { %v6836_v29 = vld [vmem:[#allocation2 + $0x98] sm:$0xff] }
 0x41f   : > { %6801 = vst.msk [vmem:[#allocation2 + $0xa0] sm:$0xff] %vm431_vm0, %v6765_v39  ;;  %11868 = vmatmul.msk.bf16.gmra.mxu2 %vm431_vm0, %v8015_v40  ;;  %12072 = vmatmul.msk.bf16.gmra.mxu0 %vm431_vm0, %v8926_v55  ;;  %v7209_v52 = vadd.f32 %v15774_v35, %v6836_v29  ;;  %v7521_v35 = vsel %vm2240_vm3, %v15805_v16, %v15850_v14  ;;  %v12512_v39 = vld [vmem:[#allocation3 + $0x60] sm:$0xff]  ;;  %v15907_v29 = vld [vmem:[#allocation3 + $0x28] sm:$0xff]  ;;  %v8942_v14 = vrot.slane %v8940_v3, 3 }
 0x420   : > { %v6707_v34 = vpop.f32.mrf.mxu3  ;;  %v8462_v55 = vsel %vm2819_vm4, %v8459_v57, %v8461_v59  ;;  %v8018_v57 = vrot.slane %v15907_v29, 2 }
 0x421   : > { %7245 = vst.msk [vmem:[#allocation2 + $0x98] sm:$0xff] %vm431_vm0, %v7209_v52  ;;  %v7678_v50 = vpop.f32.mrf.mxu1  ;;  %v8939_v52 = vrot.slane %v8937_v19, 2  ;;  %v5843_v19 = vld [vmem:[#allocation2 + $0xd8] sm:$0xff] }
 0x422   : > { %v6265_v23 = vpop.f32.mrf.mxu2  ;;  %v7768_v7 = vadd.f32 %v7678_v50, %v7262_v60  ;;  %v7535_v60 = vshll.u32 %v12512_v39, 16  ;;  %v8019_v36 = vsel %vm2819_vm4, %v8016_v56, %v8018_v57 }
 0x423   : > { %v6322_v10 = vadd.f32 %v6265_v23, %v5838_v22  ;;  %v7265_v22 = vld [vmem:[#allocation2 + $0x18] sm:$0xff]  ;;  %v15911_v25 = vor.u32 %v8942_v14, %v8939_v52 }
 0x424   : > { %v6393_v2 = vld [vmem:[#allocation2 + $0xa8] sm:$0xff]  ;;  %v15857_v48 = vpop.f32.mrf.mxu0  ;;  %7804 = vst.msk [vmem:[#allocation2] sm:$0xff] %vm431_vm0, %v7768_v7  ;;  %11773 = vmatmul.msk.bf16.gmra.mxu1 %vm431_vm0, %v7521_v35  ;;  %v7537_v12 = vrot.slane %v7535_v60, 2  ;;  %v15956_v14 = vld [vmem:[#allocation3 + $0x38] sm:$0xff] }
 0x425   : > { %v6766_v31 = vadd.f32 %v6707_v34, %v6393_v2  ;;  %6358 = vst.msk [vmem:[#allocation2 + $0xb0] sm:$0xff] %vm431_vm0, %v6322_v10  ;;  %11970 = vmatmul.msk.bf16.gmra.mxu3 %vm431_vm0, %v8460_v42  ;;  %v7532_v34 = vshrl.u32 %v12512_v39, 16  ;;  %v15916_v42 = vld [vmem:[#allocation3 + $0x30] sm:$0xff]  ;;  %v8465_v29 = vrot.slane %v15956_v14, 2 }
 0x426   : > { %v6837_v16 = vld [vmem:[#allocation2 + $0xa0] sm:$0xff] }
 0x427   : > { %6802 = vst.msk [vmem:[#allocation2 + $0xa8] sm:$0xff] %vm431_vm0, %v6766_v31  ;;  %v7210_v28 = vadd.f32 %v15791_v9, %v6837_v16  ;;  %v7534_v35 = vrot.slane %v7532_v34, 1  ;;  %v8944_v16 = vsel %vm3710_vm7, %v15874_v47, %v15911_v25 }
 0x428   : > { %v6710_v20 = vpop.f32.mrf.mxu3 }
 0x429   : > { %7246 = vst.msk [vmem:[#allocation2 + $0xa0] sm:$0xff] %vm431_vm0, %v7210_v28  ;;  %v7680_v53 = vpop.f32.mrf.mxu1  ;;  %v12566_v28 = vld [vmem:[#allocation3 + $0x38] sm:$0xff]  ;;  %v15930_v26 = vor.u32 %v7537_v12, %v7534_v35 }
 0x42a   : > { %v6267_v61 = vpop.f32.mrf.mxu2  ;;  %v7769_v33 = vadd.f32 %v7680_v53, %v7263_v13  ;;  %v7266_v13 = vld [vmem:[#allocation2 + $0x20] sm:$0xff]  ;;  %v5842_v53 = vld [vmem:[#allocation2 + $0xd0] sm:$0xff]  ;;  %v8949_v56 = vshll.u32 %v12566_v28, 16 }
 0x42b   : > { %v6323_v44 = vadd.f32 %v6267_v61, %v5839_v45  ;;  %v8946_v61 = vshrl.u32 %v12566_v28, 16 }
 0x42c   : > { %v15876_v54 = vpop.f32.mrf.mxu0  ;;  %7805 = vst.msk [vmem:[#allocation2 + $0x8] sm:$0xff] %vm431_vm0, %v7769_v33  ;;  %v6394_v9 = vld [vmem:[#allocation2 + $0xb0] sm:$0xff] }
 0x42d   : > { %v6767_v0 = vadd.f32 %v6710_v20, %v6394_v9  ;;  %6359 = vst.msk [vmem:[#allocation2 + $0xb8] sm:$0xff] %vm431_vm0, %v6323_v44  ;;  %v8463_v20 = vrot.slane %v15916_v42, 2  ;;  %v7539_v44 = vsel %vm2240_vm3, %v7529_v11, %v15930_v26  ;;  %v8948_v6 = vrot.slane %v8946_v61, 2 }
 0x42e   : > { %v8951_v11 = vrot.slane %v8949_v56, 3 }
 0x42f   : > { %11869 = vmatmul.msk.bf16.gmra.mxu2 %vm431_vm0, %v8017_v43  ;;  %12073 = vmatmul.msk.bf16.gmra.mxu0 %vm431_vm0, %v8935_v5  ;;  %6803 = vst.msk [vmem:[#allocation2 + $0xb0] sm:$0xff] %vm431_vm0, %v6767_v0  ;;  %v8464_v0 = vsel %vm2819_vm4, %v8461_v59, %v8463_v20  ;;  %v15946_v5 = vld [vmem:[#allocation3 + $0x30] sm:$0xff] }
 0x430   : > { %v6712_v41 = vpop.f32.mrf.mxu3  ;;  %v8020_v59 = vrot.slane %v15946_v5, 2  ;;  %v15950_v3 = vor.u32 %v8951_v11, %v8948_v6 }
 0x431   : > { %v7683_v1 = vpop.f32.mrf.mxu1 }
 0x432   : > { %v6270_v30 = vpop.f32.mrf.mxu2  ;;  %v7770_v46 = vadd.f32 %v7683_v1, %v7264_v27  ;;  %v7544_v27 = vshll.u32 %v12513_v62, 16  ;;  %v8021_v60 = vsel %vm2819_vm4, %v8018_v57, %v8020_v59  ;;  %v5844_v57 = vld [vmem:[#allocation2 + $0xe0] sm:$0xff] }
 0x433   : > { %v6324_v51 = vadd.f32 %v6270_v30, %v5840_v63  ;;  %v7267_v63 = vld [vmem:[#allocation2 + $0x28] sm:$0xff] }
 0x434   : > { %v15896_v15 = vpop.f32.mrf.mxu0  ;;  %7806 = vst.msk [vmem:[#allocation2 + $0x10] sm:$0xff] %vm431_vm0, %v7770_v46  ;;  %v6395_v40 = vld [vmem:[#allocation2 + $0xb8] sm:$0xff]  ;;  %11774 = vmatmul.msk.bf16.gmra.mxu1 %vm431_vm0, %v7530_v8  ;;  %v6838_v8 = vld [vmem:[#allocation2 + $0xa8] sm:$0xff] }
 0x435   : > { %v6768_v38 = vadd.f32 %v6712_v41, %v6395_v40  ;;  %6360 = vst.msk [vmem:[#allocation2 + $0xc0] sm:$0xff] %vm431_vm0, %v6324_v51  ;;  %11971 = vmatmul.msk.bf16.gmra.mxu3 %vm431_vm0, %v8462_v55  ;;  %v7541_v41 = vshrl.u32 %v12513_v62, 16  ;;  %v7546_v55 = vrot.slane %v7544_v27, 2 }
 0x437   : > { %6804 = vst.msk [vmem:[#allocation2 + $0xb8] sm:$0xff] %vm431_vm0, %v6768_v38  ;;  %v7543_v40 = vrot.slane %v7541_v41, 1  ;;  %v7211_v38 = vadd.f32 %v15813_v17, %v6838_v8  ;;  %v7270_v8 = vld [vmem:[#allocation2 + $0x40] sm:$0xff] }
 0x438   : > { %v6715_v50 = vpop.f32.mrf.mxu3 }
 0x439   : > { %v7685_v23 = vpop.f32.mrf.mxu1  ;;  %7247 = vst.msk [vmem:[#allocation2 + $0xa8] sm:$0xff] %vm431_vm0, %v7211_v38  ;;  %v15971_v17 = vor.u32 %v7546_v55, %v7543_v40  ;;  %v5846_v40 = vld [vmem:[#allocation2 + $0xf0] sm:$0xff] }
 0x43a   : > { %v6272_v24 = vpop.f32.mrf.mxu2  ;;  %v7771_v7 = vadd.f32 %v7685_v23, %v7265_v22  ;;  %v12567_v22 = vld [vmem:[#allocation3 + $0x40] sm:$0xff] }
 0x43b   : > { %v6325_v10 = vadd.f32 %v6272_v24, %v5841_v18  ;;  %v7268_v18 = vld [vmem:[#allocation2 + $0x30] sm:$0xff] }
 0x43c   : > { %v15913_v2 = vpop.f32.mrf.mxu0  ;;  %7807 = vst.msk [vmem:[#allocation2 + $0x18] sm:$0xff] %vm431_vm0, %v7771_v7  ;;  %v6396_v31 = vld [vmem:[#allocation2 + $0xc0] sm:$0xff] }
 0x43d   : > { %v6769_v32 = vadd.f32 %v6715_v50, %v6396_v31  ;;  %6361 = vst.msk [vmem:[#allocation2 + $0xc8] sm:$0xff] %vm431_vm0, %v6325_v10  ;;  %v8953_v50 = vsel %vm3710_vm7, %v15911_v25, %v15950_v3  ;;  %v8955_v10 = vshrl.u32 %v12567_v22, 16  ;;  %v8958_v25 = vshll.u32 %v12567_v22, 16  ;;  %v6839_v31 = vld [vmem:[#allocation2 + $0xb0] sm:$0xff] }
 0x43e   : > { %v7212_v28 = vadd.f32 %v15833_v58, %v6839_v31  ;;  %v7271_v31 = vld [vmem:[#allocation2 + $0x48] sm:$0xff] }
 0x43f   : > { %11870 = vmatmul.msk.bf16.gmra.mxu2 %vm431_vm0, %v8019_v36  ;;  %12074 = vmatmul.msk.bf16.gmra.mxu0 %vm431_vm0, %v8944_v16  ;;  %6805 = vst.msk [vmem:[#allocation2 + $0xc0] sm:$0xff] %vm431_vm0, %v6769_v32  ;;  %v7548_v32 = vsel %vm2240_vm3, %v15930_v26, %v15971_v17  ;;  %v12514_v16 = vld [vmem:[#allocation3 + $0x70] sm:$0xff]  ;;  %v15989_v26 = vld [vmem:[#allocation3 + $0x38] sm:$0xff]  ;;  %v8960_v58 = vrot.slane %v8958_v25, 3 }
 0x440   : > { %v6717_v37 = vpop.f32.mrf.mxu3  ;;  %7248 = vst.msk [vmem:[#allocation2 + $0xb0] sm:$0xff] %vm431_vm0, %v7212_v28  ;;  %v7553_v61 = vshll.u32 %v12514_v16, 16 }
 0x441   : > { %v7688_v49 = vpop.f32.mrf.mxu1 }
 0x442   : > { %v6275_v45 = vpop.f32.mrf.mxu2  ;;  %v7772_v33 = vadd.f32 %v7688_v49, %v7266_v13  ;;  %v8466_v13 = vsel %vm2819_vm4, %v8463_v20, %v8465_v29  ;;  %v7555_v41 = vrot.slane %v7553_v61, 2 }
 0x443   : > { %v6326_v47 = vadd.f32 %v6275_v45, %v5842_v53  ;;  %v8957_v53 = vrot.slane %v8955_v10, 2  ;;  %v7550_v45 = vshrl.u32 %v12514_v16, 16 }
 0x444   : > { %v15935_v21 = vpop.f32.mrf.mxu0  ;;  %7808 = vst.msk [vmem:[#allocation2 + $0x20] sm:$0xff] %vm431_vm0, %v7772_v33  ;;  %v6397_v9 = vld [vmem:[#allocation2 + $0xc8] sm:$0xff]  ;;  %11775 = vmatmul.msk.bf16.gmra.mxu1 %vm431_vm0, %v7539_v44  ;;  %v7269_v33 = vld [vmem:[#allocation2 + $0x38] sm:$0xff]  ;;  %v8022_v44 = vrot.slane %v15989_v26, 2 }
 0x445   : > { %v6770_v43 = vadd.f32 %v6717_v37, %v6397_v9  ;;  %6362 = vst.msk [vmem:[#allocation2 + $0xd0] sm:$0xff] %vm431_vm0, %v6326_v47  ;;  %11972 = vmatmul.msk.bf16.gmra.mxu3 %vm431_vm0, %v8464_v0  ;;  %v5845_v47 = vld [vmem:[#allocation2 + $0xe8] sm:$0xff]  ;;  %v15994_v62 = vor.u32 %v8960_v58, %v8957_v53  ;;  %v7552_v11 = vrot.slane %v7550_v45, 1 }
 0x447   : > { %6806 = vst.msk [vmem:[#allocation2 + $0xc8] sm:$0xff] %vm431_vm0, %v6770_v43  ;;  %v6840_v43 = vld [vmem:[#allocation2 + $0xb8] sm:$0xff] }
 0x448   : > { %v6720_v1 = vpop.f32.mrf.mxu3  ;;  %v7213_v27 = vadd.f32 %v15857_v48, %v6840_v43  ;;  %v16015_v48 = vor.u32 %v7555_v41, %v7552_v11  ;;  %v7272_v43 = vld [vmem:[#allocation2 + $0x50] sm:$0xff]  ;;  %v5848_v11 = vld [vmem:[#allocation2 + $0x100] sm:$0xff] }
 0x449   : > { %v7690_v30 = vpop.f32.mrf.mxu1 }
 0x44a   : > { %v6277_v4 = vpop.f32.mrf.mxu2  ;;  %v7773_v46 = vadd.f32 %v7690_v30, %v7267_v63  ;;  %v16000_v63 = vld [vmem:[#allocation3 + $0x40] sm:$0xff]  ;;  %7249 = vst.msk [vmem:[#allocation2 + $0xb8] sm:$0xff] %vm431_vm0, %v7213_v27 }
 0x44b   : > { %v6327_v51 = vadd.f32 %v6277_v4, %v5843_v19  ;;  %v8023_v19 = vsel %vm2819_vm4, %v8020_v59, %v8022_v44  ;;  %v8962_v4 = vsel %vm3710_vm7, %v15950_v3, %v15994_v62  ;;  %v8467_v5 = vrot.slane %v16000_v63, 2 }
 0x44c   : > { %v15952_v39 = vpop.f32.mrf.mxu0  ;;  %7809 = vst.msk [vmem:[#allocation2 + $0x28] sm:$0xff] %vm431_vm0, %v7773_v46  ;;  %v6398_v52 = vld [vmem:[#allocation2 + $0xd0] sm:$0xff]  ;;  %v12568_v46 = vld [vmem:[#allocation3 + $0x48] sm:$0xff] }
 0x44d   : > { %v6771_v34 = vadd.f32 %v6720_v1, %v6398_v52  ;;  %6363 = vst.msk [vmem:[#allocation2 + $0xd8] sm:$0xff] %vm431_vm0, %v6327_v51  ;;  %v8964_v38 = vshrl.u32 %v12568_v46, 16  ;;  %v8967_v3 = vshll.u32 %v12568_v46, 16 }
 0x44f   : > { %11871 = vmatmul.msk.bf16.gmra.mxu2 %vm431_vm0, %v8021_v60  ;;  %12075 = vmatmul.msk.bf16.gmra.mxu0 %vm431_vm0, %v8953_v50  ;;  %6807 = vst.msk [vmem:[#allocation2 + $0xd0] sm:$0xff] %vm431_vm0, %v6771_v34  ;;  %v6841_v60 = vld [vmem:[#allocation2 + $0xc0] sm:$0xff]  ;;  %v7557_v50 = vsel %vm2240_vm3, %v15971_v17, %v16015_v48  ;;  %v8966_v10 = vrot.slane %v8964_v38, 2 }
 0x450   : > { %v6722_v23 = vpop.f32.mrf.mxu3  ;;  %v16033_v17 = vld [vmem:[#allocation3 + $0x40] sm:$0xff] }
 0x451   : > { %v7693_v24 = vpop.f32.mrf.mxu1  ;;  %v8024_v16 = vrot.slane %v16033_v17, 2 }
 0x452   : > { %v6280_v7 = vpop.f32.mrf.mxu2  ;;  %v7774_v35 = vadd.f32 %v7693_v24, %v7268_v18  ;;  %v7214_v18 = vadd.f32 %v15876_v54, %v6841_v60  ;;  %v8969_v54 = vrot.slane %v8967_v3, 3  ;;  %v7273_v60 = vld [vmem:[#allocation2 + $0x58] sm:$0xff] }
 0x453   : > { %v6328_v12 = vadd.f32 %v6280_v7, %v5844_v57  ;;  %v8468_v57 = vsel %vm2819_vm4, %v8465_v29, %v8467_v5 }
 0x454   : > { %v15977_v36 = vpop.f32.mrf.mxu0  ;;  %7810 = vst.msk [vmem:[#allocation2 + $0x30] sm:$0xff] %vm431_vm0, %v7774_v35  ;;  %v6399_v37 = vld [vmem:[#allocation2 + $0xd8] sm:$0xff]  ;;  %11776 = vmatmul.msk.bf16.gmra.mxu1 %vm431_vm0, %v7548_v32  ;;  %v16038_v28 = vor.u32 %v8969_v54, %v8966_v10 }
 0x455   : > { %v6772_v49 = vadd.f32 %v6722_v23, %v6399_v37  ;;  %6364 = vst.msk [vmem:[#allocation2 + $0xe0] sm:$0xff] %vm431_vm0, %v6328_v12  ;;  %11973 = vmatmul.msk.bf16.gmra.mxu3 %vm431_vm0, %v8466_v13  ;;  %v12515_v23 = vld [vmem:[#allocation3 + $0x78] sm:$0xff] }
 0x456   : > { %7250 = vst.msk [vmem:[#allocation2 + $0xc0] sm:$0xff] %vm431_vm0, %v7214_v18  ;;  %v7559_v25 = vshrl.u32 %v12515_v23, 16  ;;  %v7562_v35 = vshll.u32 %v12515_v23, 16  ;;  %v5847_v32 = vld [vmem:[#allocation2 + $0xf8] sm:$0xff] }
 0x457   : > { %6808 = vst.msk [vmem:[#allocation2 + $0xd8] sm:$0xff] %vm431_vm0, %v6772_v49  ;;  %v6842_v49 = vld [vmem:[#allocation2 + $0xc8] sm:$0xff] }
 0x458   : > { %v6725_v56 = vpop.f32.mrf.mxu3  ;;  %v7561_v58 = vrot.slane %v7559_v25, 1  ;;  %v7564_v45 = vrot.slane %v7562_v35, 2  ;;  %v7215_v61 = vadd.f32 %v15896_v15, %v6842_v49  ;;  %v7274_v49 = vld [vmem:[#allocation2 + $0x60] sm:$0xff] }
 0x459   : > { %v7695_v42 = vpop.f32.mrf.mxu1 }
 0x45a   : > { %v6282_v20 = vpop.f32.mrf.mxu2  ;;  %v7775_v9 = vadd.f32 %v7695_v42, %v7269_v33  ;;  %v16044_v33 = vld [vmem:[#allocation3 + $0x48] sm:$0xff]  ;;  %7251 = vst.msk [vmem:[#allocation2 + $0xc8] sm:$0xff] %vm431_vm0, %v7215_v61  ;;  %v16059_v15 = vor.u32 %v7564_v45, %v7561_v58  ;;  %v5850_v58 = vld [vmem:[#allocation2 + $0x110] sm:$0xff] }
 0x45b   : > { %v6329_v0 = vadd.f32 %v6282_v20, %v5845_v47  ;;  %v8025_v47 = vsel %vm2819_vm4, %v8022_v44, %v8024_v16  ;;  %v8971_v20 = vsel %vm3710_vm7, %v15994_v62, %v16038_v28  ;;  %v8469_v26 = vrot.slane %v16044_v33, 2 }
 0x45c   : > { %v15996_v6 = vpop.f32.mrf.mxu0  ;;  %7811 = vst.msk [vmem:[#allocation2 + $0x38] sm:$0xff] %vm431_vm0, %v7775_v9  ;;  %v6400_v1 = vld [vmem:[#allocation2 + $0xe0] sm:$0xff]  ;;  %v12569_v9 = vld [vmem:[#allocation3 + $0x50] sm:$0xff] }
 0x45d   : > { %v6773_v30 = vadd.f32 %v6725_v56, %v6400_v1  ;;  %6365 = vst.msk [vmem:[#allocation2 + $0xe8] sm:$0xff] %vm431_vm0, %v6329_v0  ;;  %v8973_v27 = vshrl.u32 %v12569_v9, 16  ;;  %v8976_v62 = vshll.u32 %v12569_v9, 16 }
 0x45f   : > { %11872 = vmatmul.msk.bf16.gmra.mxu2 %vm431_vm0, %v8023_v19  ;;  %12076 = vmatmul.msk.bf16.gmra.mxu0 %vm431_vm0, %v8962_v4  ;;  %6809 = vst.msk [vmem:[#allocation2 + $0xe0] sm:$0xff] %vm431_vm0, %v6773_v30  ;;  %v6843_v19 = vld [vmem:[#allocation2 + $0xd0] sm:$0xff]  ;;  %v7566_v4 = vsel %vm2240_vm3, %v16015_v48, %v16059_v15  ;;  %v16077_v48 = vld [vmem:[#allocation3 + $0x48] sm:$0xff]  ;;  %v8975_v38 = vrot.slane %v8973_v27, 2 }
 0x460   : > { %v6727_v51 = vpop.f32.mrf.mxu3  ;;  %v8026_v23 = vrot.slane %v16077_v48, 2 }
 0x461   : > { %v7698_v59 = vpop.f32.mrf.mxu1 }
 0x462   : > { %v6285_v55 = vpop.f32.mrf.mxu2  ;;  %v7776_v52 = vadd.f32 %v7698_v59, %v7270_v8  ;;  %v7216_v8 = vadd.f32 %v15913_v2, %v6843_v19  ;;  %v8978_v2 = vrot.slane %v8976_v62, 3  ;;  %v7275_v19 = vld [vmem:[#allocation2 + $0x68] sm:$0xff] }
 0x463   : > { %v6330_v34 = vadd.f32 %v6285_v55, %v5846_v40  ;;  %v8470_v40 = vsel %vm2819_vm4, %v8467_v5, %v8469_v26 }
 0x464   : > { %v16021_v22 = vpop.f32.mrf.mxu0  ;;  %7812 = vst.msk [vmem:[#allocation2 + $0x40] sm:$0xff] %vm431_vm0, %v7776_v52  ;;  %v6401_v24 = vld [vmem:[#allocation2 + $0xe8] sm:$0xff]  ;;  %11777 = vmatmul.msk.bf16.gmra.mxu1 %vm431_vm0, %v7557_v50  ;;  %v16082_v18 = vor.u32 %v8978_v2, %v8975_v38 }
 0x465   : > { %v6774_v7 = vadd.f32 %v6727_v51, %v6401_v24  ;;  %6366 = vst.msk [vmem:[#allocation2 + $0xf0] sm:$0xff] %vm431_vm0, %v6330_v34  ;;  %11974 = vmatmul.msk.bf16.gmra.mxu3 %vm431_vm0, %v8468_v57  ;;  %v12516_v51 = vld [vmem:[#allocation3 + $0x80] sm:$0xff]  ;;  %v5849_v50 = vld [vmem:[#allocation2 + $0x108] sm:$0xff] }
 0x466   : > { %7252 = vst.msk [vmem:[#allocation2 + $0xd0] sm:$0xff] %vm431_vm0, %v7216_v8  ;;  %v7568_v3 = vshrl.u32 %v12516_v51, 16  ;;  %v7571_v52 = vshll.u32 %v12516_v51, 16 }
 0x467   : > { %6810 = vst.msk [vmem:[#allocation2 + $0xe8] sm:$0xff] %vm431_vm0, %v6774_v7  ;;  %v6844_v7 = vld [vmem:[#allocation2 + $0xd8] sm:$0xff] }
 0x468   : > { %v6730_v12 = vpop.f32.mrf.mxu3  ;;  %v7570_v54 = vrot.slane %v7568_v3, 1  ;;  %v7573_v25 = vrot.slane %v7571_v52, 2  ;;  %v7217_v35 = vadd.f32 %v15935_v21, %v6844_v7  ;;  %v7276_v7 = vld [vmem:[#allocation2 + $0x70] sm:$0xff] }
 0x469   : > { %v7700_v14 = vpop.f32.mrf.mxu1 }
 0x46a   : > { %v6287_v29 = vpop.f32.mrf.mxu2  ;;  %v7777_v37 = vadd.f32 %v7700_v14, %v7271_v31  ;;  %v16088_v31 = vld [vmem:[#allocation3 + $0x50] sm:$0xff]  ;;  %7253 = vst.msk [vmem:[#allocation2 + $0xd8] sm:$0xff] %vm431_vm0, %v7217_v35  ;;  %v16103_v21 = vor.u32 %v7573_v25, %v7570_v54  ;;  %v7840_v54 = vld [vmem:[#allocation2] sm:$0xff] }
 0x46b   : > { %v6331_v13 = vadd.f32 %v6287_v29, %v5847_v32  ;;  %v8027_v32 = vsel %vm2819_vm4, %v8024_v16, %v8026_v23  ;;  %v8980_v29 = vsel %vm3710_vm7, %v16038_v28, %v16082_v18  ;;  %v8471_v17 = vrot.slane %v16088_v31, 2 }
 0x46c   : > { %v16040_v53 = vpop.f32.mrf.mxu0  ;;  %7813 = vst.msk [vmem:[#allocation2 + $0x48] sm:$0xff] %vm431_vm0, %v7777_v37  ;;  %v6402_v56 = vld [vmem:[#allocation2 + $0xf0] sm:$0xff]  ;;  %v12570_v37 = vld [vmem:[#allocation3 + $0x58] sm:$0xff] }
 0x46d   : > { %v6775_v42 = vadd.f32 %v6730_v12, %v6402_v56  ;;  %6367 = vst.msk [vmem:[#allocation2 + $0xf8] sm:$0xff] %vm431_vm0, %v6331_v13  ;;  %v8982_v61 = vshrl.u32 %v12570_v37, 16  ;;  %v8985_v28 = vshll.u32 %v12570_v37, 16 }
 0x46f   : > { %11873 = vmatmul.msk.bf16.gmra.mxu2 %vm431_vm0, %v8025_v47  ;;  %12077 = vmatmul.msk.bf16.gmra.mxu0 %vm431_vm0, %v8971_v20  ;;  %6811 = vst.msk [vmem:[#allocation2 + $0xf0] sm:$0xff] %vm431_vm0, %v6775_v42  ;;  %v6845_v47 = vld [vmem:[#allocation2 + $0xe0] sm:$0xff]  ;;  %v7575_v20 = vsel %vm2240_vm3, %v16059_v15, %v16103_v21  ;;  %v16121_v15 = vld [vmem:[#allocation3 + $0x50] sm:$0xff]  ;;  %v8984_v27 = vrot.slane %v8982_v61, 2 }
 0x470   : > { %v6732_v0 = vpop.f32.mrf.mxu3  ;;  %v8028_v51 = vrot.slane %v16121_v15, 2 }
 0x471   : > { %v7703_v44 = vpop.f32.mrf.mxu1 }
 0x472   : > { %v6290_v41 = vpop.f32.mrf.mxu2  ;;  %v7778_v1 = vadd.f32 %v7703_v44, %v7272_v43  ;;  %v7218_v43 = vadd.f32 %v15952_v39, %v6845_v47  ;;  %v8987_v39 = vrot.slane %v8985_v28, 3  ;;  %v7277_v47 = vld [vmem:[#allocation2 + $0x78] sm:$0xff] }
 0x473   : > { %v6332_v30 = vadd.f32 %v6290_v41, %v5848_v11  ;;  %v8472_v11 = vsel %vm2819_vm4, %v8469_v26, %v8471_v17 }
 0x474   : > { %v16065_v46 = vpop.f32.mrf.mxu0  ;;  %7814 = vst.msk [vmem:[#allocation2 + $0x50] sm:$0xff] %vm431_vm0, %v7778_v1  ;;  %v6403_v59 = vld [vmem:[#allocation2 + $0xf8] sm:$0xff]  ;;  %11778 = vmatmul.msk.bf16.gmra.mxu1 %vm431_vm0, %v7566_v4  ;;  %v16126_v8 = vor.u32 %v8987_v39, %v8984_v27 }
 0x475   : > { %v6776_v55 = vadd.f32 %v6732_v0, %v6403_v59  ;;  %6368 = vst.msk [vmem:[#allocation2 + $0x100] sm:$0xff] %vm431_vm0, %v6332_v30  ;;  %11975 = vmatmul.msk.bf16.gmra.mxu3 %vm431_vm0, %v8470_v40  ;;  %v12517_v0 = vld [vmem:[#allocation3 + $0x88] sm:$0xff]  ;;  %v5851_v4 = vld [vmem:[#allocation2 + $0x118] sm:$0xff] }
 0x476   : > { %7254 = vst.msk [vmem:[#allocation2 + $0xe0] sm:$0xff] %vm431_vm0, %v7218_v43  ;;  %v7577_v62 = vshrl.u32 %v12517_v0, 16  ;;  %v7580_v1 = vshll.u32 %v12517_v0, 16 }
 0x477   : > { %6812 = vst.msk [vmem:[#allocation2 + $0xf8] sm:$0xff] %vm431_vm0, %v6776_v55  ;;  %v6846_v55 = vld [vmem:[#allocation2 + $0xe8] sm:$0xff] }
 0x478   : > { %v6735_v34 = vpop.f32.mrf.mxu3  ;;  %v7579_v2 = vrot.slane %v7577_v62, 1  ;;  %v7582_v3 = vrot.slane %v7580_v1, 2  ;;  %v7219_v52 = vadd.f32 %v15977_v36, %v6846_v55 }
 0x479   : > { %v7705_v63 = vpop.f32.mrf.mxu1 }
 0x47a   : > { %v6292_v5 = vpop.f32.mrf.mxu2  ;;  %v7779_v24 = vadd.f32 %v7705_v63, %v7273_v60  ;;  %v16132_v60 = vld [vmem:[#allocation3 + $0x58] sm:$0xff]  ;;  %7255 = vst.msk [vmem:[#allocation2 + $0xe8] sm:$0xff] %vm431_vm0, %v7219_v52  ;;  %v16147_v36 = vor.u32 %v7582_v3, %v7579_v2  ;;  %v7842_v52 = vld [vmem:[#allocation2 + $0x10] sm:$0xff] }
 0x47b   : > { %v6333_v57 = vadd.f32 %v6292_v5, %v5849_v50  ;;  %v8029_v50 = vsel %vm2819_vm4, %v8026_v23, %v8028_v51  ;;  %v8989_v5 = vsel %vm3710_vm7, %v16082_v18, %v16126_v8  ;;  %v8473_v48 = vrot.slane %v16132_v60, 2 }
 0x47c   : > { %v16084_v10 = vpop.f32.mrf.mxu0  ;;  %7815 = vst.msk [vmem:[#allocation2 + $0x58] sm:$0xff] %vm431_vm0, %v7779_v24  ;;  %v6404_v12 = vld [vmem:[#allocation2 + $0x100] sm:$0xff] }
 0x47d   : > { %v6777_v14 = vadd.f32 %v6735_v34, %v6404_v12  ;;  %6369 = vst.msk [vmem:[#allocation2 + $0x108] sm:$0xff] %vm431_vm0, %v6333_v57  ;;  %v12571_v24 = vld [vmem:[#allocation3 + $0x60] sm:$0xff] }
 0x47e   : > { %v8991_v35 = vshrl.u32 %v12571_v24, 16  ;;  %v8994_v18 = vshll.u32 %v12571_v24, 16 }
 0x47f   : > { %11874 = vmatmul.msk.bf16.gmra.mxu2 %vm431_vm0, %v8027_v32  ;;  %12078 = vmatmul.msk.bf16.gmra.mxu0 %vm431_vm0, %v8980_v29  ;;  %6813 = vst.msk [vmem:[#allocation2 + $0x100] sm:$0xff] %vm431_vm0, %v6777_v14  ;;  %v6847_v32 = vld [vmem:[#allocation2 + $0xf0] sm:$0xff]  ;;  %v7584_v29 = vsel %vm2240_vm3, %v16103_v21, %v16147_v36  ;;  %v16165_v21 = vld [vmem:[#allocation3 + $0x58] sm:$0xff] }
 0x480   : > { %v6737_v13 = vpop.f32.mrf.mxu3  ;;  %v8993_v61 = vrot.slane %v8991_v35, 2  ;;  %v8030_v0 = vrot.slane %v16165_v21, 2  ;;  %v7280_v21 = vld [vmem:[#allocation2 + $0x90] sm:$0xff] }
 0x481   : > { %v7708_v16 = vpop.f32.mrf.mxu1 }
 0x482   : > { %v6295_v45 = vpop.f32.mrf.mxu2  ;;  %v7780_v56 = vadd.f32 %v7708_v16, %v7274_v49  ;;  %v7220_v49 = vadd.f32 %v15996_v6, %v6847_v32  ;;  %v8996_v6 = vrot.slane %v8994_v18, 3 }
 0x483   : > { %v6334_v42 = vadd.f32 %v6295_v45, %v5850_v58  ;;  %v8474_v58 = vsel %vm2819_vm4, %v8471_v17, %v8473_v48 }
 0x484   : > { %v16109_v9 = vpop.f32.mrf.mxu0  ;;  %7816 = vst.msk [vmem:[#allocation2 + $0x60] sm:$0xff] %vm431_vm0, %v7780_v56  ;;  %v6405_v44 = vld [vmem:[#allocation2 + $0x108] sm:$0xff]  ;;  %11779 = vmatmul.msk.bf16.gmra.mxu1 %vm431_vm0, %v7575_v20  ;;  %v16170_v43 = vor.u32 %v8996_v6, %v8993_v61 }
 0x485   : > { %v6778_v41 = vadd.f32 %v6737_v13, %v6405_v44  ;;  %6370 = vst.msk [vmem:[#allocation2 + $0x110] sm:$0xff] %vm431_vm0, %v6334_v42  ;;  %11976 = vmatmul.msk.bf16.gmra.mxu3 %vm431_vm0, %v8472_v11  ;;  %v12518_v13 = vld [vmem:[#allocation3 + $0x90] sm:$0xff]  ;;  %v7841_v20 = vld [vmem:[#allocation2 + $0x8] sm:$0xff] }
 0x486   : > { %7256 = vst.msk [vmem:[#allocation2 + $0xf0] sm:$0xff] %vm431_vm0, %v7220_v49  ;;  %v7586_v28 = vshrl.u32 %v12518_v13, 16  ;;  %v7589_v56 = vshll.u32 %v12518_v13, 16  ;;  %v6849_v24 = vld [vmem:[#allocation2 + $0x100] sm:$0xff]  ;;  %v7279_v13 = vld [vmem:[#allocation2 + $0x88] sm:$0xff]  ;;  %v7843_v49 = vld [vmem:[#allocation2 + $0x18] sm:$0xff] }
 0x487   : > { %6814 = vst.msk [vmem:[#allocation2 + $0x108] sm:$0xff] %vm431_vm0, %v6778_v41  ;;  %v6848_v41 = vld [vmem:[#allocation2 + $0xf8] sm:$0xff] }
 0x488   : > { %v6740_v30 = vpop.f32.mrf.mxu3  ;;  %v7588_v39 = vrot.slane %v7586_v28, 1  ;;  %v7591_v62 = vrot.slane %v7589_v56, 2  ;;  %v7221_v1 = vadd.f32 %v16021_v22, %v6848_v41  ;;  %v12572_v22 = vld [vmem:[#allocation3 + $0x68] sm:$0xff]  ;;  %v12573_v41 = vld [vmem:[#allocation3 + $0x70] sm:$0xff] }
 0x489   : > { %v7710_v33 = vpop.f32.mrf.mxu1 }
 0x48a   : > { %v6297_v26 = vpop.f32.mrf.mxu2  ;;  %v7781_v59 = vadd.f32 %v7710_v33, %v7275_v19  ;;  %v16176_v19 = vld [vmem:[#allocation3 + $0x60] sm:$0xff]  ;;  %v7334_v33 = vld [vmem:[#allocation3 + $0x98] sm:$0x3]  ;;  %7257 = vst.msk [vmem:[#allocation2 + $0xf8] sm:$0xff] %vm431_vm0, %v7221_v1 }
 0x48b   : > { %v6335_v40 = vadd.f32 %v6297_v26, %v5851_v4  ;;  %v8031_v26 = vsel %vm2819_vm4, %v8028_v51, %v8030_v0  ;;  %v7413_v55 = vunpack.c.l.b16 %v7334_v33  ;;  %v8475_v15 = vrot.slane %v16176_v19, 2  ;;  %v7278_v51 = vld [vmem:[#allocation2 + $0x80] sm:$0xff] }
 0x48c   : > { %v16128_v38 = vpop.f32.mrf.mxu0  ;;  %7817 = vst.msk [vmem:[#allocation2 + $0x68] sm:$0xff] %vm431_vm0, %v7781_v59  ;;  %v6406_v34 = vld [vmem:[#allocation2 + $0x110] sm:$0xff]  ;;  %v8998_v59 = vsel %vm3710_vm7, %v16126_v8, %v16170_v43  ;;  %v9000_v8 = vshrl.u32 %v12572_v22, 16  ;;  %v9009_v33 = vshrl.u32 %v12573_v41, 16 }
 0x48d   : > { %v6779_v63 = vadd.f32 %v6740_v30, %v6406_v34  ;;  %6371 = vst.msk [vmem:[#allocation2 + $0x118] sm:$0xff] %vm431_vm0, %v6335_v40  ;;  %v16191_v40 = vor.u32 %v7591_v62, %v7588_v39  ;;  %v8476_v35 = vsel %vm2819_vm4, %v8473_v48, %v8475_v15 }
 0x48e   : > { %v6850_v6 = vld [vmem:[#allocation2 + $0x108] sm:$0xff] }
 0x48f   : > { %11875 = vmatmul.msk.bf16.gmra.mxu2 %vm431_vm0, %v8029_v50  ;;  %12079 = vmatmul.msk.bf16.gmra.mxu0 %vm431_vm0, %v8989_v5  ;;  %6815 = vst.msk [vmem:[#allocation2 + $0x110] sm:$0xff] %vm431_vm0, %v6779_v63  ;;  %v9003_v63 = vshll.u32 %v12572_v22, 16 }
 0x490   : > { %v6742_v57 = vpop.f32.mrf.mxu3 }
 0x491   : > { %v7713_v23 = vpop.f32.mrf.mxu1 }
 0x492   : > { %v8123_v25 = vpop.f32.mrf.mxu2  ;;  %v7782_v12 = vadd.f32 %v7713_v23, %v7276_v7  ;;  %v7432_v23 = vpack.c.b16 %v7413_v55, %v7413_v55 }
 0x493   : > { %v8213_v14 = vadd.f32 %v8123_v25, %v7840_v54  ;;  %v7222_v54 = vadd.f32 %v16040_v53, %v6849_v24  ;;  %v9005_v53 = vrot.slane %v9003_v63, 3  ;;  %v7281_v63 = vld [vmem:[#allocation2 + $0x98] sm:$0xff] }
 0x494   : > { %v16153_v37 = vpop.f32.mrf.mxu0  ;;  %7818 = vst.msk [vmem:[#allocation2 + $0x70] sm:$0xff] %vm431_vm0, %v7782_v12  ;;  %v6407_v16 = vld [vmem:[#allocation2 + $0x118] sm:$0xff]  ;;  %11780 = vmatmul.msk.bf16.gmra.mxu1 %vm431_vm0, %v7584_v29  ;;  %v9002_v12 = vrot.slane %v9000_v8, 2  ;;  %v7598_v32 = vshll.u32 %v7432_v23, 16 }
 0x495   : > { %v6780_v45 = vadd.f32 %v6742_v57, %v6407_v16  ;;  %8249 = vst.msk [vmem:[#allocation2] sm:$0xff] %vm431_vm0, %v8213_v14  ;;  %11977 = vmatmul.msk.bf16.gmra.mxu3 %vm431_vm0, %v8474_v58  ;;  %v7593_v57 = vsel %vm2240_vm3, %v16147_v36, %v16191_v40  ;;  %v16209_v36 = vld [vmem:[#allocation3 + $0x60] sm:$0xff]  ;;  %v7595_v14 = vshrl.u32 %v7432_v23, 16 }
 0x496   : > { %7258 = vst.msk [vmem:[#allocation2 + $0x100] sm:$0xff] %vm431_vm0, %v7222_v54  ;;  %v8032_v16 = vrot.slane %v16209_v36, 2  ;;  %v16214_v58 = vor.u32 %v9005_v53, %v9002_v12  ;;  %v12581_v54 = vld [vmem:[#allocation3 + $0x10] sm:$0xf0] }
 0x497   : > { %6816 = vst.msk [vmem:[#allocation2 + $0x118] sm:$0xff] %vm431_vm0, %v6780_v45  ;;  %v7597_v56 = vrot.slane %v7595_v14, 1  ;;  %v12095_v14 = vld [vmem:[#allocation3 + $0x10] sm:$0x8] }
 0x498   : > { %v8568_v42 = vpop.f32.mrf.mxu3 }
 0x499   : > { %v7715_v31 = vpop.f32.mrf.mxu1 }
 0x49a   : > { %v8125_v17 = vpop.f32.mrf.mxu2  ;;  %v7783_v44 = vadd.f32 %v7715_v31, %v7277_v47  ;;  %v7223_v47 = vadd.f32 %v16065_v46, %v6850_v6  ;;  %v7846_v6 = vld [vmem:[#allocation2 + $0x30] sm:$0xff] }
 0x49b   : > { %v8214_v11 = vadd.f32 %v8125_v17, %v7841_v20  ;;  %v16220_v20 = vld [vmem:[#allocation3 + $0x68] sm:$0xff] }
 0x49c   : > { %v16172_v27 = vpop.f32.mrf.mxu0  ;;  %7819 = vst.msk [vmem:[#allocation2 + $0x78] sm:$0xff] %vm431_vm0, %v7783_v44  ;;  %v8285_v30 = vld [vmem:[#allocation2] sm:$0xff]  ;;  %v8033_v44 = vsel %vm2819_vm4, %v8030_v0, %v8032_v16  ;;  %v8477_v62 = vrot.slane %v16220_v20, 2 }
 0x49d   : > { %v8658_v4 = vadd.f32 %v8568_v42, %v8285_v30  ;;  %8250 = vst.msk [vmem:[#allocation2 + $0x8] sm:$0xff] %vm431_vm0, %v8214_v11  ;;  %v7600_v42 = vrot.slane %v7598_v32, 2  ;;  %v9007_v11 = vsel %vm3710_vm7, %v16170_v43, %v16214_v58  ;;  %v7844_v0 = vld [vmem:[#allocation2 + $0x20] sm:$0xff]  ;;  %v16263_v32 = vld [vmem:[#allocation3 + $0x70] sm:$0xff] }
 0x49e   : > { %7259 = vst.msk [vmem:[#allocation2 + $0x108] sm:$0xff] %vm431_vm0, %v7223_v47  ;;  %v8479_v36 = vrot.slane %v16263_v32, 2 }
 0x49f   : > { %11876 = vmatmul.msk.bf16.gmra.mxu2 %vm431_vm0, %v8031_v26  ;;  %12080 = vmatmul.msk.bf16.gmra.mxu0 %vm431_vm0, %v8998_v59  ;;  %8694 = vst.msk [vmem:[#allocation2] sm:$0xff] %vm431_vm0, %v8658_v4  ;;  %v7601_v46 = vor.u32 %v7600_v42, %v7597_v56  ;;  %v9012_v4 = vshll.u32 %v12573_v41, 16  ;;  %v6851_v59 = vld [vmem:[#allocation2 + $0x110] sm:$0xff] }
 0x4a0   : > { %v8570_v2 = vpop.f32.mrf.mxu3 }
 0x4a1   : > { %v7718_v3 = vpop.f32.mrf.mxu1  ;;  %v7602_v22 = vsel %vm2240_vm3, %v16191_v40, %v7601_v46  ;;  %v16250_v40 = vld [vmem:[#allocation3 + $0x68] sm:$0xff] }
 0x4a2   : > { %v8128_v34 = vpop.f32.mrf.mxu2  ;;  %v7784_v50 = vadd.f32 %v7718_v3, %v7278_v51  ;;  %v8478_v3 = vsel %vm2819_vm4, %v8475_v15, %v8477_v62  ;;  %v8034_v15 = vrot.slane %v16250_v40, 2 }
 0x4a3   : > { %v8215_v5 = vadd.f32 %v8128_v34, %v7842_v52  ;;  %v9011_v34 = vrot.slane %v9009_v33, 2 }
 0x4a4   : > { %v16197_v7 = vpop.f32.mrf.mxu0  ;;  %7820 = vst.msk [vmem:[#allocation2 + $0x80] sm:$0xff] %vm431_vm0, %v7784_v50  ;;  %v8286_v25 = vld [vmem:[#allocation2 + $0x8] sm:$0xff]  ;;  %11781 = vmatmul.msk.bf16.gmra.mxu1 %vm431_vm0, %v7593_v57 }
 0x4a5   : > { %v8659_v18 = vadd.f32 %v8570_v2, %v8286_v25  ;;  %8251 = vst.msk [vmem:[#allocation2 + $0x10] sm:$0xff] %vm431_vm0, %v8215_v5  ;;  %11978 = vmatmul.msk.bf16.gmra.mxu3 %vm431_vm0, %v8476_v35  ;;  %v7224_v2 = vadd.f32 %v16084_v10, %v6851_v59  ;;  %v9014_v10 = vrot.slane %v9012_v4, 3  ;;  %v7845_v5 = vld [vmem:[#allocation2 + $0x28] sm:$0xff]  ;;  %v6852_v25 = vld [vmem:[#allocation2 + $0x118] sm:$0xff] }
 0x4a6   : > { %v7225_v12 = vadd.f32 %v16109_v9, %v6852_v25  ;;  %v12096_v9 = vor.u32 %v12581_v54, %v12095_v14  ;;  %v7283_v4 = vld [vmem:[#allocation2 + $0xa8] sm:$0xff]  ;;  %v7848_v54 = vld [vmem:[#allocation2 + $0x40] sm:$0xff] }
 0x4a7   : > { %8695 = vst.msk [vmem:[#allocation2 + $0x8] sm:$0xff] %vm431_vm0, %v8659_v18  ;;  %v16255_v24 = vor.u32 %v9014_v10, %v9011_v34  ;;  %v16259_v18 = vld [vmem:[#allocation3 + $0x18] sm:$0xff] }
 0x4a8   : > { %v8573_v29 = vpop.f32.mrf.mxu3  ;;  %7260 = vst.msk [vmem:[#allocation2 + $0x110] sm:$0xff] %vm431_vm0, %v7224_v2 }
 0x4a9   : > { %v7720_v60 = vpop.f32.mrf.mxu1  ;;  %7261 = vst.msk [vmem:[#allocation2 + $0x118] sm:$0xff] %vm431_vm0, %v7225_v12 }
 0x4aa   : > { %v8130_v48 = vpop.f32.mrf.mxu2  ;;  %v7785_v45 = vadd.f32 %v7720_v60, %v7279_v13  ;;  %v8035_v13 = vsel %vm2819_vm4, %v8032_v16, %v8034_v15  ;;  %v9016_v60 = vsel %vm3710_vm7, %v16214_v58, %v16255_v24  ;;  %v7282_v16 = vld [vmem:[#allocation2 + $0xa0] sm:$0xff]  ;;  %v9479_v58 = vrot.slane %v12096_v9, 3 }
 0x4ab   : > { %v8216_v61 = vadd.f32 %v8130_v48, %v7843_v49  ;;  %v12574_v49 = vld [vmem:[#allocation3 + $0x78] sm:$0xff]  ;;  %v9480_v48 = vrot.slane %v16259_v18, 3 }
 0x4ac   : > { %v16216_v28 = vpop.f32.mrf.mxu0  ;;  %7821 = vst.msk [vmem:[#allocation2 + $0x88] sm:$0xff] %vm431_vm0, %v7785_v45  ;;  %v8287_v31 = vld [vmem:[#allocation2 + $0x10] sm:$0xff]  ;;  %v9018_v42 = vshrl.u32 %v12574_v49, 16  ;;  %v9021_v47 = vshll.u32 %v12574_v49, 16  ;;  %v16340_v18 = vld [vmem:[#allocation3 + $0x78] sm:$0xff] }
 0x4ad   : > { %v8660_v17 = vadd.f32 %v8573_v29, %v8287_v31  ;;  %8252 = vst.msk [vmem:[#allocation2 + $0x18] sm:$0xff] %vm431_vm0, %v8216_v61 }
 0x4af   : > { %11877 = vmatmul.msk.bf16.gmra.mxu2 %vm431_vm0, %v8033_v44  ;;  %12081 = vmatmul.msk.bf16.gmra.mxu0 %vm431_vm0, %v9007_v11  ;;  %8696 = vst.msk [vmem:[#allocation2 + $0x10] sm:$0xff] %vm431_vm0, %v8660_v17  ;;  %v8730_v44 = vld [vmem:[#allocation2] sm:$0xff]  ;;  %v9481_v11 = vsel %vm4289_vm6, %v9479_v58, %v9480_v48  ;;  %v8038_v58 = vrot.slane %v16340_v18, 2 }
 0x4b0   : > { %v8575_v39 = vpop.f32.mrf.mxu3  ;;  %v9236_v46 = vadd.f32 %v16128_v38, %v8730_v44  ;;  %v9023_v38 = vrot.slane %v9021_v47, 3  ;;  %v16349_v44 = vld [vmem:[#allocation3 + $0x28] sm:$0xff] }
 0x4b1   : > { %v7723_v1 = vpop.f32.mrf.mxu1 }
 0x4b2   : > { %v8133_v30 = vpop.f32.mrf.mxu2  ;;  %v7786_v43 = vadd.f32 %v7723_v1, %v7280_v21  ;;  %v8480_v21 = vsel %vm2819_vm4, %v8477_v62, %v8479_v36  ;;  %9272 = vst.msk [vmem:[#allocation2] sm:$0xff] %vm431_vm0, %v9236_v46 }
 0x4b3   : > { %v8217_v26 = vadd.f32 %v8133_v30, %v7844_v0  ;;  %v16295_v0 = vld [vmem:[#allocation3 + $0x70] sm:$0xff]  ;;  %v9020_v30 = vrot.slane %v9018_v42, 2 }
 0x4b4   : > { %v16238_v55 = vpop.f32.mrf.mxu0  ;;  %7822 = vst.msk [vmem:[#allocation2 + $0x90] sm:$0xff] %vm431_vm0, %v7786_v43  ;;  %v8288_v51 = vld [vmem:[#allocation2 + $0x18] sm:$0xff]  ;;  %11782 = vmatmul.msk.bf16.gmra.mxu1 %vm431_vm0, %v7602_v22  ;;  %v8036_v62 = vrot.slane %v16295_v0, 2 }
 0x4b5   : > { %v8661_v52 = vadd.f32 %v8575_v39, %v8288_v51  ;;  %8253 = vst.msk [vmem:[#allocation2 + $0x20] sm:$0xff] %vm431_vm0, %v8217_v26  ;;  %11979 = vmatmul.msk.bf16.gmra.mxu3 %vm431_vm0, %v8478_v3  ;;  %v7847_v26 = vld [vmem:[#allocation2 + $0x38] sm:$0xff]  ;;  %v16300_v59 = vor.u32 %v9023_v38, %v9020_v30  ;;  %v8731_v51 = vld [vmem:[#allocation2 + $0x8] sm:$0xff]  ;;  %v16302_v3 = vld [vmem:[#allocation3 + $0x20] sm:$0xff] }
 0x4b6   : > { %v12576_v38 = vld [vmem:[#allocation3 + $0x88] sm:$0xff] }
 0x4b7   : > { %8697 = vst.msk [vmem:[#allocation2 + $0x18] sm:$0xff] %vm431_vm0, %v8661_v52  ;;  %v9237_v52 = vadd.f32 %v16153_v37, %v8731_v51  ;;  %v9025_v37 = vsel %vm3710_vm7, %v16255_v24, %v16300_v59 }
 0x4b8   : > { %v8578_v8 = vpop.f32.mrf.mxu3 }
 0x4b9   : > { %v7725_v50 = vpop.f32.mrf.mxu1  ;;  %9273 = vst.msk [vmem:[#allocation2 + $0x8] sm:$0xff] %vm431_vm0, %v9237_v52 }
 0x4ba   : > { %v8135_v19 = vpop.f32.mrf.mxu2  ;;  %v7787_v57 = vadd.f32 %v7725_v50, %v7281_v63  ;;  %v8037_v50 = vsel %vm2819_vm4, %v8034_v15, %v8036_v62 }
 0x4bb   : > { %v8218_v23 = vadd.f32 %v8135_v19, %v7845_v5  ;;  %v12575_v5 = vld [vmem:[#allocation3 + $0x80] sm:$0xff]  ;;  %v9482_v19 = vrot.slane %v16302_v3, 3 }
 0x4bc   : > { %v16257_v35 = vpop.f32.mrf.mxu0  ;;  %7823 = vst.msk [vmem:[#allocation2 + $0x98] sm:$0xff] %vm431_vm0, %v7787_v57  ;;  %v8289_v53 = vld [vmem:[#allocation2 + $0x20] sm:$0xff]  ;;  %v9027_v12 = vshrl.u32 %v12575_v5, 16  ;;  %v9030_v24 = vshll.u32 %v12575_v5, 16 }
 0x4bd   : > { %v8662_v29 = vadd.f32 %v8578_v8, %v8289_v53  ;;  %8254 = vst.msk [vmem:[#allocation2 + $0x28] sm:$0xff] %vm431_vm0, %v8218_v23  ;;  %v16308_v8 = vld [vmem:[#allocation3 + $0x78] sm:$0xff]  ;;  %v7284_v23 = vld [vmem:[#allocation2 + $0xb0] sm:$0xff]  ;;  %v16387_v3 = vld [vmem:[#allocation3 + $0x80] sm:$0xff] }
 0x4be   : > { %v8481_v40 = vrot.slane %v16308_v8, 2 }
 0x4bf   : > { %11878 = vmatmul.msk.bf16.gmra.mxu2 %vm431_vm0, %v8035_v13  ;;  %12082 = vmatmul.msk.bf16.gmra.mxu0 %vm431_vm0, %v9016_v60  ;;  %8698 = vst.msk [vmem:[#allocation2 + $0x20] sm:$0xff] %vm431_vm0, %v8662_v29  ;;  %v8732_v29 = vld [vmem:[#allocation2 + $0x10] sm:$0xff]  ;;  %v9483_v13 = vsel %vm4289_vm6, %v9480_v48, %v9482_v19  ;;  %v9029_v48 = vrot.slane %v9027_v12, 2 }
 0x4c0   : > { %v8580_v45 = vpop.f32.mrf.mxu3  ;;  %v9238_v60 = vadd.f32 %v16172_v27, %v8732_v29  ;;  %v8482_v49 = vsel %vm2819_vm4, %v8479_v36, %v8481_v40  ;;  %v9032_v27 = vrot.slane %v9030_v24, 3  ;;  %v16396_v29 = vld [vmem:[#allocation3 + $0x30] sm:$0xff] }
 0x4c1   : > { %v7728_v61 = vpop.f32.mrf.mxu1 }
 0x4c2   : > { %v8138_v56 = vpop.f32.mrf.mxu2  ;;  %v7788_v31 = vadd.f32 %v7728_v61, %v7282_v16  ;;  %9274 = vst.msk [vmem:[#allocation2 + $0x10] sm:$0xff] %vm431_vm0, %v9238_v60  ;;  %v16347_v42 = vor.u32 %v9032_v27, %v9029_v48  ;;  %v12577_v27 = vld [vmem:[#allocation3 + $0x90] sm:$0xff] }
 0x4c3   : > { %v8219_v17 = vadd.f32 %v8138_v56, %v7846_v6  ;;  %v7285_v6 = vld [vmem:[#allocation2 + $0xb8] sm:$0xff]  ;;  %v7849_v56 = vld [vmem:[#allocation2 + $0x48] sm:$0xff] }
 0x4c4   : > { %v16283_v41 = vpop.f32.mrf.mxu0  ;;  %7824 = vst.msk [vmem:[#allocation2 + $0xa0] sm:$0xff] %vm431_vm0, %v7788_v31  ;;  %v8290_v39 = vld [vmem:[#allocation2 + $0x28] sm:$0xff]  ;;  %12173 = vmatmul.msk.bf16.vlgmr.msra.gmra.mxu1 %vm431_vm0, %v9481_v11  ;;  %v9034_v30 = vsel %vm3710_vm7, %v16300_v59, %v16347_v42  ;;  %v9036_v59 = vshrl.u32 %v12576_v38, 16 }
 0x4c5   : > { %v8663_v1 = vadd.f32 %v8580_v45, %v8290_v39  ;;  %8255 = vst.msk [vmem:[#allocation2 + $0x30] sm:$0xff] %vm431_vm0, %v8219_v17  ;;  %11980 = vmatmul.msk.bf16.gmra.mxu3 %vm431_vm0, %v8480_v21  ;;  %v8733_v17 = vld [vmem:[#allocation2 + $0x18] sm:$0xff]  ;;  %v16353_v39 = vld [vmem:[#allocation3 + $0x80] sm:$0xff] }
 0x4c6   : > { %v9239_v11 = vadd.f32 %v16197_v7, %v8733_v17  ;;  %v9484_v7 = vrot.slane %v16349_v44, 3  ;;  %v8734_v52 = vld [vmem:[#allocation2 + $0x20] sm:$0xff]  ;;  %v16434_v44 = vld [vmem:[#allocation3 + $0x88] sm:$0xff] }
 0x4c7   : > { %8699 = vst.msk [vmem:[#allocation2 + $0x28] sm:$0xff] %vm431_vm0, %v8663_v1  ;;  %v8039_v1 = vsel %vm2819_vm4, %v8036_v62, %v8038_v58 }
 0x4c8   : > { %v8583_v33 = vpop.f32.mrf.mxu3  ;;  %9275 = vst.msk [vmem:[#allocation2 + $0x18] sm:$0xff] %vm431_vm0, %v9239_v11 }
 0x4c9   : > { %v7730_v43 = vpop.f32.mrf.mxu1 }
 0x4ca   : > { %v8140_v20 = vpop.f32.mrf.mxu2  ;;  %v7789_v22 = vadd.f32 %v7730_v43, %v7283_v4  ;;  %v8483_v4 = vrot.slane %v16353_v39, 2  ;;  %v7286_v43 = vld [vmem:[#allocation2 + $0xc0] sm:$0xff] }
 0x4cb   : > { %v8220_v2 = vadd.f32 %v8140_v20, %v7847_v26  ;;  %v7850_v20 = vld [vmem:[#allocation2 + $0x50] sm:$0xff] }
 0x4cc   : > { %7825 = vst.msk [vmem:[#allocation2 + $0xa8] sm:$0xff] %vm431_vm0, %v7789_v22  ;;  %v8291_v34 = vld [vmem:[#allocation2 + $0x30] sm:$0xff]  ;;  %v16306_v10 = vpop.f32.mrf.mxu0  ;;  %v9039_v22 = vshll.u32 %v12576_v38, 16 }
 0x4cd   : > { %v8664_v63 = vadd.f32 %v8583_v33, %v8291_v34  ;;  %8256 = vst.msk [vmem:[#allocation2 + $0x38] sm:$0xff] %vm431_vm0, %v8220_v2  ;;  %v9485_v34 = vsel %vm4289_vm6, %v9482_v19, %v9484_v7  ;;  %v9038_v19 = vrot.slane %v9036_v59, 2 }
 0x4cf   : > { %11879 = vmatmul.msk.bf16.gmra.mxu2 %vm431_vm0, %v8037_v50  ;;  %12083 = vmatmul.msk.bf16.gmra.mxu0 %vm431_vm0, %v9025_v37  ;;  %8700 = vst.msk [vmem:[#allocation2 + $0x30] sm:$0xff] %vm431_vm0, %v8664_v63  ;;  %v9240_v63 = vadd.f32 %v16216_v28, %v8734_v52  ;;  %v8484_v37 = vsel %vm2819_vm4, %v8481_v40, %v8483_v4  ;;  %v9041_v28 = vrot.slane %v9039_v22, 3  ;;  %v8040_v40 = vrot.slane %v16387_v3, 2 }
 0x4d0   : > { %v8585_v57 = vpop.f32.mrf.mxu3 }
 0x4d1   : > { %v7733_v15 = vpop.f32.mrf.mxu1  ;;  %9276 = vst.msk [vmem:[#allocation2 + $0x20] sm:$0xff] %vm431_vm0, %v9240_v63  ;;  %v16445_v63 = vld [vmem:[#allocation3 + $0x90] sm:$0xff] }
 0x4d2   : > { %v8143_v25 = vpop.f32.mrf.mxu2  ;;  %v7790_v53 = vadd.f32 %v7733_v15, %v7284_v23  ;;  %v7287_v23 = vld [vmem:[#allocation2 + $0xc8] sm:$0xff] }
 0x4d3   : > { %v8221_v14 = vadd.f32 %v8143_v25, %v7848_v54  ;;  %v7851_v54 = vld [vmem:[#allocation2 + $0x58] sm:$0xff]  ;;  %v16392_v25 = vor.u32 %v9041_v28, %v9038_v19 }
 0x4d4   : > { %7826 = vst.msk [vmem:[#allocation2 + $0xb0] sm:$0xff] %vm431_vm0, %v7790_v53  ;;  %v8292_v9 = vld [vmem:[#allocation2 + $0x38] sm:$0xff]  ;;  %12174 = vmatmul.msk.bf16.gmra.mxu1 %vm431_vm0, %v9483_v13  ;;  %v16342_v16 = vpop.f32.mrf.mxu0 }
 0x4d5   : > { %v8665_v45 = vadd.f32 %v8585_v57, %v8292_v9  ;;  %8257 = vst.msk [vmem:[#allocation2 + $0x40] sm:$0xff] %vm431_vm0, %v8221_v14  ;;  %11981 = vmatmul.msk.bf16.gmra.mxu3 %vm431_vm0, %v8482_v49  ;;  %v8735_v14 = vld [vmem:[#allocation2 + $0x28] sm:$0xff]  ;;  %v9043_v48 = vsel %vm3710_vm7, %v16347_v42, %v16392_v25  ;;  %v9048_v42 = vshll.u32 %v12577_v27, 16  ;;  %v12578_v19 = vld [vmem:[#allocation3 + $0x98] sm:$0xff] }
 0x4d6   : > { %v9241_v13 = vadd.f32 %v16238_v55, %v8735_v14  ;;  %v16400_v9 = vld [vmem:[#allocation3 + $0x88] sm:$0xff]  ;;  %v9486_v55 = vrot.slane %v16396_v29, 3  ;;  %v8736_v17 = vld [vmem:[#allocation2 + $0x30] sm:$0xff] }
 0x4d7   : > { %8701 = vst.msk [vmem:[#allocation2 + $0x38] sm:$0xff] %vm431_vm0, %v8665_v45  ;;  %v8041_v45 = vsel %vm2819_vm4, %v8038_v58, %v8040_v40  ;;  %v8485_v18 = vrot.slane %v16400_v9, 2  ;;  %v9045_v58 = vshrl.u32 %v12577_v27, 16  ;;  %v16479_v29 = vld [vmem:[#allocation3 + $0x90] sm:$0xff]  ;;  %v7291_v9 = vld [vmem:[#allocation2 + $0xe8] sm:$0xff] }
 0x4d8   : > { %v8588_v61 = vpop.f32.mrf.mxu3  ;;  %9277 = vst.msk [vmem:[#allocation2 + $0x28] sm:$0xff] %vm431_vm0, %v9241_v13  ;;  %v9487_v11 = vsel %vm4289_vm6, %v9484_v7, %v9486_v55  ;;  %v9050_v7 = vrot.slane %v9048_v42, 3 }
 0x4d9   : > { %v7735_v32 = vpop.f32.mrf.mxu1 }
 0x4da   : > { %v8145_v36 = vpop.f32.mrf.mxu2  ;;  %v7791_v47 = vadd.f32 %v7735_v32, %v7285_v6  ;;  %v7288_v6 = vld [vmem:[#allocation2 + $0xd0] sm:$0xff] }
 0x4db   : > { %v8222_v31 = vadd.f32 %v8145_v36, %v7849_v56  ;;  %v7852_v56 = vld [vmem:[#allocation2 + $0x60] sm:$0xff] }
 0x4dc   : > { %7827 = vst.msk [vmem:[#allocation2 + $0xb8] sm:$0xff] %vm431_vm0, %v7791_v47  ;;  %v8293_v46 = vld [vmem:[#allocation2 + $0x40] sm:$0xff]  ;;  %v16369_v33 = vpop.f32.mrf.mxu0 }
 0x4dd   : > { %v8666_v21 = vadd.f32 %v8588_v61, %v8293_v46  ;;  %8258 = vst.msk [vmem:[#allocation2 + $0x48] sm:$0xff] %vm431_vm0, %v8222_v31  ;;  %v9242_v46 = vadd.f32 %v16257_v35, %v8736_v17  ;;  %v9047_v35 = vrot.slane %v9045_v58, 2 }
 0x4df   : > { %11880 = vmatmul.msk.bf16.gmra.mxu2 %vm431_vm0, %v8039_v1  ;;  %12084 = vmatmul.msk.bf16.gmra.mxu0 %vm431_vm0, %v9034_v30  ;;  %8702 = vst.msk [vmem:[#allocation2 + $0x40] sm:$0xff] %vm431_vm0, %v8666_v21  ;;  %v8486_v30 = vsel %vm2819_vm4, %v8483_v4, %v8485_v18  ;;  %v8042_v4 = vrot.slane %v16434_v44, 2 }
 0x4e0   : > { %v8590_v0 = vpop.f32.mrf.mxu3  ;;  %9278 = vst.msk [vmem:[#allocation2 + $0x30] sm:$0xff] %vm431_vm0, %v9242_v46 }
 0x4e1   : > { %v7738_v26 = vpop.f32.mrf.mxu1 }
 0x4e2   : > { %v8148_v62 = vpop.f32.mrf.mxu2  ;;  %v7792_v2 = vadd.f32 %v7738_v26, %v7286_v43  ;;  %v7289_v43 = vld [vmem:[#allocation2 + $0xd8] sm:$0xff] }
 0x4e3   : > { %v8223_v51 = vadd.f32 %v8148_v62, %v7850_v20  ;;  %v7853_v20 = vld [vmem:[#allocation2 + $0x68] sm:$0xff]  ;;  %v16439_v62 = vor.u32 %v9050_v7, %v9047_v35 }
 0x4e4   : > { %7828 = vst.msk [vmem:[#allocation2 + $0xc0] sm:$0xff] %vm431_vm0, %v7792_v2  ;;  %v8294_v50 = vld [vmem:[#allocation2 + $0x48] sm:$0xff]  ;;  %12175 = vmatmul.msk.bf16.gmra.mxu1 %vm431_vm0, %v9485_v34  ;;  %v16394_v12 = vpop.f32.mrf.mxu0  ;;  %v8737_v2 = vld [vmem:[#allocation2 + $0x38] sm:$0xff] }
 0x4e5   : > { %v8667_v5 = vadd.f32 %v8590_v0, %v8294_v50  ;;  %8259 = vst.msk [vmem:[#allocation2 + $0x50] sm:$0xff] %vm431_vm0, %v8223_v51  ;;  %11982 = vmatmul.msk.bf16.gmra.mxu3 %vm431_vm0, %v8484_v37  ;;  %v16441_v51 = vld [vmem:[#allocation3 + $0x38] sm:$0xff]  ;;  %v9243_v52 = vadd.f32 %v16283_v41, %v8737_v2  ;;  %v8043_v37 = vsel %vm2819_vm4, %v8040_v40, %v8042_v4  ;;  %v9054_v40 = vshrl.u32 %v12578_v19, 16 }
 0x4e6   : > { %v9488_v28 = vrot.slane %v16441_v51, 3  ;;  %v8738_v14 = vld [vmem:[#allocation2 + $0x40] sm:$0xff] }
 0x4e7   : > { %8703 = vst.msk [vmem:[#allocation2 + $0x48] sm:$0xff] %vm431_vm0, %v8667_v5  ;;  %v9052_v5 = vsel %vm3710_vm7, %v16392_v25, %v16439_v62  ;;  %v9057_v25 = vshll.u32 %v12578_v19, 16  ;;  %v9056_v27 = vrot.slane %v9054_v40, 2 }
 0x4e8   : > { %v8593_v57 = vpop.f32.mrf.mxu3  ;;  %9279 = vst.msk [vmem:[#allocation2 + $0x38] sm:$0xff] %vm431_vm0, %v9243_v52  ;;  %v9489_v13 = vsel %vm4289_vm6, %v9486_v55, %v9488_v28  ;;  %v8802_v55 = vld [vmem:[#allocation3 + $0xa0] sm:$0x7] }
 0x4e9   : > { %v7740_v15 = vpop.f32.mrf.mxu1  ;;  %v8881_v42 = vunpack.c.l.b16 %v8802_v55 }
 0x4ea   : > { %v8150_v8 = vpop.f32.mrf.mxu2  ;;  %v7793_v24 = vadd.f32 %v7740_v15, %v7287_v23  ;;  %v7290_v23 = vld [vmem:[#allocation2 + $0xe0] sm:$0xff] }
 0x4eb   : > { %v8224_v53 = vadd.f32 %v8150_v8, %v7851_v54  ;;  %v7854_v54 = vld [vmem:[#allocation2 + $0x70] sm:$0xff] }
 0x4ec   : > { %7829 = vst.msk [vmem:[#allocation2 + $0xc8] sm:$0xff] %vm431_vm0, %v7793_v24  ;;  %v8295_v60 = vld [vmem:[#allocation2 + $0x50] sm:$0xff]  ;;  %v16423_v21 = vpop.f32.mrf.mxu0 }
 0x4ed   : > { %v8668_v49 = vadd.f32 %v8593_v57, %v8295_v60  ;;  %8260 = vst.msk [vmem:[#allocation2 + $0x58] sm:$0xff] %vm431_vm0, %v8224_v53  ;;  %v8487_v57 = vrot.slane %v16445_v63, 2  ;;  %v9244_v60 = vadd.f32 %v16306_v10, %v8738_v14  ;;  %v9059_v10 = vrot.slane %v9057_v25, 3  ;;  %v7293_v25 = vld [vmem:[#allocation2 + $0xf8] sm:$0xff]  ;;  %v7857_v63 = vld [vmem:[#allocation2 + $0x88] sm:$0xff] }
 0x4ee   : > { %v8739_v17 = vld [vmem:[#allocation2 + $0x48] sm:$0xff] }
 0x4ef   : > { %11881 = vmatmul.msk.bf16.gmra.mxu2 %vm431_vm0, %v8041_v45  ;;  %12085 = vmatmul.msk.bf16.gmra.mxu0 %vm431_vm0, %v9043_v48  ;;  %8704 = vst.msk [vmem:[#allocation2 + $0x50] sm:$0xff] %vm431_vm0, %v8668_v49  ;;  %v8488_v45 = vsel %vm2819_vm4, %v8485_v18, %v8487_v57  ;;  %v7855_v18 = vld [vmem:[#allocation2 + $0x78] sm:$0xff]  ;;  %v16486_v58 = vor.u32 %v9059_v10, %v9056_v27 }
 0x4f0   : > { %v8595_v61 = vpop.f32.mrf.mxu3  ;;  %9280 = vst.msk [vmem:[#allocation2 + $0x40] sm:$0xff] %vm431_vm0, %v9244_v60  ;;  %v9245_v46 = vadd.f32 %v16342_v16, %v8739_v17  ;;  %v7912_v16 = vld [vmem:[#allocation3 + $0x98] sm:$0x3] }
 0x4f1   : > { %v7743_v32 = vpop.f32.mrf.mxu1  ;;  %v9061_v7 = vsel %vm3710_vm7, %v16439_v62, %v16486_v58  ;;  %v7991_v62 = vunpack.c.l.b16 %v7912_v16 }
 0x4f2   : > { %v8153_v36 = vpop.f32.mrf.mxu2  ;;  %v7794_v47 = vadd.f32 %v7743_v32, %v7288_v6  ;;  %9281 = vst.msk [vmem:[#allocation2 + $0x48] sm:$0xff] %vm431_vm0, %v9245_v46 }
 0x4f3   : > { %v8225_v31 = vadd.f32 %v8153_v36, %v7852_v56  ;;  %v8044_v36 = vrot.slane %v16479_v29, 2  ;;  %v8010_v51 = vpack.c.b16 %v7991_v62, %v7991_v62  ;;  %v7858_v29 = vld [vmem:[#allocation2 + $0x90] sm:$0xff] }
 0x4f4   : > { %7830 = vst.msk [vmem:[#allocation2 + $0xd0] sm:$0xff] %vm431_vm0, %v7794_v47  ;;  %v8296_v1 = vld [vmem:[#allocation2 + $0x58] sm:$0xff]  ;;  %12176 = vmatmul.msk.bf16.gmra.mxu1 %vm431_vm0, %v9487_v11  ;;  %v16456_v41 = vpop.f32.mrf.mxu0  ;;  %v16488_v11 = vld [vmem:[#allocation3 + $0x40] sm:$0xff] }
 0x4f5   : > { %v8669_v38 = vadd.f32 %v8595_v61, %v8296_v1  ;;  %8261 = vst.msk [vmem:[#allocation2 + $0x60] sm:$0xff] %vm431_vm0, %v8225_v31  ;;  %11983 = vmatmul.msk.bf16.gmra.mxu3 %vm431_vm0, %v8486_v30  ;;  %v16492_v30 = vld [vmem:[#allocation3 + $0x98] sm:$0xff]  ;;  %v8045_v35 = vsel %vm2819_vm4, %v8042_v4, %v8044_v36  ;;  %v7856_v4 = vld [vmem:[#allocation2 + $0x80] sm:$0xff] }
 0x4f6   : > { %v8489_v44 = vrot.slane %v16492_v30, 2 }
 0x4f7   : > { %8705 = vst.msk [vmem:[#allocation2 + $0x58] sm:$0xff] %vm431_vm0, %v8669_v38 }
 0x4f8   : > { %v8598_v0 = vpop.f32.mrf.mxu3 }
 0x4f9   : > { %v7745_v26 = vpop.f32.mrf.mxu1 }
 0x4fa   : > { %v8155_v39 = vpop.f32.mrf.mxu2  ;;  %v7795_v59 = vadd.f32 %v7745_v26, %v7289_v43  ;;  %v9490_v43 = vrot.slane %v16488_v11, 3  ;;  %v7295_v11 = vld [vmem:[#allocation2 + $0x108] sm:$0xff] }
 0x4fb   : > { %v8226_v22 = vadd.f32 %v8155_v39, %v7853_v20  ;;  %v7292_v20 = vld [vmem:[#allocation2 + $0xf0] sm:$0xff] }
 0x4fc   : > { %7831 = vst.msk [vmem:[#allocation2 + $0xd8] sm:$0xff] %vm431_vm0, %v7795_v59  ;;  %v8297_v34 = vld [vmem:[#allocation2 + $0x60] sm:$0xff]  ;;  %v16483_v61 = vpop.f32.mrf.mxu0 }
 0x4fd   : > { %v8670_v50 = vadd.f32 %v8598_v0, %v8297_v34  ;;  %8262 = vst.msk [vmem:[#allocation2 + $0x68] sm:$0xff] %vm431_vm0, %v8226_v22  ;;  %v8900_v0 = vpack.c.b16 %v8881_v42, %v8881_v42  ;;  %v7294_v42 = vld [vmem:[#allocation2 + $0x100] sm:$0xff] }
 0x4ff   : > { %11882 = vmatmul.msk.bf16.gmra.mxu2 %vm431_vm0, %v8043_v37  ;;  %12086 = vmatmul.msk.bf16.gmra.mxu0 %vm431_vm0, %v9052_v5  ;;  %8706 = vst.msk [vmem:[#allocation2 + $0x60] sm:$0xff] %vm431_vm0, %v8670_v50  ;;  %v9063_v22 = vshrl.u32 %v8900_v0, 16  ;;  %v9066_v2 = vshll.u32 %v8900_v0, 16  ;;  %v8740_v37 = vld [vmem:[#allocation2 + $0x50] sm:$0xff]  ;;  %v9491_v5 = vsel %vm4289_vm6, %v9488_v28, %v9490_v43 }
 0x500   : > { %v8600_v3 = vpop.f32.mrf.mxu3  ;;  %v9246_v19 = vadd.f32 %v16369_v33, %v8740_v37  ;;  %v8357_v33 = vld [vmem:[#allocation3 + $0xa0] sm:$0x3] }
 0x501   : > { %v7748_v15 = vpop.f32.mrf.mxu1  ;;  %v9065_v28 = vrot.slane %v9063_v22, 2  ;;  %v8436_v40 = vunpack.c.l.b16 %v8357_v33 }
 0x502   : > { %v8158_v8 = vpop.f32.mrf.mxu2  ;;  %v7796_v24 = vadd.f32 %v7748_v15, %v7290_v23  ;;  %v8490_v23 = vsel %vm2819_vm4, %v8487_v57, %v8489_v44  ;;  %9282 = vst.msk [vmem:[#allocation2 + $0x50] sm:$0xff] %vm431_vm0, %v9246_v19  ;;  %v8046_v57 = vrot.slane %v8010_v51, 2 }
 0x503   : > { %v8227_v53 = vadd.f32 %v8158_v8, %v7854_v54  ;;  %v9068_v54 = vrot.slane %v9066_v2, 3  ;;  %v8455_v55 = vpack.c.b16 %v8436_v40, %v8436_v40 }
 0x504   : > { %7832 = vst.msk [vmem:[#allocation2 + $0xe0] sm:$0xff] %vm431_vm0, %v7796_v24  ;;  %v8298_v49 = vld [vmem:[#allocation2 + $0x68] sm:$0xff]  ;;  %12177 = vmatmul.msk.bf16.gmra.mxu1 %vm431_vm0, %v9489_v13  ;;  %v16509_v52 = vpop.f32.mrf.mxu0 }
 0x505   : > { %v8671_v48 = vadd.f32 %v8600_v3, %v8298_v49  ;;  %8263 = vst.msk [vmem:[#allocation2 + $0x70] sm:$0xff] %vm431_vm0, %v8227_v53  ;;  %11984 = vmatmul.msk.bf16.gmra.mxu3 %vm431_vm0, %v8488_v45  ;;  %v9069_v14 = vor.u32 %v9068_v54, %v9065_v28  ;;  %v8741_v49 = vld [vmem:[#allocation2 + $0x58] sm:$0xff]  ;;  %v16528_v45 = vld [vmem:[#allocation3 + $0x48] sm:$0xff] }
 0x506   : > { %v8742_v46 = vld [vmem:[#allocation2 + $0x60] sm:$0xff] }
 0x507   : > { %8707 = vst.msk [vmem:[#allocation2 + $0x68] sm:$0xff] %vm431_vm0, %v8671_v48  ;;  %v9247_v48 = vadd.f32 %v16394_v12, %v8741_v49  ;;  %v9492_v12 = vrot.slane %v16528_v45, 3 }
 0x508   : > { %v8603_v6 = vpop.f32.mrf.mxu3 }
 0x509   : > { %v7750_v32 = vpop.f32.mrf.mxu1  ;;  %9283 = vst.msk [vmem:[#allocation2 + $0x58] sm:$0xff] %vm431_vm0, %v9247_v48  ;;  %v9753_v48 = vld [vmem:[%s12958_s15 + $0x8] sm:$0xe] }
 0x50a   : > { %v8160_v56 = vpop.f32.mrf.mxu2  ;;  %v7797_v47 = vadd.f32 %v7750_v32, %v7291_v9  ;;  %v8047_v9 = vsel %vm2819_vm4, %v8044_v36, %v8046_v57  ;;  %v9070_v32 = vsel %vm3710_vm7, %v16486_v58, %v9069_v14  ;;  %v9493_v58 = vsel %vm4289_vm6, %v9490_v43, %v9492_v12  ;;  %v7859_v43 = vld [vmem:[#allocation2 + $0x98] sm:$0xff] }
 0x50b   : > { %v8228_v31 = vadd.f32 %v8160_v56, %v7855_v18  ;;  %v8491_v56 = vrot.slane %v8455_v55, 2  ;;  %v16576_v14 = vld [vmem:[#allocation3 + $0x58] sm:$0xff] }
 0x50c   : > { %7833 = vst.msk [vmem:[#allocation2 + $0xe8] sm:$0xff] %vm431_vm0, %v7797_v47  ;;  %v8299_v1 = vld [vmem:[#allocation2 + $0x70] sm:$0xff]  ;;  %v16531_v27 = vpop.f32.mrf.mxu0  ;;  %v9496_v45 = vrot.slane %v16576_v14, 3 }
 0x50d   : > { %v8672_v38 = vadd.f32 %v8603_v6, %v8299_v1  ;;  %8264 = vst.msk [vmem:[#allocation2 + $0x78] sm:$0xff] %vm431_vm0, %v8228_v31  ;;  %v9248_v1 = vadd.f32 %v16423_v21, %v8742_v46 }
 0x50f   : > { %11883 = vmatmul.msk.bf16.gmra.mxu2 %vm431_vm0, %v8045_v35  ;;  %12087 = vmatmul.msk.bf16.gmra.mxu0 %vm431_vm0, %v9061_v7  ;;  %8708 = vst.msk [vmem:[#allocation2 + $0x70] sm:$0xff] %vm431_vm0, %v8672_v38  ;;  %v8492_v35 = vsel %vm2819_vm4, %v8489_v44, %v8491_v56  ;;  %v12589_v44 = vld [vmem:[#allocation3 + $0x50] sm:$0xff] }
 0x510   : > { %v8605_v26 = vpop.f32.mrf.mxu3  ;;  %9284 = vst.msk [vmem:[#allocation2 + $0x60] sm:$0xff] %vm431_vm0, %v9248_v1  ;;  %v9494_v22 = vrot.slane %v12589_v44, 3 }
 0x511   : > { %v7753_v39 = vpop.f32.mrf.mxu1 }
 0x512   : > { %v8163_v59 = vpop.f32.mrf.mxu2  ;;  %v7798_v34 = vadd.f32 %v7753_v39, %v7292_v20  ;;  %v8743_v39 = vld [vmem:[#allocation2 + $0x68] sm:$0xff] }
 0x513   : > { %v8229_v50 = vadd.f32 %v8163_v59, %v7856_v4  ;;  %v9249_v4 = vadd.f32 %v16456_v41, %v8743_v39 }
 0x514   : > { %7834 = vst.msk [vmem:[#allocation2 + $0xf0] sm:$0xff] %vm431_vm0, %v7798_v34  ;;  %v8300_v3 = vld [vmem:[#allocation2 + $0x78] sm:$0xff]  ;;  %12178 = vmatmul.msk.bf16.gmra.mxu1 %vm431_vm0, %v9491_v5  ;;  %v16556_v0 = vpop.f32.mrf.mxu0  ;;  %v7860_v5 = vld [vmem:[#allocation2 + $0xa0] sm:$0xff] }
 0x515   : > { %v8673_v15 = vadd.f32 %v8605_v26, %v8300_v3  ;;  %8265 = vst.msk [vmem:[#allocation2 + $0x80] sm:$0xff] %vm431_vm0, %v8229_v50  ;;  %11985 = vmatmul.msk.bf16.gmra.mxu3 %vm431_vm0, %v8490_v23  ;;  %v7296_v50 = vld [vmem:[#allocation2 + $0x110] sm:$0xff] }
 0x516   : > { %9285 = vst.msk [vmem:[#allocation2 + $0x68] sm:$0xff] %vm431_vm0, %v9249_v4  ;;  %v8744_v23 = vld [vmem:[#allocation2 + $0x70] sm:$0xff]  ;;  %v16604_v4 = vld [vmem:[#allocation3 + $0x60] sm:$0xff] }
 0x517   : > { %8709 = vst.msk [vmem:[#allocation2 + $0x78] sm:$0xff] %vm431_vm0, %v8673_v15  ;;  %v9495_v15 = vsel %vm4289_vm6, %v9492_v12, %v9494_v22  ;;  %v9250_v51 = vadd.f32 %v16483_v61, %v8744_v23 }
 0x518   : > { %v8608_v8 = vpop.f32.mrf.mxu3 }
 0x519   : > { %v7755_v24 = vpop.f32.mrf.mxu1  ;;  %9286 = vst.msk [vmem:[#allocation2 + $0x70] sm:$0xff] %vm431_vm0, %v9250_v51 }
 0x51a   : > { %v8165_v53 = vpop.f32.mrf.mxu2  ;;  %v7799_v13 = vadd.f32 %v7755_v24, %v7293_v25  ;;  %v7861_v25 = vld [vmem:[#allocation2 + $0xa8] sm:$0xff] }
 0x51b   : > { %v8230_v60 = vadd.f32 %v8165_v53, %v7857_v63 }
 0x51c   : > { %7835 = vst.msk [vmem:[#allocation2 + $0xf8] sm:$0xff] %vm431_vm0, %v7799_v13  ;;  %v8301_v10 = vld [vmem:[#allocation2 + $0x80] sm:$0xff]  ;;  %v16565_v2 = vpop.f32.mrf.mxu0 }
 0x51d   : > { %v8674_v6 = vadd.f32 %v8608_v8, %v8301_v10  ;;  %8266 = vst.msk [vmem:[#allocation2 + $0x88] sm:$0xff] %vm431_vm0, %v8230_v60  ;;  %v7297_v8 = vld [vmem:[#allocation2 + $0x118] sm:$0xff]  ;;  %v9754_v10 = vld [vmem:[%s12958_s15 + $0xc] sm:$0xf] }
 0x51e   : > { %v8745_v57 = vld [vmem:[#allocation2 + $0x78] sm:$0xff] }
 0x51f   : > { %11884 = vmatmul.msk.bf16.gmra.mxu2 %vm431_vm0, %v8047_v9  ;;  %12088 = vmatmul.msk.bf16.gmra.mxu0 %vm431_vm0, %v9070_v32  ;;  %8710 = vst.msk [vmem:[#allocation2 + $0x80] sm:$0xff] %vm431_vm0, %v8674_v6  ;;  %v9251_v13 = vadd.f32 %v16509_v52, %v8745_v57  ;;  %v9308_v6 = vld [vmem:[#allocation2] sm:$0xff]  ;;  %v7862_v32 = vld [vmem:[#allocation2 + $0xb0] sm:$0xff] }
 0x520   : > { %v8610_v18 = vpop.f32.mrf.mxu3 }
 0x521   : > { %v7758_v47 = vpop.f32.mrf.mxu1  ;;  %9287 = vst.msk [vmem:[#allocation2 + $0x78] sm:$0xff] %vm431_vm0, %v9251_v13 }
 0x522   : > { %v8168_v31 = vpop.f32.mrf.mxu2  ;;  %v7800_v36 = vadd.f32 %v7758_v47, %v7294_v42  ;;  %v9790_v42 = vunpack.c.l.bf16 %v9753_v48  ;;  %v9791_v47 = vunpack.c.l.bf16 %v9754_v10  ;;  %v9311_v10 = vld [vmem:[#allocation2 + $0x18] sm:$0xff] }
 0x523   : > { %v8231_v17 = vadd.f32 %v8168_v31, %v7858_v29  ;;  %v9497_v29 = vsel %vm4289_vm6, %v9494_v22, %v9496_v45 }
 0x524   : > { %7836 = vst.msk [vmem:[#allocation2 + $0x100] sm:$0xff] %vm431_vm0, %v7800_v36  ;;  %v8302_v38 = vld [vmem:[#allocation2 + $0x88] sm:$0xff]  ;;  %12179 = vmatmul.msk.bf16.gmra.mxu1 %vm431_vm0, %v9493_v58  ;;  %v16574_v61 = vpop.f32.mrf.mxu0  ;;  %v9941_v58 = vrot.slane %v9790_v42, 3  ;;  %v9942_v1 = vrot.slane %v9791_v47, 3 }
 0x525   : > { %v8675_v7 = vadd.f32 %v8610_v18, %v8302_v38  ;;  %8267 = vst.msk [vmem:[#allocation2 + $0x90] sm:$0xff] %vm431_vm0, %v8231_v17  ;;  %11986 = vmatmul.msk.bf16.gmra.mxu3 %vm431_vm0, %v8492_v35  ;;  %v12671_v38 = vld [vmem:[%s12958_s15 + $0x10] sm:$0xff]   ;;  %v16640_v47 = vld [vmem:[#allocation3 + $0x68] sm:$0xff] }
 0x526   : > { %v8746_v56 = vld [vmem:[#allocation2 + $0x80] sm:$0xff]  ;;  %v9943_v39 = vsel %vm4289_vm6, %v9941_v58, %v9942_v1  ;;  %v12605_v44 = vunpack.c.l.bf16 %v12671_v38 }
 0x527   : > { %8711 = vst.msk [vmem:[#allocation2 + $0x88] sm:$0xff] %vm431_vm0, %v8675_v7  ;;  %v9252_v31 = vadd.f32 %v16531_v27, %v8746_v56  ;;  %v16600_v27 = vld [vmem:[%s17019_s4] ss:$0 sm:$0xff]  ;;  %v9309_v7 = vld [vmem:[#allocation2 + $0x8] sm:$0xff] }
 0x528   : > { %v8613_v21 = vpop.f32.mrf.mxu3 }
 0x529   : > { %v7760_v16 = vpop.f32.mrf.mxu1  ;;  %9288 = vst.msk [vmem:[#allocation2 + $0x80] sm:$0xff] %vm431_vm0, %v9252_v31 }
 0x52a   : > { %v8170_v26 = vpop.f32.mrf.mxu2  ;;  %v7801_v20 = vadd.f32 %v7760_v16, %v7295_v11  ;;  %v7863_v11 = vld [vmem:[#allocation2 + $0xb8] sm:$0xff] }
 0x52b   : > { %v8232_v30 = vadd.f32 %v8170_v26, %v7859_v43 }
 0x52c   : > { %7837 = vst.msk [vmem:[#allocation2 + $0x108] sm:$0xff] %vm431_vm0, %v7801_v20  ;;  %v8303_v59 = vld [vmem:[#allocation2 + $0x90] sm:$0xff]  ;;  %v16590_v36 = vpop.f32.mrf.mxu0 }
 0x52d   : > { %v8676_v62 = vadd.f32 %v8613_v21, %v8303_v59  ;;  %8268 = vst.msk [vmem:[#allocation2 + $0x98] sm:$0xff] %vm431_vm0, %v8232_v30 }
 0x52e   : > { %v8747_v20 = vld [vmem:[#allocation2 + $0x88] sm:$0xff] }
 0x52f   : > { %8712 = vst.msk [vmem:[#allocation2 + $0x90] sm:$0xff] %vm431_vm0, %v8676_v62  ;;  %v9253_v59 = vadd.f32 %v16556_v0, %v8747_v20 }
 0x530   : > { %v8615_v34 = vpop.f32.mrf.mxu3 }
 0x531   : > { %v7763_v37 = vpop.f32.mrf.mxu1  ;;  %9289 = vst.msk [vmem:[#allocation2 + $0x88] sm:$0xff] %vm431_vm0, %v9253_v59 }
 0x532   : > { %v8173_v19 = vpop.f32.mrf.mxu2  ;;  %v7802_v3 = vadd.f32 %v7763_v37, %v7296_v50 }
 0x533   : > { %v8233_v41 = vadd.f32 %v8173_v19, %v7860_v5  ;;  %v9944_v5 = vrot.slane %v12605_v44, 3  ;;  %v9498_v19 = vrot.slane %v16604_v4, 3 }
 0x534   : > { %7838 = vst.msk [vmem:[#allocation2 + $0x110] sm:$0xff] %vm431_vm0, %v7802_v3  ;;  %v8304_v28 = vld [vmem:[#allocation2 + $0x98] sm:$0xff]  ;;  %12180 = vmatmul.msk.bf16.gmra.mxu1 %vm431_vm0, %v9495_v15  ;;  %v16610_v50 = vpop.f32.mrf.mxu0  ;;  %v7864_v15 = vld [vmem:[#allocation2 + $0xc0] sm:$0xff] }
 0x535   : > { %v8677_v54 = vadd.f32 %v8615_v34, %v8304_v28  ;;  %8269 = vst.msk [vmem:[#allocation2 + $0xa0] sm:$0xff] %vm431_vm0, %v8233_v41  ;;  %v9310_v41 = vld [vmem:[#allocation2 + $0x10] sm:$0xff] }
 0x537   : > { %8713 = vst.msk [vmem:[#allocation2 + $0x98] sm:$0xff] %vm431_vm0, %v8677_v54 }
 0x538   : > { %v8618_v33 = vpop.f32.mrf.mxu3 }
 0x539   : > { %v7765_v40 = vpop.f32.mrf.mxu1 }
 0x53a   : > { %v8175_v24 = vpop.f32.mrf.mxu2  ;;  %v7803_v63 = vadd.f32 %v7765_v40, %v7297_v8  ;;  %v9945_v40 = vsel %vm4289_vm6, %v9942_v1, %v9944_v5 }
 0x53b   : > { %v8234_v53 = vadd.f32 %v8175_v24, %v7861_v25  ;;  %v12606_v25 = vunpack.c.h.bf16 %v12671_v38  ;;  %v9499_v24 = vsel %vm4289_vm6, %v9496_v45, %v9498_v19  ;;  %v12672_v45 = vld [vmem:[%s12958_s15 + $0x18] sm:$0xff]   ;;  %v9500_v38 = vrot.slane %v16640_v47, 3 }
 0x53c   : > { %7839 = vst.msk [vmem:[#allocation2 + $0x118] sm:$0xff] %vm431_vm0, %v7803_v63  ;;  %v8305_v60 = vld [vmem:[#allocation2 + $0xa0] sm:$0xff]  ;;  %v16634_v14 = vpop.f32.mrf.mxu0  ;;  %v12609_v42 = vunpack.c.l.bf16 %v12672_v45  ;;  %v12610_v59 = vunpack.c.h.bf16 %v12672_v45 }
 0x53d   : > { %v8678_v49 = vadd.f32 %v8618_v33, %v8305_v60  ;;  %8270 = vst.msk [vmem:[#allocation2 + $0xa8] sm:$0xff] %vm431_vm0, %v8234_v53  ;;  %v8748_v33 = vld [vmem:[#allocation2 + $0x90] sm:$0xff] }
 0x53e   : > { %v9254_v63 = vadd.f32 %v16565_v2, %v8748_v33  ;;  %v9948_v1 = vrot.slane %v12609_v42, 3 }
 0x53f   : > { %8714 = vst.msk [vmem:[#allocation2 + $0xa0] sm:$0xff] %vm431_vm0, %v8678_v49  ;;  %v9946_v49 = vrot.slane %v12606_v25, 3 }
 0x540   : > { %v8620_v55 = vpop.f32.mrf.mxu3  ;;  %9290 = vst.msk [vmem:[#allocation2 + $0x90] sm:$0xff] %vm431_vm0, %v9254_v63 }
 0x541   : > { %v9591_v9 = vpop.f32.mrf.mxu1  ;;  %v9947_v56 = vsel %vm4289_vm6, %v9944_v5, %v9946_v49  ;;  %v9949_v44 = vsel %vm4289_vm6, %v9946_v49, %v9948_v1 }
 0x542   : > { %v8178_v12 = vpop.f32.mrf.mxu2  ;;  %v9681_v52 = vadd.f32 %v9591_v9, %v9308_v6  ;;  %v7865_v6 = vld [vmem:[#allocation2 + $0xc8] sm:$0xff] }
 0x543   : > { %v8235_v18 = vadd.f32 %v8178_v12, %v7862_v32 }
 0x544   : > { %9717 = vst.msk [vmem:[#allocation2] sm:$0xff] %vm431_vm0, %v9681_v52  ;;  %v8306_v17 = vld [vmem:[#allocation2 + $0xa8] sm:$0xff]  ;;  %12181 = vmatmul.msk.bf16.gmra.mxu1 %vm431_vm0, %v9497_v29  ;;  %v8749_v52 = vld [vmem:[#allocation2 + $0x98] sm:$0xff] }
 0x545   : > { %v8679_v46 = vadd.f32 %v8620_v55, %v8306_v17  ;;  %8271 = vst.msk [vmem:[#allocation2 + $0xb0] sm:$0xff] %vm431_vm0, %v8235_v18  ;;  %v9255_v29 = vadd.f32 %v16574_v61, %v8749_v52  ;;  %v9312_v61 = vld [vmem:[#allocation2 + $0x20] sm:$0xff] }
 0x547   : > { %8715 = vst.msk [vmem:[#allocation2 + $0xa8] sm:$0xff] %vm431_vm0, %v8679_v46 }
 0x548   : > { %v8623_v35 = vpop.f32.mrf.mxu3  ;;  %9291 = vst.msk [vmem:[#allocation2 + $0x98] sm:$0xff] %vm431_vm0, %v9255_v29 }
 0x549   : > { %v9593_v21 = vpop.f32.mrf.mxu1 }
 0x54a   : > { %v8180_v16 = vpop.f32.mrf.mxu2  ;;  %v9682_v43 = vadd.f32 %v9593_v21, %v9309_v7 }
 0x54b   : > { %v8236_v26 = vadd.f32 %v8180_v16, %v7863_v11  ;;  %v9827_v30 = vld [vmem:[#allocation2] sm:$0xff]  ;;  %v7866_v11 = vld [vmem:[#allocation2 + $0xd0] sm:$0xff] }
 0x54c   : > { %v9867_v62 = vadd.f32 %v16600_v27, %v9827_v30  ;;  %9718 = vst.msk [vmem:[#allocation2 + $0x8] sm:$0xff] %vm431_vm0, %v9682_v43  ;;  %v8307_v22 = vld [vmem:[#allocation2 + $0xb0] sm:$0xff]  ;;  %v16649_v43 = vpop.f32.mrf.mxu0  ;;  %v8750_v30 = vld [vmem:[#allocation2 + $0xa0] sm:$0xff] }
 0x54d   : > { %v8680_v34 = vadd.f32 %v8623_v35, %v8307_v22  ;;  %8272 = vst.msk [vmem:[#allocation2 + $0xb8] sm:$0xff] %vm431_vm0, %v8236_v26  ;;  %v9256_v22 = vadd.f32 %v16590_v36, %v8750_v30 }
 0x54e   : > { %v10050_v37 = vadd.f32 %v9943_v39, %v9867_v62  ;;  %v9501_v62 = vsel %vm4289_vm6, %v9498_v19, %v9500_v38  ;;  %v12673_v19 = vld [vmem:[%s12958_s15 + $0x20] sm:$0xff]   ;;  %v8751_v33 = vld [vmem:[#allocation2 + $0xa8] sm:$0xff] }
 0x54f   : > { %8716 = vst.msk [vmem:[#allocation2 + $0xb0] sm:$0xff] %vm431_vm0, %v8680_v34  ;;  %v12613_v25 = vunpack.c.l.bf16 %v12673_v19  ;;  %v9257_v63 = vadd.f32 %v16610_v50, %v8751_v33  ;;  %v12614_v42 = vunpack.c.h.bf16 %v12673_v19 }
 0x550   : > { %v10086_v0 = vmax.f32 %v10050_v37, 0.0  ;;  %v8625_v3 = vpop.f32.mrf.mxu3  ;;  %9292 = vst.msk [vmem:[#allocation2 + $0xa0] sm:$0xff] %vm431_vm0, %v9256_v22 }
 0x551   : > { %v9596_v23 = vpop.f32.mrf.mxu1  ;;  %9293 = vst.msk [vmem:[#allocation2 + $0xa8] sm:$0xff] %vm431_vm0, %v9257_v63  ;;  %v9954_v47 = vrot.slane %v12614_v42, 3 }
 0x552   : > { %v8183_v51 = vpop.f32.mrf.mxu2  ;;  %10122 = vst.msk [vmem:[%s16617_s8] sm:$0xff] %vm431_vm0, %v10086_v0  ;;  %v9683_v28 = vadd.f32 %v9596_v23, %v9310_v41  ;;  %v9313_v41 = vld [vmem:[#allocation2 + $0x28] sm:$0xff] }
 0x553   : > { %v8237_v54 = vadd.f32 %v8183_v51, %v7864_v15  ;;  %v9828_v8 = vld [vmem:[#allocation2 + $0x8] sm:$0xff]  ;;  %v7867_v15 = vld [vmem:[#allocation2 + $0xd8] sm:$0xff] }
 0x554   : > { %v9868_v53 = vadd.f32 %v16600_v27, %v9828_v8  ;;  %9719 = vst.msk [vmem:[#allocation2 + $0x10] sm:$0xff] %vm431_vm0, %v9683_v28  ;;  %v8308_v57 = vld [vmem:[#allocation2 + $0xb8] sm:$0xff]  ;;  %12182 = vmatmul.msk.bf16.gmra.mxu1 %vm431_vm0, %v9499_v24  ;;  %v16670_v24 = vld [vmem:[#allocation3 + $0x70] sm:$0xff] }
 0x555   : > { %v8681_v13 = vadd.f32 %v8625_v3, %v8308_v57  ;;  %8273 = vst.msk [vmem:[#allocation2 + $0xc0] sm:$0xff] %vm431_vm0, %v8237_v54  ;;  %v9950_v3 = vrot.slane %v12610_v59, 3  ;;  %v9502_v50 = vrot.slane %v16670_v24, 3 }
 0x556   : > { %v10051_v60 = vadd.f32 %v9945_v40, %v9868_v53  ;;  %v16673_v53 = vpop.f32.mrf.mxu0  ;;  %v8752_v52 = vld [vmem:[#allocation2 + $0xb0] sm:$0xff] }
 0x557   : > { %8717 = vst.msk [vmem:[#allocation2 + $0xb8] sm:$0xff] %vm431_vm0, %v8681_v13  ;;  %v9951_v40 = vsel %vm4289_vm6, %v9948_v1, %v9950_v3  ;;  %v9503_v29 = vsel %vm4289_vm6, %v9500_v38, %v9502_v50  ;;  %v12674_v38 = vld [vmem:[%s12958_s15 + $0x28] sm:$0xff]  }
 0x558   : > { %v10087_v2 = vmax.f32 %v10051_v60, 0.0  ;;  %v8628_v48 = vpop.f32.mrf.mxu3  ;;  %v12617_v59 = vunpack.c.l.bf16 %v12674_v38 }
 0x559   : > { %v9598_v55 = vpop.f32.mrf.mxu1 }
 0x55a   : > { %v8185_v9 = vpop.f32.mrf.mxu2  ;;  %10123 = vst.msk [vmem:[%s16617_s8 + $0x8] sm:$0xff] %vm431_vm0, %v10087_v2  ;;  %v9684_v32 = vadd.f32 %v9598_v55, %v9311_v10  ;;  %v9952_v2 = vrot.slane %v12613_v25, 3  ;;  %v9314_v10 = vld [vmem:[#allocation2 + $0x30] sm:$0xff]  ;;  %v12618_v25 = vunpack.c.h.bf16 %v12674_v38 }
 0x55b   : > { %v8238_v12 = vadd.f32 %v8185_v9, %v7865_v6  ;;  %v9829_v18 = vld [vmem:[#allocation2 + $0x10] sm:$0xff]  ;;  %v7868_v6 = vld [vmem:[#allocation2 + $0xe0] sm:$0xff] }
 0x55c   : > { %v9869_v31 = vadd.f32 %v16600_v27, %v9829_v18  ;;  %9720 = vst.msk [vmem:[#allocation2 + $0x18] sm:$0xff] %vm431_vm0, %v9684_v32  ;;  %v8309_v17 = vld [vmem:[#allocation2 + $0xc0] sm:$0xff] }
 0x55d   : > { %v8682_v46 = vadd.f32 %v8628_v48, %v8309_v17  ;;  %8274 = vst.msk [vmem:[#allocation2 + $0xc8] sm:$0xff] %vm431_vm0, %v8238_v12 }
 0x55e   : > { %v10052_v58 = vadd.f32 %v9947_v56, %v9869_v31  ;;  %v9953_v56 = vsel %vm4289_vm6, %v9950_v3, %v9952_v2  ;;  %v9258_v31 = vadd.f32 %v16634_v14, %v8752_v52  ;;  %v16696_v1 = vpop.f32.mrf.mxu0  ;;  %v8753_v30 = vld [vmem:[#allocation2 + $0xb8] sm:$0xff]  ;;  %v9956_v3 = vrot.slane %v12617_v59, 3 }
 0x55f   : > { %8718 = vst.msk [vmem:[#allocation2 + $0xc0] sm:$0xff] %vm431_vm0, %v8682_v46  ;;  %v9259_v22 = vadd.f32 %v16649_v43, %v8753_v30 }
 0x560   : > { %v10088_v35 = vmax.f32 %v10052_v58, 0.0  ;;  %v8630_v7 = vpop.f32.mrf.mxu3  ;;  %9294 = vst.msk [vmem:[#allocation2 + $0xb0] sm:$0xff] %vm431_vm0, %v9258_v31 }
 0x561   : > { %v9601_v21 = vpop.f32.mrf.mxu1  ;;  %9295 = vst.msk [vmem:[#allocation2 + $0xb8] sm:$0xff] %vm431_vm0, %v9259_v22 }
 0x562   : > { %v8188_v16 = vpop.f32.mrf.mxu2  ;;  %12191 = vst.msk [vmem:[%s16617_s8 + $0xe] sm:$0xfc] %vm4679_vm15, %v10088_v35  ;;  %v9685_v26 = vadd.f32 %v9601_v21, %v9312_v61  ;;  %v9315_v61 = vld [vmem:[#allocation2 + $0x38] sm:$0xff] }
 0x563   : > { %v8239_v20 = vadd.f32 %v8188_v16, %v7866_v11  ;;  %v9830_v39 = vld [vmem:[#allocation2 + $0x18] sm:$0xff]  ;;  %v7869_v11 = vld [vmem:[#allocation2 + $0xe8] sm:$0xff] }
 0x564   : > { %v9870_v34 = vadd.f32 %v16600_v27, %v9830_v39  ;;  %9721 = vst.msk [vmem:[#allocation2 + $0x20] sm:$0xff] %vm431_vm0, %v9685_v26  ;;  %v8310_v37 = vld [vmem:[#allocation2 + $0xc8] sm:$0xff]  ;;  %12183 = vmatmul.msk.bf16.gmra.mxu1 %vm431_vm0, %v9501_v62  ;;  %v16704_v62 = vld [vmem:[#allocation3 + $0x78] sm:$0xff] }
 0x565   : > { %v8683_v5 = vadd.f32 %v8630_v7, %v8310_v37  ;;  %8275 = vst.msk [vmem:[#allocation2 + $0xd0] sm:$0xff] %vm431_vm0, %v8239_v20 }
 0x566   : > { %v10053_v0 = vadd.f32 %v9949_v44, %v9870_v34  ;;  %v9955_v44 = vsel %vm4289_vm6, %v9952_v2, %v9954_v47  ;;  %v16713_v19 = vpop.f32.mrf.mxu0  ;;  %v8754_v33 = vld [vmem:[#allocation2 + $0xc0] sm:$0xff] }
 0x567   : > { %8719 = vst.msk [vmem:[#allocation2 + $0xc8] sm:$0xff] %vm431_vm0, %v8683_v5 }
 0x568   : > { %v10089_v4 = vmax.f32 %v10053_v0, 0.0  ;;  %v8633_v36 = vpop.f32.mrf.mxu3 }
 0x569   : > { %v9603_v23 = vpop.f32.mrf.mxu1 }
 0x56a   : > { %v8190_v51 = vpop.f32.mrf.mxu2  ;;  %12192 = vst.msk [vmem:[%s16617_s8 + $0x16] sm:$0xff] %vm431_vm0, %v10089_v4  ;;  %v9686_v28 = vadd.f32 %v9603_v23, %v9313_v41  ;;  %v9504_v4 = vrot.slane %v16704_v62, 3  ;;  %v9316_v41 = vld [vmem:[#allocation2 + $0x40] sm:$0xff] }
 0x56b   : > { %v8240_v54 = vadd.f32 %v8190_v51, %v7867_v15  ;;  %v9831_v8 = vld [vmem:[#allocation2 + $0x20] sm:$0xff]  ;;  %v7870_v15 = vld [vmem:[#allocation2 + $0xf0] sm:$0xff] }
 0x56c   : > { %v9871_v57 = vadd.f32 %v16600_v27, %v9831_v8  ;;  %9722 = vst.msk [vmem:[#allocation2 + $0x28] sm:$0xff] %vm431_vm0, %v9686_v28  ;;  %v8311_v13 = vld [vmem:[#allocation2 + $0xd0] sm:$0xff]  ;;  %v9505_v63 = vsel %vm4289_vm6, %v9502_v50, %v9504_v4 }
 0x56d   : > { %v8684_v60 = vadd.f32 %v8633_v36, %v8311_v13  ;;  %8276 = vst.msk [vmem:[#allocation2 + $0xd8] sm:$0xff] %vm431_vm0, %v8240_v54  ;;  %v12675_v50 = vld [vmem:[%s12958_s15 + $0x30] sm:$0xff]  }
 0x56e   : > { %v10054_v49 = vadd.f32 %v9951_v40, %v9871_v57  ;;  %v9957_v40 = vsel %vm4289_vm6, %v9954_v47, %v9956_v3  ;;  %v9260_v57 = vadd.f32 %v16673_v53, %v8754_v33  ;;  %v8755_v52 = vld [vmem:[#allocation2 + $0xc8] sm:$0xff]  ;;  %v12621_v42 = vunpack.c.l.bf16 %v12675_v50 }
 0x56f   : > { %8720 = vst.msk [vmem:[#allocation2 + $0xd0] sm:$0xff] %vm431_vm0, %v8684_v60  ;;  %v9261_v31 = vadd.f32 %v16696_v1, %v8755_v52  ;;  %v9318_v1 = vld [vmem:[#allocation2 + $0x50] sm:$0xff] }
 0x570   : > { %v10090_v45 = vmax.f32 %v10054_v49, 0.0  ;;  %v8635_v48 = vpop.f32.mrf.mxu3  ;;  %9296 = vst.msk [vmem:[#allocation2 + $0xc0] sm:$0xff] %vm431_vm0, %v9260_v57  ;;  %v9960_v47 = vrot.slane %v12621_v42, 3 }
 0x571   : > { %v9606_v55 = vpop.f32.mrf.mxu1  ;;  %9297 = vst.msk [vmem:[#allocation2 + $0xc8] sm:$0xff] %vm431_vm0, %v9261_v31 }
 0x572   : > { %v8193_v9 = vpop.f32.mrf.mxu2  ;;  %12193 = vst.msk [vmem:[%s16617_s8 + $0x1e] sm:$0x3] %vm4682_vm8, %v10090_v45  ;;  %v9687_v32 = vadd.f32 %v9606_v55, %v9314_v10  ;;  %v7871_v55 = vld [vmem:[#allocation2 + $0xf8] sm:$0xff] }
 0x573   : > { %v8241_v12 = vadd.f32 %v8193_v9, %v7868_v6  ;;  %12194 = vst.msk [vmem:[%s16617_s8 + $0x1c] sm:$0xf0] %vm4685_vm9, %v10090_v45  ;;  %v9832_v18 = vld [vmem:[#allocation2 + $0x28] sm:$0xff]  ;;  %v9958_v45 = vrot.slane %v12618_v25, 3  ;;  %v9213_v9 = vpop.f32.mrf.mxu0 }
 0x574   : > { %v9872_v17 = vadd.f32 %v16600_v27, %v9832_v18  ;;  %9723 = vst.msk [vmem:[#allocation2 + $0x30] sm:$0xff] %vm431_vm0, %v9687_v32  ;;  %v8312_v46 = vld [vmem:[#allocation2 + $0xd8] sm:$0xff]  ;;  %12184 = vmatmul.msk.bf16.gmra.mxu1 %vm431_vm0, %v9503_v29  ;;  %v16736_v29 = vld [vmem:[#allocation3 + $0x80] sm:$0xff]  ;;  %v16764_v25 = vld [vmem:[#allocation3 + $0x88] sm:$0xff] }
 0x575   : > { %v8685_v58 = vadd.f32 %v8635_v48, %v8312_v46  ;;  %8277 = vst.msk [vmem:[#allocation2 + $0xe0] sm:$0xff] %vm431_vm0, %v8241_v12  ;;  %v9317_v48 = vld [vmem:[#allocation2 + $0x48] sm:$0xff] }
 0x576   : > { %v10055_v35 = vadd.f32 %v9953_v56, %v9872_v17  ;;  %v9959_v56 = vsel %vm4289_vm6, %v9956_v3, %v9958_v45 }
 0x577   : > { %8721 = vst.msk [vmem:[#allocation2 + $0xd8] sm:$0xff] %vm431_vm0, %v8685_v58 }
 0x578   : > { %v10091_v14 = vmax.f32 %v10055_v35, 0.0  ;;  %v8638_v7 = vpop.f32.mrf.mxu3 }
 0x579   : > { %v9608_v21 = vpop.f32.mrf.mxu1 }
 0x57a   : > { %v8195_v16 = vpop.f32.mrf.mxu2  ;;  %12195 = vst.msk [vmem:[%s16617_s8 + $0x24] sm:$0xff] %vm431_vm0, %v10091_v14  ;;  %v9688_v26 = vadd.f32 %v9608_v21, %v9315_v61  ;;  %v9506_v14 = vrot.slane %v16736_v29, 3  ;;  %v7872_v21 = vld [vmem:[#allocation2 + $0x100] sm:$0xff] }
 0x57b   : > { %v8242_v20 = vadd.f32 %v8195_v16, %v7869_v11  ;;  %v9833_v39 = vld [vmem:[#allocation2 + $0x30] sm:$0xff] }
 0x57c   : > { %v9873_v34 = vadd.f32 %v16600_v27, %v9833_v39  ;;  %9724 = vst.msk [vmem:[#allocation2 + $0x38] sm:$0xff] %vm431_vm0, %v9688_v26  ;;  %v8313_v37 = vld [vmem:[#allocation2 + $0xe0] sm:$0xff]  ;;  %v9961_v39 = vsel %vm4289_vm6, %v9958_v45, %v9960_v47  ;;  %v9507_v59 = vsel %vm4289_vm6, %v9504_v4, %v9506_v14 }
 0x57d   : > { %v8686_v5 = vadd.f32 %v8638_v7, %v8313_v37  ;;  %8278 = vst.msk [vmem:[#allocation2 + $0xe8] sm:$0xff] %vm431_vm0, %v8242_v20  ;;  %v8756_v20 = vld [vmem:[#allocation2 + $0xd0] sm:$0xff] }
 0x57e   : > { %v10056_v0 = vadd.f32 %v9955_v44, %v9873_v34  ;;  %v12622_v44 = vunpack.c.h.bf16 %v12675_v50  ;;  %v9262_v22 = vadd.f32 %v16713_v19, %v8756_v20  ;;  %v9216_v34 = vpop.f32.mrf.mxu0  ;;  %v12676_v19 = vld [vmem:[%s12958_s15 + $0x38] sm:$0xff]  }
 0x57f   : > { %8722 = vst.msk [vmem:[#allocation2 + $0xe0] sm:$0xff] %vm431_vm0, %v8686_v5 }
 0x580   : > { %v10092_v43 = vmax.f32 %v10056_v0, 0.0  ;;  %v8640_v36 = vpop.f32.mrf.mxu3  ;;  %9298 = vst.msk [vmem:[#allocation2 + $0xd0] sm:$0xff] %vm431_vm0, %v9262_v22  ;;  %v9962_v62 = vrot.slane %v12622_v44, 3 }
 0x581   : > { %v9611_v23 = vpop.f32.mrf.mxu1 }
 0x582   : > { %v8198_v51 = vpop.f32.mrf.mxu2  ;;  %12196 = vst.msk [vmem:[%s16617_s8 + $0x2c] sm:$0xf] %vm4688_vm5, %v10092_v43  ;;  %v9689_v28 = vadd.f32 %v9611_v23, %v9316_v41  ;;  %v7873_v23 = vld [vmem:[#allocation2 + $0x108] sm:$0xff] }
 0x583   : > { %v8243_v54 = vadd.f32 %v8198_v51, %v7870_v15  ;;  %12197 = vst.msk [vmem:[%s16617_s8 + $0x2a] sm:$0xc0] %vm4691_vm12, %v10092_v43  ;;  %v9834_v8 = vld [vmem:[#allocation2 + $0x38] sm:$0xff] }
 0x584   : > { %v9874_v13 = vadd.f32 %v16600_v27, %v9834_v8  ;;  %9725 = vst.msk [vmem:[#allocation2 + $0x40] sm:$0xff] %vm431_vm0, %v9689_v28  ;;  %v8314_v60 = vld [vmem:[#allocation2 + $0xe8] sm:$0xff]  ;;  %12185 = vmatmul.msk.bf16.gmra.mxu1 %vm431_vm0, %v9505_v63  ;;  %v9963_v8 = vsel %vm4289_vm6, %v9960_v47, %v9962_v62 }
 0x585   : > { %v8687_v49 = vadd.f32 %v8640_v36, %v8314_v60  ;;  %8279 = vst.msk [vmem:[#allocation2 + $0xf0] sm:$0xff] %vm431_vm0, %v8243_v54  ;;  %v9319_v36 = vld [vmem:[#allocation2 + $0x58] sm:$0xff] }
 0x586   : > { %v10057_v2 = vadd.f32 %v9957_v40, %v9874_v13  ;;  %v8757_v54 = vld [vmem:[#allocation2 + $0xd8] sm:$0xff]  ;;  %v12625_v40 = vunpack.c.l.bf16 %v12676_v19 }
 0x587   : > { %8723 = vst.msk [vmem:[#allocation2 + $0xe8] sm:$0xff] %vm431_vm0, %v8687_v49  ;;  %v9263_v63 = vadd.f32 %v9213_v9, %v8757_v54  ;;  %v9218_v49 = vpop.f32.mrf.mxu0 }
 0x588   : > { %v10093_v24 = vmax.f32 %v10057_v2, 0.0  ;;  %v8643_v53 = vpop.f32.mrf.mxu3  ;;  %v9964_v45 = vrot.slane %v12625_v40, 3 }
 0x589   : > { %v9613_v10 = vpop.f32.mrf.mxu1  ;;  %9299 = vst.msk [vmem:[#allocation2 + $0xd8] sm:$0xff] %vm431_vm0, %v9263_v63 }
 0x58a   : > { %v8200_v6 = vpop.f32.mrf.mxu2  ;;  %12198 = vst.msk [vmem:[%s16617_s8 + $0x32] sm:$0xff] %vm431_vm0, %v10093_v24  ;;  %v9690_v32 = vadd.f32 %v9613_v10, %v9317_v48  ;;  %v9508_v24 = vrot.slane %v16764_v25, 3  ;;  %v9320_v48 = vld [vmem:[#allocation2 + $0x60] sm:$0xff] }
 0x58b   : > { %v8244_v12 = vadd.f32 %v8200_v6, %v7871_v55  ;;  %v9835_v18 = vld [vmem:[#allocation2 + $0x40] sm:$0xff]  ;;  %v7874_v55 = vld [vmem:[#allocation2 + $0x110] sm:$0xff] }
 0x58c   : > { %v9875_v17 = vadd.f32 %v16600_v27, %v9835_v18  ;;  %9726 = vst.msk [vmem:[#allocation2 + $0x48] sm:$0xff] %vm431_vm0, %v9690_v32  ;;  %v8315_v46 = vld [vmem:[#allocation2 + $0xf0] sm:$0xff]  ;;  %v9965_v18 = vsel %vm4289_vm6, %v9962_v62, %v9964_v45  ;;  %v9509_v42 = vsel %vm4289_vm6, %v9506_v14, %v9508_v24 }
 0x58d   : > { %v8688_v58 = vadd.f32 %v8643_v53, %v8315_v46  ;;  %8280 = vst.msk [vmem:[#allocation2 + $0xf8] sm:$0xff] %vm431_vm0, %v8244_v12  ;;  %v8758_v12 = vld [vmem:[#allocation2 + $0xe0] sm:$0xff] }
 0x58e   : > { %v10058_v35 = vadd.f32 %v9959_v56, %v9875_v17  ;;  %v12626_v56 = vunpack.c.h.bf16 %v12676_v19  ;;  %v9264_v31 = vadd.f32 %v9216_v34, %v8758_v12  ;;  %v8759_v20 = vld [vmem:[#allocation2 + $0xe8] sm:$0xff]  ;;  %v9322_v19 = vld [vmem:[#allocation2 + $0x70] sm:$0xff] }
 0x58f   : > { %8724 = vst.msk [vmem:[#allocation2 + $0xf0] sm:$0xff] %vm431_vm0, %v8688_v58  ;;  %v9221_v29 = vpop.f32.mrf.mxu0  ;;  %v9265_v22 = vadd.f32 %v9218_v49, %v8759_v20  ;;  %v12678_v49 = vld [vmem:[%s12958_s15 + $0x48] sm:$0xff]  }
 0x590   : > { %v10094_v38 = vmax.f32 %v10058_v35, 0.0  ;;  %v8645_v7 = vpop.f32.mrf.mxu3  ;;  %9300 = vst.msk [vmem:[#allocation2 + $0xe0] sm:$0xff] %vm431_vm0, %v9264_v31  ;;  %v9966_v47 = vrot.slane %v12626_v56, 3  ;;  %v9325_v20 = vld [vmem:[#allocation2 + $0x88] sm:$0xff] }
 0x591   : > { %v9616_v61 = vpop.f32.mrf.mxu1  ;;  %9301 = vst.msk [vmem:[#allocation2 + $0xe8] sm:$0xff] %vm431_vm0, %v9265_v22 }
 0x592   : > { %v8203_v11 = vpop.f32.mrf.mxu2  ;;  %12199 = vst.msk [vmem:[%s16617_s8 + $0x3a] sm:$0x3f] %vm4694_vm14, %v10094_v38  ;;  %v9691_v16 = vadd.f32 %v9616_v61, %v9318_v1  ;;  %v12677_v38 = vld [vmem:[%s12958_s15 + $0x40] sm:$0xff]   ;;  %v7875_v61 = vld [vmem:[#allocation2 + $0x118] sm:$0xff] }
 0x593   : > { %v8245_v26 = vadd.f32 %v8203_v11, %v7872_v21  ;;  %v9836_v30 = vld [vmem:[#allocation2 + $0x48] sm:$0xff]  ;;  %v12629_v44 = vunpack.c.l.bf16 %v12677_v38 }
 0x594   : > { %v9876_v37 = vadd.f32 %v16600_v27, %v9836_v30  ;;  %9727 = vst.msk [vmem:[#allocation2 + $0x50] sm:$0xff] %vm431_vm0, %v9691_v16  ;;  %v8316_v5 = vld [vmem:[#allocation2 + $0xf8] sm:$0xff]  ;;  %12186 = vmatmul.msk.bf16.gmra.mxu1 %vm431_vm0, %v9507_v59  ;;  %v16790_v59 = vld [vmem:[#allocation3 + $0x90] sm:$0xff] }
 0x595   : > { %v8689_v0 = vadd.f32 %v8645_v7, %v8316_v5  ;;  %8281 = vst.msk [vmem:[#allocation2 + $0x100] sm:$0xff] %vm431_vm0, %v8245_v26  ;;  %v9321_v7 = vld [vmem:[#allocation2 + $0x68] sm:$0xff]  ;;  %v9510_v62 = vrot.slane %v16790_v59, 3 }
 0x596   : > { %v10059_v3 = vadd.f32 %v9961_v39, %v9876_v37  ;;  %v9967_v39 = vsel %vm4289_vm6, %v9964_v45, %v9966_v47 }
 0x597   : > { %8725 = vst.msk [vmem:[#allocation2 + $0xf8] sm:$0xff] %vm431_vm0, %v8689_v0  ;;  %v9511_v54 = vsel %vm4289_vm6, %v9508_v24, %v9510_v62 }
 0x598   : > { %v10095_v4 = vmax.f32 %v10059_v3, 0.0  ;;  %v8648_v43 = vpop.f32.mrf.mxu3  ;;  %v9968_v3 = vrot.slane %v12629_v44, 3 }
 0x599   : > { %v9618_v41 = vpop.f32.mrf.mxu1 }
 0x59a   : > { %v8205_v15 = vpop.f32.mrf.mxu2  ;;  %12200 = vst.msk [vmem:[%s16617_s8 + $0x40] sm:$0xff] %vm431_vm0, %v10095_v4  ;;  %v9692_v51 = vadd.f32 %v9618_v41, %v9319_v36  ;;  %v9223_v36 = vpop.f32.mrf.mxu0 }
 0x59b   : > { %v8246_v28 = vadd.f32 %v8205_v15, %v7873_v23  ;;  %v9837_v33 = vld [vmem:[#allocation2 + $0x50] sm:$0xff] }
 0x59c   : > { %v9877_v57 = vadd.f32 %v16600_v27, %v9837_v33  ;;  %9728 = vst.msk [vmem:[#allocation2 + $0x58] sm:$0xff] %vm431_vm0, %v9692_v51  ;;  %v8317_v13 = vld [vmem:[#allocation2 + $0x100] sm:$0xff]  ;;  %v8760_v23 = vld [vmem:[#allocation2 + $0xf0] sm:$0xff]  ;;  %v9969_v51 = vsel %vm4289_vm6, %v9966_v47, %v9968_v3  ;;  %v12634_v47 = vunpack.c.h.bf16 %v12678_v49 }
 0x59d   : > { %v8690_v60 = vadd.f32 %v8648_v43, %v8317_v13  ;;  %8282 = vst.msk [vmem:[#allocation2 + $0x108] sm:$0xff] %vm431_vm0, %v8246_v28  ;;  %v12630_v28 = vunpack.c.h.bf16 %v12677_v38  ;;  %v9266_v33 = vadd.f32 %v9221_v29, %v8760_v23 }
 0x59e   : > { %v10060_v2 = vadd.f32 %v9963_v8, %v9877_v57 }
 0x59f   : > { %8726 = vst.msk [vmem:[#allocation2 + $0x100] sm:$0xff] %vm431_vm0, %v8690_v60  ;;  %v9970_v60 = vrot.slane %v12630_v28, 3 }
 0x5a0   : > { %v10096_v50 = vmax.f32 %v10060_v2, 0.0  ;;  %v8650_v53 = vpop.f32.mrf.mxu3  ;;  %9302 = vst.msk [vmem:[#allocation2 + $0xf0] sm:$0xff] %vm431_vm0, %v9266_v33  ;;  %v9323_v2 = vld [vmem:[#allocation2 + $0x78] sm:$0xff] }
 0x5a1   : > { %v9621_v10 = vpop.f32.mrf.mxu1 }
 0x5a2   : > { %v8208_v6 = vpop.f32.mrf.mxu2  ;;  %12201 = vst.msk [vmem:[%s16617_s8 + $0x48] sm:$0xff] %vm431_vm0, %v10096_v50  ;;  %v9693_v9 = vadd.f32 %v9621_v10, %v9320_v48  ;;  %v8761_v50 = vld [vmem:[#allocation2 + $0xf8] sm:$0xff]  ;;  %v9971_v48 = vsel %vm4289_vm6, %v9968_v3, %v9970_v60  ;;  %v12633_v10 = vunpack.c.l.bf16 %v12678_v49 }
 0x5a3   : > { %v8247_v32 = vadd.f32 %v8208_v6, %v7874_v55  ;;  %v9838_v52 = vld [vmem:[#allocation2 + $0x58] sm:$0xff]  ;;  %v9267_v6 = vadd.f32 %v9223_v36, %v8761_v50  ;;  %v9326_v36 = vld [vmem:[#allocation2 + $0x90] sm:$0xff] }
 0x5a4   : > { %v9878_v17 = vadd.f32 %v16600_v27, %v9838_v52  ;;  %9729 = vst.msk [vmem:[#allocation2 + $0x60] sm:$0xff] %vm431_vm0, %v9693_v9  ;;  %v8318_v46 = vld [vmem:[#allocation2 + $0x108] sm:$0xff]  ;;  %12187 = vmatmul.msk.bf16.gmra.mxu1 %vm431_vm0, %v9509_v42  ;;  %v12598_v55 = vld [vmem:[#allocation3 + $0x98] sm:$0xff]  ;;  %v9226_v9 = vpop.f32.mrf.mxu0  ;;  %v9972_v52 = vrot.slane %v12633_v10, 3  ;;  %v9324_v42 = vld [vmem:[#allocation2 + $0x80] sm:$0xff] }
 0x5a5   : > { %v8691_v58 = vadd.f32 %v8650_v53, %v8318_v46  ;;  %8283 = vst.msk [vmem:[#allocation2 + $0x110] sm:$0xff] %vm431_vm0, %v8247_v32 }
 0x5a6   : > { %v10061_v35 = vadd.f32 %v9965_v18, %v9878_v17  ;;  %9303 = vst.msk [vmem:[#allocation2 + $0xf8] sm:$0xff] %vm431_vm0, %v9267_v6  ;;  %v9512_v18 = vrot.slane %v12598_v55, 3  ;;  %v8762_v46 = vld [vmem:[#allocation2 + $0x100] sm:$0xff] }
 0x5a7   : > { %8727 = vst.msk [vmem:[#allocation2 + $0x108] sm:$0xff] %vm431_vm0, %v8691_v58 }
 0x5a8   : > { %v10097_v14 = vmax.f32 %v10061_v35, 0.0  ;;  %v8653_v16 = vpop.f32.mrf.mxu3  ;;  %v9973_v35 = vsel %vm4289_vm6, %v9970_v60, %v9972_v52  ;;  %v9513_v29 = vsel %vm4289_vm6, %v9510_v62, %v9512_v18  ;;  %v12680_v60 = vld [vmem:[%s12958_s15 + $0x58] sm:$0xff]  }
 0x5a9   : > { %v9623_v1 = vpop.f32.mrf.mxu1 }
 0x5aa   : > { %v8210_v21 = vpop.f32.mrf.mxu2  ;;  %12202 = vst.msk [vmem:[%s16617_s8 + $0x4e] sm:$0xfc] %vm4679_vm15, %v10097_v14  ;;  %v9694_v11 = vadd.f32 %v9623_v1, %v9321_v7  ;;  %v9268_v14 = vadd.f32 %v9226_v9, %v8762_v46  ;;  %v9380_v7 = vld [vmem:[#allocation3 + $0xa0] sm:$0x7] }
 0x5ab   : > { %v8248_v26 = vadd.f32 %v8210_v21, %v7875_v61  ;;  %v9839_v30 = vld [vmem:[#allocation2 + $0x60] sm:$0xff]  ;;  %v9974_v21 = vrot.slane %v12634_v47, 3 }
 0x5ac   : > { %v9879_v34 = vadd.f32 %v16600_v27, %v9839_v30  ;;  %9730 = vst.msk [vmem:[#allocation2 + $0x68] sm:$0xff] %vm431_vm0, %v9694_v11  ;;  %v8319_v37 = vld [vmem:[#allocation2 + $0x110] sm:$0xff]  ;;  %v9228_v1 = vpop.f32.mrf.mxu0  ;;  %v9459_v11 = vunpack.c.l.b16 %v9380_v7  ;;  %v12681_v47 = vld [vmem:[%s12958_s15 + $0x60] sm:$0xff]  }
 0x5ad   : > { %v8692_v5 = vadd.f32 %v8653_v16, %v8319_v37  ;;  %8284 = vst.msk [vmem:[#allocation2 + $0x118] sm:$0xff] %vm431_vm0, %v8248_v26  ;;  %v12679_v26 = vld [vmem:[%s12958_s15 + $0x50] sm:$0xff]   ;;  %v9975_v22 = vsel %vm4289_vm6, %v9972_v52, %v9974_v21 }
 0x5ae   : > { %v10062_v0 = vadd.f32 %v9967_v39, %v9879_v34  ;;  %9304 = vst.msk [vmem:[#allocation2 + $0x100] sm:$0xff] %vm431_vm0, %v9268_v14  ;;  %v8763_v44 = vld [vmem:[#allocation2 + $0x108] sm:$0xff]  ;;  %v12637_v34 = vunpack.c.l.bf16 %v12679_v26  ;;  %v9478_v37 = vpack.c.b16 %v9459_v11, %v9459_v11 }
 0x5af   : > { %8728 = vst.msk [vmem:[#allocation2 + $0x110] sm:$0xff] %vm431_vm0, %v8692_v5  ;;  %v9269_v5 = vadd.f32 %v9228_v1, %v8763_v44 }
 0x5b0   : > { %v10098_v4 = vmax.f32 %v10062_v0, 0.0  ;;  %v8655_v63 = vpop.f32.mrf.mxu3  ;;  %v9976_v62 = vrot.slane %v12637_v34, 3 }
 0x5b1   : > { %v9626_v43 = vpop.f32.mrf.mxu1  ;;  %9305 = vst.msk [vmem:[#allocation2 + $0x108] sm:$0xff] %vm431_vm0, %v9269_v5 }
 0x5b2   : > { %12203 = vst.msk [vmem:[%s16617_s8 + $0x56] sm:$0xff] %vm431_vm0, %v10098_v4  ;;  %v9695_v41 = vadd.f32 %v9626_v43, %v9322_v19  ;;  %v9514_v4 = vrot.slane %v9478_v37, 3  ;;  %v9977_v28 = vsel %vm4289_vm6, %v9974_v21, %v9976_v62 }
 0x5b3   : > { %v9840_v15 = vld [vmem:[#allocation2 + $0x68] sm:$0xff] }
 0x5b4   : > { %v9880_v8 = vadd.f32 %v16600_v27, %v9840_v15  ;;  %9731 = vst.msk [vmem:[#allocation2 + $0x70] sm:$0xff] %vm431_vm0, %v9695_v41  ;;  %v8320_v40 = vld [vmem:[#allocation2 + $0x118] sm:$0xff]  ;;  %12188 = vmatmul.msk.bf16.gmra.mxu1 %vm431_vm0, %v9511_v54  ;;  %v9231_v19 = vpop.f32.mrf.mxu0  ;;  %v12638_v54 = vunpack.c.h.bf16 %v12679_v26  ;;  %v9515_v33 = vsel %vm4289_vm6, %v9512_v18, %v9514_v4 }
 0x5b5   : > { %v8693_v57 = vadd.f32 %v8655_v63, %v8320_v40 }
 0x5b6   : > { %v10063_v13 = vadd.f32 %v9969_v51, %v9880_v8  ;;  %v8764_v15 = vld [vmem:[#allocation2 + $0x110] sm:$0xff] }
 0x5b7   : > { %8729 = vst.msk [vmem:[#allocation2 + $0x118] sm:$0xff] %vm431_vm0, %v8693_v57  ;;  %v9270_v8 = vadd.f32 %v9231_v19, %v8764_v15  ;;  %v9978_v57 = vrot.slane %v12638_v54, 3 }
 0x5b8   : > { %v10099_v25 = vmax.f32 %v10063_v13, 0.0 }
 0x5b9   : > { %v9628_v45 = vpop.f32.mrf.mxu1  ;;  %9306 = vst.msk [vmem:[#allocation2 + $0x110] sm:$0xff] %vm431_vm0, %v9270_v8 }
 0x5ba   : > { %12204 = vst.msk [vmem:[%s16617_s8 + $0x5e] sm:$0x3] %vm4682_vm8, %v10099_v25  ;;  %v9696_v24 = vadd.f32 %v9628_v45, %v9323_v2 }
 0x5bb   : > { %12205 = vst.msk [vmem:[%s16617_s8 + $0x5c] sm:$0xf0] %vm4685_vm9, %v10099_v25  ;;  %v9841_v53 = vld [vmem:[#allocation2 + $0x70] sm:$0xff]  ;;  %v9327_v25 = vld [vmem:[#allocation2 + $0x98] sm:$0xff] }
 0x5bc   : > { %v9881_v32 = vadd.f32 %v16600_v27, %v9841_v53  ;;  %9732 = vst.msk [vmem:[#allocation2 + $0x78] sm:$0xff] %vm431_vm0, %v9696_v24  ;;  %v9233_v2 = vpop.f32.mrf.mxu0  ;;  %v9979_v53 = vsel %vm4289_vm6, %v9976_v62, %v9978_v57 }
 0x5be   : > { %v10064_v12 = vadd.f32 %v9971_v48, %v9881_v32  ;;  %v8765_v24 = vld [vmem:[#allocation2 + $0x118] sm:$0xff]  ;;  %v12641_v48 = vunpack.c.l.bf16 %v12680_v60 }
 0x5bf   : > { %v9271_v10 = vadd.f32 %v9233_v2, %v8765_v24 }
 0x5c0   : > { %v10100_v56 = vmax.f32 %v10064_v12, 0.0  ;;  %v9980_v9 = vrot.slane %v12641_v48, 3  ;;  %v9328_v12 = vld [vmem:[#allocation2 + $0xa0] sm:$0xff] }
 0x5c1   : > { %v9631_v31 = vpop.f32.mrf.mxu1  ;;  %9307 = vst.msk [vmem:[#allocation2 + $0x118] sm:$0xff] %vm431_vm0, %v9271_v10 }
 0x5c2   : > { %12206 = vst.msk [vmem:[%s16617_s8 + $0x64] sm:$0xff] %vm431_vm0, %v10100_v56  ;;  %v9697_v17 = vadd.f32 %v9631_v31, %v9324_v42  ;;  %v9981_v42 = vsel %vm4289_vm6, %v9978_v57, %v9980_v9  ;;  %v12642_v31 = vunpack.c.h.bf16 %v12680_v60 }
 0x5c3   : > { %v9842_v58 = vld [vmem:[#allocation2 + $0x78] sm:$0xff] }
 0x5c4   : > { %v9882_v38 = vadd.f32 %v16600_v27, %v9842_v58  ;;  %9733 = vst.msk [vmem:[#allocation2 + $0x80] sm:$0xff] %vm431_vm0, %v9697_v17  ;;  %12189 = vmatmul.msk.bf16.gmra.mxu1 %vm431_vm0, %v9513_v29  ;;  %v9982_v58 = vrot.slane %v12642_v31, 3  ;;  %v9329_v29 = vld [vmem:[#allocation2 + $0xa8] sm:$0xff] }
 0x5c6   : > { %v10065_v61 = vadd.f32 %v9973_v35, %v9882_v38  ;;  %v9983_v1 = vsel %vm4289_vm6, %v9980_v9, %v9982_v58 }
 0x5c8   : > { %v10101_v16 = vmax.f32 %v10065_v61, 0.0  ;;  %v12645_v61 = vunpack.c.l.bf16 %v12681_v47 }
 0x5c9   : > { %v9633_v30 = vpop.f32.mrf.mxu1 }
 0x5ca   : > { %12207 = vst.msk [vmem:[%s16617_s8 + $0x6c] sm:$0xf] %vm4688_vm5, %v10101_v16  ;;  %v9698_v39 = vadd.f32 %v9633_v30, %v9325_v20  ;;  %v9330_v20 = vld [vmem:[#allocation2 + $0xb0] sm:$0xff] }
 0x5cb   : > { %12208 = vst.msk [vmem:[%s16617_s8 + $0x6a] sm:$0xc0] %vm4691_vm12, %v10101_v16  ;;  %v9843_v59 = vld [vmem:[#allocation2 + $0x80] sm:$0xff]  ;;  %v9984_v16 = vrot.slane %v12645_v61, 3 }
 0x5cc   : > { %v9883_v0 = vadd.f32 %v16600_v27, %v9843_v59  ;;  %9734 = vst.msk [vmem:[#allocation2 + $0x88] sm:$0xff] %vm431_vm0, %v9698_v39 }
 0x5cd   : > { %v9985_v59 = vsel %vm4289_vm6, %v9982_v58, %v9984_v16 }
 0x5ce   : > { %v10066_v3 = vadd.f32 %v9975_v22, %v9883_v0  ;;  %v12646_v22 = vunpack.c.h.bf16 %v12681_v47 }
 0x5d0   : > { %v10102_v43 = vmax.f32 %v10066_v3, 0.0 }
 0x5d1   : > { %v9636_v41 = vpop.f32.mrf.mxu1 }
 0x5d2   : > { %12209 = vst.msk [vmem:[%s16617_s8 + $0x72] sm:$0xff] %vm431_vm0, %v10102_v43  ;;  %v9699_v23 = vadd.f32 %v9636_v41, %v9326_v36 }
 0x5d3   : > { %v9844_v51 = vld [vmem:[#allocation2 + $0x88] sm:$0xff] }
 0x5d4   : > { %v9884_v40 = vadd.f32 %v16600_v27, %v9844_v51  ;;  %9735 = vst.msk [vmem:[#allocation2 + $0x90] sm:$0xff] %vm431_vm0, %v9699_v23  ;;  %12190 = vmatmul.msk.bf16.gmra.mxu1 %vm431_vm0, %v9515_v33 }
 0x5d6   : > { %v10067_v63 = vadd.f32 %v9977_v28, %v9884_v40 }
 0x5d8   : > { %v10103_v13 = vmax.f32 %v10067_v63, 0.0 }
 0x5d9   : > { %v9638_v49 = vpop.f32.mrf.mxu1 }
 0x5da   : > { %12210 = vst.msk [vmem:[%s16617_s8 + $0x7a] sm:$0x3f] %vm4694_vm14, %v10103_v13  ;;  %v9700_v45 = vadd.f32 %v9638_v49, %v9327_v25 }
 0x5db   : > { %v9845_v50 = vld [vmem:[#allocation2 + $0x90] sm:$0xff] }
 0x5dc   : > { %v9885_v55 = vadd.f32 %v16600_v27, %v9845_v50  ;;  %9736 = vst.msk [vmem:[#allocation2 + $0x98] sm:$0xff] %vm431_vm0, %v9700_v45 }
 0x5de   : > { %v10068_v6 = vadd.f32 %v9979_v53, %v9885_v55 }
 0x5e0   : > { %v10104_v32 = vmax.f32 %v10068_v6, 0.0 }
 0x5e1   : > { %v9641_v52 = vpop.f32.mrf.mxu1 }
 0x5e2   : > { %12211 = vst.msk [vmem:[%s16617_s8 + $0x80] sm:$0xff] %vm431_vm0, %v10104_v32  ;;  %v9701_v18 = vadd.f32 %v9641_v52, %v9328_v12 }
 0x5e3   : > { %v9846_v56 = vld [vmem:[#allocation2 + $0x98] sm:$0xff] }
 0x5e4   : > { %v9886_v17 = vadd.f32 %v16600_v27, %v9846_v56  ;;  %9737 = vst.msk [vmem:[#allocation2 + $0xa0] sm:$0xff] %vm431_vm0, %v9701_v18 }
 0x5e6   : > { %v10069_v46 = vadd.f32 %v9981_v42, %v9886_v17 }
 0x5e8   : > { %v10105_v35 = vmax.f32 %v10069_v46, 0.0 }
 0x5e9   : > { %v9643_v14 = vpop.f32.mrf.mxu1 }
 0x5ea   : > { %12212 = vst.msk [vmem:[%s16617_s8 + $0x88] sm:$0xff] %vm431_vm0, %v10105_v35  ;;  %v9702_v38 = vadd.f32 %v9643_v14, %v9329_v29 }
 0x5eb   : > { %v9847_v7 = vld [vmem:[#allocation2 + $0xa0] sm:$0xff] }
 0x5ec   : > { %v9887_v21 = vadd.f32 %v16600_v27, %v9847_v7  ;;  %9738 = vst.msk [vmem:[#allocation2 + $0xa8] sm:$0xff] %vm431_vm0, %v9702_v38 }
 0x5ee   : > { %v10070_v11 = vadd.f32 %v9983_v1, %v9887_v21 }
 0x5f0   : > { %v10106_v26 = vmax.f32 %v10070_v11, 0.0 }
 0x5f1   : > { %v9646_v30 = vpop.f32.mrf.mxu1 }
 0x5f2   : > { %12213 = vst.msk [vmem:[%s16617_s8 + $0x8e] sm:$0xfc] %vm4679_vm15, %v10106_v26  ;;  %v9703_v39 = vadd.f32 %v9646_v30, %v9330_v20 }
 0x5f3   : > { %v9848_v44 = vld [vmem:[#allocation2 + $0xa8] sm:$0xff] }
 0x5f4   : > { %v9888_v34 = vadd.f32 %v16600_v27, %v9848_v44  ;;  %9739 = vst.msk [vmem:[#allocation2 + $0xb0] sm:$0xff] %vm431_vm0, %v9703_v39 }
 0x5f5   : > { %12775 = shalt.err (!%p12772_p3)
}
 0x5f6   : > { %s12845_s19 = smov 128   ;;  %s12846_s0 = smov 8   ;;  %v10071_v27 = vadd.f32 %v9985_v59, %v9888_v34  ;;  %v9986_v37 = vrot.slane %v12646_v22, 3  ;;  %v12682_v0 = vld [vmem:[%s12958_s15 + $0x68] sm:$0xff]   ;;  %v9331_v3 = vld [vmem:[#allocation2 + $0xb8] sm:$0xff]  ;;  %v9332_v54 = vld [vmem:[#allocation2 + $0xc0] sm:$0xff] }
 0x5f7   : > { %12694 = dma.vmem_to_hbm [thread:$0]  (%p12925_p5), %s10217_s17, 4096, %s10219_s18, %s10187_s20, %s12845_s19, %s12845_s19, %s12846_s0   ;;  %v12649_v36 = vunpack.c.l.bf16 %v12682_v0  ;;  %v12650_v57 = vunpack.c.h.bf16 %v12682_v0  ;;  %v9333_v45 = vld [vmem:[#allocation2 + $0xc8] sm:$0xff]  ;;  %v9334_v12 = vld [vmem:[#allocation2 + $0xd0] sm:$0xff]  ;;  %v9335_v29 = vld [vmem:[#allocation2 + $0xd8] sm:$0xff] }
 0x5f8   : > { %v10107_v5 = vmax.f32 %v10071_v27, 0.0  ;;  %v9987_v43 = vsel %vm4289_vm6, %v9984_v16, %v9986_v37  ;;  %v16894_v41 = vld [vmem:[%s17019_s4] ss:$0 sm:$0xff]  ;;  %v12683_v2 = vld [vmem:[%s12958_s15 + $0x70] sm:$0xff]   ;;  %v12684_v47 = vld [vmem:[%s12958_s15 + $0x78] sm:$0xff]   ;;  %s10199_s23 = sshll.u32 %s16617_s8, 4  ;;  %s10200_s23 = int_to_ptr.vmem [resolvable:$true] %s10199_s23 }
 0x5f9   : > { %v9648_v62 = vpop.f32.mrf.mxu1  ;;  %v9988_v51 = vrot.slane %v12649_v36, 3  ;;  %v9990_v25 = vrot.slane %v12650_v57, 3  ;;  %v12653_v10 = vunpack.c.l.bf16 %v12683_v2  ;;  %v12654_v31 = vunpack.c.h.bf16 %v12683_v2  ;;  %v9336_v20 = vld [vmem:[#allocation2 + $0xe0] sm:$0xff]  ;;  %v12686_v2 = vld [vmem:[%s12958_s15 + $0x88] sm:$0xff]   ;;  %s10182_s9 = scalar_lea.sflag [#allocation5], %s14399_s16  ;;  %s12796_s21 = scalar_lea.hbm %s17021_s6, 512 }
 0x5fa   : > { %12214 = vst.msk [vmem:[%s16617_s8 + $0x96] sm:$0xff] %vm431_vm0, %v10107_v5  ;;  %v9704_v4 = vadd.f32 %v9648_v62, %v9331_v3  ;;  %v12657_v61 = vunpack.c.l.bf16 %v12684_v47  ;;  %v12658_v22 = vunpack.c.h.bf16 %v12684_v47  ;;  %v12685_v0 = vld [vmem:[%s12958_s15 + $0x80] sm:$0xff]   ;;  %v9337_v3 = vld [vmem:[#allocation2 + $0xe8] sm:$0xff]  ;;  %v12687_v47 = vld [vmem:[%s12958_s15 + $0x90] sm:$0xff]  }
 0x5fb   : > { %v9849_v19 = vld [vmem:[#allocation2 + $0xb0] sm:$0xff]  ;;  %v9989_v63 = vsel %vm4289_vm6, %v9986_v37, %v9988_v51  ;;  %v9991_v48 = vsel %vm4289_vm6, %v9988_v51, %v9990_v25  ;;  %v9992_v9 = vrot.slane %v12653_v10, 3  ;;  %v9994_v58 = vrot.slane %v12654_v31, 3 }
 0x5fc   : > { %v9889_v23 = vadd.f32 %v16894_v41, %v9849_v19  ;;  %9740 = vst.msk [vmem:[#allocation2 + $0xb8] sm:$0xff] %vm431_vm0, %v9704_v4  ;;  %v9996_v16 = vrot.slane %v12657_v61, 3  ;;  %v9998_v37 = vrot.slane %v12658_v22, 3  ;;  %v12661_v36 = vunpack.c.l.bf16 %v12685_v0 }
 0x5fd   : > { %v9993_v42 = vsel %vm4289_vm6, %v9990_v25, %v9992_v9  ;;  %v9995_v1 = vsel %vm4289_vm6, %v9992_v9, %v9994_v58  ;;  %v12662_v57 = vunpack.c.h.bf16 %v12685_v0  ;;  %v12665_v10 = vunpack.c.l.bf16 %v12686_v2  ;;  %v9789_v0 = vld [vmem:[%s12958_s15 + $0x98] sm:$0x3]  ;;  %s17034_s15 = sshll.u32 %s12908_s28, 8 }
 0x5fe   : > { %v10072_v15 = vadd.f32 %v9987_v43, %v9889_v23  ;;  %v9997_v59 = vsel %vm4289_vm6, %v9994_v58, %v9996_v16  ;;  %v9999_v43 = vsel %vm4289_vm6, %v9996_v16, %v9998_v37  ;;  %v10000_v51 = vrot.slane %v12661_v36, 3  ;;  %s10198_s20 = scalar_lea.hbm %s17021_s6, %s17034_s15 }
 0x5ff   : > { %v10002_v25 = vrot.slane %v12662_v57, 3  ;;  %v10004_v9 = vrot.slane %v12665_v10, 3  ;;  %v12666_v31 = vunpack.c.h.bf16 %v12686_v2  ;;  %v12669_v61 = vunpack.c.l.bf16 %v12687_v47  ;;  %s10201_s29 = sshll.u32 %s10198_s20, 4  ;;  %s10202_s29 = int_to_ptr.hbm [resolvable:$true] %s10201_s29 }
 0x600   : > { %v10108_v28 = vmax.f32 %v10072_v15, 0.0  ;;  %v12670_v22 = vunpack.c.h.bf16 %v12687_v47  ;;  %v9826_v36 = vunpack.c.l.bf16 %v9789_v0  ;;  %s12790_s28 = sshra.s32 %s10202_s29, 4  ;;  %s12791_s28 = int_to_ptr.hbm [resolvable:$true] %s12790_s28 }
 0x601   : > { %v9651_v33 = vpop.f32.mrf.mxu1  ;;  %v10006_v58 = vrot.slane %v12666_v31, 3  ;;  %v10008_v16 = vrot.slane %v12669_v61, 3  ;;  %s12792_s13 = scalar_lea.hbm %s12791_s28, 256  ;;  %p12797_p9 = scmp.lt.s32.totalorder %s12791_s28, %s17021_s6 }
 0x602   : > { %12215 = vst.msk [vmem:[%s16617_s8 + $0x9e] sm:$0x3] %vm4682_vm8, %v10108_v28  ;;  %v9705_v8 = vadd.f32 %v9651_v33, %v9332_v54  ;;  %v9338_v54 = vld [vmem:[#allocation2 + $0xf0] sm:$0xff]  ;;  %p12793_p4 = scmp.ne.s32.totalorder %s12791_s28, %s12792_s13  ;;  %p12798_p10 = scmp.lt.s32.totalorder %s12796_s21, %s12792_s13 }
 0x603   : > { %12216 = vst.msk [vmem:[%s16617_s8 + $0x9c] sm:$0xf0] %vm4685_vm9, %v10108_v28  ;;  %v9850_v40 = vld [vmem:[#allocation2 + $0xb8] sm:$0xff] }
 0x604   : > { %v9890_v13 = vadd.f32 %v16894_v41, %v9850_v40  ;;  %9741 = vst.msk [vmem:[#allocation2 + $0xc0] sm:$0xff] %vm431_vm0, %v9705_v8  ;;  %p12794_p7 = pnand %p12793_p4, %p12925_p5  ;;  %p12799_p11 = por %p12798_p10, %p12797_p9 }
 0x606   : > { %v10073_v60 = vadd.f32 %v9989_v63, %v9890_v13  ;;  %v10001_v63 = vsel %vm4289_vm6, %v9998_v37, %v10000_v51  ;;  %v10010_v37 = vrot.slane %v12670_v22, 3  ;;  %p12795_p8 = pneg %p12794_p7 }
 0x608   : > { %v10109_v49 = vmax.f32 %v10073_v60, 0.0  ;;  %p12800_p12 = pnand %p12799_p11, %p12795_p8 }
 0x609   : > { %v9653_v24 = vpop.f32.mrf.mxu1 }
 0x60a   : > { %12217 = vst.msk [vmem:[%s16617_s8 + $0xa4] sm:$0xff] %vm431_vm0, %v10109_v49  ;;  %v9706_v50 = vadd.f32 %v9653_v24, %v9333_v45  ;;  %v9339_v45 = vld [vmem:[#allocation2 + $0xf8] sm:$0xff] }
 0x60b   : > { %v9851_v53 = vld [vmem:[#allocation2 + $0xc0] sm:$0xff] }
 0x60c   : > { %v9891_v55 = vadd.f32 %v16894_v41, %v9851_v53  ;;  %9742 = vst.msk [vmem:[#allocation2 + $0xc8] sm:$0xff] %vm431_vm0, %v9706_v50 }
 0x60e   : > { %v10074_v6 = vadd.f32 %v9991_v48, %v9891_v55  ;;  %v10003_v48 = vsel %vm4289_vm6, %v10000_v51, %v10002_v25  ;;  %v10012_v51 = vrot.slane %v9826_v36, 3 }
 0x610   : > { %v10110_v32 = vmax.f32 %v10074_v6, 0.0 }
 0x611   : > { %v9656_v52 = vpop.f32.mrf.mxu1 }
 0x612   : > { %12218 = vst.msk [vmem:[%s16617_s8 + $0xac] sm:$0xf] %vm4688_vm5, %v10110_v32  ;;  %v9707_v18 = vadd.f32 %v9656_v52, %v9334_v12  ;;  %v9340_v12 = vld [vmem:[#allocation2 + $0x100] sm:$0xff] }
 0x613   : > { %12219 = vst.msk [vmem:[%s16617_s8 + $0xaa] sm:$0xc0] %vm4691_vm12, %v10110_v32  ;;  %v9852_v56 = vld [vmem:[#allocation2 + $0xc8] sm:$0xff] }
 0x614   : > { %v9892_v17 = vadd.f32 %v16894_v41, %v9852_v56  ;;  %9743 = vst.msk [vmem:[#allocation2 + $0xd0] sm:$0xff] %vm431_vm0, %v9707_v18 }
 0x616   : > { %v10075_v46 = vadd.f32 %v9993_v42, %v9892_v17  ;;  %v10005_v42 = vsel %vm4289_vm6, %v10002_v25, %v10004_v9 }
 0x618   : > { %v10111_v35 = vmax.f32 %v10075_v46, 0.0 }
 0x619   : > { %v9658_v14 = vpop.f32.mrf.mxu1 }
 0x61a   : > { %12220 = vst.msk [vmem:[%s16617_s8 + $0xb2] sm:$0xff] %vm431_vm0, %v10111_v35  ;;  %v9708_v38 = vadd.f32 %v9658_v14, %v9335_v29  ;;  %v9341_v29 = vld [vmem:[#allocation2 + $0x108] sm:$0xff] }
 0x61b   : > { %v9853_v7 = vld [vmem:[#allocation2 + $0xd0] sm:$0xff] }
 0x61c   : > { %v9893_v21 = vadd.f32 %v16894_v41, %v9853_v7  ;;  %9744 = vst.msk [vmem:[#allocation2 + $0xd8] sm:$0xff] %vm431_vm0, %v9708_v38 }
 0x61e   : > { %v10076_v11 = vadd.f32 %v9995_v1, %v9893_v21  ;;  %v10007_v1 = vsel %vm4289_vm6, %v10004_v9, %v10006_v58 }
 0x620   : > { %v10112_v26 = vmax.f32 %v10076_v11, 0.0 }
 0x621   : > { %v9661_v30 = vpop.f32.mrf.mxu1 }
 0x622   : > { %12221 = vst.msk [vmem:[%s16617_s8 + $0xba] sm:$0x3f] %vm4694_vm14, %v10112_v26  ;;  %v9709_v39 = vadd.f32 %v9661_v30, %v9336_v20  ;;  %v9342_v20 = vld [vmem:[#allocation2 + $0x110] sm:$0xff] }
 0x623   : > { %v9854_v44 = vld [vmem:[#allocation2 + $0xd8] sm:$0xff] }
 0x624   : > { %v9894_v34 = vadd.f32 %v16894_v41, %v9854_v44  ;;  %9745 = vst.msk [vmem:[#allocation2 + $0xe0] sm:$0xff] %vm431_vm0, %v9709_v39 }
 0x626   : > { %v10077_v27 = vadd.f32 %v9997_v59, %v9894_v34  ;;  %v10009_v59 = vsel %vm4289_vm6, %v10006_v58, %v10008_v16 }
 0x628   : > { %v10113_v5 = vmax.f32 %v10077_v27, 0.0 }
 0x629   : > { %v9663_v62 = vpop.f32.mrf.mxu1 }
 0x62a   : > { %12222 = vst.msk [vmem:[%s16617_s8 + $0xc0] sm:$0xff] %vm431_vm0, %v10113_v5  ;;  %v9710_v4 = vadd.f32 %v9663_v62, %v9337_v3  ;;  %v9343_v3 = vld [vmem:[#allocation2 + $0x118] sm:$0xff] }
 0x62b   : > { %v9855_v19 = vld [vmem:[#allocation2 + $0xe0] sm:$0xff] }
 0x62c   : > { %v9895_v23 = vadd.f32 %v16894_v41, %v9855_v19  ;;  %9746 = vst.msk [vmem:[#allocation2 + $0xe8] sm:$0xff] %vm431_vm0, %v9710_v4 }
 0x62e   : > { %v10078_v15 = vadd.f32 %v9999_v43, %v9895_v23  ;;  %v10011_v43 = vsel %vm4289_vm6, %v10008_v16, %v10010_v37 }
 0x630   : > { %v10114_v28 = vmax.f32 %v10078_v15, 0.0 }
 0x631   : > { %v9666_v33 = vpop.f32.mrf.mxu1 }
 0x632   : > { %12223 = vst.msk [vmem:[%s16617_s8 + $0xc8] sm:$0xff] %vm431_vm0, %v10114_v28  ;;  %v9711_v8 = vadd.f32 %v9666_v33, %v9338_v54  ;;  %v10013_v33 = vsel %vm4289_vm6, %v10010_v37, %v10012_v51 }
 0x633   : > { %v9856_v40 = vld [vmem:[#allocation2 + $0xe8] sm:$0xff] }
 0x634   : > { %v9896_v13 = vadd.f32 %v16894_v41, %v9856_v40  ;;  %9747 = vst.msk [vmem:[#allocation2 + $0xf0] sm:$0xff] %vm431_vm0, %v9711_v8 }
 0x636   : > { %v10079_v60 = vadd.f32 %v10001_v63, %v9896_v13 }
 0x638   : > { %v10115_v49 = vmax.f32 %v10079_v60, 0.0 }
 0x639   : > { %v9668_v24 = vpop.f32.mrf.mxu1 }
 0x63a   : > { %12224 = vst.msk [vmem:[%s16617_s8 + $0xce] sm:$0xfc] %vm4679_vm15, %v10115_v49  ;;  %v9712_v50 = vadd.f32 %v9668_v24, %v9339_v45 }
 0x63b   : > { %v9857_v53 = vld [vmem:[#allocation2 + $0xf0] sm:$0xff] }
 0x63c   : > { %v9897_v55 = vadd.f32 %v16894_v41, %v9857_v53  ;;  %9748 = vst.msk [vmem:[#allocation2 + $0xf8] sm:$0xff] %vm431_vm0, %v9712_v50 }
 0x63e   : > { %v10080_v6 = vadd.f32 %v10003_v48, %v9897_v55 }
 0x640   : > { %v10116_v32 = vmax.f32 %v10080_v6, 0.0 }
 0x641   : > { %v9671_v52 = vpop.f32.mrf.mxu1 }
 0x642   : > { %12225 = vst.msk [vmem:[%s16617_s8 + $0xd6] sm:$0xff] %vm431_vm0, %v10116_v32  ;;  %v9713_v18 = vadd.f32 %v9671_v52, %v9340_v12 }
 0x643   : > { %v9858_v56 = vld [vmem:[#allocation2 + $0xf8] sm:$0xff] }
 0x644   : > { %v9898_v17 = vadd.f32 %v16894_v41, %v9858_v56  ;;  %9749 = vst.msk [vmem:[#allocation2 + $0x100] sm:$0xff] %vm431_vm0, %v9713_v18 }
 0x646   : > { %v10081_v46 = vadd.f32 %v10005_v42, %v9898_v17 }
 0x648   : > { %v10117_v35 = vmax.f32 %v10081_v46, 0.0 }
 0x649   : > { %v9673_v14 = vpop.f32.mrf.mxu1 }
 0x64a   : > { %12226 = vst.msk [vmem:[%s16617_s8 + $0xde] sm:$0x3] %vm4682_vm8, %v10117_v35  ;;  %v9714_v38 = vadd.f32 %v9673_v14, %v9341_v29 }
 0x64b   : > { %12227 = vst.msk [vmem:[%s16617_s8 + $0xdc] sm:$0xf0] %vm4685_vm9, %v10117_v35  ;;  %v9859_v7 = vld [vmem:[#allocation2 + $0x100] sm:$0xff] }
 0x64c   : > { %v9899_v21 = vadd.f32 %v16894_v41, %v9859_v7  ;;  %9750 = vst.msk [vmem:[#allocation2 + $0x108] sm:$0xff] %vm431_vm0, %v9714_v38 }
 0x64e   : > { %v10082_v11 = vadd.f32 %v10007_v1, %v9899_v21 }
 0x650   : > { %v10118_v26 = vmax.f32 %v10082_v11, 0.0 }
 0x651   : > { %v9676_v30 = vpop.f32.mrf.mxu1 }
 0x652   : > { %12228 = vst.msk [vmem:[%s16617_s8 + $0xe4] sm:$0xff] %vm431_vm0, %v10118_v26  ;;  %v9715_v39 = vadd.f32 %v9676_v30, %v9342_v20 }
 0x653   : > { %v9860_v44 = vld [vmem:[#allocation2 + $0x108] sm:$0xff] }
 0x654   : > { %v9900_v34 = vadd.f32 %v16894_v41, %v9860_v44  ;;  %9751 = vst.msk [vmem:[#allocation2 + $0x110] sm:$0xff] %vm431_vm0, %v9715_v39 }
 0x656   : > { %v10083_v27 = vadd.f32 %v10009_v59, %v9900_v34 }
 0x658   : > { %v10119_v5 = vmax.f32 %v10083_v27, 0.0 }
 0x659   : > { %v9678_v62 = vpop.f32.mrf.mxu1 }
 0x65a   : > { %12229 = vst.msk [vmem:[%s16617_s8 + $0xec] sm:$0xf] %vm4688_vm5, %v10119_v5  ;;  %v9716_v4 = vadd.f32 %v9678_v62, %v9343_v3 }
 0x65b   : > { %12230 = vst.msk [vmem:[%s16617_s8 + $0xea] sm:$0xc0] %vm4691_vm12, %v10119_v5  ;;  %v9861_v19 = vld [vmem:[#allocation2 + $0x110] sm:$0xff] }
 0x65c   : > { %v9901_v23 = vadd.f32 %v16894_v41, %v9861_v19  ;;  %9752 = vst.msk [vmem:[#allocation2 + $0x118] sm:$0xff] %vm431_vm0, %v9716_v4 }
 0x65e   : > { %v10084_v15 = vadd.f32 %v10011_v43, %v9901_v23 }
 0x660   : > { %v10120_v28 = vmax.f32 %v10084_v15, 0.0 }
 0x662   : > { %12231 = vst.msk [vmem:[%s16617_s8 + $0xf2] sm:$0xff] %vm431_vm0, %v10120_v28 }
 0x663   : > { %v9862_v54 = vld [vmem:[#allocation2 + $0x118] sm:$0xff] }
 0x664   : > { %v9902_v8 = vadd.f32 %v16894_v41, %v9862_v54 }
 0x666   : > { %v10085_v40 = vadd.f32 %v10013_v33, %v9902_v8 }
 0x668   : > { %v10121_v63 = vmax.f32 %v10085_v40, 0.0 }
 0x66a   : > { %12232 = vst.msk [vmem:[%s16617_s8 + $0xfa] sm:$0x3f] %vm4694_vm14, %v10121_v63 }
 0x66b   : > { %12803 = shalt.err (!%p12800_p12)
}
 0x66c   : > { %12693 = dma.vmem_to_hbm [thread:$0]  (%p12925_p5), %s10200_s23, 4096, %s10202_s29, %s10182_s9, %s12845_s19, %s12845_s19, %s12846_s0  }
 0x66d PF: > { %p12704_p13 = scmp.ge.s32.totalorder %s12842_s27, 2  ;;  %s10233_s16 = sand.u32 1, %s12830_s24  }
 0x66e   : > { %s10234_s8 = scalar_lea.sflag [#allocation5], %s10233_s16 }
 0x66f   : > { %p12698_p0 = pnand %p12704_p13, %p12929_p6 }
 0x671   : > { %p12699_p1 = pneg %p12698_p0 }
 0x673   : > { %12821 = dma.done.wait (%p12699_p1), %s10234_s8, 4096  }
 0x674   : > { %12823 = vsyncadd (%p12699_p1), %s10234_s8, 4294963200  ;;  %s10244_s18 = scalar_lea.sflag [#allocation7], %s10233_s16 }
 0x675   : > { %12825 = dma.done.wait (%p12699_p1), %s10244_s18, 4096  }
 0x676   : > { %12827 = vsyncadd (%p12699_p1), %s10244_s18, 4294963200  ;;  %p21_p5 = scmp.ge.s32.totalorder %s12912_s30, 4   ;;  %s17035_s24 = smov %s12834_s25 }
 0x677   : > { %s17036_s25 = smov %s12838_s26  ;;  %s17037_s26 = smov %s12923_s10 }
 0x678   : > { %s17038_s27 = smov %s12912_s30  ;;  %23 = sbr.rel (!%p21_p5) target bundleno = 7 (0x7), region = 142 }
 0x67d   :  { %10250 = vsyncpa [#allocation5], 1 }
 0x67e   :  { %10252 = vsyncpa [#allocation5 + $0x1], 1 }
 0x67f   :  { %10253 = vsyncpa [#allocation7], 1 }
 0x680   :  { %10255 = vsyncpa [#allocation7 + $0x1], 1 }

</bundles_post_ra>
